<compile_context>
chip_gen: v7x
topology: tpu7x:2x2x1
jax: 0.10.0
libtpu: 0.0.40
codegen_flags: <defaults>
</compile_context>

<pallas_src>
import jax
import jax.numpy as jnp
from jax import lax
from jax.experimental import pallas as pl
from jax.experimental.pallas import tpu as pltpu


# ---------------------------------------------------------------------------
# Compiler params: batch axis parallel (megacore), per-generation VMEM limit.
# ---------------------------------------------------------------------------
def _vmem_limit_bytes():
    cap = None
    try:
        info = pltpu.get_tpu_info()
        for name in ("vmem_capacity_bytes", "vmem_size_bytes", "vmem_bytes"):
            v = getattr(info, name, None)
            if v:
                cap = int(v)
                break
    except Exception:
        cap = None
    if cap is None:
        return 48 * 2**20          # safe on every generation (v7x: 64 MiB / TC)
    return max(32 * 2**20, min(cap * 3 // 4, 96 * 2**20))


def _compiler_params():
    return pltpu.CompilerParams(
        dimension_semantics=("parallel",),
        vmem_limit_bytes=_vmem_limit_bytes(),
    )


# ---------------------------------------------------------------------------
# In-kernel helpers (values laid out as (rows, C, W): W on lanes, C sublanes).
# ---------------------------------------------------------------------------
def _shift_w(x, d):
    """out[..., w] = x[..., w - d], zero-filled outside (static |d| << W)."""
    if d == 0:
        return x
    W = x.shape[-1]
    pad = jnp.zeros(x.shape[:-1] + (abs(d),), x.dtype)
    if d > 0:
        return jnp.concatenate([pad, x[..., : W - d]], axis=-1)
    return jnp.concatenate([x[..., -d:], pad], axis=-1)


def _conv1x1(x, w, b, act):
    """Pointwise conv as VPU broadcast-FMAs (no tiny-K MXU matmul).

    x: (R, Cin, W) value, w: (Cout, Cin), b: (Cout, 1)."""
    cin = x.shape[1]
    cout = w.shape[0]
    acc = [None, None]
    for k in range(cin):
        t = x[:, k:k + 1, :] * w[:, k:k + 1].reshape(1, cout, 1)
        acc[k % 2] = t if acc[k % 2] is None else acc[k % 2] + t
    y = acc[0] if acc[1] is None else acc[0] + acc[1]
    y = y + b.reshape(1, cout, 1)
    if act:
        y = y * jax.nn.sigmoid(y)                  # SiLU
    return y


# ---------------------------------------------------------------------------
# Fused GLKRep kernel: cv1 -> cv2 -> n ShuffleRepDwFusion blocks -> concat
# ---------------------------------------------------------------------------
def _glkrep_kernel(xe_ref, xo_ref, w1_ref, b1_ref, w2_ref, b2_ref,
                   w5_ref, bdw_ref, fw_ref, fb_ref, o_ref,
                   ze_ref, zo_ref, zs_ref, bpad_ref):
    _, H, _, Wo = xe_ref.shape
    _, Ho, c2, _ = o_ref.shape
    n, c, _ = fw_ref.shape
    cm = c2 // 2
    f32 = jnp.float32

    # ---- cv1: 1x1 conv + SiLU on both W-parity planes ---------------------
    w1 = w1_ref[...]                               # (c2, c1)
    b1 = b1_ref[...]                               # (c2, 1)
    ye = _conv1x1(xe_ref[0], w1, b1, act=True)     # (H, c2, Wo) even W cols
    yo = _conv1x1(xo_ref[0], w1, b1, act=True)     # (H, c2, Wo) odd  W cols

    # ---- stage cv2 tap sources: pad-1 halo only on the leading H dim ------
    zrow = jnp.zeros((1, c2, Wo), f32)
    ze_ref[0:1] = zrow                             # zero only the halo row
    zo_ref[0:1] = zrow
    zs_ref[0:1] = zrow
    ze_ref[1:H + 1] = ye                           # kw = 1 taps (even cols)
    zo_ref[1:H + 1] = yo                           # kw = 2 taps (odd cols)
    zs_ref[1:H + 1] = _shift_w(yo, 1)              # kw = 0 taps (odd cols >>1)

    # ---- cv2: depthwise 3x3, stride 2, pad 1, bias, no activation ---------
    w2 = w2_ref[...]                               # (c2, 9) flat (kh, kw)
    b2 = b2_ref[...]                               # (c2, 1)
    planes = (zs_ref, ze_ref, zo_ref)              # kw = 0, 1, 2 sources
    acc = [None, None]
    for kh in range(3):
        for kw in range(3):
            kk = kh * 3 + kw
            tap = planes[kw][pl.ds(kh, Ho, stride=2)]        # leading-dim stride
            t = tap * w2[:, kk:kk + 1].reshape(1, c2, 1)
            acc[kk % 2] = t if acc[kk % 2] is None else acc[kk % 2] + t
    h = acc[0] + acc[1] + b2.reshape(1, c2, 1)     # (Ho, c2, Wo)

    x0 = h[:, :cm, :]                              # GLKRep passthrough half
    a = h[:, cm:cm + c, :]                         # block passthrough half
    bh = h[:, cm + c:, :]                          # block processed half

    # ---- n ShuffleRepDwFusion blocks, fully resident in VMEM --------------
    zhalo = jnp.zeros((2, c, Wo), f32)
    bpad_ref[0:2] = zhalo                          # pad-2 halo rows only
    bpad_ref[Ho + 2:Ho + 4] = zhalo
    z = bh
    for i in range(n):
        w5 = w5_ref[i]                             # (c, 25) flat (kh, kw)
        # RepDW: reparam'd 5x5 depthwise + bias + SiLU
        bpad_ref[2:Ho + 2] = bh
        slab = bpad_ref[...]                       # (Ho+4, c, Wo)
        dacc = [None, None]
        for kw in range(5):
            sh = _shift_w(slab, 2 - kw)            # one lane shift per kw
            for kh in range(5):
                kk = kh * 5 + kw
                t = sh[kh:kh + Ho] * w5[:, kk:kk + 1].reshape(1, c, 1)
                dacc[kk % 2] = t if dacc[kk % 2] is None else dacc[kk % 2] + t
        d = dacc[0] + dacc[1] + bdw_ref[i].reshape(1, c, 1)
        d = d * jax.nn.sigmoid(d)                  # SiLU
        # fusion: 1x1 conv + SiLU, while the RepDW result is still in VMEM
        z = _conv1x1(d, fw_ref[i], fb_ref[i], act=True)      # (Ho, c, Wo)
        if i != n - 1:
            # channel_shuffle(groups=2) folded into the next block's halves
            cols = [(a, z)[k % 2][:, k // 2:k // 2 + 1, :] for k in range(2 * c)]
            a = jnp.concatenate(cols[:c], axis=1)
            bh = jnp.concatenate(cols[c:], axis=1)

    # ---- final output: three channel-slice stores (no concat) -------------
    o_ref[0, :, 0:cm, :] = x0
    o_ref[0, :, cm:cm + c, :] = a
    o_ref[0, :, cm + c:, :] = z


def glkrep_forward(x_nchw, params):
    """GLKRep forward.  x_nchw: (B, c1, H, W) -> (B, c2, H//2, W//2)."""
    x = x_nchw.astype(jnp.float32)
    B, c1, H, W = x.shape
    assert H % 2 == 0 and W % 2 == 0, "even spatial dims required"
    Ho, Wo = H // 2, W // 2
    c2 = params["cv1_w"].shape[0]
    n, c, _ = params["fw"].shape

    # Wrapper-side layout plumbing (smallest tensor): NCHW -> (B, H, C, W)
    # with W on lanes, plus even/odd W-column deinterleave so the stride-2
    # cv2 taps become unit-stride lane reads in-kernel.
    xt = jnp.transpose(x, (0, 2, 1, 3))            # (B, H, c1, W)
    xe = xt[..., 0::2]                             # (B, H, c1, Wo)
    xo = xt[..., 1::2]

    out = pl.pallas_call(
        _glkrep_kernel,
        out_shape=jax.ShapeDtypeStruct((B, Ho, c2, Wo), jnp.float32),
        grid=(B,),
        in_specs=[
            pl.BlockSpec((1, H, c1, Wo), lambda b: (b, 0, 0, 0)),
            pl.BlockSpec((1, H, c1, Wo), lambda b: (b, 0, 0, 0)),
            pl.BlockSpec((c2, c1), lambda b: (0, 0)),
            pl.BlockSpec((c2, 1), lambda b: (0, 0)),
            pl.BlockSpec((c2, 9), lambda b: (0, 0)),
            pl.BlockSpec((c2, 1), lambda b: (0, 0)),
            pl.BlockSpec((n, c, 25), lambda b: (0, 0, 0)),
            pl.BlockSpec((n, c, 1), lambda b: (0, 0, 0)),
            pl.BlockSpec((n, c, c), lambda b: (0, 0, 0)),
            pl.BlockSpec((n, c, 1), lambda b: (0, 0, 0)),
        ],
        out_specs=pl.BlockSpec((1, Ho, c2, Wo), lambda b: (b, 0, 0, 0)),
        scratch_shapes=[
            pltpu.VMEM((H + 1, c2, Wo), jnp.float32),   # even-col cv1 output
            pltpu.VMEM((H + 1, c2, Wo), jnp.float32),   # odd-col  cv1 output
            pltpu.VMEM((H + 1, c2, Wo), jnp.float32),   # odd-col shifted (+1)
            pltpu.VMEM((Ho + 4, c, Wo), jnp.float32),   # 5x5 pad-2 H halo
        ],
        compiler_params=_compiler_params(),
    )(xe, xo, params["cv1_w"], params["cv1_b"], params["cv2_w"], params["cv2_b"],
      params["w5"], params["bdw"], params["fw"], params["fb"])

    return jnp.transpose(out, (0, 2, 1, 3))        # (B, Ho, c2, Wo) -> NCHW


# ---------------------------------------------------------------------------
# Parameter init (deterministic, BN folded into conv scale/bias, eval mode)
# ---------------------------------------------------------------------------
def init_conv_bn(key, cin, cout, k, groups=1, eps=1e-5):
    k1, k2, k3, k4, k5 = jax.random.split(key, 5)
    w = 0.1 * jax.random.normal(k1, (cout, cin // groups, k, k), jnp.float32)
    gamma = 1.0 + 0.1 * jax.random.normal(k2, (cout,), jnp.float32)
    beta = 0.1 * jax.random.normal(k3, (cout,), jnp.float32)
    mean = 0.1 * jax.random.normal(k4, (cout,), jnp.float32)
    var = jnp.abs(jax.random.normal(k5, (cout,), jnp.float32)) + 0.5
    scale = gamma / jnp.sqrt(var + eps)
    return w * scale[:, None, None, None], beta - mean * scale


def init_glkrep_params(key, c1, c2, n=2):
    assert c2 % 4 == 0
    cm = c2 // 2
    c = cm // 2
    keys = jax.random.split(key, 2 + 3 * n)
    p = {}
    w, b = init_conv_bn(keys[0], c1, c2, 1)                 # cv1 (1x1 + SiLU)
    p["cv1_w"] = w[:, :, 0, 0]                              # (c2, c1)  [out, in]
    p["cv1_b"] = b.reshape(c2, 1)
    w, b = init_conv_bn(keys[1], c2, c2, 3, groups=c2)      # cv2 depthwise, no act
    p["cv2_w"] = w[:, 0].reshape(c2, 9)                     # (c2, 9) flat (kh, kw)
    p["cv2_b"] = b.reshape(c2, 1)
    w5s, bdws, fws, fbs = [], [], [], []
    ki = 2
    for _ in range(n):
        w5, b5 = init_conv_bn(keys[ki], c, c, 5, groups=c); ki += 1
        w3, b3 = init_conv_bn(keys[ki], c, c, 3, groups=c); ki += 1
        wf, bf = init_conv_bn(keys[ki], c, c, 1);           ki += 1
        w5 = w5.at[:, :, 1:4, 1:4].add(w3)                  # RepDW.fuse(): fold 3x3
        w5s.append(w5[:, 0].reshape(c, 25))
        bdws.append((b5 + b3).reshape(c, 1))
        fws.append(wf[:, :, 0, 0])                          # (c, c) [out, in]
        fbs.append(bf.reshape(c, 1))
    p["w5"] = jnp.stack(w5s)                                # (n, c, 25)
    p["bdw"] = jnp.stack(bdws)                              # (n, c, 1)
    p["fw"] = jnp.stack(fws)                                # (n, c, c)
    p["fb"] = jnp.stack(fbs)                                # (n, c, 1)
    return p


# ---------------------------------------------------------------------------
# Pure-JAX reference
# ---------------------------------------------------------------------------
def ref_forward(x_nchw, params):
    hp = lax.Precision.HIGHEST
    x = jnp.transpose(x_nchw, (0, 2, 3, 1)).astype(jnp.float32)     # NHWC
    c2 = params["cv1_w"].shape[0]
    n, c, _ = params["fw"].shape
    y = jnp.einsum("bhwc,cd->bhwd", x, jnp.transpose(params["cv1_w"]),
                   precision=hp) + params["cv1_b"][:, 0]
    y = y * jax.nn.sigmoid(y)
    w2 = jnp.transpose(params["cv2_w"].reshape(c2, 3, 3), (1, 2, 0))[:, :, None, :]
    y = lax.conv_general_dilated(
        y, w2, (2, 2), ((1, 1), (1, 1)),
        dimension_numbers=("NHWC", "HWIO", "NHWC"),
        feature_group_count=c2, precision=hp) + params["cv2_b"][:, 0]
    x0, x1 = y[..., : c2 // 2], y[..., c2 // 2:]
    for i in range(n):
        a, bh = x1[..., :c], x1[..., c:]
        w5 = jnp.transpose(params["w5"][i].reshape(c, 5, 5), (1, 2, 0))[:, :, None, :]
        z = lax.conv_general_dilated(
            bh, w5, (1, 1), ((2, 2), (2, 2)),
            dimension_numbers=("NHWC", "HWIO", "NHWC"),
            feature_group_count=c, precision=hp) + params["bdw"][i][:, 0]
        z = z * jax.nn.sigmoid(z)
        z = jnp.einsum("bhwc,cd->bhwd", z, jnp.transpose(params["fw"][i]),
                       precision=hp) + params["fb"][i][:, 0]
        z = z * jax.nn.sigmoid(z)
        x1 = jnp.concatenate([a, z], axis=-1)
        if i != n - 1:                                      # channel_shuffle(g=2)
            Bs, Hs, Ws, Cs = x1.shape
            x1 = x1.reshape(Bs, Hs, Ws, 2, Cs // 2)
            x1 = jnp.transpose(x1, (0, 1, 2, 4, 3)).reshape(Bs, Hs, Ws, Cs)
    out = jnp.concatenate([x0, x1], axis=-1)
    return jnp.transpose(out, (0, 3, 1, 2))


# ---------------------------------------------------------------------------
if __name__ == "__main__":
    key = jax.random.PRNGKey(0)
    kp, kx, kx2 = jax.random.split(key, 3)

    c1, c2, n = 8, 16, 2
    params = init_glkrep_params(kp, c1, c2, n)
    fwd = jax.jit(glkrep_forward)

    # Test 1: square spatial, B=2
    B, H, W = 2, 16, 16
    x = jax.random.normal(kx, (B, c1, H, W), jnp.float32)
    out = jax.block_until_ready(fwd(x, params))
    assert out.shape == (B, c2, H // 2, W // 2), out.shape
    assert bool(jnp.all(jnp.isfinite(out)))
    ref = jax.block_until_ready(ref_forward(x, params))
    assert bool(jnp.allclose(out, ref, rtol=1e-3, atol=1e-3)), float(
        jnp.max(jnp.abs(out - ref)))

    # Test 2: non-square spatial, B=1
    x2 = jax.random.normal(kx2, (1, c1, 12, 20), jnp.float32)
    out2 = jax.block_until_ready(fwd(x2, params))
    ref2 = jax.block_until_ready(ref_forward(x2, params))
    assert out2.shape == (1, c2, 6, 10), out2.shape
    assert bool(jnp.allclose(out2, ref2, rtol=1e-3, atol=1e-3)), float(
        jnp.max(jnp.abs(out2 - ref2)))

    print("KERNEL_OK")
</pallas_src>

<mosaic_0001>
module attributes {stable_mosaic.version = 11 : i64} {
  func.func @_glkrep_kernel(%arg0: i32, %arg1: memref<1x16x8x8xf32, #tpu.memory_space<vmem>>, %arg2: memref<1x16x8x8xf32, #tpu.memory_space<vmem>>, %arg3: memref<16x8xf32, #tpu.memory_space<vmem>>, %arg4: memref<16x1xf32, #tpu.memory_space<vmem>>, %arg5: memref<16x9xf32, #tpu.memory_space<vmem>>, %arg6: memref<16x1xf32, #tpu.memory_space<vmem>>, %arg7: memref<2x4x25xf32, #tpu.memory_space<vmem>>, %arg8: memref<2x4x1xf32, #tpu.memory_space<vmem>>, %arg9: memref<2x4x4xf32, #tpu.memory_space<vmem>>, %arg10: memref<2x4x1xf32, #tpu.memory_space<vmem>>, %arg11: memref<1x8x16x8xf32, #tpu.memory_space<vmem>>, %arg12: memref<17x16x8xf32, #tpu.memory_space<vmem>>, %arg13: memref<17x16x8xf32, #tpu.memory_space<vmem>>, %arg14: memref<17x16x8xf32, #tpu.memory_space<vmem>>, %arg15: memref<12x4x8xf32, #tpu.memory_space<vmem>>) attributes {dimension_semantics = [#tpu.dimension_semantics<parallel>], iteration_bounds = array<i64: 2>, scalar_prefetch = 0 : i64, scratch_operands = 4 : i64, tpu.core_type = #tpu.core_type<tc>, window_params = [{transform_indices = @transform_0, window_bounds = array<i64: 1, 16, 8, 8>}, {transform_indices = @transform_1, window_bounds = array<i64: 1, 16, 8, 8>}, {pipeline_mode = #tpu.pipeline_mode<synchronous>, transform_indices = @transform_2, window_bounds = array<i64: 16, 8>}, {pipeline_mode = #tpu.pipeline_mode<synchronous>, transform_indices = @transform_3, window_bounds = array<i64: 16, 1>}, {pipeline_mode = #tpu.pipeline_mode<synchronous>, transform_indices = @transform_4, window_bounds = array<i64: 16, 9>}, {pipeline_mode = #tpu.pipeline_mode<synchronous>, transform_indices = @transform_5, window_bounds = array<i64: 16, 1>}, {pipeline_mode = #tpu.pipeline_mode<synchronous>, transform_indices = @transform_6, window_bounds = array<i64: 2, 4, 25>}, {pipeline_mode = #tpu.pipeline_mode<synchronous>, transform_indices = @transform_7, window_bounds = array<i64: 2, 4, 1>}, {pipeline_mode = #tpu.pipeline_mode<synchronous>, transform_indices = @transform_8, window_bounds = array<i64: 2, 4, 4>}, {pipeline_mode = #tpu.pipeline_mode<synchronous>, transform_indices = @transform_9, window_bounds = array<i64: 2, 4, 1>}, {transform_indices = @transform_10, window_bounds = array<i64: 1, 8, 16, 8>}]} {
    %c0 = arith.constant 0 : index
    %c0_0 = arith.constant 0 : index
    %0 = vector.load %arg3[%c0, %c0_0] : memref<16x8xf32, #tpu.memory_space<vmem>>, vector<16x8xf32>
    %c0_1 = arith.constant 0 : index
    %c0_2 = arith.constant 0 : index
    %1 = vector.load %arg4[%c0_1, %c0_2] : memref<16x1xf32, #tpu.memory_space<vmem>>, vector<16x1xf32>
    %c0_3 = arith.constant 0 : index
    %c0_4 = arith.constant 0 : index
    %c0_5 = arith.constant 0 : index
    %c0_6 = arith.constant 0 : index
    %2 = vector.load %arg1[%c0_3, %c0_4, %c0_5, %c0_6] : memref<1x16x8x8xf32, #tpu.memory_space<vmem>>, vector<1x16x8x8xf32>
    %3 = vector.shape_cast %2 : vector<1x16x8x8xf32> to vector<16x8x8xf32>
    %4 = vector.extract_strided_slice %3 {offsets = [0, 0, 0], sizes = [16, 1, 8], strides = [1, 1, 1]} : vector<16x8x8xf32> to vector<16x1x8xf32>
    %5 = vector.extract_strided_slice %0 {offsets = [0, 0], sizes = [16, 1], strides = [1, 1]} : vector<16x8xf32> to vector<16x1xf32>
    %6 = vector.shape_cast %5 : vector<16x1xf32> to vector<1x16x1xf32>
    %7 = vector.broadcast %4 : vector<16x1x8xf32> to vector<16x16x8xf32>
    %8 = vector.broadcast %6 : vector<1x16x1xf32> to vector<16x16x8xf32>
    %9 = arith.mulf %7, %8 : vector<16x16x8xf32>
    %10 = vector.extract_strided_slice %3 {offsets = [0, 1, 0], sizes = [16, 1, 8], strides = [1, 1, 1]} : vector<16x8x8xf32> to vector<16x1x8xf32>
    %11 = vector.extract_strided_slice %0 {offsets = [0, 1], sizes = [16, 1], strides = [1, 1]} : vector<16x8xf32> to vector<16x1xf32>
    %12 = vector.shape_cast %11 : vector<16x1xf32> to vector<1x16x1xf32>
    %13 = vector.broadcast %10 : vector<16x1x8xf32> to vector<16x16x8xf32>
    %14 = vector.broadcast %12 : vector<1x16x1xf32> to vector<16x16x8xf32>
    %15 = arith.mulf %13, %14 : vector<16x16x8xf32>
    %16 = vector.extract_strided_slice %3 {offsets = [0, 2, 0], sizes = [16, 1, 8], strides = [1, 1, 1]} : vector<16x8x8xf32> to vector<16x1x8xf32>
    %17 = vector.extract_strided_slice %0 {offsets = [0, 2], sizes = [16, 1], strides = [1, 1]} : vector<16x8xf32> to vector<16x1xf32>
    %18 = vector.shape_cast %17 : vector<16x1xf32> to vector<1x16x1xf32>
    %19 = vector.broadcast %16 : vector<16x1x8xf32> to vector<16x16x8xf32>
    %20 = vector.broadcast %18 : vector<1x16x1xf32> to vector<16x16x8xf32>
    %21 = arith.mulf %19, %20 : vector<16x16x8xf32>
    %22 = arith.addf %9, %21 : vector<16x16x8xf32>
    %23 = vector.extract_strided_slice %3 {offsets = [0, 3, 0], sizes = [16, 1, 8], strides = [1, 1, 1]} : vector<16x8x8xf32> to vector<16x1x8xf32>
    %24 = vector.extract_strided_slice %0 {offsets = [0, 3], sizes = [16, 1], strides = [1, 1]} : vector<16x8xf32> to vector<16x1xf32>
    %25 = vector.shape_cast %24 : vector<16x1xf32> to vector<1x16x1xf32>
    %26 = vector.broadcast %23 : vector<16x1x8xf32> to vector<16x16x8xf32>
    %27 = vector.broadcast %25 : vector<1x16x1xf32> to vector<16x16x8xf32>
    %28 = arith.mulf %26, %27 : vector<16x16x8xf32>
    %29 = arith.addf %15, %28 : vector<16x16x8xf32>
    %30 = vector.extract_strided_slice %3 {offsets = [0, 4, 0], sizes = [16, 1, 8], strides = [1, 1, 1]} : vector<16x8x8xf32> to vector<16x1x8xf32>
    %31 = vector.extract_strided_slice %0 {offsets = [0, 4], sizes = [16, 1], strides = [1, 1]} : vector<16x8xf32> to vector<16x1xf32>
    %32 = vector.shape_cast %31 : vector<16x1xf32> to vector<1x16x1xf32>
    %33 = vector.broadcast %30 : vector<16x1x8xf32> to vector<16x16x8xf32>
    %34 = vector.broadcast %32 : vector<1x16x1xf32> to vector<16x16x8xf32>
    %35 = arith.mulf %33, %34 : vector<16x16x8xf32>
    %36 = arith.addf %22, %35 : vector<16x16x8xf32>
    %37 = vector.extract_strided_slice %3 {offsets = [0, 5, 0], sizes = [16, 1, 8], strides = [1, 1, 1]} : vector<16x8x8xf32> to vector<16x1x8xf32>
    %38 = vector.extract_strided_slice %0 {offsets = [0, 5], sizes = [16, 1], strides = [1, 1]} : vector<16x8xf32> to vector<16x1xf32>
    %39 = vector.shape_cast %38 : vector<16x1xf32> to vector<1x16x1xf32>
    %40 = vector.broadcast %37 : vector<16x1x8xf32> to vector<16x16x8xf32>
    %41 = vector.broadcast %39 : vector<1x16x1xf32> to vector<16x16x8xf32>
    %42 = arith.mulf %40, %41 : vector<16x16x8xf32>
    %43 = arith.addf %29, %42 : vector<16x16x8xf32>
    %44 = vector.extract_strided_slice %3 {offsets = [0, 6, 0], sizes = [16, 1, 8], strides = [1, 1, 1]} : vector<16x8x8xf32> to vector<16x1x8xf32>
    %45 = vector.extract_strided_slice %0 {offsets = [0, 6], sizes = [16, 1], strides = [1, 1]} : vector<16x8xf32> to vector<16x1xf32>
    %46 = vector.shape_cast %45 : vector<16x1xf32> to vector<1x16x1xf32>
    %47 = vector.broadcast %44 : vector<16x1x8xf32> to vector<16x16x8xf32>
    %48 = vector.broadcast %46 : vector<1x16x1xf32> to vector<16x16x8xf32>
    %49 = arith.mulf %47, %48 : vector<16x16x8xf32>
    %50 = arith.addf %36, %49 : vector<16x16x8xf32>
    %51 = vector.extract_strided_slice %3 {offsets = [0, 7, 0], sizes = [16, 1, 8], strides = [1, 1, 1]} : vector<16x8x8xf32> to vector<16x1x8xf32>
    %52 = vector.extract_strided_slice %0 {offsets = [0, 7], sizes = [16, 1], strides = [1, 1]} : vector<16x8xf32> to vector<16x1xf32>
    %53 = vector.shape_cast %52 : vector<16x1xf32> to vector<1x16x1xf32>
    %54 = vector.broadcast %51 : vector<16x1x8xf32> to vector<16x16x8xf32>
    %55 = vector.broadcast %53 : vector<1x16x1xf32> to vector<16x16x8xf32>
    %56 = arith.mulf %54, %55 : vector<16x16x8xf32>
    %57 = arith.addf %43, %56 : vector<16x16x8xf32>
    %58 = arith.addf %50, %57 : vector<16x16x8xf32>
    %59 = vector.shape_cast %1 : vector<16x1xf32> to vector<1x16x1xf32>
    %60 = vector.broadcast %59 : vector<1x16x1xf32> to vector<16x16x8xf32>
    %61 = arith.addf %58, %60 : vector<16x16x8xf32>
    %62 = arith.negf %61 : vector<16x16x8xf32>
    %63 = math.exp %62 : vector<16x16x8xf32>
    %cst = arith.constant 1.000000e+00 : f32
    %64 = vector.broadcast %cst : f32 to vector<16x16x8xf32>
    %65 = arith.addf %64, %63 : vector<16x16x8xf32>
    %66 = arith.divf %64, %65 : vector<16x16x8xf32>
    %67 = arith.mulf %61, %66 : vector<16x16x8xf32>
    %c0_7 = arith.constant 0 : index
    %c0_8 = arith.constant 0 : index
    %c0_9 = arith.constant 0 : index
    %c0_10 = arith.constant 0 : index
    %68 = vector.load %arg2[%c0_7, %c0_8, %c0_9, %c0_10] : memref<1x16x8x8xf32, #tpu.memory_space<vmem>>, vector<1x16x8x8xf32>
    %69 = vector.shape_cast %68 : vector<1x16x8x8xf32> to vector<16x8x8xf32>
    %70 = vector.extract_strided_slice %69 {offsets = [0, 0, 0], sizes = [16, 1, 8], strides = [1, 1, 1]} : vector<16x8x8xf32> to vector<16x1x8xf32>
    %71 = vector.extract_strided_slice %0 {offsets = [0, 0], sizes = [16, 1], strides = [1, 1]} : vector<16x8xf32> to vector<16x1xf32>
    %72 = vector.shape_cast %71 : vector<16x1xf32> to vector<1x16x1xf32>
    %73 = vector.broadcast %70 : vector<16x1x8xf32> to vector<16x16x8xf32>
    %74 = vector.broadcast %72 : vector<1x16x1xf32> to vector<16x16x8xf32>
    %75 = arith.mulf %73, %74 : vector<16x16x8xf32>
    %76 = vector.extract_strided_slice %69 {offsets = [0, 1, 0], sizes = [16, 1, 8], strides = [1, 1, 1]} : vector<16x8x8xf32> to vector<16x1x8xf32>
    %77 = vector.extract_strided_slice %0 {offsets = [0, 1], sizes = [16, 1], strides = [1, 1]} : vector<16x8xf32> to vector<16x1xf32>
    %78 = vector.shape_cast %77 : vector<16x1xf32> to vector<1x16x1xf32>
    %79 = vector.broadcast %76 : vector<16x1x8xf32> to vector<16x16x8xf32>
    %80 = vector.broadcast %78 : vector<1x16x1xf32> to vector<16x16x8xf32>
    %81 = arith.mulf %79, %80 : vector<16x16x8xf32>
    %82 = vector.extract_strided_slice %69 {offsets = [0, 2, 0], sizes = [16, 1, 8], strides = [1, 1, 1]} : vector<16x8x8xf32> to vector<16x1x8xf32>
    %83 = vector.extract_strided_slice %0 {offsets = [0, 2], sizes = [16, 1], strides = [1, 1]} : vector<16x8xf32> to vector<16x1xf32>
    %84 = vector.shape_cast %83 : vector<16x1xf32> to vector<1x16x1xf32>
    %85 = vector.broadcast %82 : vector<16x1x8xf32> to vector<16x16x8xf32>
    %86 = vector.broadcast %84 : vector<1x16x1xf32> to vector<16x16x8xf32>
    %87 = arith.mulf %85, %86 : vector<16x16x8xf32>
    %88 = arith.addf %75, %87 : vector<16x16x8xf32>
    %89 = vector.extract_strided_slice %69 {offsets = [0, 3, 0], sizes = [16, 1, 8], strides = [1, 1, 1]} : vector<16x8x8xf32> to vector<16x1x8xf32>
    %90 = vector.extract_strided_slice %0 {offsets = [0, 3], sizes = [16, 1], strides = [1, 1]} : vector<16x8xf32> to vector<16x1xf32>
    %91 = vector.shape_cast %90 : vector<16x1xf32> to vector<1x16x1xf32>
    %92 = vector.broadcast %89 : vector<16x1x8xf32> to vector<16x16x8xf32>
    %93 = vector.broadcast %91 : vector<1x16x1xf32> to vector<16x16x8xf32>
    %94 = arith.mulf %92, %93 : vector<16x16x8xf32>
    %95 = arith.addf %81, %94 : vector<16x16x8xf32>
    %96 = vector.extract_strided_slice %69 {offsets = [0, 4, 0], sizes = [16, 1, 8], strides = [1, 1, 1]} : vector<16x8x8xf32> to vector<16x1x8xf32>
    %97 = vector.extract_strided_slice %0 {offsets = [0, 4], sizes = [16, 1], strides = [1, 1]} : vector<16x8xf32> to vector<16x1xf32>
    %98 = vector.shape_cast %97 : vector<16x1xf32> to vector<1x16x1xf32>
    %99 = vector.broadcast %96 : vector<16x1x8xf32> to vector<16x16x8xf32>
    %100 = vector.broadcast %98 : vector<1x16x1xf32> to vector<16x16x8xf32>
    %101 = arith.mulf %99, %100 : vector<16x16x8xf32>
    %102 = arith.addf %88, %101 : vector<16x16x8xf32>
    %103 = vector.extract_strided_slice %69 {offsets = [0, 5, 0], sizes = [16, 1, 8], strides = [1, 1, 1]} : vector<16x8x8xf32> to vector<16x1x8xf32>
    %104 = vector.extract_strided_slice %0 {offsets = [0, 5], sizes = [16, 1], strides = [1, 1]} : vector<16x8xf32> to vector<16x1xf32>
    %105 = vector.shape_cast %104 : vector<16x1xf32> to vector<1x16x1xf32>
    %106 = vector.broadcast %103 : vector<16x1x8xf32> to vector<16x16x8xf32>
    %107 = vector.broadcast %105 : vector<1x16x1xf32> to vector<16x16x8xf32>
    %108 = arith.mulf %106, %107 : vector<16x16x8xf32>
    %109 = arith.addf %95, %108 : vector<16x16x8xf32>
    %110 = vector.extract_strided_slice %69 {offsets = [0, 6, 0], sizes = [16, 1, 8], strides = [1, 1, 1]} : vector<16x8x8xf32> to vector<16x1x8xf32>
    %111 = vector.extract_strided_slice %0 {offsets = [0, 6], sizes = [16, 1], strides = [1, 1]} : vector<16x8xf32> to vector<16x1xf32>
    %112 = vector.shape_cast %111 : vector<16x1xf32> to vector<1x16x1xf32>
    %113 = vector.broadcast %110 : vector<16x1x8xf32> to vector<16x16x8xf32>
    %114 = vector.broadcast %112 : vector<1x16x1xf32> to vector<16x16x8xf32>
    %115 = arith.mulf %113, %114 : vector<16x16x8xf32>
    %116 = arith.addf %102, %115 : vector<16x16x8xf32>
    %117 = vector.extract_strided_slice %69 {offsets = [0, 7, 0], sizes = [16, 1, 8], strides = [1, 1, 1]} : vector<16x8x8xf32> to vector<16x1x8xf32>
    %118 = vector.extract_strided_slice %0 {offsets = [0, 7], sizes = [16, 1], strides = [1, 1]} : vector<16x8xf32> to vector<16x1xf32>
    %119 = vector.shape_cast %118 : vector<16x1xf32> to vector<1x16x1xf32>
    %120 = vector.broadcast %117 : vector<16x1x8xf32> to vector<16x16x8xf32>
    %121 = vector.broadcast %119 : vector<1x16x1xf32> to vector<16x16x8xf32>
    %122 = arith.mulf %120, %121 : vector<16x16x8xf32>
    %123 = arith.addf %109, %122 : vector<16x16x8xf32>
    %124 = arith.addf %116, %123 : vector<16x16x8xf32>
    %125 = vector.shape_cast %1 : vector<16x1xf32> to vector<1x16x1xf32>
    %126 = vector.broadcast %125 : vector<1x16x1xf32> to vector<16x16x8xf32>
    %127 = arith.addf %124, %126 : vector<16x16x8xf32>
    %128 = arith.negf %127 : vector<16x16x8xf32>
    %129 = math.exp %128 : vector<16x16x8xf32>
    %cst_11 = arith.constant 1.000000e+00 : f32
    %130 = vector.broadcast %cst_11 : f32 to vector<16x16x8xf32>
    %131 = arith.addf %130, %129 : vector<16x16x8xf32>
    %132 = arith.divf %130, %131 : vector<16x16x8xf32>
    %133 = arith.mulf %127, %132 : vector<16x16x8xf32>
    %cst_12 = arith.constant 0.000000e+00 : f32
    %134 = vector.broadcast %cst_12 : f32 to vector<1x16x8xf32>
    %c0_13 = arith.constant 0 : index
    %c0_14 = arith.constant 0 : index
    %c0_15 = arith.constant 0 : index
    %135 = vector.load %arg12[%c0_13, %c0_14, %c0_15] : memref<17x16x8xf32, #tpu.memory_space<vmem>>, vector<1x16x8xf32>
    tpu.vector_store %arg12[%c0_13, %c0_14, %c0_15], %134 {strides = array<i32>} : memref<17x16x8xf32, #tpu.memory_space<vmem>>, vector<1x16x8xf32>,
    %c0_16 = arith.constant 0 : index
    %c0_17 = arith.constant 0 : index
    %c0_18 = arith.constant 0 : index
    %136 = vector.load %arg13[%c0_16, %c0_17, %c0_18] : memref<17x16x8xf32, #tpu.memory_space<vmem>>, vector<1x16x8xf32>
    tpu.vector_store %arg13[%c0_16, %c0_17, %c0_18], %134 {strides = array<i32>} : memref<17x16x8xf32, #tpu.memory_space<vmem>>, vector<1x16x8xf32>,
    %c0_19 = arith.constant 0 : index
    %c0_20 = arith.constant 0 : index
    %c0_21 = arith.constant 0 : index
    %137 = vector.load %arg14[%c0_19, %c0_20, %c0_21] : memref<17x16x8xf32, #tpu.memory_space<vmem>>, vector<1x16x8xf32>
    tpu.vector_store %arg14[%c0_19, %c0_20, %c0_21], %134 {strides = array<i32>} : memref<17x16x8xf32, #tpu.memory_space<vmem>>, vector<1x16x8xf32>,
    %c1 = arith.constant 1 : index
    %c0_22 = arith.constant 0 : index
    %c0_23 = arith.constant 0 : index
    %138 = vector.load %arg12[%c1, %c0_22, %c0_23] : memref<17x16x8xf32, #tpu.memory_space<vmem>>, vector<16x16x8xf32>
    tpu.vector_store %arg12[%c1, %c0_22, %c0_23], %67 {strides = array<i32>} : memref<17x16x8xf32, #tpu.memory_space<vmem>>, vector<16x16x8xf32>,
    %c1_24 = arith.constant 1 : index
    %c0_25 = arith.constant 0 : index
    %c0_26 = arith.constant 0 : index
    %139 = vector.load %arg13[%c1_24, %c0_25, %c0_26] : memref<17x16x8xf32, #tpu.memory_space<vmem>>, vector<16x16x8xf32>
    tpu.vector_store %arg13[%c1_24, %c0_25, %c0_26], %133 {strides = array<i32>} : memref<17x16x8xf32, #tpu.memory_space<vmem>>, vector<16x16x8xf32>,
    %cst_27 = arith.constant 0.000000e+00 : f32
    %140 = vector.broadcast %cst_27 : f32 to vector<16x16x1xf32>
    %141 = vector.extract_strided_slice %133 {offsets = [0, 0, 0], sizes = [16, 16, 7], strides = [1, 1, 1]} : vector<16x16x8xf32> to vector<16x16x7xf32>
    %142 = tpu.concatenate %140, %141 in 2 : vector<16x16x1xf32>, vector<16x16x7xf32> -> vector<16x16x8xf32>
    %c1_28 = arith.constant 1 : index
    %c0_29 = arith.constant 0 : index
    %c0_30 = arith.constant 0 : index
    %143 = vector.load %arg14[%c1_28, %c0_29, %c0_30] : memref<17x16x8xf32, #tpu.memory_space<vmem>>, vector<16x16x8xf32>
    tpu.vector_store %arg14[%c1_28, %c0_29, %c0_30], %142 {strides = array<i32>} : memref<17x16x8xf32, #tpu.memory_space<vmem>>, vector<16x16x8xf32>,
    %c0_31 = arith.constant 0 : index
    %c0_32 = arith.constant 0 : index
    %144 = vector.load %arg5[%c0_31, %c0_32] : memref<16x9xf32, #tpu.memory_space<vmem>>, vector<16x9xf32>
    %c0_33 = arith.constant 0 : index
    %c0_34 = arith.constant 0 : index
    %145 = vector.load %arg6[%c0_33, %c0_34] : memref<16x1xf32, #tpu.memory_space<vmem>>, vector<16x1xf32>
    %c0_35 = arith.constant 0 : index
    %c0_36 = arith.constant 0 : index
    %c0_37 = arith.constant 0 : index
    %146 = tpu.strided_load %arg14[%c0_35, %c0_36, %c0_37] {strides = array<i32: 2, 1, 1>} : memref<17x16x8xf32, #tpu.memory_space<vmem>>, vector<8x16x8xf32>
    %147 = vector.extract_strided_slice %144 {offsets = [0, 0], sizes = [16, 1], strides = [1, 1]} : vector<16x9xf32> to vector<16x1xf32>
    %148 = vector.shape_cast %147 : vector<16x1xf32> to vector<1x16x1xf32>
    %149 = vector.broadcast %148 : vector<1x16x1xf32> to vector<8x16x8xf32>
    %150 = arith.mulf %146, %149 : vector<8x16x8xf32>
    %c0_38 = arith.constant 0 : index
    %c0_39 = arith.constant 0 : index
    %c0_40 = arith.constant 0 : index
    %151 = tpu.strided_load %arg12[%c0_38, %c0_39, %c0_40] {strides = array<i32: 2, 1, 1>} : memref<17x16x8xf32, #tpu.memory_space<vmem>>, vector<8x16x8xf32>
    %152 = vector.extract_strided_slice %144 {offsets = [0, 1], sizes = [16, 1], strides = [1, 1]} : vector<16x9xf32> to vector<16x1xf32>
    %153 = vector.shape_cast %152 : vector<16x1xf32> to vector<1x16x1xf32>
    %154 = vector.broadcast %153 : vector<1x16x1xf32> to vector<8x16x8xf32>
    %155 = arith.mulf %151, %154 : vector<8x16x8xf32>
    %c0_41 = arith.constant 0 : index
    %c0_42 = arith.constant 0 : index
    %c0_43 = arith.constant 0 : index
    %156 = tpu.strided_load %arg13[%c0_41, %c0_42, %c0_43] {strides = array<i32: 2, 1, 1>} : memref<17x16x8xf32, #tpu.memory_space<vmem>>, vector<8x16x8xf32>
    %157 = vector.extract_strided_slice %144 {offsets = [0, 2], sizes = [16, 1], strides = [1, 1]} : vector<16x9xf32> to vector<16x1xf32>
    %158 = vector.shape_cast %157 : vector<16x1xf32> to vector<1x16x1xf32>
    %159 = vector.broadcast %158 : vector<1x16x1xf32> to vector<8x16x8xf32>
    %160 = arith.mulf %156, %159 : vector<8x16x8xf32>
    %161 = arith.addf %150, %160 : vector<8x16x8xf32>
    %c1_44 = arith.constant 1 : index
    %c0_45 = arith.constant 0 : index
    %c0_46 = arith.constant 0 : index
    %162 = tpu.strided_load %arg14[%c1_44, %c0_45, %c0_46] {strides = array<i32: 2, 1, 1>} : memref<17x16x8xf32, #tpu.memory_space<vmem>>, vector<8x16x8xf32>
    %163 = vector.extract_strided_slice %144 {offsets = [0, 3], sizes = [16, 1], strides = [1, 1]} : vector<16x9xf32> to vector<16x1xf32>
    %164 = vector.shape_cast %163 : vector<16x1xf32> to vector<1x16x1xf32>
    %165 = vector.broadcast %164 : vector<1x16x1xf32> to vector<8x16x8xf32>
    %166 = arith.mulf %162, %165 : vector<8x16x8xf32>
    %167 = arith.addf %155, %166 : vector<8x16x8xf32>
    %c1_47 = arith.constant 1 : index
    %c0_48 = arith.constant 0 : index
    %c0_49 = arith.constant 0 : index
    %168 = tpu.strided_load %arg12[%c1_47, %c0_48, %c0_49] {strides = array<i32: 2, 1, 1>} : memref<17x16x8xf32, #tpu.memory_space<vmem>>, vector<8x16x8xf32>
    %169 = vector.extract_strided_slice %144 {offsets = [0, 4], sizes = [16, 1], strides = [1, 1]} : vector<16x9xf32> to vector<16x1xf32>
    %170 = vector.shape_cast %169 : vector<16x1xf32> to vector<1x16x1xf32>
    %171 = vector.broadcast %170 : vector<1x16x1xf32> to vector<8x16x8xf32>
    %172 = arith.mulf %168, %171 : vector<8x16x8xf32>
    %173 = arith.addf %161, %172 : vector<8x16x8xf32>
    %c1_50 = arith.constant 1 : index
    %c0_51 = arith.constant 0 : index
    %c0_52 = arith.constant 0 : index
    %174 = tpu.strided_load %arg13[%c1_50, %c0_51, %c0_52] {strides = array<i32: 2, 1, 1>} : memref<17x16x8xf32, #tpu.memory_space<vmem>>, vector<8x16x8xf32>
    %175 = vector.extract_strided_slice %144 {offsets = [0, 5], sizes = [16, 1], strides = [1, 1]} : vector<16x9xf32> to vector<16x1xf32>
    %176 = vector.shape_cast %175 : vector<16x1xf32> to vector<1x16x1xf32>
    %177 = vector.broadcast %176 : vector<1x16x1xf32> to vector<8x16x8xf32>
    %178 = arith.mulf %174, %177 : vector<8x16x8xf32>
    %179 = arith.addf %167, %178 : vector<8x16x8xf32>
    %c2 = arith.constant 2 : index
    %c0_53 = arith.constant 0 : index
    %c0_54 = arith.constant 0 : index
    %180 = tpu.strided_load %arg14[%c2, %c0_53, %c0_54] {strides = array<i32: 2, 1, 1>} : memref<17x16x8xf32, #tpu.memory_space<vmem>>, vector<8x16x8xf32>
    %181 = vector.extract_strided_slice %144 {offsets = [0, 6], sizes = [16, 1], strides = [1, 1]} : vector<16x9xf32> to vector<16x1xf32>
    %182 = vector.shape_cast %181 : vector<16x1xf32> to vector<1x16x1xf32>
    %183 = vector.broadcast %182 : vector<1x16x1xf32> to vector<8x16x8xf32>
    %184 = arith.mulf %180, %183 : vector<8x16x8xf32>
    %185 = arith.addf %173, %184 : vector<8x16x8xf32>
    %c2_55 = arith.constant 2 : index
    %c0_56 = arith.constant 0 : index
    %c0_57 = arith.constant 0 : index
    %186 = tpu.strided_load %arg12[%c2_55, %c0_56, %c0_57] {strides = array<i32: 2, 1, 1>} : memref<17x16x8xf32, #tpu.memory_space<vmem>>, vector<8x16x8xf32>
    %187 = vector.extract_strided_slice %144 {offsets = [0, 7], sizes = [16, 1], strides = [1, 1]} : vector<16x9xf32> to vector<16x1xf32>
    %188 = vector.shape_cast %187 : vector<16x1xf32> to vector<1x16x1xf32>
    %189 = vector.broadcast %188 : vector<1x16x1xf32> to vector<8x16x8xf32>
    %190 = arith.mulf %186, %189 : vector<8x16x8xf32>
    %191 = arith.addf %179, %190 : vector<8x16x8xf32>
    %c2_58 = arith.constant 2 : index
    %c0_59 = arith.constant 0 : index
    %c0_60 = arith.constant 0 : index
    %192 = tpu.strided_load %arg13[%c2_58, %c0_59, %c0_60] {strides = array<i32: 2, 1, 1>} : memref<17x16x8xf32, #tpu.memory_space<vmem>>, vector<8x16x8xf32>
    %193 = vector.extract_strided_slice %144 {offsets = [0, 8], sizes = [16, 1], strides = [1, 1]} : vector<16x9xf32> to vector<16x1xf32>
    %194 = vector.shape_cast %193 : vector<16x1xf32> to vector<1x16x1xf32>
    %195 = vector.broadcast %194 : vector<1x16x1xf32> to vector<8x16x8xf32>
    %196 = arith.mulf %192, %195 : vector<8x16x8xf32>
    %197 = arith.addf %185, %196 : vector<8x16x8xf32>
    %198 = arith.addf %197, %191 : vector<8x16x8xf32>
    %199 = vector.shape_cast %145 : vector<16x1xf32> to vector<1x16x1xf32>
    %200 = vector.broadcast %199 : vector<1x16x1xf32> to vector<8x16x8xf32>
    %201 = arith.addf %198, %200 : vector<8x16x8xf32>
    %202 = vector.extract_strided_slice %201 {offsets = [0, 0, 0], sizes = [8, 8, 8], strides = [1, 1, 1]} : vector<8x16x8xf32> to vector<8x8x8xf32>
    %203 = vector.extract_strided_slice %201 {offsets = [0, 8, 0], sizes = [8, 4, 8], strides = [1, 1, 1]} : vector<8x16x8xf32> to vector<8x4x8xf32>
    %204 = vector.extract_strided_slice %201 {offsets = [0, 12, 0], sizes = [8, 4, 8], strides = [1, 1, 1]} : vector<8x16x8xf32> to vector<8x4x8xf32>
    %cst_61 = arith.constant 0.000000e+00 : f32
    %205 = vector.broadcast %cst_61 : f32 to vector<2x4x8xf32>
    %c0_62 = arith.constant 0 : index
    %c0_63 = arith.constant 0 : index
    %c0_64 = arith.constant 0 : index
    %206 = vector.load %arg15[%c0_62, %c0_63, %c0_64] : memref<12x4x8xf32, #tpu.memory_space<vmem>>, vector<2x4x8xf32>
    tpu.vector_store %arg15[%c0_62, %c0_63, %c0_64], %205 {strides = array<i32>} : memref<12x4x8xf32, #tpu.memory_space<vmem>>, vector<2x4x8xf32>,
    %c10 = arith.constant 10 : index
    %c0_65 = arith.constant 0 : index
    %c0_66 = arith.constant 0 : index
    %207 = vector.load %arg15[%c10, %c0_65, %c0_66] : memref<12x4x8xf32, #tpu.memory_space<vmem>>, vector<2x4x8xf32>
    tpu.vector_store %arg15[%c10, %c0_65, %c0_66], %205 {strides = array<i32>} : memref<12x4x8xf32, #tpu.memory_space<vmem>>, vector<2x4x8xf32>,
    %c0_67 = arith.constant 0 : index
    %c0_68 = arith.constant 0 : index
    %c0_69 = arith.constant 0 : index
    %208 = vector.load %arg7[%c0_67, %c0_68, %c0_69] : memref<2x4x25xf32, #tpu.memory_space<vmem>>, vector<1x4x25xf32>
    %209 = vector.shape_cast %208 : vector<1x4x25xf32> to vector<4x25xf32>
    %c2_70 = arith.constant 2 : index
    %c0_71 = arith.constant 0 : index
    %c0_72 = arith.constant 0 : index
    %210 = vector.load %arg15[%c2_70, %c0_71, %c0_72] : memref<12x4x8xf32, #tpu.memory_space<vmem>>, vector<8x4x8xf32>
    tpu.vector_store %arg15[%c2_70, %c0_71, %c0_72], %204 {strides = array<i32>} : memref<12x4x8xf32, #tpu.memory_space<vmem>>, vector<8x4x8xf32>,
    %c0_73 = arith.constant 0 : index
    %c0_74 = arith.constant 0 : index
    %c0_75 = arith.constant 0 : index
    %211 = vector.load %arg15[%c0_73, %c0_74, %c0_75] : memref<12x4x8xf32, #tpu.memory_space<vmem>>, vector<12x4x8xf32>
    %cst_76 = arith.constant 0.000000e+00 : f32
    %212 = vector.broadcast %cst_76 : f32 to vector<12x4x2xf32>
    %213 = vector.extract_strided_slice %211 {offsets = [0, 0, 0], sizes = [12, 4, 6], strides = [1, 1, 1]} : vector<12x4x8xf32> to vector<12x4x6xf32>
    %214 = tpu.concatenate %212, %213 in 2 : vector<12x4x2xf32>, vector<12x4x6xf32> -> vector<12x4x8xf32>
    %215 = vector.extract_strided_slice %214 {offsets = [0, 0, 0], sizes = [8, 4, 8], strides = [1, 1, 1]} : vector<12x4x8xf32> to vector<8x4x8xf32>
    %216 = vector.extract_strided_slice %209 {offsets = [0, 0], sizes = [4, 1], strides = [1, 1]} : vector<4x25xf32> to vector<4x1xf32>
    %217 = vector.shape_cast %216 : vector<4x1xf32> to vector<1x4x1xf32>
    %218 = vector.broadcast %217 : vector<1x4x1xf32> to vector<8x4x8xf32>
    %219 = arith.mulf %215, %218 : vector<8x4x8xf32>
    %220 = vector.extract_strided_slice %214 {offsets = [1, 0, 0], sizes = [8, 4, 8], strides = [1, 1, 1]} : vector<12x4x8xf32> to vector<8x4x8xf32>
    %221 = vector.extract_strided_slice %209 {offsets = [0, 5], sizes = [4, 1], strides = [1, 1]} : vector<4x25xf32> to vector<4x1xf32>
    %222 = vector.shape_cast %221 : vector<4x1xf32> to vector<1x4x1xf32>
    %223 = vector.broadcast %222 : vector<1x4x1xf32> to vector<8x4x8xf32>
    %224 = arith.mulf %220, %223 : vector<8x4x8xf32>
    %225 = vector.extract_strided_slice %214 {offsets = [2, 0, 0], sizes = [8, 4, 8], strides = [1, 1, 1]} : vector<12x4x8xf32> to vector<8x4x8xf32>
    %226 = vector.extract_strided_slice %209 {offsets = [0, 10], sizes = [4, 1], strides = [1, 1]} : vector<4x25xf32> to vector<4x1xf32>
    %227 = vector.shape_cast %226 : vector<4x1xf32> to vector<1x4x1xf32>
    %228 = vector.broadcast %227 : vector<1x4x1xf32> to vector<8x4x8xf32>
    %229 = arith.mulf %225, %228 : vector<8x4x8xf32>
    %230 = arith.addf %219, %229 : vector<8x4x8xf32>
    %231 = vector.extract_strided_slice %214 {offsets = [3, 0, 0], sizes = [8, 4, 8], strides = [1, 1, 1]} : vector<12x4x8xf32> to vector<8x4x8xf32>
    %232 = vector.extract_strided_slice %209 {offsets = [0, 15], sizes = [4, 1], strides = [1, 1]} : vector<4x25xf32> to vector<4x1xf32>
    %233 = vector.shape_cast %232 : vector<4x1xf32> to vector<1x4x1xf32>
    %234 = vector.broadcast %233 : vector<1x4x1xf32> to vector<8x4x8xf32>
    %235 = arith.mulf %231, %234 : vector<8x4x8xf32>
    %236 = arith.addf %224, %235 : vector<8x4x8xf32>
    %237 = vector.extract_strided_slice %214 {offsets = [4, 0, 0], sizes = [8, 4, 8], strides = [1, 1, 1]} : vector<12x4x8xf32> to vector<8x4x8xf32>
    %238 = vector.extract_strided_slice %209 {offsets = [0, 20], sizes = [4, 1], strides = [1, 1]} : vector<4x25xf32> to vector<4x1xf32>
    %239 = vector.shape_cast %238 : vector<4x1xf32> to vector<1x4x1xf32>
    %240 = vector.broadcast %239 : vector<1x4x1xf32> to vector<8x4x8xf32>
    %241 = arith.mulf %237, %240 : vector<8x4x8xf32>
    %242 = arith.addf %230, %241 : vector<8x4x8xf32>
    %cst_77 = arith.constant 0.000000e+00 : f32
    %243 = vector.broadcast %cst_77 : f32 to vector<12x4x1xf32>
    %244 = vector.extract_strided_slice %211 {offsets = [0, 0, 0], sizes = [12, 4, 7], strides = [1, 1, 1]} : vector<12x4x8xf32> to vector<12x4x7xf32>
    %245 = tpu.concatenate %243, %244 in 2 : vector<12x4x1xf32>, vector<12x4x7xf32> -> vector<12x4x8xf32>
    %246 = vector.extract_strided_slice %245 {offsets = [0, 0, 0], sizes = [8, 4, 8], strides = [1, 1, 1]} : vector<12x4x8xf32> to vector<8x4x8xf32>
    %247 = vector.extract_strided_slice %209 {offsets = [0, 1], sizes = [4, 1], strides = [1, 1]} : vector<4x25xf32> to vector<4x1xf32>
    %248 = vector.shape_cast %247 : vector<4x1xf32> to vector<1x4x1xf32>
    %249 = vector.broadcast %248 : vector<1x4x1xf32> to vector<8x4x8xf32>
    %250 = arith.mulf %246, %249 : vector<8x4x8xf32>
    %251 = arith.addf %236, %250 : vector<8x4x8xf32>
    %252 = vector.extract_strided_slice %245 {offsets = [1, 0, 0], sizes = [8, 4, 8], strides = [1, 1, 1]} : vector<12x4x8xf32> to vector<8x4x8xf32>
    %253 = vector.extract_strided_slice %209 {offsets = [0, 6], sizes = [4, 1], strides = [1, 1]} : vector<4x25xf32> to vector<4x1xf32>
    %254 = vector.shape_cast %253 : vector<4x1xf32> to vector<1x4x1xf32>
    %255 = vector.broadcast %254 : vector<1x4x1xf32> to vector<8x4x8xf32>
    %256 = arith.mulf %252, %255 : vector<8x4x8xf32>
    %257 = arith.addf %242, %256 : vector<8x4x8xf32>
    %258 = vector.extract_strided_slice %245 {offsets = [2, 0, 0], sizes = [8, 4, 8], strides = [1, 1, 1]} : vector<12x4x8xf32> to vector<8x4x8xf32>
    %259 = vector.extract_strided_slice %209 {offsets = [0, 11], sizes = [4, 1], strides = [1, 1]} : vector<4x25xf32> to vector<4x1xf32>
    %260 = vector.shape_cast %259 : vector<4x1xf32> to vector<1x4x1xf32>
    %261 = vector.broadcast %260 : vector<1x4x1xf32> to vector<8x4x8xf32>
    %262 = arith.mulf %258, %261 : vector<8x4x8xf32>
    %263 = arith.addf %251, %262 : vector<8x4x8xf32>
    %264 = vector.extract_strided_slice %245 {offsets = [3, 0, 0], sizes = [8, 4, 8], strides = [1, 1, 1]} : vector<12x4x8xf32> to vector<8x4x8xf32>
    %265 = vector.extract_strided_slice %209 {offsets = [0, 16], sizes = [4, 1], strides = [1, 1]} : vector<4x25xf32> to vector<4x1xf32>
    %266 = vector.shape_cast %265 : vector<4x1xf32> to vector<1x4x1xf32>
    %267 = vector.broadcast %266 : vector<1x4x1xf32> to vector<8x4x8xf32>
    %268 = arith.mulf %264, %267 : vector<8x4x8xf32>
    %269 = arith.addf %257, %268 : vector<8x4x8xf32>
    %270 = vector.extract_strided_slice %245 {offsets = [4, 0, 0], sizes = [8, 4, 8], strides = [1, 1, 1]} : vector<12x4x8xf32> to vector<8x4x8xf32>
    %271 = vector.extract_strided_slice %209 {offsets = [0, 21], sizes = [4, 1], strides = [1, 1]} : vector<4x25xf32> to vector<4x1xf32>
    %272 = vector.shape_cast %271 : vector<4x1xf32> to vector<1x4x1xf32>
    %273 = vector.broadcast %272 : vector<1x4x1xf32> to vector<8x4x8xf32>
    %274 = arith.mulf %270, %273 : vector<8x4x8xf32>
    %275 = arith.addf %263, %274 : vector<8x4x8xf32>
    %276 = vector.extract_strided_slice %211 {offsets = [0, 0, 0], sizes = [8, 4, 8], strides = [1, 1, 1]} : vector<12x4x8xf32> to vector<8x4x8xf32>
    %277 = vector.extract_strided_slice %209 {offsets = [0, 2], sizes = [4, 1], strides = [1, 1]} : vector<4x25xf32> to vector<4x1xf32>
    %278 = vector.shape_cast %277 : vector<4x1xf32> to vector<1x4x1xf32>
    %279 = vector.broadcast %278 : vector<1x4x1xf32> to vector<8x4x8xf32>
    %280 = arith.mulf %276, %279 : vector<8x4x8xf32>
    %281 = arith.addf %269, %280 : vector<8x4x8xf32>
    %282 = vector.extract_strided_slice %211 {offsets = [1, 0, 0], sizes = [8, 4, 8], strides = [1, 1, 1]} : vector<12x4x8xf32> to vector<8x4x8xf32>
    %283 = vector.extract_strided_slice %209 {offsets = [0, 7], sizes = [4, 1], strides = [1, 1]} : vector<4x25xf32> to vector<4x1xf32>
    %284 = vector.shape_cast %283 : vector<4x1xf32> to vector<1x4x1xf32>
    %285 = vector.broadcast %284 : vector<1x4x1xf32> to vector<8x4x8xf32>
    %286 = arith.mulf %282, %285 : vector<8x4x8xf32>
    %287 = arith.addf %275, %286 : vector<8x4x8xf32>
    %288 = vector.extract_strided_slice %211 {offsets = [2, 0, 0], sizes = [8, 4, 8], strides = [1, 1, 1]} : vector<12x4x8xf32> to vector<8x4x8xf32>
    %289 = vector.extract_strided_slice %209 {offsets = [0, 12], sizes = [4, 1], strides = [1, 1]} : vector<4x25xf32> to vector<4x1xf32>
    %290 = vector.shape_cast %289 : vector<4x1xf32> to vector<1x4x1xf32>
    %291 = vector.broadcast %290 : vector<1x4x1xf32> to vector<8x4x8xf32>
    %292 = arith.mulf %288, %291 : vector<8x4x8xf32>
    %293 = arith.addf %281, %292 : vector<8x4x8xf32>
    %294 = vector.extract_strided_slice %211 {offsets = [3, 0, 0], sizes = [8, 4, 8], strides = [1, 1, 1]} : vector<12x4x8xf32> to vector<8x4x8xf32>
    %295 = vector.extract_strided_slice %209 {offsets = [0, 17], sizes = [4, 1], strides = [1, 1]} : vector<4x25xf32> to vector<4x1xf32>
    %296 = vector.shape_cast %295 : vector<4x1xf32> to vector<1x4x1xf32>
    %297 = vector.broadcast %296 : vector<1x4x1xf32> to vector<8x4x8xf32>
    %298 = arith.mulf %294, %297 : vector<8x4x8xf32>
    %299 = arith.addf %287, %298 : vector<8x4x8xf32>
    %300 = vector.extract_strided_slice %211 {offsets = [4, 0, 0], sizes = [8, 4, 8], strides = [1, 1, 1]} : vector<12x4x8xf32> to vector<8x4x8xf32>
    %301 = vector.extract_strided_slice %209 {offsets = [0, 22], sizes = [4, 1], strides = [1, 1]} : vector<4x25xf32> to vector<4x1xf32>
    %302 = vector.shape_cast %301 : vector<4x1xf32> to vector<1x4x1xf32>
    %303 = vector.broadcast %302 : vector<1x4x1xf32> to vector<8x4x8xf32>
    %304 = arith.mulf %300, %303 : vector<8x4x8xf32>
    %305 = arith.addf %293, %304 : vector<8x4x8xf32>
    %cst_78 = arith.constant 0.000000e+00 : f32
    %306 = vector.broadcast %cst_78 : f32 to vector<12x4x1xf32>
    %307 = vector.extract_strided_slice %211 {offsets = [0, 0, 1], sizes = [12, 4, 7], strides = [1, 1, 1]} : vector<12x4x8xf32> to vector<12x4x7xf32>
    %308 = tpu.concatenate %307, %306 in 2 : vector<12x4x7xf32>, vector<12x4x1xf32> -> vector<12x4x8xf32>
    %309 = vector.extract_strided_slice %308 {offsets = [0, 0, 0], sizes = [8, 4, 8], strides = [1, 1, 1]} : vector<12x4x8xf32> to vector<8x4x8xf32>
    %310 = vector.extract_strided_slice %209 {offsets = [0, 3], sizes = [4, 1], strides = [1, 1]} : vector<4x25xf32> to vector<4x1xf32>
    %311 = vector.shape_cast %310 : vector<4x1xf32> to vector<1x4x1xf32>
    %312 = vector.broadcast %311 : vector<1x4x1xf32> to vector<8x4x8xf32>
    %313 = arith.mulf %309, %312 : vector<8x4x8xf32>
    %314 = arith.addf %299, %313 : vector<8x4x8xf32>
    %315 = vector.extract_strided_slice %308 {offsets = [1, 0, 0], sizes = [8, 4, 8], strides = [1, 1, 1]} : vector<12x4x8xf32> to vector<8x4x8xf32>
    %316 = vector.extract_strided_slice %209 {offsets = [0, 8], sizes = [4, 1], strides = [1, 1]} : vector<4x25xf32> to vector<4x1xf32>
    %317 = vector.shape_cast %316 : vector<4x1xf32> to vector<1x4x1xf32>
    %318 = vector.broadcast %317 : vector<1x4x1xf32> to vector<8x4x8xf32>
    %319 = arith.mulf %315, %318 : vector<8x4x8xf32>
    %320 = arith.addf %305, %319 : vector<8x4x8xf32>
    %321 = vector.extract_strided_slice %308 {offsets = [2, 0, 0], sizes = [8, 4, 8], strides = [1, 1, 1]} : vector<12x4x8xf32> to vector<8x4x8xf32>
    %322 = vector.extract_strided_slice %209 {offsets = [0, 13], sizes = [4, 1], strides = [1, 1]} : vector<4x25xf32> to vector<4x1xf32>
    %323 = vector.shape_cast %322 : vector<4x1xf32> to vector<1x4x1xf32>
    %324 = vector.broadcast %323 : vector<1x4x1xf32> to vector<8x4x8xf32>
    %325 = arith.mulf %321, %324 : vector<8x4x8xf32>
    %326 = arith.addf %314, %325 : vector<8x4x8xf32>
    %327 = vector.extract_strided_slice %308 {offsets = [3, 0, 0], sizes = [8, 4, 8], strides = [1, 1, 1]} : vector<12x4x8xf32> to vector<8x4x8xf32>
    %328 = vector.extract_strided_slice %209 {offsets = [0, 18], sizes = [4, 1], strides = [1, 1]} : vector<4x25xf32> to vector<4x1xf32>
    %329 = vector.shape_cast %328 : vector<4x1xf32> to vector<1x4x1xf32>
    %330 = vector.broadcast %329 : vector<1x4x1xf32> to vector<8x4x8xf32>
    %331 = arith.mulf %327, %330 : vector<8x4x8xf32>
    %332 = arith.addf %320, %331 : vector<8x4x8xf32>
    %333 = vector.extract_strided_slice %308 {offsets = [4, 0, 0], sizes = [8, 4, 8], strides = [1, 1, 1]} : vector<12x4x8xf32> to vector<8x4x8xf32>
    %334 = vector.extract_strided_slice %209 {offsets = [0, 23], sizes = [4, 1], strides = [1, 1]} : vector<4x25xf32> to vector<4x1xf32>
    %335 = vector.shape_cast %334 : vector<4x1xf32> to vector<1x4x1xf32>
    %336 = vector.broadcast %335 : vector<1x4x1xf32> to vector<8x4x8xf32>
    %337 = arith.mulf %333, %336 : vector<8x4x8xf32>
    %338 = arith.addf %326, %337 : vector<8x4x8xf32>
    %cst_79 = arith.constant 0.000000e+00 : f32
    %339 = vector.broadcast %cst_79 : f32 to vector<12x4x2xf32>
    %340 = vector.extract_strided_slice %211 {offsets = [0, 0, 2], sizes = [12, 4, 6], strides = [1, 1, 1]} : vector<12x4x8xf32> to vector<12x4x6xf32>
    %341 = tpu.concatenate %340, %339 in 2 : vector<12x4x6xf32>, vector<12x4x2xf32> -> vector<12x4x8xf32>
    %342 = vector.extract_strided_slice %341 {offsets = [0, 0, 0], sizes = [8, 4, 8], strides = [1, 1, 1]} : vector<12x4x8xf32> to vector<8x4x8xf32>
    %343 = vector.extract_strided_slice %209 {offsets = [0, 4], sizes = [4, 1], strides = [1, 1]} : vector<4x25xf32> to vector<4x1xf32>
    %344 = vector.shape_cast %343 : vector<4x1xf32> to vector<1x4x1xf32>
    %345 = vector.broadcast %344 : vector<1x4x1xf32> to vector<8x4x8xf32>
    %346 = arith.mulf %342, %345 : vector<8x4x8xf32>
    %347 = arith.addf %332, %346 : vector<8x4x8xf32>
    %348 = vector.extract_strided_slice %341 {offsets = [1, 0, 0], sizes = [8, 4, 8], strides = [1, 1, 1]} : vector<12x4x8xf32> to vector<8x4x8xf32>
    %349 = vector.extract_strided_slice %209 {offsets = [0, 9], sizes = [4, 1], strides = [1, 1]} : vector<4x25xf32> to vector<4x1xf32>
    %350 = vector.shape_cast %349 : vector<4x1xf32> to vector<1x4x1xf32>
    %351 = vector.broadcast %350 : vector<1x4x1xf32> to vector<8x4x8xf32>
    %352 = arith.mulf %348, %351 : vector<8x4x8xf32>
    %353 = arith.addf %338, %352 : vector<8x4x8xf32>
    %354 = vector.extract_strided_slice %341 {offsets = [2, 0, 0], sizes = [8, 4, 8], strides = [1, 1, 1]} : vector<12x4x8xf32> to vector<8x4x8xf32>
    %355 = vector.extract_strided_slice %209 {offsets = [0, 14], sizes = [4, 1], strides = [1, 1]} : vector<4x25xf32> to vector<4x1xf32>
    %356 = vector.shape_cast %355 : vector<4x1xf32> to vector<1x4x1xf32>
    %357 = vector.broadcast %356 : vector<1x4x1xf32> to vector<8x4x8xf32>
    %358 = arith.mulf %354, %357 : vector<8x4x8xf32>
    %359 = arith.addf %347, %358 : vector<8x4x8xf32>
    %360 = vector.extract_strided_slice %341 {offsets = [3, 0, 0], sizes = [8, 4, 8], strides = [1, 1, 1]} : vector<12x4x8xf32> to vector<8x4x8xf32>
    %361 = vector.extract_strided_slice %209 {offsets = [0, 19], sizes = [4, 1], strides = [1, 1]} : vector<4x25xf32> to vector<4x1xf32>
    %362 = vector.shape_cast %361 : vector<4x1xf32> to vector<1x4x1xf32>
    %363 = vector.broadcast %362 : vector<1x4x1xf32> to vector<8x4x8xf32>
    %364 = arith.mulf %360, %363 : vector<8x4x8xf32>
    %365 = arith.addf %353, %364 : vector<8x4x8xf32>
    %366 = vector.extract_strided_slice %341 {offsets = [4, 0, 0], sizes = [8, 4, 8], strides = [1, 1, 1]} : vector<12x4x8xf32> to vector<8x4x8xf32>
    %367 = vector.extract_strided_slice %209 {offsets = [0, 24], sizes = [4, 1], strides = [1, 1]} : vector<4x25xf32> to vector<4x1xf32>
    %368 = vector.shape_cast %367 : vector<4x1xf32> to vector<1x4x1xf32>
    %369 = vector.broadcast %368 : vector<1x4x1xf32> to vector<8x4x8xf32>
    %370 = arith.mulf %366, %369 : vector<8x4x8xf32>
    %371 = arith.addf %359, %370 : vector<8x4x8xf32>
    %372 = arith.addf %371, %365 : vector<8x4x8xf32>
    %c0_80 = arith.constant 0 : index
    %c0_81 = arith.constant 0 : index
    %c0_82 = arith.constant 0 : index
    %373 = vector.load %arg8[%c0_80, %c0_81, %c0_82] : memref<2x4x1xf32, #tpu.memory_space<vmem>>, vector<1x4x1xf32>
    %374 = vector.shape_cast %373 : vector<1x4x1xf32> to vector<4x1xf32>
    %375 = vector.shape_cast %374 : vector<4x1xf32> to vector<1x4x1xf32>
    %376 = vector.broadcast %375 : vector<1x4x1xf32> to vector<8x4x8xf32>
    %377 = arith.addf %372, %376 : vector<8x4x8xf32>
    %378 = arith.negf %377 : vector<8x4x8xf32>
    %379 = math.exp %378 : vector<8x4x8xf32>
    %cst_83 = arith.constant 1.000000e+00 : f32
    %380 = vector.broadcast %cst_83 : f32 to vector<8x4x8xf32>
    %381 = arith.addf %380, %379 : vector<8x4x8xf32>
    %382 = arith.divf %380, %381 : vector<8x4x8xf32>
    %383 = arith.mulf %377, %382 : vector<8x4x8xf32>
    %c0_84 = arith.constant 0 : index
    %c0_85 = arith.constant 0 : index
    %c0_86 = arith.constant 0 : index
    %384 = vector.load %arg9[%c0_84, %c0_85, %c0_86] : memref<2x4x4xf32, #tpu.memory_space<vmem>>, vector<1x4x4xf32>
    %385 = vector.shape_cast %384 : vector<1x4x4xf32> to vector<4x4xf32>
    %c0_87 = arith.constant 0 : index
    %c0_88 = arith.constant 0 : index
    %c0_89 = arith.constant 0 : index
    %386 = vector.load %arg10[%c0_87, %c0_88, %c0_89] : memref<2x4x1xf32, #tpu.memory_space<vmem>>, vector<1x4x1xf32>
    %387 = vector.shape_cast %386 : vector<1x4x1xf32> to vector<4x1xf32>
    %388 = vector.extract_strided_slice %383 {offsets = [0, 0, 0], sizes = [8, 1, 8], strides = [1, 1, 1]} : vector<8x4x8xf32> to vector<8x1x8xf32>
    %389 = vector.extract_strided_slice %385 {offsets = [0, 0], sizes = [4, 1], strides = [1, 1]} : vector<4x4xf32> to vector<4x1xf32>
    %390 = vector.shape_cast %389 : vector<4x1xf32> to vector<1x4x1xf32>
    %391 = vector.broadcast %388 : vector<8x1x8xf32> to vector<8x4x8xf32>
    %392 = vector.broadcast %390 : vector<1x4x1xf32> to vector<8x4x8xf32>
    %393 = arith.mulf %391, %392 : vector<8x4x8xf32>
    %394 = vector.extract_strided_slice %383 {offsets = [0, 1, 0], sizes = [8, 1, 8], strides = [1, 1, 1]} : vector<8x4x8xf32> to vector<8x1x8xf32>
    %395 = vector.extract_strided_slice %385 {offsets = [0, 1], sizes = [4, 1], strides = [1, 1]} : vector<4x4xf32> to vector<4x1xf32>
    %396 = vector.shape_cast %395 : vector<4x1xf32> to vector<1x4x1xf32>
    %397 = vector.broadcast %394 : vector<8x1x8xf32> to vector<8x4x8xf32>
    %398 = vector.broadcast %396 : vector<1x4x1xf32> to vector<8x4x8xf32>
    %399 = arith.mulf %397, %398 : vector<8x4x8xf32>
    %400 = vector.extract_strided_slice %383 {offsets = [0, 2, 0], sizes = [8, 1, 8], strides = [1, 1, 1]} : vector<8x4x8xf32> to vector<8x1x8xf32>
    %401 = vector.extract_strided_slice %385 {offsets = [0, 2], sizes = [4, 1], strides = [1, 1]} : vector<4x4xf32> to vector<4x1xf32>
    %402 = vector.shape_cast %401 : vector<4x1xf32> to vector<1x4x1xf32>
    %403 = vector.broadcast %400 : vector<8x1x8xf32> to vector<8x4x8xf32>
    %404 = vector.broadcast %402 : vector<1x4x1xf32> to vector<8x4x8xf32>
    %405 = arith.mulf %403, %404 : vector<8x4x8xf32>
    %406 = arith.addf %393, %405 : vector<8x4x8xf32>
    %407 = vector.extract_strided_slice %383 {offsets = [0, 3, 0], sizes = [8, 1, 8], strides = [1, 1, 1]} : vector<8x4x8xf32> to vector<8x1x8xf32>
    %408 = vector.extract_strided_slice %385 {offsets = [0, 3], sizes = [4, 1], strides = [1, 1]} : vector<4x4xf32> to vector<4x1xf32>
    %409 = vector.shape_cast %408 : vector<4x1xf32> to vector<1x4x1xf32>
    %410 = vector.broadcast %407 : vector<8x1x8xf32> to vector<8x4x8xf32>
    %411 = vector.broadcast %409 : vector<1x4x1xf32> to vector<8x4x8xf32>
    %412 = arith.mulf %410, %411 : vector<8x4x8xf32>
    %413 = arith.addf %399, %412 : vector<8x4x8xf32>
    %414 = arith.addf %406, %413 : vector<8x4x8xf32>
    %415 = vector.shape_cast %387 : vector<4x1xf32> to vector<1x4x1xf32>
    %416 = vector.broadcast %415 : vector<1x4x1xf32> to vector<8x4x8xf32>
    %417 = arith.addf %414, %416 : vector<8x4x8xf32>
    %418 = arith.negf %417 : vector<8x4x8xf32>
    %419 = math.exp %418 : vector<8x4x8xf32>
    %cst_90 = arith.constant 1.000000e+00 : f32
    %420 = vector.broadcast %cst_90 : f32 to vector<8x4x8xf32>
    %421 = arith.addf %420, %419 : vector<8x4x8xf32>
    %422 = arith.divf %420, %421 : vector<8x4x8xf32>
    %423 = arith.mulf %417, %422 : vector<8x4x8xf32>
    %424 = vector.extract_strided_slice %203 {offsets = [0, 0, 0], sizes = [8, 1, 8], strides = [1, 1, 1]} : vector<8x4x8xf32> to vector<8x1x8xf32>
    %425 = vector.extract_strided_slice %423 {offsets = [0, 0, 0], sizes = [8, 1, 8], strides = [1, 1, 1]} : vector<8x4x8xf32> to vector<8x1x8xf32>
    %426 = vector.extract_strided_slice %203 {offsets = [0, 1, 0], sizes = [8, 1, 8], strides = [1, 1, 1]} : vector<8x4x8xf32> to vector<8x1x8xf32>
    %427 = vector.extract_strided_slice %423 {offsets = [0, 1, 0], sizes = [8, 1, 8], strides = [1, 1, 1]} : vector<8x4x8xf32> to vector<8x1x8xf32>
    %428 = vector.extract_strided_slice %203 {offsets = [0, 2, 0], sizes = [8, 1, 8], strides = [1, 1, 1]} : vector<8x4x8xf32> to vector<8x1x8xf32>
    %429 = vector.extract_strided_slice %423 {offsets = [0, 2, 0], sizes = [8, 1, 8], strides = [1, 1, 1]} : vector<8x4x8xf32> to vector<8x1x8xf32>
    %430 = vector.extract_strided_slice %203 {offsets = [0, 3, 0], sizes = [8, 1, 8], strides = [1, 1, 1]} : vector<8x4x8xf32> to vector<8x1x8xf32>
    %431 = vector.extract_strided_slice %423 {offsets = [0, 3, 0], sizes = [8, 1, 8], strides = [1, 1, 1]} : vector<8x4x8xf32> to vector<8x1x8xf32>
    %432 = tpu.concatenate %424, %425, %426, %427 in 1 : vector<8x1x8xf32>, vector<8x1x8xf32>, vector<8x1x8xf32>, vector<8x1x8xf32> -> vector<8x4x8xf32>
    %433 = tpu.concatenate %428, %429, %430, %431 in 1 : vector<8x1x8xf32>, vector<8x1x8xf32>, vector<8x1x8xf32>, vector<8x1x8xf32> -> vector<8x4x8xf32>
    %c1_91 = arith.constant 1 : index
    %c0_92 = arith.constant 0 : index
    %c0_93 = arith.constant 0 : index
    %434 = vector.load %arg7[%c1_91, %c0_92, %c0_93] : memref<2x4x25xf32, #tpu.memory_space<vmem>>, vector<1x4x25xf32>
    %435 = vector.shape_cast %434 : vector<1x4x25xf32> to vector<4x25xf32>
    %c2_94 = arith.constant 2 : index
    %c0_95 = arith.constant 0 : index
    %c0_96 = arith.constant 0 : index
    %436 = vector.load %arg15[%c2_94, %c0_95, %c0_96] : memref<12x4x8xf32, #tpu.memory_space<vmem>>, vector<8x4x8xf32>
    tpu.vector_store %arg15[%c2_94, %c0_95, %c0_96], %433 {strides = array<i32>} : memref<12x4x8xf32, #tpu.memory_space<vmem>>, vector<8x4x8xf32>,
    %c0_97 = arith.constant 0 : index
    %c0_98 = arith.constant 0 : index
    %c0_99 = arith.constant 0 : index
    %437 = vector.load %arg15[%c0_97, %c0_98, %c0_99] : memref<12x4x8xf32, #tpu.memory_space<vmem>>, vector<12x4x8xf32>
    %cst_100 = arith.constant 0.000000e+00 : f32
    %438 = vector.broadcast %cst_100 : f32 to vector<12x4x2xf32>
    %439 = vector.extract_strided_slice %437 {offsets = [0, 0, 0], sizes = [12, 4, 6], strides = [1, 1, 1]} : vector<12x4x8xf32> to vector<12x4x6xf32>
    %440 = tpu.concatenate %438, %439 in 2 : vector<12x4x2xf32>, vector<12x4x6xf32> -> vector<12x4x8xf32>
    %441 = vector.extract_strided_slice %440 {offsets = [0, 0, 0], sizes = [8, 4, 8], strides = [1, 1, 1]} : vector<12x4x8xf32> to vector<8x4x8xf32>
    %442 = vector.extract_strided_slice %435 {offsets = [0, 0], sizes = [4, 1], strides = [1, 1]} : vector<4x25xf32> to vector<4x1xf32>
    %443 = vector.shape_cast %442 : vector<4x1xf32> to vector<1x4x1xf32>
    %444 = vector.broadcast %443 : vector<1x4x1xf32> to vector<8x4x8xf32>
    %445 = arith.mulf %441, %444 : vector<8x4x8xf32>
    %446 = vector.extract_strided_slice %440 {offsets = [1, 0, 0], sizes = [8, 4, 8], strides = [1, 1, 1]} : vector<12x4x8xf32> to vector<8x4x8xf32>
    %447 = vector.extract_strided_slice %435 {offsets = [0, 5], sizes = [4, 1], strides = [1, 1]} : vector<4x25xf32> to vector<4x1xf32>
    %448 = vector.shape_cast %447 : vector<4x1xf32> to vector<1x4x1xf32>
    %449 = vector.broadcast %448 : vector<1x4x1xf32> to vector<8x4x8xf32>
    %450 = arith.mulf %446, %449 : vector<8x4x8xf32>
    %451 = vector.extract_strided_slice %440 {offsets = [2, 0, 0], sizes = [8, 4, 8], strides = [1, 1, 1]} : vector<12x4x8xf32> to vector<8x4x8xf32>
    %452 = vector.extract_strided_slice %435 {offsets = [0, 10], sizes = [4, 1], strides = [1, 1]} : vector<4x25xf32> to vector<4x1xf32>
    %453 = vector.shape_cast %452 : vector<4x1xf32> to vector<1x4x1xf32>
    %454 = vector.broadcast %453 : vector<1x4x1xf32> to vector<8x4x8xf32>
    %455 = arith.mulf %451, %454 : vector<8x4x8xf32>
    %456 = arith.addf %445, %455 : vector<8x4x8xf32>
    %457 = vector.extract_strided_slice %440 {offsets = [3, 0, 0], sizes = [8, 4, 8], strides = [1, 1, 1]} : vector<12x4x8xf32> to vector<8x4x8xf32>
    %458 = vector.extract_strided_slice %435 {offsets = [0, 15], sizes = [4, 1], strides = [1, 1]} : vector<4x25xf32> to vector<4x1xf32>
    %459 = vector.shape_cast %458 : vector<4x1xf32> to vector<1x4x1xf32>
    %460 = vector.broadcast %459 : vector<1x4x1xf32> to vector<8x4x8xf32>
    %461 = arith.mulf %457, %460 : vector<8x4x8xf32>
    %462 = arith.addf %450, %461 : vector<8x4x8xf32>
    %463 = vector.extract_strided_slice %440 {offsets = [4, 0, 0], sizes = [8, 4, 8], strides = [1, 1, 1]} : vector<12x4x8xf32> to vector<8x4x8xf32>
    %464 = vector.extract_strided_slice %435 {offsets = [0, 20], sizes = [4, 1], strides = [1, 1]} : vector<4x25xf32> to vector<4x1xf32>
    %465 = vector.shape_cast %464 : vector<4x1xf32> to vector<1x4x1xf32>
    %466 = vector.broadcast %465 : vector<1x4x1xf32> to vector<8x4x8xf32>
    %467 = arith.mulf %463, %466 : vector<8x4x8xf32>
    %468 = arith.addf %456, %467 : vector<8x4x8xf32>
    %cst_101 = arith.constant 0.000000e+00 : f32
    %469 = vector.broadcast %cst_101 : f32 to vector<12x4x1xf32>
    %470 = vector.extract_strided_slice %437 {offsets = [0, 0, 0], sizes = [12, 4, 7], strides = [1, 1, 1]} : vector<12x4x8xf32> to vector<12x4x7xf32>
    %471 = tpu.concatenate %469, %470 in 2 : vector<12x4x1xf32>, vector<12x4x7xf32> -> vector<12x4x8xf32>
    %472 = vector.extract_strided_slice %471 {offsets = [0, 0, 0], sizes = [8, 4, 8], strides = [1, 1, 1]} : vector<12x4x8xf32> to vector<8x4x8xf32>
    %473 = vector.extract_strided_slice %435 {offsets = [0, 1], sizes = [4, 1], strides = [1, 1]} : vector<4x25xf32> to vector<4x1xf32>
    %474 = vector.shape_cast %473 : vector<4x1xf32> to vector<1x4x1xf32>
    %475 = vector.broadcast %474 : vector<1x4x1xf32> to vector<8x4x8xf32>
    %476 = arith.mulf %472, %475 : vector<8x4x8xf32>
    %477 = arith.addf %462, %476 : vector<8x4x8xf32>
    %478 = vector.extract_strided_slice %471 {offsets = [1, 0, 0], sizes = [8, 4, 8], strides = [1, 1, 1]} : vector<12x4x8xf32> to vector<8x4x8xf32>
    %479 = vector.extract_strided_slice %435 {offsets = [0, 6], sizes = [4, 1], strides = [1, 1]} : vector<4x25xf32> to vector<4x1xf32>
    %480 = vector.shape_cast %479 : vector<4x1xf32> to vector<1x4x1xf32>
    %481 = vector.broadcast %480 : vector<1x4x1xf32> to vector<8x4x8xf32>
    %482 = arith.mulf %478, %481 : vector<8x4x8xf32>
    %483 = arith.addf %468, %482 : vector<8x4x8xf32>
    %484 = vector.extract_strided_slice %471 {offsets = [2, 0, 0], sizes = [8, 4, 8], strides = [1, 1, 1]} : vector<12x4x8xf32> to vector<8x4x8xf32>
    %485 = vector.extract_strided_slice %435 {offsets = [0, 11], sizes = [4, 1], strides = [1, 1]} : vector<4x25xf32> to vector<4x1xf32>
    %486 = vector.shape_cast %485 : vector<4x1xf32> to vector<1x4x1xf32>
    %487 = vector.broadcast %486 : vector<1x4x1xf32> to vector<8x4x8xf32>
    %488 = arith.mulf %484, %487 : vector<8x4x8xf32>
    %489 = arith.addf %477, %488 : vector<8x4x8xf32>
    %490 = vector.extract_strided_slice %471 {offsets = [3, 0, 0], sizes = [8, 4, 8], strides = [1, 1, 1]} : vector<12x4x8xf32> to vector<8x4x8xf32>
    %491 = vector.extract_strided_slice %435 {offsets = [0, 16], sizes = [4, 1], strides = [1, 1]} : vector<4x25xf32> to vector<4x1xf32>
    %492 = vector.shape_cast %491 : vector<4x1xf32> to vector<1x4x1xf32>
    %493 = vector.broadcast %492 : vector<1x4x1xf32> to vector<8x4x8xf32>
    %494 = arith.mulf %490, %493 : vector<8x4x8xf32>
    %495 = arith.addf %483, %494 : vector<8x4x8xf32>
    %496 = vector.extract_strided_slice %471 {offsets = [4, 0, 0], sizes = [8, 4, 8], strides = [1, 1, 1]} : vector<12x4x8xf32> to vector<8x4x8xf32>
    %497 = vector.extract_strided_slice %435 {offsets = [0, 21], sizes = [4, 1], strides = [1, 1]} : vector<4x25xf32> to vector<4x1xf32>
    %498 = vector.shape_cast %497 : vector<4x1xf32> to vector<1x4x1xf32>
    %499 = vector.broadcast %498 : vector<1x4x1xf32> to vector<8x4x8xf32>
    %500 = arith.mulf %496, %499 : vector<8x4x8xf32>
    %501 = arith.addf %489, %500 : vector<8x4x8xf32>
    %502 = vector.extract_strided_slice %437 {offsets = [0, 0, 0], sizes = [8, 4, 8], strides = [1, 1, 1]} : vector<12x4x8xf32> to vector<8x4x8xf32>
    %503 = vector.extract_strided_slice %435 {offsets = [0, 2], sizes = [4, 1], strides = [1, 1]} : vector<4x25xf32> to vector<4x1xf32>
    %504 = vector.shape_cast %503 : vector<4x1xf32> to vector<1x4x1xf32>
    %505 = vector.broadcast %504 : vector<1x4x1xf32> to vector<8x4x8xf32>
    %506 = arith.mulf %502, %505 : vector<8x4x8xf32>
    %507 = arith.addf %495, %506 : vector<8x4x8xf32>
    %508 = vector.extract_strided_slice %437 {offsets = [1, 0, 0], sizes = [8, 4, 8], strides = [1, 1, 1]} : vector<12x4x8xf32> to vector<8x4x8xf32>
    %509 = vector.extract_strided_slice %435 {offsets = [0, 7], sizes = [4, 1], strides = [1, 1]} : vector<4x25xf32> to vector<4x1xf32>
    %510 = vector.shape_cast %509 : vector<4x1xf32> to vector<1x4x1xf32>
    %511 = vector.broadcast %510 : vector<1x4x1xf32> to vector<8x4x8xf32>
    %512 = arith.mulf %508, %511 : vector<8x4x8xf32>
    %513 = arith.addf %501, %512 : vector<8x4x8xf32>
    %514 = vector.extract_strided_slice %437 {offsets = [2, 0, 0], sizes = [8, 4, 8], strides = [1, 1, 1]} : vector<12x4x8xf32> to vector<8x4x8xf32>
    %515 = vector.extract_strided_slice %435 {offsets = [0, 12], sizes = [4, 1], strides = [1, 1]} : vector<4x25xf32> to vector<4x1xf32>
    %516 = vector.shape_cast %515 : vector<4x1xf32> to vector<1x4x1xf32>
    %517 = vector.broadcast %516 : vector<1x4x1xf32> to vector<8x4x8xf32>
    %518 = arith.mulf %514, %517 : vector<8x4x8xf32>
    %519 = arith.addf %507, %518 : vector<8x4x8xf32>
    %520 = vector.extract_strided_slice %437 {offsets = [3, 0, 0], sizes = [8, 4, 8], strides = [1, 1, 1]} : vector<12x4x8xf32> to vector<8x4x8xf32>
    %521 = vector.extract_strided_slice %435 {offsets = [0, 17], sizes = [4, 1], strides = [1, 1]} : vector<4x25xf32> to vector<4x1xf32>
    %522 = vector.shape_cast %521 : vector<4x1xf32> to vector<1x4x1xf32>
    %523 = vector.broadcast %522 : vector<1x4x1xf32> to vector<8x4x8xf32>
    %524 = arith.mulf %520, %523 : vector<8x4x8xf32>
    %525 = arith.addf %513, %524 : vector<8x4x8xf32>
    %526 = vector.extract_strided_slice %437 {offsets = [4, 0, 0], sizes = [8, 4, 8], strides = [1, 1, 1]} : vector<12x4x8xf32> to vector<8x4x8xf32>
    %527 = vector.extract_strided_slice %435 {offsets = [0, 22], sizes = [4, 1], strides = [1, 1]} : vector<4x25xf32> to vector<4x1xf32>
    %528 = vector.shape_cast %527 : vector<4x1xf32> to vector<1x4x1xf32>
    %529 = vector.broadcast %528 : vector<1x4x1xf32> to vector<8x4x8xf32>
    %530 = arith.mulf %526, %529 : vector<8x4x8xf32>
    %531 = arith.addf %519, %530 : vector<8x4x8xf32>
    %cst_102 = arith.constant 0.000000e+00 : f32
    %532 = vector.broadcast %cst_102 : f32 to vector<12x4x1xf32>
    %533 = vector.extract_strided_slice %437 {offsets = [0, 0, 1], sizes = [12, 4, 7], strides = [1, 1, 1]} : vector<12x4x8xf32> to vector<12x4x7xf32>
    %534 = tpu.concatenate %533, %532 in 2 : vector<12x4x7xf32>, vector<12x4x1xf32> -> vector<12x4x8xf32>
    %535 = vector.extract_strided_slice %534 {offsets = [0, 0, 0], sizes = [8, 4, 8], strides = [1, 1, 1]} : vector<12x4x8xf32> to vector<8x4x8xf32>
    %536 = vector.extract_strided_slice %435 {offsets = [0, 3], sizes = [4, 1], strides = [1, 1]} : vector<4x25xf32> to vector<4x1xf32>
    %537 = vector.shape_cast %536 : vector<4x1xf32> to vector<1x4x1xf32>
    %538 = vector.broadcast %537 : vector<1x4x1xf32> to vector<8x4x8xf32>
    %539 = arith.mulf %535, %538 : vector<8x4x8xf32>
    %540 = arith.addf %525, %539 : vector<8x4x8xf32>
    %541 = vector.extract_strided_slice %534 {offsets = [1, 0, 0], sizes = [8, 4, 8], strides = [1, 1, 1]} : vector<12x4x8xf32> to vector<8x4x8xf32>
    %542 = vector.extract_strided_slice %435 {offsets = [0, 8], sizes = [4, 1], strides = [1, 1]} : vector<4x25xf32> to vector<4x1xf32>
    %543 = vector.shape_cast %542 : vector<4x1xf32> to vector<1x4x1xf32>
    %544 = vector.broadcast %543 : vector<1x4x1xf32> to vector<8x4x8xf32>
    %545 = arith.mulf %541, %544 : vector<8x4x8xf32>
    %546 = arith.addf %531, %545 : vector<8x4x8xf32>
    %547 = vector.extract_strided_slice %534 {offsets = [2, 0, 0], sizes = [8, 4, 8], strides = [1, 1, 1]} : vector<12x4x8xf32> to vector<8x4x8xf32>
    %548 = vector.extract_strided_slice %435 {offsets = [0, 13], sizes = [4, 1], strides = [1, 1]} : vector<4x25xf32> to vector<4x1xf32>
    %549 = vector.shape_cast %548 : vector<4x1xf32> to vector<1x4x1xf32>
    %550 = vector.broadcast %549 : vector<1x4x1xf32> to vector<8x4x8xf32>
    %551 = arith.mulf %547, %550 : vector<8x4x8xf32>
    %552 = arith.addf %540, %551 : vector<8x4x8xf32>
    %553 = vector.extract_strided_slice %534 {offsets = [3, 0, 0], sizes = [8, 4, 8], strides = [1, 1, 1]} : vector<12x4x8xf32> to vector<8x4x8xf32>
    %554 = vector.extract_strided_slice %435 {offsets = [0, 18], sizes = [4, 1], strides = [1, 1]} : vector<4x25xf32> to vector<4x1xf32>
    %555 = vector.shape_cast %554 : vector<4x1xf32> to vector<1x4x1xf32>
    %556 = vector.broadcast %555 : vector<1x4x1xf32> to vector<8x4x8xf32>
    %557 = arith.mulf %553, %556 : vector<8x4x8xf32>
    %558 = arith.addf %546, %557 : vector<8x4x8xf32>
    %559 = vector.extract_strided_slice %534 {offsets = [4, 0, 0], sizes = [8, 4, 8], strides = [1, 1, 1]} : vector<12x4x8xf32> to vector<8x4x8xf32>
    %560 = vector.extract_strided_slice %435 {offsets = [0, 23], sizes = [4, 1], strides = [1, 1]} : vector<4x25xf32> to vector<4x1xf32>
    %561 = vector.shape_cast %560 : vector<4x1xf32> to vector<1x4x1xf32>
    %562 = vector.broadcast %561 : vector<1x4x1xf32> to vector<8x4x8xf32>
    %563 = arith.mulf %559, %562 : vector<8x4x8xf32>
    %564 = arith.addf %552, %563 : vector<8x4x8xf32>
    %cst_103 = arith.constant 0.000000e+00 : f32
    %565 = vector.broadcast %cst_103 : f32 to vector<12x4x2xf32>
    %566 = vector.extract_strided_slice %437 {offsets = [0, 0, 2], sizes = [12, 4, 6], strides = [1, 1, 1]} : vector<12x4x8xf32> to vector<12x4x6xf32>
    %567 = tpu.concatenate %566, %565 in 2 : vector<12x4x6xf32>, vector<12x4x2xf32> -> vector<12x4x8xf32>
    %568 = vector.extract_strided_slice %567 {offsets = [0, 0, 0], sizes = [8, 4, 8], strides = [1, 1, 1]} : vector<12x4x8xf32> to vector<8x4x8xf32>
    %569 = vector.extract_strided_slice %435 {offsets = [0, 4], sizes = [4, 1], strides = [1, 1]} : vector<4x25xf32> to vector<4x1xf32>
    %570 = vector.shape_cast %569 : vector<4x1xf32> to vector<1x4x1xf32>
    %571 = vector.broadcast %570 : vector<1x4x1xf32> to vector<8x4x8xf32>
    %572 = arith.mulf %568, %571 : vector<8x4x8xf32>
    %573 = arith.addf %558, %572 : vector<8x4x8xf32>
    %574 = vector.extract_strided_slice %567 {offsets = [1, 0, 0], sizes = [8, 4, 8], strides = [1, 1, 1]} : vector<12x4x8xf32> to vector<8x4x8xf32>
    %575 = vector.extract_strided_slice %435 {offsets = [0, 9], sizes = [4, 1], strides = [1, 1]} : vector<4x25xf32> to vector<4x1xf32>
    %576 = vector.shape_cast %575 : vector<4x1xf32> to vector<1x4x1xf32>
    %577 = vector.broadcast %576 : vector<1x4x1xf32> to vector<8x4x8xf32>
    %578 = arith.mulf %574, %577 : vector<8x4x8xf32>
    %579 = arith.addf %564, %578 : vector<8x4x8xf32>
    %580 = vector.extract_strided_slice %567 {offsets = [2, 0, 0], sizes = [8, 4, 8], strides = [1, 1, 1]} : vector<12x4x8xf32> to vector<8x4x8xf32>
    %581 = vector.extract_strided_slice %435 {offsets = [0, 14], sizes = [4, 1], strides = [1, 1]} : vector<4x25xf32> to vector<4x1xf32>
    %582 = vector.shape_cast %581 : vector<4x1xf32> to vector<1x4x1xf32>
    %583 = vector.broadcast %582 : vector<1x4x1xf32> to vector<8x4x8xf32>
    %584 = arith.mulf %580, %583 : vector<8x4x8xf32>
    %585 = arith.addf %573, %584 : vector<8x4x8xf32>
    %586 = vector.extract_strided_slice %567 {offsets = [3, 0, 0], sizes = [8, 4, 8], strides = [1, 1, 1]} : vector<12x4x8xf32> to vector<8x4x8xf32>
    %587 = vector.extract_strided_slice %435 {offsets = [0, 19], sizes = [4, 1], strides = [1, 1]} : vector<4x25xf32> to vector<4x1xf32>
    %588 = vector.shape_cast %587 : vector<4x1xf32> to vector<1x4x1xf32>
    %589 = vector.broadcast %588 : vector<1x4x1xf32> to vector<8x4x8xf32>
    %590 = arith.mulf %586, %589 : vector<8x4x8xf32>
    %591 = arith.addf %579, %590 : vector<8x4x8xf32>
    %592 = vector.extract_strided_slice %567 {offsets = [4, 0, 0], sizes = [8, 4, 8], strides = [1, 1, 1]} : vector<12x4x8xf32> to vector<8x4x8xf32>
    %593 = vector.extract_strided_slice %435 {offsets = [0, 24], sizes = [4, 1], strides = [1, 1]} : vector<4x25xf32> to vector<4x1xf32>
    %594 = vector.shape_cast %593 : vector<4x1xf32> to vector<1x4x1xf32>
    %595 = vector.broadcast %594 : vector<1x4x1xf32> to vector<8x4x8xf32>
    %596 = arith.mulf %592, %595 : vector<8x4x8xf32>
    %597 = arith.addf %585, %596 : vector<8x4x8xf32>
    %598 = arith.addf %597, %591 : vector<8x4x8xf32>
    %c1_104 = arith.constant 1 : index
    %c0_105 = arith.constant 0 : index
    %c0_106 = arith.constant 0 : index
    %599 = vector.load %arg8[%c1_104, %c0_105, %c0_106] : memref<2x4x1xf32, #tpu.memory_space<vmem>>, vector<1x4x1xf32>
    %600 = vector.shape_cast %599 : vector<1x4x1xf32> to vector<4x1xf32>
    %601 = vector.shape_cast %600 : vector<4x1xf32> to vector<1x4x1xf32>
    %602 = vector.broadcast %601 : vector<1x4x1xf32> to vector<8x4x8xf32>
    %603 = arith.addf %598, %602 : vector<8x4x8xf32>
    %604 = arith.negf %603 : vector<8x4x8xf32>
    %605 = math.exp %604 : vector<8x4x8xf32>
    %cst_107 = arith.constant 1.000000e+00 : f32
    %606 = vector.broadcast %cst_107 : f32 to vector<8x4x8xf32>
    %607 = arith.addf %606, %605 : vector<8x4x8xf32>
    %608 = arith.divf %606, %607 : vector<8x4x8xf32>
    %609 = arith.mulf %603, %608 : vector<8x4x8xf32>
    %c1_108 = arith.constant 1 : index
    %c0_109 = arith.constant 0 : index
    %c0_110 = arith.constant 0 : index
    %610 = vector.load %arg9[%c1_108, %c0_109, %c0_110] : memref<2x4x4xf32, #tpu.memory_space<vmem>>, vector<1x4x4xf32>
    %611 = vector.shape_cast %610 : vector<1x4x4xf32> to vector<4x4xf32>
    %c1_111 = arith.constant 1 : index
    %c0_112 = arith.constant 0 : index
    %c0_113 = arith.constant 0 : index
    %612 = vector.load %arg10[%c1_111, %c0_112, %c0_113] : memref<2x4x1xf32, #tpu.memory_space<vmem>>, vector<1x4x1xf32>
    %613 = vector.shape_cast %612 : vector<1x4x1xf32> to vector<4x1xf32>
    %614 = vector.extract_strided_slice %609 {offsets = [0, 0, 0], sizes = [8, 1, 8], strides = [1, 1, 1]} : vector<8x4x8xf32> to vector<8x1x8xf32>
    %615 = vector.extract_strided_slice %611 {offsets = [0, 0], sizes = [4, 1], strides = [1, 1]} : vector<4x4xf32> to vector<4x1xf32>
    %616 = vector.shape_cast %615 : vector<4x1xf32> to vector<1x4x1xf32>
    %617 = vector.broadcast %614 : vector<8x1x8xf32> to vector<8x4x8xf32>
    %618 = vector.broadcast %616 : vector<1x4x1xf32> to vector<8x4x8xf32>
    %619 = arith.mulf %617, %618 : vector<8x4x8xf32>
    %620 = vector.extract_strided_slice %609 {offsets = [0, 1, 0], sizes = [8, 1, 8], strides = [1, 1, 1]} : vector<8x4x8xf32> to vector<8x1x8xf32>
    %621 = vector.extract_strided_slice %611 {offsets = [0, 1], sizes = [4, 1], strides = [1, 1]} : vector<4x4xf32> to vector<4x1xf32>
    %622 = vector.shape_cast %621 : vector<4x1xf32> to vector<1x4x1xf32>
    %623 = vector.broadcast %620 : vector<8x1x8xf32> to vector<8x4x8xf32>
    %624 = vector.broadcast %622 : vector<1x4x1xf32> to vector<8x4x8xf32>
    %625 = arith.mulf %623, %624 : vector<8x4x8xf32>
    %626 = vector.extract_strided_slice %609 {offsets = [0, 2, 0], sizes = [8, 1, 8], strides = [1, 1, 1]} : vector<8x4x8xf32> to vector<8x1x8xf32>
    %627 = vector.extract_strided_slice %611 {offsets = [0, 2], sizes = [4, 1], strides = [1, 1]} : vector<4x4xf32> to vector<4x1xf32>
    %628 = vector.shape_cast %627 : vector<4x1xf32> to vector<1x4x1xf32>
    %629 = vector.broadcast %626 : vector<8x1x8xf32> to vector<8x4x8xf32>
    %630 = vector.broadcast %628 : vector<1x4x1xf32> to vector<8x4x8xf32>
    %631 = arith.mulf %629, %630 : vector<8x4x8xf32>
    %632 = arith.addf %619, %631 : vector<8x4x8xf32>
    %633 = vector.extract_strided_slice %609 {offsets = [0, 3, 0], sizes = [8, 1, 8], strides = [1, 1, 1]} : vector<8x4x8xf32> to vector<8x1x8xf32>
    %634 = vector.extract_strided_slice %611 {offsets = [0, 3], sizes = [4, 1], strides = [1, 1]} : vector<4x4xf32> to vector<4x1xf32>
    %635 = vector.shape_cast %634 : vector<4x1xf32> to vector<1x4x1xf32>
    %636 = vector.broadcast %633 : vector<8x1x8xf32> to vector<8x4x8xf32>
    %637 = vector.broadcast %635 : vector<1x4x1xf32> to vector<8x4x8xf32>
    %638 = arith.mulf %636, %637 : vector<8x4x8xf32>
    %639 = arith.addf %625, %638 : vector<8x4x8xf32>
    %640 = arith.addf %632, %639 : vector<8x4x8xf32>
    %641 = vector.shape_cast %613 : vector<4x1xf32> to vector<1x4x1xf32>
    %642 = vector.broadcast %641 : vector<1x4x1xf32> to vector<8x4x8xf32>
    %643 = arith.addf %640, %642 : vector<8x4x8xf32>
    %644 = arith.negf %643 : vector<8x4x8xf32>
    %645 = math.exp %644 : vector<8x4x8xf32>
    %cst_114 = arith.constant 1.000000e+00 : f32
    %646 = vector.broadcast %cst_114 : f32 to vector<8x4x8xf32>
    %647 = arith.addf %646, %645 : vector<8x4x8xf32>
    %648 = arith.divf %646, %647 : vector<8x4x8xf32>
    %649 = arith.mulf %643, %648 : vector<8x4x8xf32>
    %c0_115 = arith.constant 0 : index
    %c0_116 = arith.constant 0 : index
    %c0_117 = arith.constant 0 : index
    %c0_118 = arith.constant 0 : index
    %650 = vector.load %arg11[%c0_115, %c0_116, %c0_117, %c0_118] : memref<1x8x16x8xf32, #tpu.memory_space<vmem>>, vector<1x8x8x8xf32>
    %651 = vector.shape_cast %650 : vector<1x8x8x8xf32> to vector<8x8x8xf32>
    %652 = vector.shape_cast %202 : vector<8x8x8xf32> to vector<1x8x8x8xf32>
    tpu.vector_store %arg11[%c0_115, %c0_116, %c0_117, %c0_118], %652 {strides = array<i32>} : memref<1x8x16x8xf32, #tpu.memory_space<vmem>>, vector<1x8x8x8xf32>,
    %c0_119 = arith.constant 0 : index
    %c0_120 = arith.constant 0 : index
    %c8 = arith.constant 8 : index
    %c0_121 = arith.constant 0 : index
    %653 = vector.load %arg11[%c0_119, %c0_120, %c8, %c0_121] : memref<1x8x16x8xf32, #tpu.memory_space<vmem>>, vector<1x8x4x8xf32>
    %654 = vector.shape_cast %653 : vector<1x8x4x8xf32> to vector<8x4x8xf32>
    %655 = vector.shape_cast %432 : vector<8x4x8xf32> to vector<1x8x4x8xf32>
    tpu.vector_store %arg11[%c0_119, %c0_120, %c8, %c0_121], %655 {strides = array<i32>} : memref<1x8x16x8xf32, #tpu.memory_space<vmem>>, vector<1x8x4x8xf32>,
    %c0_122 = arith.constant 0 : index
    %c0_123 = arith.constant 0 : index
    %c12 = arith.constant 12 : index
    %c0_124 = arith.constant 0 : index
    %656 = vector.load %arg11[%c0_122, %c0_123, %c12, %c0_124] : memref<1x8x16x8xf32, #tpu.memory_space<vmem>>, vector<1x8x4x8xf32>
    %657 = vector.shape_cast %656 : vector<1x8x4x8xf32> to vector<8x4x8xf32>
    %658 = vector.shape_cast %649 : vector<8x4x8xf32> to vector<1x8x4x8xf32>
    tpu.vector_store %arg11[%c0_122, %c0_123, %c12, %c0_124], %658 {strides = array<i32>} : memref<1x8x16x8xf32, #tpu.memory_space<vmem>>, vector<1x8x4x8xf32>,
    return
  }
  func.func @transform_0(%arg0: i32) -> (i32, i32, i32, i32) {
    %c0_i32 = arith.constant 0 : i32
    %c0_i32_0 = arith.constant 0 : i32
    %c0_i32_1 = arith.constant 0 : i32
    %c0_i32_2 = arith.constant 0 : i32
    return %arg0, %c0_i32, %c0_i32_0, %c0_i32_1 : i32, i32, i32, i32
  }
  func.func @transform_1(%arg0: i32) -> (i32, i32, i32, i32) {
    %c0_i32 = arith.constant 0 : i32
    %c0_i32_0 = arith.constant 0 : i32
    %c0_i32_1 = arith.constant 0 : i32
    %c0_i32_2 = arith.constant 0 : i32
    return %arg0, %c0_i32, %c0_i32_0, %c0_i32_1 : i32, i32, i32, i32
  }
  func.func @transform_2(%arg0: i32) -> (i32, i32) {
    %c0_i32 = arith.constant 0 : i32
    %c0_i32_0 = arith.constant 0 : i32
    %c0_i32_1 = arith.constant 0 : i32
    return %c0_i32, %c0_i32_0 : i32, i32
  }
  func.func @transform_3(%arg0: i32) -> (i32, i32) {
    %c0_i32 = arith.constant 0 : i32
    %c0_i32_0 = arith.constant 0 : i32
    %c0_i32_1 = arith.constant 0 : i32
    return %c0_i32, %c0_i32_0 : i32, i32
  }
  func.func @transform_4(%arg0: i32) -> (i32, i32) {
    %c0_i32 = arith.constant 0 : i32
    %c0_i32_0 = arith.constant 0 : i32
    %c0_i32_1 = arith.constant 0 : i32
    return %c0_i32, %c0_i32_0 : i32, i32
  }
  func.func @transform_5(%arg0: i32) -> (i32, i32) {
    %c0_i32 = arith.constant 0 : i32
    %c0_i32_0 = arith.constant 0 : i32
    %c0_i32_1 = arith.constant 0 : i32
    return %c0_i32, %c0_i32_0 : i32, i32
  }
  func.func @transform_6(%arg0: i32) -> (i32, i32, i32) {
    %c0_i32 = arith.constant 0 : i32
    %c0_i32_0 = arith.constant 0 : i32
    %c0_i32_1 = arith.constant 0 : i32
    %c0_i32_2 = arith.constant 0 : i32
    return %c0_i32, %c0_i32_0, %c0_i32_1 : i32, i32, i32
  }
  func.func @transform_7(%arg0: i32) -> (i32, i32, i32) {
    %c0_i32 = arith.constant 0 : i32
    %c0_i32_0 = arith.constant 0 : i32
    %c0_i32_1 = arith.constant 0 : i32
    %c0_i32_2 = arith.constant 0 : i32
    return %c0_i32, %c0_i32_0, %c0_i32_1 : i32, i32, i32
  }
  func.func @transform_8(%arg0: i32) -> (i32, i32, i32) {
    %c0_i32 = arith.constant 0 : i32
    %c0_i32_0 = arith.constant 0 : i32
    %c0_i32_1 = arith.constant 0 : i32
    %c0_i32_2 = arith.constant 0 : i32
    return %c0_i32, %c0_i32_0, %c0_i32_1 : i32, i32, i32
  }
  func.func @transform_9(%arg0: i32) -> (i32, i32, i32) {
    %c0_i32 = arith.constant 0 : i32
    %c0_i32_0 = arith.constant 0 : i32
    %c0_i32_1 = arith.constant 0 : i32
    %c0_i32_2 = arith.constant 0 : i32
    return %c0_i32, %c0_i32_0, %c0_i32_1 : i32, i32, i32
  }
  func.func @transform_10(%arg0: i32) -> (i32, i32, i32, i32) {
    %c0_i32 = arith.constant 0 : i32
    %c0_i32_0 = arith.constant 0 : i32
    %c0_i32_1 = arith.constant 0 : i32
    %c0_i32_2 = arith.constant 0 : i32
    return %arg0, %c0_i32, %c0_i32_0, %c0_i32_1 : i32, i32, i32, i32
  }
}

</mosaic_0001>

<bundles_post_ra>
// kernel: glkrep_forward.1
= control target key start
LH: loop header
LB: loop body
LE: loop exit
PB: predicated region body
PF: predicated region fallthrough
CT: control target
= control target key end

     0   :  { %s6901_s13 = smov 0   ;;  %s12073_s0 = inlined_call_operand.vmem [shape: f32[2,16,8,8], index: 0, kind: input, shape index: {}]   ;;  %s12074_s1 = inlined_call_operand.vmem [shape: f32[2,16,8,8], index: 1, kind: input, shape index: {}]   ;;  %s12075_s2 = inlined_call_operand.vmem [shape: f32[16,8], index: 2, kind: input, shape index: {}]   ;;  %s12076_s3 = inlined_call_operand.vmem [shape: f32[16,1], index: 3, kind: input, shape index: {}]   ;;  %s12077_s4 = inlined_call_operand.vmem [shape: f32[16,9], index: 4, kind: input, shape index: {}]   ;;  %s12078_s5 = inlined_call_operand.vmem [shape: f32[16,1], index: 5, kind: input, shape index: {}]   ;;  %s12079_s6 = inlined_call_operand.vmem [shape: f32[2,4,25], index: 6, kind: input, shape index: {}]   ;;  %s12080_s7 = inlined_call_operand.vmem [shape: f32[2,4,1], index: 7, kind: input, shape index: {}]   ;;  %s12081_s8 = inlined_call_operand.vmem [shape: f32[2,4,4], index: 8, kind: input, shape index: {}]   ;;  %s12082_s9 = inlined_call_operand.vmem [shape: f32[2,4,1], index: 9, kind: input, shape index: {}]   ;;  %s12083_s10 = inlined_call_operand.vmem [shape: f32[2,8,16,8], index: 10, kind: output, shape index: {}]  }
   0x1 LB: > { %s6167_s14 = sadd.s32 4294967295, %s6814_s13   ;;  %p6171_p0 = scmp.ge.s32.totalorder %s6814_s13, 1  ;;  %s6814_s13 = sphi %s6901_s13, %s20_s13  }
   0x2   : > { %p322_p1 = scmp.lt.s32.totalorder %s6814_s13, 3 }
   0x4   : > { %p323_p2 = pnand %p6171_p0, %p322_p1 }
   0x6   : > { %326 = sbr.rel (%p323_p2) target bundleno = 1291 (0x50b), region = 60 }
   0xd   : > { %v380_v0 = vld [vmem:[%s12075_s2] sm:$0xff]  ;;  %v12091_v1 = vmov 2   ;;  %v12099_v2 = vmov 1   ;;  %vm3778_vm0 = vcmask 60416   ;;  %v381_v3 = vld [vmem:[%s12075_s2 + $0x8] sm:$0xff]  ;;  %v6818_v4 = vmov 0.0  }
   0xe   : > { %6322 = vset.pattern.permute.xlu0 %v12091_v1  ;;  %6321 = vset.pattern.permute.xlu1 %v12099_v2  ;;  %3780 = vst.msk [vmem:[#allocation5 + $0x4] sm:$0xf] %vm3778_vm0, %v6818_v4  ;;  %3779 = vst.msk [vmem:[#allocation5] sm:$0xf] %vm3778_vm0, %v6818_v4  ;;  %v12087_v5 = vmov 3   ;;  %v12097_v6 = vmov 6   ;;  %v400_v18 = vlaneseq }
   0xf   : > { %675 = vperm.xlu0 %6322, %v380_v0   ;;  %571 = vperm.xlu1 %6321, %v380_v0   ;;  %3782 = vst.msk [vmem:[#allocation5 + $0x28] sm:$0xf] %vm3778_vm0, %v6818_v4  ;;  %3783 = vst.msk [vmem:[#allocation5 + $0x2c] sm:$0xf] %vm3778_vm0, %v6818_v4  ;;  %v12089_v7 = vmov 0   ;;  %v12085_v8 = vmov 4  }
  0x10   : > { %v382_v9 = vld [vmem:[%s12076_s3] sm:$0xff]  ;;  %v6933_v10 = vld [vmem:[%s12077_s4 + $0x8] sm:$0xff]  ;;  %vm2988_vm1 = vcmask 64512   ;;  %v12084_v11 = vmov 5   ;;  %v12095_v12 = vmov 7   ;;  %s6825_s23 = smov 2  }
  0x11   : > { %2994 = vst.msk [vmem:[#allocation4 + $0x8] sm:$0xff] %vm2988_vm1, %v6818_v4  ;;  %2989 = vst.msk [vmem:[#allocation2] sm:$0xff] %vm2988_vm1, %v6818_v4  ;;  %v383_v15 = vld [vmem:[%s12076_s3 + $0x8] sm:$0xff]  ;;  %v6957_v16 = vld [vmem:[%s12079_s6] sm:$0xf]  ;;  %p365_p3 = scmp.lt.s32.totalorder %s6167_s14, 1 }
  0x12   : > { %2990 = vst.msk [vmem:[#allocation2 + $0x8] sm:$0xff] %vm2988_vm1, %v6818_v4  ;;  %2991 = vst.msk [vmem:[#allocation3] sm:$0xff] %vm2988_vm1, %v6818_v4  ;;  %v3255_v17 = vld [vmem:[%s12077_s4] sm:$0xff]  ;;  %v401_v19 = vshrl.u32 %v400_v18, 7  ;;  %v12093_v20 = vmov 8   ;;  %v3258_v37 = vld [vmem:[%s12078_s5 + $0x8] sm:$0xff] }
  0x13   : > { %6325 = vset.pattern.permute.xlu0 %v12087_v5  ;;  %575 = vperm.xlu1 %6321, %v381_v3   ;;  %2992 = vst.msk [vmem:[#allocation3 + $0x8] sm:$0xff] %vm2988_vm1, %v6818_v4  ;;  %2993 = vst.msk [vmem:[#allocation4] sm:$0xff] %vm2988_vm1, %v6818_v4  ;;  %s13290_s14 = smov (!%p365_p3, %s6167_s14), 1  ;;  %s6827_s20 = smov 1   ;;  %vm3189_vm2 = vcmask 7168   ;;  %vm3786_vm3 = vcmask 64516  }
  0x14   : > { %815 = vperm.xlu0 %6325, %v381_v3   ;;  %s6978_s30 = sshll.u32 %s13290_s14, 7  ;;  %v6993_v21 = vsub.s32 1, %v401_v19  ;;  %v6995_v22 = vsub.s32 2, %v401_v19  ;;  %v6997_v23 = vsub.s32 3, %v401_v19  ;;  %v7079_v46 = vsub.s32 0, %v401_v19  ;;  %s6840_s28 = smov 127  }
  0x15   : > { %v3796_v13 = vld [vmem:[#allocation5 + $0x4] sm:$0xf]  ;;  %s6985_s15 = scalar_lea.vmem %s12073_s0, %s6978_s30  ;;  %s6991_s14 = scalar_lea.vmem %s12074_s1, %s6978_s30  ;;  %v3795_v54 = vld [vmem:[#allocation5] sm:$0xf]  ;;  %v7109_v55 = vsub.s32 4, %v401_v19  ;;  %v7123_v59 = vsub.s32 6, %v401_v19 }
  0x16   : > { %v3806_v14 = vld [vmem:[#allocation5 + $0x2c] sm:$0xf]  ;;  %12423 = vst [vmem:[#allocation6_spill] sm:$0xff] %v6993_v21  ;;  %12424 = vst [vmem:[#allocation7_spill] sm:$0xff] %v6995_v22  ;;  %v7000_v24 = vld [vmem:[%s6985_s15] sm:$0xff]  ;;  %v7137_v63 = vsub.s32 5, %v401_v19  ;;  %s10809_s26 = scalar_lea.vmem %s12083_s10, %s6978_s30 }
  0x17   : > { %6323 = vset.pattern.permute.xlu1 %v12091_v1  ;;  %12425 = vst [vmem:[#allocation8_spill] sm:$0xff] %v6997_v23  ;;  %v7003_v25 = vld [vmem:[%s6991_s14] sm:$0xff]  ;;  %v7006_v26 = vld [vmem:[%s6985_s15 + $0x10] sm:$0xff]  ;;  %v7026_v32 = vrot.slane %v7000_v24, %v6993_v21  ;;  %v7030_v33 = vrot.slane %v7000_v24, %v6995_v22  ;;  %v7034_v34 = vrot.slane %v7000_v24, %v6997_v23  ;;  %12429 = vst [vmem:[#allocation12_spill] sm:$0xff] %v7079_v46  ;;  %s6841_s29 = smov 126   ;;  %vm3855_vm4 = vcmask 15360  }
  0x18   : > { %6329 = vset.pattern.permute.xlu0 %v12097_v6  ;;  %679 = vperm.xlu1 %6323, %v381_v3   ;;  %v7009_v27 = vld [vmem:[%s6985_s15 + $0x20] sm:$0xff]  ;;  %v7012_v28 = vld [vmem:[%s6985_s15 + $0x30] sm:$0xff]  ;;  %v7038_v35 = vrot.slane %v7003_v25, %v6993_v21  ;;  %v7048_v38 = vrot.slane %v7003_v25, %v6995_v22  ;;  %v7052_v39 = vrot.slane %v7003_v25, %v6997_v23  ;;  %vm4237_vm5 = vcmask 56320  }
  0x19   : > { %1223 = vperm.xlu0 %6329, %v381_v3   ;;  %v7016_v29 = vld [vmem:[%s6985_s15 + $0x40] sm:$0xff]  ;;  %v7019_v30 = vld [vmem:[%s6985_s15 + $0x50] sm:$0xff]  ;;  %v7056_v40 = vrot.slane %v7006_v26, %v6993_v21  ;;  %v7060_v41 = vrot.slane %v7009_v27, %v6993_v21  ;;  %v7064_v42 = vrot.slane %v7012_v28, %v6993_v21  ;;  %v7087_v48 = vrot.slane %v7006_v26, %v6995_v22 }
  0x1a   : > { %v7022_v31 = vld [vmem:[%s6985_s15 + $0x60] sm:$0xff]  ;;  %12426 = vst [vmem:[#allocation9_spill] sm:$0xff] %v7038_v35  ;;  %v7041_v36 = vld [vmem:[%s6985_s15 + $0x70] sm:$0xff]  ;;  %12427 = vst [vmem:[#allocation10_spill] sm:$0xff] %v7048_v38  ;;  %v7068_v43 = vrot.slane %v7016_v29, %v6993_v21  ;;  %v7072_v44 = vrot.slane %v7019_v30, %v6993_v21  ;;  %v7091_v49 = vrot.slane %v7009_v27, %v6995_v22  ;;  %vm4386_vm6 = vcmask 48128  }
  0x1b   : > { %12428 = vst [vmem:[#allocation11_spill] sm:$0xff] %v7052_v39  ;;  %v7076_v45 = vrot.slane %v7022_v31, %v6993_v21  ;;  %v7083_v47 = vrot.slane %v7041_v36, %v6993_v21  ;;  %v7095_v50 = vrot.slane %v7012_v28, %v6995_v22  ;;  %v7099_v51 = vrot.slane %v7016_v29, %v6995_v22 }
  0x1c   : > { %6324 = vset.pattern.permute.xlu1 %v12087_v5  ;;  %v7103_v52 = vrot.slane %v7019_v30, %v6995_v22  ;;  %v7107_v53 = vrot.slane %v7022_v31, %v6995_v22  ;;  %12430 = vst [vmem:[#allocation13_spill] sm:$0xff] %v7109_v55  ;;  %v7113_v56 = vrot.slane %v7041_v36, %v6995_v22  ;;  %12431 = vst [vmem:[#allocation14_spill] sm:$0xff] %v7123_v59  ;;  %vm4913_vm7 = vcmask 1040384  }
  0x1d   : > { %6330 = vset.pattern.permute.xlu0 %v12089_v7  ;;  %811 = vperm.xlu1 %6324, %v380_v0   ;;  %v7117_v57 = vrot.slane %v7006_v26, %v6997_v23  ;;  %v7121_v58 = vrot.slane %v7009_v27, %v6997_v23  ;;  %v7127_v60 = vrot.slane %v7012_v28, %v6997_v23  ;;  %vm4922_vm8 = vcmask 1041408  }
  0x1e   : > { %466 = vperm.xlu0 %6330, %v380_v0   ;;  %v7131_v61 = vrot.slane %v7016_v29, %v6997_v23  ;;  %v7135_v62 = vrot.slane %v7019_v30, %v6997_v23  ;;  %12432 = vst [vmem:[#allocation15_spill] sm:$0xff] %v7137_v63  ;;  %v7149_v4 = vrot.slane %v7006_v26, %v7079_v46  ;;  %vm4931_vm9 = vcmask 1042432  }
  0x1f   : > { %v7172_v18 = vrot.slane %v7000_v24, %v7109_v55 }
  0x21   : > { %6326 = vset.pattern.permute.xlu1 %v12085_v8  ;;  %12435 = vst [vmem:[#allocation18_spill] sm:$0xff] %v7172_v18  ;;  %v7290_v18 = vrot.slane %v7016_v29, %v7137_v63 }
  0x22   : > { %471 = vperm.xlu0 %6330, %v381_v3   ;;  %947 = vperm.xlu1 %6326, %v380_v0  }
  0x23   : > { %12461 = vst [vmem:[#allocation44_spill] sm:$0xff] %v7290_v18  ;;  %v7317_v18 = vld [vmem:[%s6991_s14 + $0x18] sm:$0xff] }
  0x24   : > { %12468 = vst [vmem:[#allocation51_spill] sm:$0xff] %v7317_v18 }
  0x26   : > { %1460 = vperm.xlu0 %6330, %v382_v9   ;;  %951 = vperm.xlu1 %6326, %v381_v3   ;;  %v7154_v9 = vrot.slane %v7009_v27, %v7079_v46 }
  0x2a   : > { %3282 = vperm.xlu0 %6330, %v6933_v10   ;;  %6327 = vset.pattern.permute.xlu1 %v12084_v11 }
  0x2b   : > { %1087 = vperm.xlu1 %6327, %v381_v3  }
  0x2e   : > { %6337 = vset.pattern.permute.xlu0 %v12085_v8 }
  0x2f   : > { %3474 = vperm.xlu0 %6337, %v6933_v10   ;;  %6328 = vset.pattern.permute.xlu1 %v12097_v6 }
  0x30   : > { %1219 = vperm.xlu1 %6328, %v380_v0  }
  0x33   : > { %6338 = vset.pattern.permute.xlu0 %v12084_v11 }
  0x34   : > { %1083 = vperm.xlu0 %6338, %v380_v0   ;;  %6331 = vset.pattern.permute.xlu1 %v12095_v12 }
  0x35   : > { %1355 = vperm.xlu1 %6331, %v380_v0   ;;  %v7141_v0 = vrot.slane %v7000_v24, %v7079_v46 }
  0x38   : > { %3821 = vrot.lane.b32.xlu0 %v3796_v13, %s6825_s23  ;;  %v7162_v13 = vrot.slane %v7016_v29, %v7079_v46 }
  0x39   : > { %1359 = vperm.xlu1 %6331, %v381_v3   ;;  %v7145_v3 = vrot.slane %v7003_v25, %v7079_v46 }
  0x3b   : > { %12433 = vst [vmem:[#allocation16_spill] sm:$0xff] %v7145_v3 }
  0x3c   : > { %3841 = vrot.lane.b32.xlu0 %v3806_v14, %s6825_s23  ;;  %v7166_v14 = vrot.slane %v7019_v30, %v7079_v46 }
  0x3d   : > { %6332 = vset.pattern.permute.xlu1 %v12089_v7 }
  0x3e   : > { %1465 = vperm.xlu1 %6332, %v383_v15   ;;  %v3805_v15 = vld [vmem:[#allocation5 + $0x28] sm:$0xf] }
  0x40   : > { %3882 = vperm.xlu0 %6338, %v6957_v16  }
  0x42   : > { %3277 = vperm.xlu1 %6332, %v3255_v17  }
  0x46   : > { %6333 = vset.pattern.permute.xlu1 %v12099_v2  ;;  %v7221_v2 = vrot.slane %v7012_v28, %v7109_v55 }
  0x47   : > { %3318 = vperm.xlu1 %6333, %v3255_v17  }
  0x48   : > { %12444 = vst [vmem:[#allocation27_spill] sm:$0xff] %v7221_v2  ;;  %v7241_v2 = vrot.slane %v7022_v31, %v7109_v55 }
  0x4a   : > { %12449 = vst [vmem:[#allocation32_spill] sm:$0xff] %v7241_v2  ;;  %v7273_v2 = vrot.slane %v7022_v31, %v7123_v59 }
  0x4b   : > { %6334 = vset.pattern.permute.xlu1 %v12091_v1  ;;  %v7204_v1 = vrot.slane %v7003_v25, %v7137_v63 }
  0x4c   : > { %3358 = vperm.xlu1 %6334, %v3255_v17   ;;  %12457 = vst [vmem:[#allocation40_spill] sm:$0xff] %v7273_v2  ;;  %v7294_v2 = vrot.slane %v7019_v30, %v7137_v63 }
  0x4d   : > { %12440 = vst [vmem:[#allocation23_spill] sm:$0xff] %v7204_v1  ;;  %v7225_v1 = vrot.slane %v7016_v29, %v7109_v55 }
  0x4e   : > { %12462 = vst [vmem:[#allocation45_spill] sm:$0xff] %v7294_v2 }
  0x4f   : > { %12445 = vst [vmem:[#allocation28_spill] sm:$0xff] %v7225_v1  ;;  %v7245_v1 = vrot.slane %v7041_v36, %v7109_v55 }
  0x50   : > { %3362 = vperm.xlu1 %6334, %v6933_v10  }
  0x51   : > { %12450 = vst [vmem:[#allocation33_spill] sm:$0xff] %v7245_v1  ;;  %v7269_v1 = vrot.slane %v7019_v30, %v7123_v59 }
  0x53   : > { %12456 = vst [vmem:[#allocation39_spill] sm:$0xff] %v7269_v1 }
  0x54   : > { %6335 = vset.pattern.permute.xlu1 %v12087_v5  ;;  %v7196_v5 = vrot.slane %v7041_v36, %v6997_v23 }
  0x55   : > { %3418 = vperm.xlu1 %6335, %v6933_v10  }
  0x59   : > { %6336 = vset.pattern.permute.xlu1 %v12085_v8  ;;  %v7192_v8 = vrot.slane %v7022_v31, %v6997_v23 }
  0x5a   : > { %3470 = vperm.xlu1 %6336, %v3255_v17  }
  0x5e   : > { %6339 = vset.pattern.permute.xlu1 %v12084_v11  ;;  %v7184_v11 = vrot.slane %v7000_v24, %v7123_v59 }
  0x5f   : > { %3526 = vperm.xlu1 %6339, %v3255_v17  }
  0x60   : > { %12437 = vst [vmem:[#allocation20_spill] sm:$0xff] %v7184_v11 }
  0x63   : > { %3530 = vperm.xlu1 %6339, %v6933_v10  }
  0x67   : > { %6340 = vset.pattern.permute.xlu1 %v12097_v6  ;;  %v7217_v6 = vrot.slane %v7009_v27, %v7109_v55 }
  0x68   : > { %3587 = vperm.xlu1 %6340, %v6933_v10  }
  0x69   : > { %12443 = vst [vmem:[#allocation26_spill] sm:$0xff] %v7217_v6  ;;  %v7277_v6 = vrot.slane %v7041_v36, %v7123_v59 }
  0x6b   : > { %12458 = vst [vmem:[#allocation41_spill] sm:$0xff] %v7277_v6  ;;  %v1725_v6 = vld [vmem:[%s6991_s14 + $0x8] sm:$0xff] }
  0x6c   : > { %6341 = vset.pattern.permute.xlu1 %v12095_v12  ;;  %v7212_v12 = vrot.slane %v7006_v26, %v7109_v55 }
  0x6d   : > { %3640 = vperm.xlu1 %6341, %v3255_v17  }
  0x6e   : > { %12442 = vst [vmem:[#allocation25_spill] sm:$0xff] %v7212_v12 }
  0x71   : > { %6342 = vset.pattern.permute.xlu1 %v12093_v20  ;;  %v7208_v20 = vrot.slane %v7003_v25, %v7123_v59 }
  0x72   : > { %3697 = vperm.xlu1 %6342, %v3255_v17   ;;  %v7168_v17 = vsub.s32 7, %v401_v19  ;;  %v7188_v19 = vrot.slane %v7041_v36, %v7079_v46 }
  0x73   : > { %12441 = vst [vmem:[#allocation24_spill] sm:$0xff] %v7208_v20  ;;  %v7229_v20 = vrot.slane %v7019_v30, %v7109_v55 }
  0x74   : > { %12434 = vst [vmem:[#allocation17_spill] sm:$0xff] %v7168_v17  ;;  %12438 = vst [vmem:[#allocation21_spill] sm:$0xff] %v7188_v19  ;;  %v7233_v12 = vrot.slane %v7000_v24, %v7168_v17  ;;  %v7314_v2 = vrot.slane %v7009_v27, %v7168_v17  ;;  %v7321_v19 = vrot.slane %v7012_v28, %v7168_v17 }
  0x75   : > { %12446 = vst [vmem:[#allocation29_spill] sm:$0xff] %v7229_v20  ;;  %v7249_v20 = vrot.slane %v7006_v26, %v7123_v59 }
  0x76   : > { %3701 = vperm.xlu1 %6342, %v6933_v10   ;;  %v7158_v10 = vrot.slane %v7012_v28, %v7079_v46  ;;  %12447 = vst [vmem:[#allocation30_spill] sm:$0xff] %v7233_v12  ;;  %v7261_v12 = vrot.slane %v7016_v29, %v7123_v59  ;;  %12467 = vst [vmem:[#allocation50_spill] sm:$0xff] %v7314_v2  ;;  %v7403_v2 = vrot.slane %v1725_v6, %v7168_v17 }
  0x77   : > { %12451 = vst [vmem:[#allocation34_spill] sm:$0xff] %v7249_v20  ;;  %12469 = vst [vmem:[#allocation52_spill] sm:$0xff] %v7321_v19  ;;  %v7384_v19 = vrot.slane %v1725_v6, %v7137_v63 }
  0x78   : > { %12454 = vst [vmem:[#allocation37_spill] sm:$0xff] %v7261_v12  ;;  %12492 = vst [vmem:[#allocation75_spill] sm:$0xff] %v7403_v2 }
  0x79   : > { %12486 = vst [vmem:[#allocation69_spill] sm:$0xff] %v7384_v19 }
  0x7a   : > { %6343 = vset.pattern.permute.xlu1 %v12089_v7  ;;  %v7200_v7 = vrot.slane %v7000_v24, %v7137_v63  ;;  %v7253_v24 = vrot.slane %v7009_v27, %v7123_v59 }
  0x7b   : > { %3759 = vperm.xlu1 %6343, %v3258_v37   ;;  %v7176_v37 = vrot.slane %v7003_v25, %v7109_v55 }
  0x7c   : > { %12439 = vst [vmem:[#allocation22_spill] sm:$0xff] %v7200_v7  ;;  %12452 = vst [vmem:[#allocation35_spill] sm:$0xff] %v7253_v24  ;;  %v7282_v7 = vrot.slane %v7009_v27, %v7137_v63  ;;  %v7337_v27 = vrot.slane %v7041_v36, %v7168_v17 }
  0x7d   : > { %12436 = vst [vmem:[#allocation19_spill] sm:$0xff] %v7176_v37  ;;  %v7298_v37 = vld [vmem:[%s6991_s14 + $0x10] sm:$0xff] }
  0x7e   : > { %12459 = vst [vmem:[#allocation42_spill] sm:$0xff] %v7282_v7  ;;  %12463 = vst [vmem:[#allocation46_spill] sm:$0xff] %v7298_v37  ;;  %v7306_v7 = vrot.slane %v7041_v36, %v7137_v63  ;;  %v7360_v36 = vrot.slane %v7298_v37, %v7079_v46  ;;  %v7407_v19 = vrot.slane %v7298_v37, %v7109_v55 }
  0x7f   : > { %3819 = vrot.lane.b32.xlu1 %v3795_v54, %s6825_s23  ;;  %v7180_v54 = vrot.slane %v7022_v31, %v7079_v46  ;;  %12473 = vst [vmem:[#allocation56_spill] sm:$0xff] %v7337_v27  ;;  %v7368_v27 = vrot.slane %v1725_v6, %v7109_v55 }
  0x80   : > { %12465 = vst [vmem:[#allocation48_spill] sm:$0xff] %v7306_v7  ;;  %v7329_v7 = vrot.slane %v7019_v30, %v7168_v17  ;;  %v7347_v30 = vrot.slane %v7298_v37, %v6993_v21  ;;  %12480 = vst [vmem:[#allocation63_spill] sm:$0xff] %v7360_v36  ;;  %v387_v36 = vld [vmem:[%s6985_s15 + $0x18] sm:$0xff] }
  0x81   : > { %12482 = vst [vmem:[#allocation65_spill] sm:$0xff] %v7368_v27  ;;  %12493 = vst [vmem:[#allocation76_spill] sm:$0xff] %v7407_v19 }
  0x82   : > { %12471 = vst [vmem:[#allocation54_spill] sm:$0xff] %v7329_v7  ;;  %12476 = vst [vmem:[#allocation59_spill] sm:$0xff] %v7347_v30  ;;  %v7350_v7 = vld [vmem:[%s6991_s14 + $0x20] sm:$0xff]  ;;  %v7371_v30 = vrot.slane %v1725_v6, %v7123_v59 }
  0x83   : > { %3839 = vrot.lane.b32.xlu1 %v3805_v15, %s6825_s23  ;;  %v7237_v15 = vrot.slane %v7003_v25, %v7168_v17  ;;  %v7257_v25 = vrot.slane %v7012_v28, %v7123_v59  ;;  %12477 = vst [vmem:[#allocation60_spill] sm:$0xff] %v7350_v7 }
  0x84   : > { %12483 = vst [vmem:[#allocation66_spill] sm:$0xff] %v7371_v30  ;;  %v7392_v30 = vrot.slane %v7317_v18, %v6997_v23 }
  0x85   : > { %12448 = vst [vmem:[#allocation31_spill] sm:$0xff] %v7237_v15  ;;  %12453 = vst [vmem:[#allocation36_spill] sm:$0xff] %v7257_v25  ;;  %v7265_v15 = vrot.slane %v7006_v26, %v7137_v63 }
  0x86   : > { %12488 = vst [vmem:[#allocation71_spill] sm:$0xff] %v7392_v30 }
  0x87   : > { %12455 = vst [vmem:[#allocation38_spill] sm:$0xff] %v7265_v15  ;;  %3870 = vperm.xlu1 %6343, %v6957_v16   ;;  %v7286_v15 = vrot.slane %v7012_v28, %v7137_v63  ;;  %v7302_v16 = vrot.slane %v7022_v31, %v7137_v63  ;;  %v7340_v28 = vrot.slane %v1725_v6, %v6993_v21 }
  0x89   : > { %12460 = vst [vmem:[#allocation43_spill] sm:$0xff] %v7286_v15  ;;  %12464 = vst [vmem:[#allocation47_spill] sm:$0xff] %v7302_v16  ;;  %v7310_v15 = vrot.slane %v7006_v26, %v7168_v17  ;;  %v7325_v16 = vrot.slane %v7016_v29, %v7168_v17  ;;  %v7333_v26 = vrot.slane %v7022_v31, %v7168_v17 }
  0x8a   : > { %12474 = vst [vmem:[#allocation57_spill] sm:$0xff] %v7340_v28  ;;  %v7343_v29 = vrot.slane %v1725_v6, %v6997_v23  ;;  %v7353_v31 = vrot.slane %v1725_v6, %v7079_v46  ;;  %v7364_v28 = vrot.slane %v7317_v18, %v6993_v21 }
  0x8b   : > { %12466 = vst [vmem:[#allocation49_spill] sm:$0xff] %v7310_v15  ;;  %12470 = vst [vmem:[#allocation53_spill] sm:$0xff] %v7325_v16  ;;  %v389_v16 = vld [vmem:[%s6985_s15 + $0x28] sm:$0xff] }
  0x8c   : > { %12472 = vst [vmem:[#allocation55_spill] sm:$0xff] %v7333_v26  ;;  %12475 = vst [vmem:[#allocation58_spill] sm:$0xff] %v7343_v29  ;;  %v7356_v26 = vrot.slane %v1725_v6, %v6995_v22  ;;  %v385_v29 = vld [vmem:[%s6985_s15 + $0x8] sm:$0xff]  ;;  %v7425_v6 = vrot.slane %v387_v36, %v6993_v21  ;;  %v7428_v30 = vrot.slane %v389_v16, %v6993_v21 }
  0x8d   : > { %12478 = vst [vmem:[#allocation61_spill] sm:$0xff] %v7353_v31  ;;  %12481 = vst [vmem:[#allocation64_spill] sm:$0xff] %v7364_v28  ;;  %v7375_v31 = vrot.slane %v7298_v37, %v6995_v22  ;;  %v7388_v28 = vrot.slane %v7317_v18, %v7079_v46  ;;  %v7411_v46 = vrot.slane %v7317_v18, %v6995_v22 }
  0x8e   : > { %12479 = vst [vmem:[#allocation62_spill] sm:$0xff] %v7356_v26  ;;  %v7379_v26 = vrot.slane %v7298_v37, %v6997_v23  ;;  %v7398_v27 = vpop.permute.xlu1 %571  ;;  %v7414_v23 = vrot.slane %v385_v29, %v6993_v21  ;;  %12497 = vst [vmem:[#allocation80_spill] sm:$0xff] %v7425_v6 }
  0x8f   : > { %12484 = vst [vmem:[#allocation67_spill] sm:$0xff] %v7375_v31  ;;  %12487 = vst [vmem:[#allocation70_spill] sm:$0xff] %v7388_v28  ;;  %v7396_v31 = vrot.slane %v7350_v7, %v6993_v21  ;;  %v7422_v7 = vrot.slane %v7298_v37, %v7123_v59  ;;  %v7436_v29 = vmul.f32 %v7398_v27, %v7026_v32 }
  0x90   : > { %12485 = vst [vmem:[#allocation68_spill] sm:$0xff] %v7379_v26  ;;  %12490 = vst [vmem:[#allocation73_spill] sm:$0xff] %v7398_v27  ;;  %v7400_v26 = vpop.permute.xlu0 %675  ;;  %v7448_v16 = vmul.f32 %v7398_v27, %v7064_v42  ;;  %v7452_v36 = vmul.f32 %v7398_v27, %v7068_v43  ;;  %v7460_v6 = vmul.f32 %v7398_v27, %v7076_v45 }
  0x91   : > { %12489 = vst [vmem:[#allocation72_spill] sm:$0xff] %v7396_v31  ;;  %12491 = vst [vmem:[#allocation74_spill] sm:$0xff] %v7400_v26  ;;  %v7418_v31 = vmul.f32 %v7038_v35, %v7398_v27  ;;  %v7432_v22 = vmul.f32 %v7048_v38, %v7400_v26  ;;  %v7466_v28 = vmul.f32 %v7398_v27, %v7083_v47 }
  0x92   : > { %12494 = vst [vmem:[#allocation77_spill] sm:$0xff] %v7411_v46  ;;  %12495 = vst [vmem:[#allocation78_spill] sm:$0xff] %v7414_v23  ;;  %v7440_v23 = vmul.f32 %v7398_v27, %v7056_v40  ;;  %v7444_v46 = vmul.f32 %v7398_v27, %v7060_v41  ;;  %v7462_v21 = vpop.permute.xlu1 %575  ;;  %v7474_v19 = vmul.f32 %v7400_v26, %v7087_v48 }
  0x93   : > { %12496 = vst [vmem:[#allocation79_spill] sm:$0xff] %v7422_v7  ;;  %12498 = vst [vmem:[#allocation81_spill] sm:$0xff] %v7428_v30  ;;  %v7456_v30 = vmul.f32 %v7398_v27, %v7072_v44  ;;  %v7470_v7 = vmul.f32 %v7400_v26, %v7030_v33  ;;  %v7478_v17 = vmul.f32 %v7400_v26, %v7091_v49 }
  0x94   : > { %12499 = vst [vmem:[#allocation82_spill] sm:$0xff] %v7436_v29  ;;  %12500 = vst [vmem:[#allocation83_spill] sm:$0xff] %v7440_v23  ;;  %v7480_v59 = vpop.permute.xlu0 %815  ;;  %v583_v2 = vmul.f32 %v7462_v21, %v7056_v40  ;;  %v7486_v27 = vmul.f32 %v7400_v26, %v7095_v50  ;;  %v7490_v38 = vmul.f32 %v7400_v26, %v7099_v51 }
  0x95   : > { %12501 = vst [vmem:[#allocation84_spill] sm:$0xff] %v7444_v46  ;;  %12502 = vst [vmem:[#allocation85_spill] sm:$0xff] %v7448_v16  ;;  %v7494_v35 = vmul.f32 %v7400_v26, %v7103_v52  ;;  %v579_v18 = vmul.f32 %v7462_v21, %v7026_v32  ;;  %v819_v55 = vmul.f32 %v7480_v59, %v7034_v34 }
  0x96   : > { %12503 = vst [vmem:[#allocation86_spill] sm:$0xff] %v7452_v36  ;;  %12504 = vst [vmem:[#allocation87_spill] sm:$0xff] %v7456_v30  ;;  %v587_v40 = vmul.f32 %v7462_v21, %v7060_v41  ;;  %v591_v37 = vmul.f32 %v7462_v21, %v7064_v42  ;;  %v595_v63 = vmul.f32 %v7462_v21, %v7068_v43 }
  0x97   : > { %12505 = vst [vmem:[#allocation88_spill] sm:$0xff] %v7460_v6  ;;  %12506 = vst [vmem:[#allocation89_spill] sm:$0xff] %v7462_v21  ;;  %v599_v15 = vmul.f32 %v7462_v21, %v7072_v44  ;;  %v823_v32 = vmul.f32 %v7480_v59, %v7117_v57  ;;  %v607_v6 = vmul.f32 %v7462_v21, %v7083_v47  ;;  %v7520_v30 = vpop.permute.xlu1 %679 }
  0x98   : > { %12507 = vst [vmem:[#allocation90_spill] sm:$0xff] %v7466_v28  ;;  %12508 = vst [vmem:[#allocation91_spill] sm:$0xff] %v7480_v59  ;;  %v603_v28 = vmul.f32 %v7462_v21, %v7076_v45  ;;  %v827_v41 = vmul.f32 %v7480_v59, %v7121_v58  ;;  %v831_v42 = vmul.f32 %v7480_v59, %v7127_v60  ;;  %v7530_v36 = vpop.permute.xlu0 %1223 }
  0x99   : > { %v835_v43 = vmul.f32 %v7480_v59, %v7131_v61  ;;  %12509 = vst [vmem:[#allocation92_spill] sm:$0xff] %v7520_v30  ;;  %v839_v44 = vmul.f32 %v7480_v59, %v7135_v62  ;;  %v843_v45 = vmul.f32 %v7480_v59, %v7192_v8  ;;  %v847_v47 = vmul.f32 %v7480_v59, %v7196_v5 }
  0x9a   : > { %v7528_v21 = vadd.f32 %v823_v32, %v583_v2  ;;  %12511 = vst [vmem:[#allocation94_spill] sm:$0xff] %v7530_v36  ;;  %v683_v16 = vmul.f32 %v7520_v30, %v7030_v33  ;;  %v7534_v46 = vadd.f32 %v819_v55, %v579_v18  ;;  %v7538_v23 = vmul.f32 %v7400_v26, %v7107_v53 }
  0x9b   : > { %v7542_v29 = vmul.f32 %v7400_v26, %v7113_v56  ;;  %v7546_v59 = vmul.f32 %v7530_v36, %v7184_v11  ;;  %v687_v2 = vmul.f32 %v7520_v30, %v7087_v48  ;;  %v691_v33 = vmul.f32 %v7520_v30, %v7091_v49 }
  0x9c   : > { %12510 = vst [vmem:[#allocation93_spill] sm:$0xff] %v7528_v21  ;;  %12512 = vst [vmem:[#allocation95_spill] sm:$0xff] %v7534_v46  ;;  %v695_v55 = vmul.f32 %v7520_v30, %v7095_v50  ;;  %v699_v18 = vmul.f32 %v7520_v30, %v7099_v51  ;;  %v7556_v32 = vadd.f32 %v827_v41, %v587_v40 }
  0x9d   : > { %12513 = vst [vmem:[#allocation96_spill] sm:$0xff] %v7546_v59  ;;  %v7558_v26 = vadd.f32 %v831_v42, %v591_v37  ;;  %v7560_v21 = vadd.f32 %v835_v43, %v595_v63  ;;  %v703_v11 = vmul.f32 %v7520_v30, %v7103_v52  ;;  %v7564_v46 = vadd.f32 %v839_v44, %v599_v15  ;;  %v7570_v59 = vpop.permute.xlu1 %811  ;;  %v7584_v37 = vpop.permute.xlu0 %466 }
  0x9e   : > { %v7566_v48 = vadd.f32 %v843_v45, %v603_v28  ;;  %v7568_v49 = vadd.f32 %v847_v47, %v607_v6  ;;  %12514 = vst [vmem:[#allocation97_spill] sm:$0xff] %v7570_v59  ;;  %v707_v50 = vmul.f32 %v7520_v30, %v7107_v53  ;;  %v711_v51 = vmul.f32 %v7520_v30, %v7113_v56 }
  0x9f   : > { %v7578_v63 = vmul.f32 %v7530_v36, %v7249_v20  ;;  %v7582_v52 = vmul.f32 %v7530_v36, %v7253_v24  ;;  %12517 = vst [vmem:[#allocation100_spill] sm:$0xff] %v7584_v37  ;;  %v2124_v15 = vmul.f32 %v7052_v39, %v7570_v59  ;;  %v7590_v28 = vmul.f32 %v7530_v36, %v7257_v25  ;;  %v12526_v24 = vld [vmem:[#allocation18_spill] sm:$0xff] }
  0xa0   : > { %v7594_v53 = vmul.f32 %v7530_v36, %v7261_v12  ;;  %v7598_v56 = vmul.f32 %v7530_v36, %v7269_v1  ;;  %v1804_v6 = vmul.f32 %v7145_v3, %v7584_v37  ;;  %v474_v40 = vmul.f32 %v7584_v37, %v7141_v0 }
  0xa1   : > { %12515 = vst [vmem:[#allocation98_spill] sm:$0xff] %v7578_v63  ;;  %12516 = vst [vmem:[#allocation99_spill] sm:$0xff] %v7582_v52  ;;  %v478_v41 = vmul.f32 %v7584_v37, %v7149_v4  ;;  %v818_v42 = vmul.f32 %v7570_v59, %v7034_v34  ;;  %v7609_v43 = vadd.f32 %v2124_v15, %v7418_v31  ;;  %v7624_v15 = vpop.permute.xlu0 %471  ;;  %v7626_v3 = vpop.permute.xlu1 %947 }
  0xa2   : > { %12518 = vst [vmem:[#allocation101_spill] sm:$0xff] %v7590_v28  ;;  %12519 = vst [vmem:[#allocation102_spill] sm:$0xff] %v7594_v53  ;;  %v482_v44 = vmul.f32 %v7584_v37, %v7154_v9  ;;  %v822_v45 = vmul.f32 %v7570_v59, %v7117_v57  ;;  %v826_v47 = vmul.f32 %v7570_v59, %v7121_v58  ;;  %v12524_v28 = vld [vmem:[#allocation19_spill] sm:$0xff] }
  0xa3   : > { %12520 = vst [vmem:[#allocation103_spill] sm:$0xff] %v7598_v56  ;;  %v2028_v39 = vadd.f32 %v7432_v22, %v1804_v6  ;;  %v486_v30 = vmul.f32 %v7584_v37, %v7158_v10  ;;  %v490_v34 = vmul.f32 %v7584_v37, %v7162_v13  ;;  %v494_v31 = vmul.f32 %v7584_v37, %v7166_v14  ;;  %v12523_v56 = vld [vmem:[#allocation21_spill] sm:$0xff] }
  0xa4   : > { %12521 = vst [vmem:[#allocation104_spill] sm:$0xff] %v7624_v15  ;;  %12522 = vst [vmem:[#allocation105_spill] sm:$0xff] %v7626_v3  ;;  %v498_v57 = vmul.f32 %v7584_v37, %v7180_v54  ;;  %v502_v58 = vmul.f32 %v7584_v37, %v12523_v56  ;;  %v7633_v22 = vadd.f32 %v7470_v7, %v474_v40 }
  0xa5   : > { %v7636_v6 = vadd.f32 %v7474_v19, %v478_v41  ;;  %v475_v53 = vmul.f32 %v7624_v15, %v7141_v0  ;;  %v2252_v52 = vmul.f32 %v12524_v28, %v7626_v3  ;;  %v479_v63 = vmul.f32 %v7624_v15, %v7149_v4  ;;  %v7658_v28 = vpop.permute.xlu1 %951 }
  0xa6   : > { %v483_v36 = vmul.f32 %v7624_v15, %v7154_v9  ;;  %v487_v37 = vmul.f32 %v7624_v15, %v7158_v10  ;;  %v491_v7 = vmul.f32 %v7624_v15, %v7162_v13  ;;  %v495_v19 = vmul.f32 %v7624_v15, %v7166_v14  ;;  %12525 = vst [vmem:[#allocation21_spill] sm:$0xff] %v7658_v28  ;;  %v7660_v10 = vpop.permute.xlu0 %1460 }
  0xa7   : > { %v499_v0 = vmul.f32 %v7624_v15, %v7180_v54  ;;  %v503_v40 = vmul.f32 %v7624_v15, %v12523_v56  ;;  %v719_v41 = vadd.f32 %v687_v2, %v479_v63  ;;  %v722_v4 = vadd.f32 %v7478_v17, %v482_v44 }
  0xa8   : > { %v726_v9 = vadd.f32 %v7486_v27, %v486_v30  ;;  %v723_v1 = vadd.f32 %v691_v33, %v483_v36  ;;  %v727_v13 = vadd.f32 %v695_v55, %v487_v37  ;;  %v730_v12 = vadd.f32 %v7490_v38, %v490_v34  ;;  %v12528_v55 = vld [vmem:[#allocation82_spill] sm:$0xff]  ;;  %v12537_v34 = vld [vmem:[#allocation88_spill] sm:$0xff] }
  0xa9   : > { %v731_v14 = vadd.f32 %v699_v18, %v491_v7  ;;  %v715_v25 = vadd.f32 %v683_v16, %v475_v53  ;;  %v955_v54 = vmul.f32 %v7658_v28, %v12526_v24  ;;  %v735_v20 = vadd.f32 %v703_v11, %v495_v19  ;;  %v12535_v37 = vld [vmem:[#allocation86_spill] sm:$0xff] }
  0xaa   : > { %v739_v56 = vadd.f32 %v707_v50, %v499_v0  ;;  %v2284_v2 = vadd.f32 %v2252_v52, %v2028_v39  ;;  %v743_v63 = vadd.f32 %v711_v51, %v503_v40  ;;  %v830_v17 = vmul.f32 %v7570_v59, %v7127_v60  ;;  %v7675_v11 = vpop.permute.xlu0 %3282  ;;  %v12533_v52 = vld [vmem:[#allocation85_spill] sm:$0xff]  ;;  %v12540_v0 = vld [vmem:[#allocation95_spill] sm:$0xff] }
  0xab   : > { %v834_v27 = vmul.f32 %v7570_v59, %v7131_v61  ;;  %v987_v30 = vadd.f32 %v955_v54, %v715_v25  ;;  %v838_v36 = vmul.f32 %v7570_v59, %v7135_v62  ;;  %v842_v38 = vmul.f32 %v7570_v59, %v7192_v8  ;;  %12527 = vst [vmem:[#allocation18_spill] sm:$0xff] %v7675_v11  ;;  %v7683_v25 = vpop.permute.xlu1 %1087  ;;  %v12530_v62 = vld [vmem:[#allocation96_spill] sm:$0xff]  ;;  %v12531_v8 = vld [vmem:[#allocation83_spill] sm:$0xff]  ;;  %v12541_v54 = vld [vmem:[#allocation26_spill] sm:$0xff] }
  0xac   : > { %v846_v16 = vmul.f32 %v7570_v59, %v7196_v5  ;;  %v734_v39 = vadd.f32 %v7494_v35, %v494_v31  ;;  %v738_v33 = vadd.f32 %v7538_v23, %v498_v57  ;;  %v742_v60 = vadd.f32 %v7542_v29, %v502_v58  ;;  %12529 = vst [vmem:[#allocation82_spill] sm:$0xff] %v7683_v25  ;;  %v12532_v5 = vld [vmem:[#allocation84_spill] sm:$0xff]  ;;  %v12534_v23 = vld [vmem:[#allocation22_spill] sm:$0xff]  ;;  %v12539_v58 = vld [vmem:[#allocation25_spill] sm:$0xff] }
  0xad   : > { %v7681_v61 = vadd.f32 %v818_v42, %v12528_v55  ;;  %v7686_v18 = vadd.f32 %v12530_v62, %v987_v30  ;;  %v7689_v50 = vadd.f32 %v822_v45, %v12531_v8  ;;  %v7692_v51 = vadd.f32 %v826_v47, %v12532_v5  ;;  %v12536_v42 = vld [vmem:[#allocation87_spill] sm:$0xff]  ;;  %v12538_v45 = vld [vmem:[#allocation90_spill] sm:$0xff]  ;;  %v12545_v8 = vld [vmem:[#allocation29_spill] sm:$0xff] }
  0xae   : > { %v7695_v35 = vadd.f32 %v830_v17, %v12533_v52  ;;  %v1091_v29 = vmul.f32 %v7683_v25, %v12534_v23  ;;  %v7700_v53 = vadd.f32 %v834_v27, %v12535_v37  ;;  %v7703_v44 = vadd.f32 %v838_v36, %v12536_v42  ;;  %v12542_v30 = vld [vmem:[#allocation27_spill] sm:$0xff]  ;;  %v12546_v37 = vld [vmem:[#allocation32_spill] sm:$0xff] }
  0xaf   : > { %v7706_v31 = vadd.f32 %v842_v38, %v12537_v34  ;;  %v7709_v57 = vadd.f32 %v846_v16, %v12538_v45  ;;  %v954_v47 = vmul.f32 %v7626_v3, %v12526_v24  ;;  %v958_v7 = vmul.f32 %v7626_v3, %v12539_v58  ;;  %v7724_v38 = vpop.permute.xlu0 %3474  ;;  %v12544_v16 = vld [vmem:[#allocation28_spill] sm:$0xff]  ;;  %v7734_v52 = vpop.permute.xlu1 %1219  ;;  %v12547_v45 = vld [vmem:[#allocation33_spill] sm:$0xff] }
  0xb0   : > { %v959_v19 = vmul.f32 %v7658_v28, %v12539_v58  ;;  %v1123_v40 = vadd.f32 %v1091_v29, %v12540_v0  ;;  %v962_v17 = vmul.f32 %v7626_v3, %v12541_v54  ;;  %v963_v27 = vmul.f32 %v7658_v28, %v12541_v54  ;;  %12543 = vst [vmem:[#allocation96_spill] sm:$0xff] %v7724_v38  ;;  %v12548_v0 = vld [vmem:[#allocation24_spill] sm:$0xff] }
  0xb1   : > { %v967_v36 = vmul.f32 %v7658_v28, %v12542_v30  ;;  %v966_v24 = vmul.f32 %v7626_v3, %v12542_v30  ;;  %v970_v55 = vmul.f32 %v7626_v3, %v12544_v16  ;;  %v971_v62 = vmul.f32 %v7658_v28, %v12544_v16 }
  0xb2   : > { %v975_v5 = vmul.f32 %v7658_v28, %v12545_v8  ;;  %v974_v29 = vmul.f32 %v7626_v3, %v12545_v8  ;;  %v978_v42 = vmul.f32 %v7626_v3, %v12546_v37  ;;  %v979_v34 = vmul.f32 %v7658_v28, %v12546_v37 }
  0xb3   : > { %v983_v58 = vmul.f32 %v7658_v28, %v12547_v45  ;;  %v2508_v54 = vmul.f32 %v12548_v0, %v7734_v52  ;;  %v982_v30 = vmul.f32 %v7626_v3, %v12547_v45  ;;  %v7749_v16 = vadd.f32 %v954_v47, %v7633_v22  ;;  %v7770_v22 = vpop.permute.xlu0 %1083  ;;  %v12562_v3 = vld [vmem:[#allocation93_spill] sm:$0xff] }
  0xb4   : > { %v7751_v38 = vadd.f32 %v959_v19, %v719_v41  ;;  %v7754_v8 = vadd.f32 %v958_v7, %v7636_v6  ;;  %v7756_v11 = vadd.f32 %v962_v17, %v722_v4  ;;  %v7758_v37 = vadd.f32 %v963_v27, %v723_v1  ;;  %12549 = vst [vmem:[#allocation83_spill] sm:$0xff] %v7770_v22  ;;  %v7778_v1 = vpop.permute.xlu1 %1355  ;;  %v12553_v7 = vld [vmem:[#allocation38_spill] sm:$0xff]  ;;  %v12555_v27 = vld [vmem:[#allocation43_spill] sm:$0xff] }
  0xb5   : > { %v7760_v59 = vadd.f32 %v967_v36, %v727_v13  ;;  %v7762_v28 = vadd.f32 %v966_v24, %v726_v9  ;;  %v7764_v0 = vadd.f32 %v970_v55, %v730_v12  ;;  %v7766_v15 = vadd.f32 %v971_v62, %v731_v14  ;;  %v12550_v9 = vld [vmem:[#allocation23_spill] sm:$0xff]  ;;  %v12554_v19 = vld [vmem:[#allocation42_spill] sm:$0xff]  ;;  %v12556_v24 = vld [vmem:[#allocation44_spill] sm:$0xff] }
  0xb6   : > { %v7768_v45 = vadd.f32 %v975_v5, %v735_v20  ;;  %v2540_v41 = vadd.f32 %v2508_v54, %v2284_v2  ;;  %v7772_v47 = vadd.f32 %v974_v29, %v734_v39  ;;  %v7774_v6 = vadd.f32 %v979_v34, %v739_v56  ;;  %v12552_v2 = vld [vmem:[#allocation31_spill] sm:$0xff]  ;;  %v12557_v5 = vld [vmem:[#allocation45_spill] sm:$0xff] }
  0xb7   : > { %v7776_v4 = vadd.f32 %v983_v58, %v743_v63  ;;  %v2380_v13 = vmul.f32 %v12550_v9, %v7770_v22  ;;  %v7782_v12 = vadd.f32 %v978_v42, %v738_v33  ;;  %v7784_v14 = vadd.f32 %v982_v30, %v742_v60  ;;  %v12559_v58 = vld [vmem:[#allocation47_spill] sm:$0xff] }
  0xb8   : > { %v1090_v20 = vmul.f32 %v7770_v22, %v12534_v23  ;;  %v2636_v39 = vmul.f32 %v12552_v2, %v7778_v1  ;;  %v1094_v56 = vmul.f32 %v7770_v22, %v12553_v7  ;;  %v1095_v63 = vmul.f32 %v7683_v25, %v12553_v7  ;;  %v7811_v42 = vpop.permute.xlu1 %1359 }
  0xb9   : > { %12551 = vst [vmem:[#allocation84_spill] sm:$0xff] %v7784_v14  ;;  %v1098_v17 = vmul.f32 %v7770_v22, %v12554_v19  ;;  %v2412_v33 = vadd.f32 %v2380_v13, %v7609_v43  ;;  %v1099_v60 = vmul.f32 %v7683_v25, %v12554_v19  ;;  %v1102_v23 = vmul.f32 %v7770_v22, %v12555_v27  ;;  %v12560_v13 = vld [vmem:[#allocation48_spill] sm:$0xff]  ;;  %v12561_v19 = vld [vmem:[#allocation30_spill] sm:$0xff] }
  0xba   : > { %v1103_v36 = vmul.f32 %v7683_v25, %v12555_v27  ;;  %v1106_v55 = vmul.f32 %v7770_v22, %v12556_v24  ;;  %v1107_v62 = vmul.f32 %v7683_v25, %v12556_v24  ;;  %v1110_v29 = vmul.f32 %v7770_v22, %v12557_v5  ;;  %12558 = vst [vmem:[#allocation85_spill] sm:$0xff] %v7811_v42 }
  0xbb   : > { %v1111_v43 = vmul.f32 %v7683_v25, %v12557_v5  ;;  %v2668_v34 = vadd.f32 %v2636_v39, %v2412_v33  ;;  %v1114_v54 = vmul.f32 %v7770_v22, %v12559_v58  ;;  %v1115_v30 = vmul.f32 %v7683_v25, %v12559_v58 }
  0xbc   : > { %v1118_v7 = vmul.f32 %v7770_v22, %v12560_v13  ;;  %v1363_v27 = vmul.f32 %v7811_v42, %v12561_v19  ;;  %v1119_v24 = vmul.f32 %v7683_v25, %v12560_v13  ;;  %v7824_v5 = vadd.f32 %v1090_v20, %v7681_v61 }
  0xbd   : > { %v7827_v39 = vadd.f32 %v1095_v63, %v12562_v3  ;;  %v2700_v33 = vadd.f32 %v2668_v34, %v2540_v41  ;;  %v1126_v2 = vadd.f32 %v1094_v56, %v7689_v50  ;;  %v7831_v58 = vadd.f32 %v1099_v60, %v7556_v32  ;;  %v12565_v56 = vld [vmem:[#allocation34_spill] sm:$0xff]  ;;  %v12566_v63 = vld [vmem:[#allocation35_spill] sm:$0xff] }
  0xbe   : > { %v7834_v22 = vadd.f32 %v1103_v36, %v7558_v26  ;;  %v1395_v9 = vadd.f32 %v1363_v27, %v1123_v40  ;;  %v1130_v14 = vadd.f32 %v1098_v17, %v7692_v51  ;;  %v1134_v13 = vadd.f32 %v1102_v23, %v7695_v35  ;;  %v7851_v26 = vpop.permute.xlu1 %1465  ;;  %v12569_v23 = vld [vmem:[#allocation39_spill] sm:$0xff] }
  0xbf   : > { %v7839_v61 = vadd.f32 %v1107_v62, %v7560_v21  ;;  %v7842_v3 = vadd.f32 %v2700_v33, %v7660_v10  ;;  %v1138_v41 = vadd.f32 %v1106_v55, %v7700_v53  ;;  %v7846_v50 = vadd.f32 %v1111_v43, %v7564_v46  ;;  %12563 = vst [vmem:[#allocation22_spill] sm:$0xff] %v7851_v26  ;;  %v12564_v53 = vld [vmem:[#allocation20_spill] sm:$0xff] }
  0xc0   : > { %v7849_v32 = vadd.f32 %v1115_v30, %v7566_v48  ;;  %v1427_v51 = vadd.f32 %v1395_v9, %v7686_v18  ;;  %v1142_v35 = vadd.f32 %v1110_v29, %v7703_v44  ;;  %v1146_v21 = vadd.f32 %v1114_v54, %v7706_v31  ;;  %v12567_v31 = vld [vmem:[#allocation36_spill] sm:$0xff]  ;;  %v12568_v9 = vld [vmem:[#allocation37_spill] sm:$0xff]  ;;  %v12571_v29 = vld [vmem:[#allocation94_spill] sm:$0xff] }
  0xc1   : > { %v7857_v40 = vadd.f32 %v1119_v24, %v7568_v49  ;;  %v6210_v20 = vmul.f32 -1.442695, %v7842_v3  ;;  %v1226_v46 = vmul.f32 %v7734_v52, %v12564_v53  ;;  %v1230_v48 = vmul.f32 %v7734_v52, %v12565_v56  ;;  %v12570_v55 = vld [vmem:[#allocation40_spill] sm:$0xff]  ;;  %v12572_v54 = vld [vmem:[#allocation41_spill] sm:$0xff] }
  0xc2   : > { %v1234_v17 = vmul.f32 %v7734_v52, %v12566_v63  ;;  %v7867_v18 = vadd.f32 %v7851_v26, %v1427_v51  ;;  %v1150_v44 = vadd.f32 %v1118_v7, %v7709_v57  ;;  %v1238_v49 = vmul.f32 %v7734_v52, %v12567_v31  ;;  %v12573_v7 = vld [vmem:[#allocation98_spill] sm:$0xff]  ;;  %v12577_v63 = vld [vmem:[#allocation101_spill] sm:$0xff] }
  0xc3   : > { %v1242_v60 = vmul.f32 %v7734_v52, %v12568_v9  ;;  %6404 = vpow2.f32 %v6210_v20  ;;  %v1246_v36 = vmul.f32 %v7734_v52, %v12569_v23  ;;  %v1250_v62 = vmul.f32 %v7734_v52, %v12570_v55  ;;  %v12575_v20 = vld [vmem:[#allocation99_spill] sm:$0xff] }
  0xc4   : > { %v1251_v43 = vmul.f32 %v12571_v29, %v12570_v55  ;;  %v6179_v34 = vmul.f32 -1.442695, %v7867_v18  ;;  %v1254_v57 = vmul.f32 %v7734_v52, %v12572_v54  ;;  %v1255_v30 = vmul.f32 %v12571_v29, %v12572_v54 }
  0xc5   : > { %v7887_v27 = vadd.f32 %v12573_v7, %v7751_v38  ;;  %v1258_v24 = vadd.f32 %v1226_v46, %v7749_v16  ;;  %v1262_v33 = vadd.f32 %v1230_v48, %v7754_v8  ;;  %v1266_v51 = vadd.f32 %v1234_v17, %v7756_v11  ;;  %v12579_v38 = vld [vmem:[#allocation102_spill] sm:$0xff]  ;;  %v12581_v11 = vld [vmem:[#allocation103_spill] sm:$0xff]  ;;  %v12585_v48 = vld [vmem:[#allocation49_spill] sm:$0xff] }
  0xc6   : > { %v7894_v53 = vadd.f32 %v12575_v20, %v7758_v37  ;;  %6406 = vpow2.f32 %v6179_v34  ;;  %v1270_v56 = vadd.f32 %v1238_v49, %v7762_v28  ;;  %v7899_v31 = vadd.f32 %v12577_v63, %v7760_v59  ;;  %v12586_v17 = vld [vmem:[#allocation50_spill] sm:$0xff]  ;;  %v12587_v49 = vld [vmem:[#allocation52_spill] sm:$0xff] }
  0xc7   : > { %12574 = vst [vmem:[#allocation86_spill] sm:$0xff] %v7887_v27  ;;  %v7903_v9 = vadd.f32 %v12579_v38, %v7766_v15  ;;  %v1274_v16 = vadd.f32 %v1242_v60, %v7764_v0  ;;  %v1278_v8 = vadd.f32 %v1246_v36, %v7772_v47  ;;  %v7909_v46 = vadd.f32 %v12581_v11, %v7768_v45  ;;  %v12588_v60 = vld [vmem:[#allocation53_spill] sm:$0xff]  ;;  %v12589_v36 = vld [vmem:[#allocation54_spill] sm:$0xff] }
  0xc8   : > { %12576 = vst [vmem:[#allocation87_spill] sm:$0xff] %v7894_v53  ;;  %12578 = vst [vmem:[#allocation88_spill] sm:$0xff] %v7899_v31  ;;  %v7912_v37 = vadd.f32 %v1251_v43, %v7774_v6  ;;  %v1282_v28 = vadd.f32 %v1250_v62, %v7782_v12  ;;  %v7916_v59 = vadd.f32 %v1255_v30, %v7776_v4  ;;  %v12590_v43 = vld [vmem:[#allocation55_spill] sm:$0xff]  ;;  %v12591_v30 = vld [vmem:[#allocation56_spill] sm:$0xff] }
  0xc9   : > { %12580 = vst [vmem:[#allocation90_spill] sm:$0xff] %v7903_v9  ;;  %12582 = vst [vmem:[#allocation25_spill] sm:$0xff] %v7909_v46  ;;  %v1362_v15 = vmul.f32 %v7778_v1, %v12561_v19  ;;  %v1366_v0 = vmul.f32 %v7778_v1, %v12585_v48  ;;  %v1367_v47 = vmul.f32 %v7811_v42, %v12585_v48  ;;  %v12627_v9 = vld [vmem:[#allocation83_spill] sm:$0xff] }
  0xca   : > { %12583 = vst [vmem:[#allocation95_spill] sm:$0xff] %v7912_v37  ;;  %12584 = vst [vmem:[#allocation26_spill] sm:$0xff] %v7916_v59  ;;  %v1370_v45 = vmul.f32 %v7778_v1, %v12586_v17  ;;  %v1371_v6 = vmul.f32 %v7811_v42, %v12586_v17  ;;  %v1374_v12 = vmul.f32 %v7778_v1, %v12587_v49 }
  0xcb   : > { %v1375_v4 = vmul.f32 %v7811_v42, %v12587_v49  ;;  %v1378_v19 = vmul.f32 %v7778_v1, %v12588_v60  ;;  %v1379_v23 = vmul.f32 %v7811_v42, %v12588_v60  ;;  %v1382_v55 = vmul.f32 %v7778_v1, %v12589_v36 }
  0xcc   : > { %v1383_v62 = vmul.f32 %v7811_v42, %v12589_v36  ;;  %v1386_v34 = vmul.f32 %v7778_v1, %v12590_v43  ;;  %v1387_v54 = vmul.f32 %v7811_v42, %v12590_v43  ;;  %v1390_v7 = vmul.f32 %v7778_v1, %v12591_v30 }
  0xcd   : > { %v1391_v20 = vmul.f32 %v7811_v42, %v12591_v30  ;;  %v1394_v63 = vadd.f32 %v1362_v15, %v7824_v5  ;;  %v1398_v38 = vadd.f32 %v1366_v0, %v1126_v2  ;;  %v7950_v11 = vadd.f32 %v1367_v47, %v7827_v39  ;;  %v6405_v48 = vpop.eup %6404  ;;  %v12596_v5 = vld [vmem:[#allocation84_spill] sm:$0xff] }
  0xce   : > { %v1402_v17 = vadd.f32 %v1370_v45, %v1130_v14  ;;  %v7953_v49 = vadd.f32 %v1371_v6, %v7831_v58  ;;  %v1406_v60 = vadd.f32 %v1374_v12, %v1134_v13  ;;  %v7956_v36 = vadd.f32 %v1375_v4, %v7834_v22  ;;  %v12601_v12 = vld [vmem:[#allocation46_spill] sm:$0xff]  ;;  %v12603_v4 = vld [vmem:[#allocation51_spill] sm:$0xff] }
  0xcf   : > { %12592 = vst [vmem:[#allocation27_spill] sm:$0xff] %v7950_v11  ;;  %v2860_v43 = vadd.f32 1.0, %v6405_v48  ;;  %v1410_v59 = vadd.f32 %v1378_v19, %v1138_v41  ;;  %v7959_v37 = vadd.f32 %v1379_v23, %v7839_v61  ;;  %v1414_v30 = vadd.f32 %v1382_v55, %v1142_v35 }
  0xd0   : > { %12593 = vst [vmem:[#allocation28_spill] sm:$0xff] %v7953_v49  ;;  %12594 = vst [vmem:[#allocation29_spill] sm:$0xff] %v7956_v36  ;;  %v1286_v2 = vadd.f32 %v1254_v57, %v12596_v5  ;;  %v7963_v39 = vadd.f32 %v1383_v62, %v7846_v50  ;;  %v1418_v15 = vadd.f32 %v1386_v34, %v1146_v21  ;;  %v6407_v58 = vpop.eup %6406  ;;  %v12604_v34 = vld [vmem:[#allocation104_spill] sm:$0xff]  ;;  %v12609_v5 = vld [vmem:[#allocation10_spill] sm:$0xff] }
  0xd1   : > { %12595 = vst [vmem:[#allocation32_spill] sm:$0xff] %v7959_v37  ;;  %v7966_v14 = vadd.f32 %v1387_v54, %v7849_v32  ;;  %6408 = vrcp.f32 %v2860_v43  ;;  %v1422_v13 = vadd.f32 %v1390_v7, %v1150_v44  ;;  %v7969_v22 = vadd.f32 %v1391_v20, %v7857_v40  ;;  %v12600_v44 = vld [vmem:[#allocation15_spill] sm:$0xff]  ;;  %v12605_v54 = vld [vmem:[#allocation16_spill] sm:$0xff]  ;;  %v12628_v36 = vld [vmem:[#allocation69_spill] sm:$0xff] }
  0xd2   : > { %12597 = vst [vmem:[#allocation33_spill] sm:$0xff] %v7963_v39  ;;  %v1426_v41 = vadd.f32 %v1394_v63, %v1258_v24  ;;  %v1597_v0 = vadd.f32 1.0, %v6407_v58  ;;  %v1430_v61 = vadd.f32 %v1398_v38, %v1262_v33  ;;  %v1434_v47 = vadd.f32 %v1402_v17, %v1266_v51  ;;  %v12606_v17 = vld [vmem:[#allocation89_spill] sm:$0xff]  ;;  %v12611_v58 = vld [vmem:[#allocation11_spill] sm:$0xff] }
  0xd3   : > { %12598 = vst [vmem:[#allocation38_spill] sm:$0xff] %v7966_v14  ;;  %12599 = vst [vmem:[#allocation42_spill] sm:$0xff] %v7969_v22  ;;  %v1438_v35 = vadd.f32 %v1406_v60, %v1270_v56  ;;  %v1442_v45 = vadd.f32 %v1410_v59, %v1274_v16  ;;  %v1446_v57 = vadd.f32 %v1414_v30, %v1278_v8  ;;  %v12602_v59 = vld [vmem:[#allocation13_spill] sm:$0xff]  ;;  %v12608_v30 = vld [vmem:[#allocation92_spill] sm:$0xff] }
  0xd4   : > { %v1450_v6 = vadd.f32 %v1418_v15, %v1282_v28  ;;  %v1454_v50 = vadd.f32 %v1422_v13, %v1286_v2  ;;  %6410 = vrcp.f32 %v1597_v0  ;;  %v7972_v21 = vadd.f32 %v7660_v10, %v1426_v41  ;;  %v12607_v60 = vld [vmem:[#allocation9_spill] sm:$0xff]  ;;  %v12610_v15 = vld [vmem:[#allocation91_spill] sm:$0xff] }
  0xd5   : > { %v7975_v32 = vadd.f32 %v7660_v10, %v1430_v61  ;;  %v7979_v40 = vrot.slane %v12601_v12, %v12600_v44  ;;  %v7982_v24 = vadd.f32 %v7660_v10, %v1434_v47  ;;  %v7985_v33 = vadd.f32 %v7660_v10, %v1438_v35  ;;  %v12612_v41 = vld [vmem:[#allocation21_spill] sm:$0xff]  ;;  %v12613_v0 = vld [vmem:[#allocation19_spill] sm:$0xff] }
  0xd6   : > { %v7988_v51 = vadd.f32 %v7660_v10, %v1442_v45  ;;  %v7991_v56 = vadd.f32 %v7660_v10, %v1446_v57  ;;  %v7994_v16 = vadd.f32 %v7660_v10, %v1450_v6  ;;  %v7997_v8 = vadd.f32 %v7660_v10, %v1454_v50  ;;  %v12614_v47 = vld [vmem:[#allocation23_spill] sm:$0xff]  ;;  %v12615_v6 = vld [vmem:[#allocation24_spill] sm:$0xff]  ;;  %v12619_v22 = vld [vmem:[#allocation73_spill] sm:$0xff] }
  0xd7   : > { %v6178_v28 = vmul.f32 -1.442695, %v7972_v21  ;;  %v8002_v19 = vrot.slane %v12603_v4, %v12602_v59  ;;  %v6182_v23 = vmul.f32 -1.442695, %v7975_v32  ;;  %v6186_v55 = vmul.f32 -1.442695, %v7982_v24 }
  0xd8   : > { %v6190_v62 = vmul.f32 -1.442695, %v7985_v33  ;;  %v1805_v7 = vmul.f32 %v12605_v54, %v12604_v34  ;;  %v6194_v20 = vmul.f32 -1.442695, %v7988_v51  ;;  %v6198_v63 = vmul.f32 -1.442695, %v7991_v56 }
  0xd9   : > { %6412 = vpow2.f32 %v6178_v28  ;;  %v6202_v38 = vmul.f32 -1.442695, %v7994_v16  ;;  %v6206_v48 = vmul.f32 -1.442695, %v7997_v8  ;;  %v1901_v43 = vmul.f32 %v12607_v60, %v12606_v17  ;;  %v12616_v28 = vld [vmem:[#allocation31_spill] sm:$0xff]  ;;  %v12617_v60 = vld [vmem:[#allocation100_spill] sm:$0xff] }
  0xda   : > { %6414 = vpow2.f32 %v6182_v23  ;;  %v1997_v2 = vmul.f32 %v12609_v5, %v12608_v30  ;;  %v2125_v13 = vmul.f32 %v12611_v58, %v12610_v15  ;;  %v2253_v61 = vmul.f32 %v12613_v0, %v12612_v41  ;;  %v12618_v5 = vld [vmem:[#allocation61_spill] sm:$0xff] }
  0xdb   : > { %6416 = vpow2.f32 %v6186_v55  ;;  %v2381_v35 = vmul.f32 %v12614_v47, %v7683_v25  ;;  %v6409_v45 = vpop.eup %6408  ;;  %v2509_v50 = vmul.f32 %v12615_v6, %v12571_v29  ;;  %v2637_v23 = vmul.f32 %v12616_v28, %v7811_v42  ;;  %v12620_v47 = vld [vmem:[#allocation57_spill] sm:$0xff] }
  0xdc   : > { %6418 = vpow2.f32 %v6190_v62  ;;  %v2029_v57 = vadd.f32 %v1997_v2, %v1805_v7  ;;  %v2956_v55 = vmul.f32 %v6409_v45, %v7842_v3  ;;  %v2157_v54 = vadd.f32 %v2125_v13, %v1901_v43  ;;  %v12621_v62 = vld [vmem:[#allocation74_spill] sm:$0xff]  ;;  %v12625_v45 = vld [vmem:[#allocation105_spill] sm:$0xff] }
  0xdd   : > { %6420 = vpow2.f32 %v6194_v20  ;;  %v1806_v58 = vmul.f32 %v12618_v5, %v12617_v60  ;;  %v1902_v14 = vmul.f32 %v12620_v47, %v12619_v22  ;;  %v12622_v7 = vld [vmem:[#allocation62_spill] sm:$0xff]  ;;  %v12623_v20 = vld [vmem:[#allocation97_spill] sm:$0xff]  ;;  %v2382_v31 = vmul.f32 %v12628_v36, %v12627_v9 }
  0xde   : > { %6422 = vpow2.f32 %v6198_v63  ;;  %v2285_v0 = vadd.f32 %v2253_v61, %v2029_v57  ;;  %v1998_v2 = vmul.f32 %v12622_v7, %v12621_v62  ;;  %v6411_v39 = vpop.eup %6410  ;;  %3093 = vrot.lane.b32.xlu1 %v2956_v55, %s6827_s20  ;;  %3029 = vst.msk [vmem:[#allocation3 + $0x10] sm:$0xff] %vm2988_vm1, %v2956_v55  ;;  %v2413_v3 = vadd.f32 %v2381_v35, %v2157_v54  ;;  %v12624_v43 = vld [vmem:[#allocation58_spill] sm:$0xff]  ;;  %v12626_v63 = vld [vmem:[#allocation65_spill] sm:$0xff]  ;;  %v12630_v54 = vld [vmem:[#allocation75_spill] sm:$0xff] }
  0xdf   : > { %6424 = vpow2.f32 %v6202_v38  ;;  %v2126_v13 = vmul.f32 %v12624_v43, %v12623_v20  ;;  %v2254_v61 = vmul.f32 %v12626_v63, %v12625_v45  ;;  %v1693_v57 = vmul.f32 %v6411_v39, %v7867_v18  ;;  %v12629_v55 = vld [vmem:[#allocation66_spill] sm:$0xff] }
  0xe0   : > { %6426 = vpow2.f32 %v6206_v48  ;;  %v2541_v6 = vadd.f32 %v2509_v50, %v2285_v0  ;;  %v2030_v28 = vadd.f32 %v1998_v2, %v1806_v58  ;;  %v2669_v46 = vadd.f32 %v2637_v23, %v2413_v3  ;;  %v12631_v39 = vld [vmem:[#allocation14_spill] sm:$0xff] }
  0xe1   : > { %v2158_v37 = vadd.f32 %v2126_v13, %v1902_v14  ;;  %v2510_v38 = vmul.f32 %v12629_v55, %v7734_v52  ;;  %2997 = vst.msk [vmem:[#allocation2 + $0x18] sm:$0xff] %vm2988_vm1, %v1693_v57  ;;  %v2638_v49 = vmul.f32 %v12630_v54, %v7778_v1  ;;  %v1807_v18 = vmul.f32 %v12618_v5, %v12604_v34 }
  0xe2   : > { %v2286_v35 = vadd.f32 %v2254_v61, %v2030_v28  ;;  %v8052_v48 = vrot.slane %v12603_v4, %v12631_v39  ;;  %v2701_v50 = vadd.f32 %v2669_v46, %v2541_v6  ;;  %v1903_v58 = vmul.f32 %v12620_v47, %v12606_v17  ;;  %v12632_v61 = vld [vmem:[#allocation17_spill] sm:$0xff] }
  0xe3   : > { %v6413_v14 = vpop.eup %6412  ;;  %v2414_v23 = vadd.f32 %v2382_v31, %v2158_v37  ;;  %v2127_v0 = vmul.f32 %v12624_v43, %v12610_v15  ;;  %v1999_v13 = vmul.f32 %v12622_v7, %v12608_v30  ;;  %v2255_v5 = vmul.f32 %v12626_v63, %v12612_v41 }
  0xe4   : > { %v6415_v2 = vpop.eup %6414  ;;  %v1596_v3 = vadd.f32 1.0, %v6413_v14  ;;  %v8064_v57 = vrot.slane %v12601_v12, %v12632_v61  ;;  %v2542_v37 = vadd.f32 %v2510_v38, %v2286_v35  ;;  %v2383_v47 = vmul.f32 %v12628_v36, %v7683_v25 }
  0xe5   : > { %v6417_v46 = vpop.eup %6416  ;;  %v1600_v31 = vadd.f32 1.0, %v6415_v2  ;;  %v2670_v6 = vadd.f32 %v2638_v49, %v2414_v23  ;;  %v8069_v14 = vadd.f32 %v2701_v50, %v7851_v26  ;;  %v2031_v7 = vadd.f32 %v1999_v13, %v1807_v18 }
  0xe6   : > { %v6419_v43 = vpop.eup %6418  ;;  %v1604_v28 = vadd.f32 1.0, %v6417_v46  ;;  %6428 = vrcp.f32 %v1596_v3  ;;  %v2159_v12 = vadd.f32 %v2127_v0, %v1903_v58  ;;  %v2511_v49 = vmul.f32 %v12629_v55, %v12571_v29  ;;  %v12633_v3 = vld [vmem:[#allocation63_spill] sm:$0xff] }
  0xe7   : > { %v6421_v53 = vpop.eup %6420  ;;  %v1608_v63 = vadd.f32 1.0, %v6419_v43  ;;  %6430 = vrcp.f32 %v1600_v31  ;;  %v2702_v11 = vadd.f32 %v2670_v6, %v2542_v37  ;;  %v2287_v38 = vadd.f32 %v2255_v5, %v2031_v7  ;;  %v12634_v5 = vld [vmem:[#allocation59_spill] sm:$0xff]  ;;  %v12636_v6 = vld [vmem:[#allocation68_spill] sm:$0xff] }
  0xe8   : > { %v6423_v27 = vpop.eup %6422  ;;  %v1612_v39 = vadd.f32 1.0, %v6421_v53  ;;  %6432 = vrcp.f32 %v1604_v28  ;;  %v8078_v18 = vrot.slane %v12603_v4, %v12600_v44  ;;  %v6211_v53 = vmul.f32 -1.442695, %v8069_v14  ;;  %v12635_v31 = vld [vmem:[#allocation67_spill] sm:$0xff]  ;;  %v12637_v43 = vld [vmem:[#allocation76_spill] sm:$0xff] }
  0xe9   : > { %v6425_v36 = vpop.eup %6424  ;;  %v1616_v35 = vadd.f32 1.0, %v6423_v27  ;;  %6434 = vrcp.f32 %v1608_v63  ;;  %v8074_v23 = vadd.f32 %v2702_v11, %v7660_v10  ;;  %v2415_v58 = vadd.f32 %v2383_v47, %v2159_v12  ;;  %v12638_v7 = vld [vmem:[#allocation79_spill] sm:$0xff] }
  0xea   : > { %v6427_v50 = vpop.eup %6426  ;;  %v1620_v2 = vadd.f32 1.0, %v6425_v36  ;;  %6436 = vrcp.f32 %v1612_v39  ;;  %v2639_v27 = vmul.f32 %v12630_v54, %v7811_v42  ;;  %v2543_v11 = vadd.f32 %v2511_v49, %v2287_v38 }
  0xeb   : > { %v1624_v0 = vadd.f32 1.0, %v6427_v50  ;;  %6438 = vrcp.f32 %v1616_v35  ;;  %v6212_v55 = vmul.f32 -1.442695, %v8074_v23  ;;  %v1808_v13 = vmul.f32 %v12633_v3, %v12617_v60 }
  0xec   : > { %6440 = vrcp.f32 %v1620_v2  ;;  %v1904_v46 = vmul.f32 %v12634_v5, %v12619_v22  ;;  %v2671_v39 = vadd.f32 %v2639_v27, %v2415_v58  ;;  %v2000_v37 = vmul.f32 %v12635_v31, %v12621_v62 }
  0xed   : > { %6442 = vrcp.f32 %v1624_v0  ;;  %v2128_v47 = vmul.f32 %v12636_v6, %v12623_v20  ;;  %v2256_v54 = vmul.f32 %v12637_v43, %v12625_v45  ;;  %v2384_v28 = vmul.f32 %v7979_v40, %v12627_v9 }
  0xee   : > { %6444 = vpow2.f32 %v6211_v53  ;;  %v2512_v63 = vmul.f32 %v12638_v7, %v7734_v52  ;;  %v2703_v12 = vadd.f32 %v2671_v39, %v2543_v11  ;;  %v2032_v38 = vadd.f32 %v2000_v37, %v1808_v13 }
  0xef   : > { %6446 = vpow2.f32 %v6212_v55  ;;  %v2160_v49 = vadd.f32 %v2128_v47, %v1904_v46  ;;  %v2640_v35 = vmul.f32 %v8064_v57, %v7778_v1  ;;  %v1809_v50 = vmul.f32 %v12633_v3, %v12604_v34 }
  0xf0   : > { %v6429_v36 = vpop.eup %6428  ;;  %v1905_v2 = vmul.f32 %v12634_v5, %v12606_v17  ;;  %v2001_v53 = vmul.f32 %v12635_v31, %v12608_v30  ;;  %v8108_v55 = vadd.f32 %v2703_v12, %v7851_v26  ;;  %v2288_v27 = vadd.f32 %v2256_v54, %v2032_v38 }
  0xf1   : > { %v6431_v58 = vpop.eup %6430  ;;  %v1692_v0 = vmul.f32 %v6429_v36, %v7972_v21  ;;  %v2416_v11 = vadd.f32 %v2384_v28, %v2160_v49  ;;  %v2129_v3 = vmul.f32 %v12636_v6, %v12610_v15  ;;  %v2257_v5 = vmul.f32 %v12637_v43, %v12612_v41 }
  0xf2   : > { %v6433_v13 = vpop.eup %6432  ;;  %v1696_v46 = vmul.f32 %v6431_v58, %v7975_v32  ;;  %v2033_v39 = vadd.f32 %v2001_v53, %v1809_v50  ;;  %v6213_v21 = vmul.f32 -1.442695, %v8108_v55  ;;  %v2544_v47 = vadd.f32 %v2512_v63, %v2288_v27  ;;  %v12639_v50 = vld [vmem:[#allocation70_spill] sm:$0xff]  ;;  %v8140_v27 = vld [vmem:[%s6985_s15 + $0x38] sm:$0xff] }
  0xf3   : > { %v6435_v37 = vpop.eup %6434  ;;  %v1700_v31 = vmul.f32 %v6433_v13, %v7982_v24  ;;  %2996 = vst.msk [vmem:[#allocation2 + $0x10] sm:$0xff] %vm2988_vm1, %v1692_v0  ;;  %v2672_v54 = vadd.f32 %v2640_v35, %v2416_v11  ;;  %v2161_v32 = vadd.f32 %v2129_v3, %v1905_v2  ;;  %v2385_v6 = vmul.f32 %v7979_v40, %v7683_v25 }
  0xf4   : > { %v6437_v28 = vpop.eup %6436  ;;  %v1704_v12 = vmul.f32 %v6435_v37, %v7985_v33  ;;  %3000 = vst.msk [vmem:[#allocation2 + $0x30] sm:$0xff] %vm2988_vm1, %v1696_v46  ;;  %v2289_v38 = vadd.f32 %v2257_v5, %v2033_v39  ;;  %6448 = vpow2.f32 %v6213_v21  ;;  %v2513_v63 = vmul.f32 %v12638_v7, %v12571_v29  ;;  %v12642_v39 = vld [vmem:[#allocation71_spill] sm:$0xff] }
  0xf5   : > { %v6439_v43 = vpop.eup %6438  ;;  %v1708_v49 = vmul.f32 %v6437_v28, %v7988_v51  ;;  %3004 = vst.msk [vmem:[#allocation2 + $0x50] sm:$0xff] %vm2988_vm1, %v1700_v31  ;;  %v2704_v24 = vadd.f32 %v2672_v54, %v2544_v47  ;;  %v2417_v35 = vadd.f32 %v2385_v6, %v2161_v32  ;;  %v2641_v40 = vmul.f32 %v8064_v57, %v7811_v42  ;;  %v8155_v47 = vld [vmem:[%s6985_s15 + $0x48] sm:$0xff]  ;;  %v8158_v54 = vld [vmem:[%s6985_s15 + $0x58] sm:$0xff] }
  0xf6   : > { %v6441_v36 = vpop.eup %6440  ;;  %v1712_v33 = vmul.f32 %v6439_v43, %v7991_v56  ;;  %3008 = vst.msk [vmem:[#allocation2 + $0x70] sm:$0xff] %vm2988_vm1, %v1704_v12  ;;  %v1810_v51 = vmul.f32 %v12639_v50, %v12617_v60  ;;  %v2545_v7 = vadd.f32 %v2513_v63, %v2289_v38  ;;  %v12640_v56 = vld [vmem:[#allocation64_spill] sm:$0xff]  ;;  %v2130_v3 = vmul.f32 %v12642_v39, %v12623_v20  ;;  %v12643_v38 = vld [vmem:[#allocation6_spill] sm:$0xff]  ;;  %v8170_v63 = vld [vmem:[%s6985_s15 + $0x68] sm:$0xff] }
  0xf7   : > { %v6443_v2 = vpop.eup %6442  ;;  %v1716_v53 = vmul.f32 %v6441_v36, %v7994_v16  ;;  %3012 = vst.msk [vmem:[#allocation2 + $0x90] sm:$0xff] %vm2988_vm1, %v1708_v49  ;;  %v8135_v58 = vadd.f32 %v2704_v24, %v7660_v10  ;;  %v1906_v0 = vmul.f32 %v12640_v56, %v12619_v22  ;;  %v2673_v13 = vadd.f32 %v2641_v40, %v2417_v35  ;;  %v12641_v16 = vld [vmem:[#allocation77_spill] sm:$0xff] }
  0xf8   : > { %v6445_v57 = vpop.eup %6444  ;;  %v1720_v11 = vmul.f32 %v6443_v2, %v7997_v8  ;;  %3016 = vst.msk [vmem:[#allocation2 + $0xb0] sm:$0xff] %vm2988_vm1, %v1712_v33  ;;  %v2002_v46 = vmul.f32 %v12641_v16, %v12621_v62  ;;  %v2258_v21 = vmul.f32 %v8002_v19, %v12625_v45  ;;  %v2386_v8 = vmul.f32 %v8078_v18, %v12627_v9 }
  0xf9   : > { %v6447_v5 = vpop.eup %6446  ;;  %3020 = vst.msk [vmem:[#allocation2 + $0xd0] sm:$0xff] %vm2988_vm1, %v1716_v53  ;;  %v2861_v37 = vadd.f32 1.0, %v6445_v57  ;;  %v6214_v31 = vmul.f32 -1.442695, %v8135_v58  ;;  %v2705_v12 = vadd.f32 %v2673_v13, %v2545_v7  ;;  %v8163_v6 = vrot.slane %v8140_v27, %v12643_v38  ;;  %v12647_v7 = vld [vmem:[#allocation8_spill] sm:$0xff] }
  0xfa   : > { %3024 = vst.msk [vmem:[#allocation2 + $0xf0] sm:$0xff] %vm2988_vm1, %v1720_v11  ;;  %v2862_v28 = vadd.f32 1.0, %v6447_v5  ;;  %v2034_v32 = vadd.f32 %v2002_v46, %v1810_v51  ;;  %v2162_v43 = vadd.f32 %v2130_v3, %v1906_v0  ;;  %v2514_v49 = vmul.f32 %v8052_v48, %v7734_v52  ;;  %v12648_v0 = vld [vmem:[#allocation60_spill] sm:$0xff] }
  0xfb   : > { %12644 = vst [vmem:[#allocation43_spill] sm:$0xff] %v8163_v6  ;;  %6450 = vrcp.f32 %v2861_v37  ;;  %v2587_v24 = vrot.slane %v12603_v4, %v12632_v61  ;;  %v8173_v36 = vadd.f32 %v2705_v12, %v7851_v26  ;;  %v8177_v33 = vrot.slane %v8155_v47, %v12643_v38 }
  0xfc   : > { %6452 = vrcp.f32 %v2862_v28  ;;  %v8181_v35 = vrot.slane %v8158_v54, %v12643_v38  ;;  %v2290_v40 = vadd.f32 %v2258_v21, %v2034_v32  ;;  %v2418_v51 = vadd.f32 %v2386_v8, %v2162_v43  ;;  %v6788_v21 = vld [vmem:[%s6991_s14 + $0x20] sm:$0xff]  ;;  %v12651_v8 = vld [vmem:[#allocation12_spill] sm:$0xff] }
  0xfd   : > { %12645 = vst [vmem:[#allocation44_spill] sm:$0xff] %v8177_v33  ;;  %6454 = vpow2.f32 %v6214_v31  ;;  %v2642_v4 = vmul.f32 %v2587_v24, %v7778_v1  ;;  %v6215_v2 = vmul.f32 -1.442695, %v8173_v36  ;;  %v1811_v53 = vmul.f32 %v12639_v50, %v12604_v34 }
  0xfe   : > { %12646 = vst [vmem:[#allocation45_spill] sm:$0xff] %v8181_v35  ;;  %v8189_v57 = vrot.slane %v12648_v0, %v12647_v7  ;;  %v8193_v11 = vrot.slane %v8170_v63, %v12643_v38  ;;  %v6449_v13 = vpop.eup %6448  ;;  %v2546_v46 = vadd.f32 %v2514_v49, %v2290_v40  ;;  %v1907_v5 = vmul.f32 %v12640_v56, %v12606_v17  ;;  %v12652_v49 = vld [vmem:[#allocation7_spill] sm:$0xff] }
  0xff   : > { %v2674_v3 = vadd.f32 %v2642_v4, %v2418_v51  ;;  %v2003_v37 = vmul.f32 %v12641_v16, %v12608_v30  ;;  %v2863_v31 = vadd.f32 1.0, %v6449_v13  ;;  %6456 = vpow2.f32 %v6215_v2  ;;  %v8213_v51 = vld [vmem:[%s6985_s15 + $0x8] sm:$0xff] }
 0x100   : > { %12649 = vst [vmem:[#allocation47_spill] sm:$0xff] %v8189_v57  ;;  %12650 = vst [vmem:[#allocation48_spill] sm:$0xff] %v8193_v11  ;;  %v2131_v50 = vmul.f32 %v12642_v39, %v12610_v15  ;;  %v8203_v28 = vrot.slane %v6788_v21, %v12651_v8  ;;  %v2259_v43 = vmul.f32 %v8002_v19, %v12612_v41 }
 0x101   : > { %v2706_v12 = vadd.f32 %v2674_v3, %v2546_v46  ;;  %v2035_v32 = vadd.f32 %v2003_v37, %v1811_v53  ;;  %v8208_v40 = vrot.slane %v6788_v21, %v12652_v49  ;;  %6458 = vrcp.f32 %v2863_v31 }
 0x102   : > { %v2163_v56 = vadd.f32 %v2131_v50, %v1907_v5  ;;  %v2387_v16 = vmul.f32 %v8078_v18, %v7683_v25  ;;  %v8217_v39 = vrot.slane %v8213_v51, %v12651_v8  ;;  %v2515_v19 = vmul.f32 %v8052_v48, %v12571_v29  ;;  %v12655_v18 = vld [vmem:[#allocation72_spill] sm:$0xff] }
 0x103   : > { %12653 = vst [vmem:[#allocation30_spill] sm:$0xff] %v8208_v40  ;;  %v8220_v4 = vadd.f32 %v2706_v12, %v7660_v10  ;;  %v2291_v2 = vadd.f32 %v2259_v43, %v2035_v32  ;;  %v2643_v53 = vmul.f32 %v2587_v24, %v7811_v42  ;;  %v1812_v13 = vmul.f32 %v8203_v28, %v12617_v60 }
 0x104   : > { %12654 = vst [vmem:[#allocation93_spill] sm:$0xff] %v8217_v39  ;;  %v2419_v0 = vadd.f32 %v2387_v16, %v2163_v56  ;;  %v1908_v46 = vmul.f32 %v12655_v18, %v12619_v22  ;;  %v2004_v3 = vmul.f32 %v8208_v40, %v12621_v62  ;;  %v2132_v50 = vmul.f32 %v8189_v57, %v12623_v20 }
 0x105   : > { %v6451_v5 = vpop.eup %6450  ;;  %v6216_v37 = vmul.f32 -1.442695, %v8220_v4  ;;  %v2547_v31 = vadd.f32 %v2515_v19, %v2291_v2  ;;  %v8235_v48 = vrot.slane %v6788_v21, %v12602_v59  ;;  %v8239_v56 = vrot.slane %v6788_v21, %v12600_v44 }
 0x106   : > { %v6453_v24 = vpop.eup %6452  ;;  %v2957_v12 = vmul.f32 %v6451_v5, %v8069_v14  ;;  %v2675_v32 = vadd.f32 %v2643_v53, %v2419_v0  ;;  %v2036_v43 = vadd.f32 %v2004_v3, %v1812_v13  ;;  %v2164_v2 = vadd.f32 %v2132_v50, %v1908_v46  ;;  %v12658_v13 = vld [vmem:[#allocation14_spill] sm:$0xff]  ;;  %v8257_v46 = vld [vmem:[%s6985_s15 + $0x18] sm:$0xff] }
 0x107   : > { %12656 = vst [vmem:[#allocation20_spill] sm:$0xff] %v8235_v48  ;;  %12657 = vst [vmem:[#allocation34_spill] sm:$0xff] %v8239_v56  ;;  %v6455_v16 = vpop.eup %6454  ;;  %v2958_v42 = vmul.f32 %v6453_v24, %v8074_v23  ;;  %6460 = vpow2.f32 %v6216_v37  ;;  %v2260_v19 = vmul.f32 %v8235_v48, %v12625_v45  ;;  %v2388_v0 = vmul.f32 %v8239_v56, %v12627_v9  ;;  %v8264_v37 = vld [vmem:[%s6985_s15 + $0x28] sm:$0xff]  ;;  %v8282_v56 = vld [vmem:[%s6985_s15 + $0x78] sm:$0xff] }
 0x108   : > { %3095 = vrot.lane.b32.xlu0 %v2957_v12, %s6827_s20  ;;  %3030 = vst.msk [vmem:[#allocation3 + $0x18] sm:$0xff] %vm2988_vm1, %v2957_v12  ;;  %v2864_v14 = vadd.f32 1.0, %v6455_v16  ;;  %v2707_v53 = vadd.f32 %v2675_v32, %v2547_v31  ;;  %v8249_v3 = vrot.slane %v6788_v21, %v12658_v13  ;;  %v8254_v23 = vrot.slane %v6788_v21, %v12632_v61 }
 0x109   : > { %3031 = vst.msk [vmem:[#allocation3 + $0x20] sm:$0xff] %vm2988_vm1, %v2958_v42  ;;  %3097 = vrot.lane.b32.xlu1 %v2958_v42, %s6827_s20  ;;  %v8261_v5 = vrot.slane %v8257_v46, %v12651_v8  ;;  %v8268_v31 = vrot.slane %v8264_v37, %v12651_v8  ;;  %v8272_v50 = vrot.slane %v8140_v27, %v12651_v8  ;;  %v6457_v42 = vpop.eup %6456 }
 0x10a   : > { %12659 = vst [vmem:[#allocation35_spill] sm:$0xff] %v8249_v3  ;;  %12660 = vst [vmem:[#allocation36_spill] sm:$0xff] %v8254_v23  ;;  %6462 = vrcp.f32 %v2864_v14  ;;  %v8275_v21 = vadd.f32 %v2707_v53, %v7851_v26  ;;  %v2420_v24 = vadd.f32 %v2388_v0, %v2164_v2  ;;  %v2516_v12 = vmul.f32 %v8249_v3, %v7734_v52 }
 0x10b   : > { %12661 = vst [vmem:[#allocation37_spill] sm:$0xff] %v8261_v5  ;;  %12662 = vst [vmem:[#allocation39_spill] sm:$0xff] %v8268_v31  ;;  %v2865_v32 = vadd.f32 1.0, %v6457_v42  ;;  %v2292_v16 = vadd.f32 %v2260_v19, %v2036_v43  ;;  %v2644_v29 = vmul.f32 %v8254_v23, %v7778_v1  ;;  %v8286_v25 = vrot.slane %v8155_v47, %v12651_v8  ;;  %v6459_v48 = vpop.eup %6458 }
 0x10c   : > { %12663 = vst [vmem:[#allocation40_spill] sm:$0xff] %v8272_v50  ;;  %v6217_v14 = vmul.f32 -1.442695, %v8275_v21  ;;  %v8291_v2 = vrot.slane %v8158_v54, %v12651_v8  ;;  %v8295_v53 = vrot.slane %v8170_v63, %v12651_v8  ;;  %v8299_v43 = vrot.slane %v8282_v56, %v12651_v8 }
 0x10d   : > { %12664 = vst [vmem:[#allocation41_spill] sm:$0xff] %v8286_v25  ;;  %v2959_v19 = vmul.f32 %v6459_v48, %v8108_v55  ;;  %6464 = vrcp.f32 %v2865_v32  ;;  %v2548_v0 = vadd.f32 %v2516_v12, %v2292_v16  ;;  %v2676_v42 = vadd.f32 %v2644_v29, %v2420_v24  ;;  %v12669_v16 = vld [vmem:[#allocation78_spill] sm:$0xff] }
 0x10e   : > { %12665 = vst [vmem:[#allocation98_spill] sm:$0xff] %v8291_v2  ;;  %12666 = vst [vmem:[#allocation99_spill] sm:$0xff] %v8295_v53  ;;  %6466 = vpow2.f32 %v6217_v14  ;;  %v476_v26 = vmul.f32 %v12617_v60, %v8217_v39  ;;  %v480_v23 = vmul.f32 %v12617_v60, %v8261_v5  ;;  %v8308_v3 = vrot.slane %v8282_v56, %v12643_v38 }
 0x10f   : > { %12667 = vst [vmem:[#allocation101_spill] sm:$0xff] %v8299_v43  ;;  %3032 = vst.msk [vmem:[#allocation3 + $0x28] sm:$0xff] %vm2988_vm1, %v2959_v19  ;;  %3099 = vrot.lane.b32.xlu0 %v2959_v19, %s6827_s20  ;;  %v2708_v8 = vadd.f32 %v2676_v42, %v2548_v0  ;;  %v484_v55 = vmul.f32 %v12617_v60, %v8268_v31  ;;  %v488_v29 = vmul.f32 %v12617_v60, %v8272_v50  ;;  %v12670_v42 = vld [vmem:[#allocation80_spill] sm:$0xff] }
 0x110   : > { %12668 = vst [vmem:[#allocation102_spill] sm:$0xff] %v8308_v3  ;;  %v492_v48 = vmul.f32 %v12617_v60, %v8286_v25  ;;  %v496_v24 = vmul.f32 %v12617_v60, %v8291_v2  ;;  %v8322_v12 = vmul.f32 %v12617_v60, %v8295_v53  ;;  %v8326_v32 = vmul.f32 %v12617_v60, %v8299_v43  ;;  %v12671_v2 = vld [vmem:[#allocation81_spill] sm:$0xff] }
 0x111   : > { %v8330_v14 = vmul.f32 %v12619_v22, %v12669_v16  ;;  %v6461_v19 = vpop.eup %6460  ;;  %v8333_v0 = vadd.f32 %v2708_v8, %v7660_v10  ;;  %v8337_v25 = vmul.f32 %v12619_v22, %v12670_v42  ;;  %v8341_v53 = vmul.f32 %v12619_v22, %v12671_v2 }
 0x112   : > { %v8345_v43 = vmul.f32 %v12619_v22, %v8163_v6  ;;  %v2866_v50 = vadd.f32 1.0, %v6461_v19  ;;  %v8349_v16 = vmul.f32 %v12619_v22, %v8177_v33  ;;  %v8353_v8 = vrot.slane %v8213_v51, %v12652_v49 }
 0x113   : > { %v8357_v42 = vrot.slane %v8257_v46, %v12652_v49  ;;  %v6218_v2 = vmul.f32 -1.442695, %v8333_v0  ;;  %v8362_v31 = vrot.slane %v8264_v37, %v12652_v49  ;;  %v8366_v19 = vrot.slane %v8140_v27, %v12652_v49 }
 0x114   : > { %12672 = vst [vmem:[#allocation103_spill] sm:$0xff] %v8353_v8  ;;  %v8370_v33 = vrot.slane %v8155_v47, %v12652_v49  ;;  %v6463_v6 = vpop.eup %6462  ;;  %6468 = vrcp.f32 %v2866_v50  ;;  %v8374_v5 = vrot.slane %v8158_v54, %v12652_v49  ;;  %v8378_v39 = vrot.slane %v8170_v63, %v12652_v49 }
 0x115   : > { %12673 = vst [vmem:[#allocation49_spill] sm:$0xff] %v8357_v42  ;;  %12674 = vst [vmem:[#allocation50_spill] sm:$0xff] %v8362_v31  ;;  %v8382_v60 = vrot.slane %v8282_v56, %v12652_v49  ;;  %v2960_v38 = vmul.f32 %v6463_v6, %v8135_v58  ;;  %6470 = vpow2.f32 %v6218_v2  ;;  %v684_v41 = vmul.f32 %v12621_v62, %v8353_v8 }
 0x116   : > { %12675 = vst [vmem:[#allocation52_spill] sm:$0xff] %v8366_v19  ;;  %12676 = vst [vmem:[#allocation53_spill] sm:$0xff] %v8370_v33  ;;  %v688_v50 = vmul.f32 %v12621_v62, %v8357_v42  ;;  %v692_v57 = vmul.f32 %v12621_v62, %v8362_v31  ;;  %v696_v15 = vmul.f32 %v12621_v62, %v8366_v19 }
 0x117   : > { %12677 = vst [vmem:[#allocation54_spill] sm:$0xff] %v8374_v5  ;;  %12678 = vst [vmem:[#allocation55_spill] sm:$0xff] %v8378_v39  ;;  %v700_v40 = vmul.f32 %v12621_v62, %v8370_v33  ;;  %v704_v49 = vmul.f32 %v12621_v62, %v8374_v5  ;;  %v6465_v58 = vpop.eup %6464  ;;  %3101 = vrot.lane.b32.xlu1 %v2960_v38, %s6827_s20  ;;  %v600_v6 = vmul.f32 %v12619_v22, %v8181_v35 }
 0x118   : > { %12679 = vst [vmem:[#allocation56_spill] sm:$0xff] %v8382_v60  ;;  %3033 = vst.msk [vmem:[#allocation3 + $0x30] sm:$0xff] %vm2988_vm1, %v2960_v38  ;;  %v604_v2 = vmul.f32 %v12619_v22, %v8193_v11  ;;  %v608_v19 = vmul.f32 %v12619_v22, %v8308_v3  ;;  %v708_v33 = vmul.f32 %v12621_v62, %v8378_v39  ;;  %v6467_v31 = vpop.eup %6466 }
 0x119   : > { %v2961_v5 = vmul.f32 %v6465_v58, %v8173_v36  ;;  %v712_v42 = vmul.f32 %v12621_v62, %v8382_v60  ;;  %v716_v8 = vadd.f32 %v684_v41, %v476_v26  ;;  %v720_v38 = vadd.f32 %v688_v50, %v480_v23 }
 0x11a   : > { %v2867_v30 = vadd.f32 1.0, %v6467_v31  ;;  %v724_v18 = vadd.f32 %v692_v57, %v484_v55  ;;  %v728_v35 = vadd.f32 %v696_v15, %v488_v29  ;;  %v732_v17 = vadd.f32 %v700_v40, %v492_v48 }
 0x11b   : > { %3034 = vst.msk [vmem:[#allocation3 + $0x38] sm:$0xff] %vm2988_vm1, %v2961_v5  ;;  %3103 = vrot.lane.b32.xlu0 %v2961_v5, %s6827_s20  ;;  %v736_v3 = vadd.f32 %v704_v49, %v496_v24  ;;  %v8414_v39 = vrot.slane %v8213_v51, %v12647_v7  ;;  %v8418_v36 = vrot.slane %v8257_v46, %v12647_v7 }
 0x11c   : > { %v8422_v26 = vrot.slane %v8264_v37, %v12647_v7  ;;  %6472 = vrcp.f32 %v2867_v30  ;;  %v8426_v15 = vrot.slane %v8140_v27, %v12647_v7  ;;  %v8430_v41 = vrot.slane %v8155_v47, %v12647_v7 }
 0x11d   : > { %12680 = vst [vmem:[#allocation84_spill] sm:$0xff] %v8414_v39  ;;  %12681 = vst [vmem:[#allocation15_spill] sm:$0xff] %v8418_v36  ;;  %v8434_v57 = vrot.slane %v8158_v54, %v12647_v7  ;;  %v8438_v49 = vrot.slane %v8170_v63, %v12647_v7  ;;  %v8442_v40 = vrot.slane %v8282_v56, %v12647_v7 }
 0x11e   : > { %12682 = vst [vmem:[#allocation46_spill] sm:$0xff] %v8422_v26  ;;  %12683 = vst [vmem:[#allocation13_spill] sm:$0xff] %v8426_v15  ;;  %v820_v30 = vmul.f32 %v12623_v20, %v8414_v39  ;;  %v824_v23 = vmul.f32 %v12623_v20, %v8418_v36  ;;  %v828_v5 = vmul.f32 %v12623_v20, %v8422_v26  ;;  %v6469_v48 = vpop.eup %6468 }
 0x11f   : > { %12684 = vst [vmem:[#allocation51_spill] sm:$0xff] %v8430_v41  ;;  %12685 = vst [vmem:[#allocation104_spill] sm:$0xff] %v8434_v57  ;;  %v832_v31 = vmul.f32 %v12623_v20, %v8426_v15  ;;  %v836_v55 = vmul.f32 %v12623_v20, %v8430_v41  ;;  %v840_v29 = vmul.f32 %v12623_v20, %v8434_v57  ;;  %v6471_v26 = vpop.eup %6470 }
 0x120   : > { %12686 = vst [vmem:[#allocation16_spill] sm:$0xff] %v8438_v49  ;;  %12687 = vst [vmem:[#allocation9_spill] sm:$0xff] %v8442_v40  ;;  %v740_v24 = vadd.f32 %v708_v33, %v8322_v12  ;;  %v744_v50 = vadd.f32 %v712_v42, %v8326_v32  ;;  %v844_v58 = vmul.f32 %v12623_v20, %v8438_v49  ;;  %v2868_v39 = vadd.f32 1.0, %v6471_v26 }
 0x121   : > { %v848_v60 = vmul.f32 %v12623_v20, %v8442_v40  ;;  %v2962_v15 = vmul.f32 %v6469_v48, %v8220_v4  ;;  %v852_v36 = vadd.f32 %v820_v30, %v8330_v14  ;;  %v856_v41 = vadd.f32 %v824_v23, %v8337_v25 }
 0x122   : > { %v860_v57 = vadd.f32 %v828_v5, %v8341_v53  ;;  %v864_v33 = vadd.f32 %v832_v31, %v8345_v43  ;;  %v868_v12 = vadd.f32 %v836_v55, %v8349_v16  ;;  %v872_v32 = vadd.f32 %v840_v29, %v600_v6 }
 0x123   : > { %3035 = vst.msk [vmem:[#allocation3 + $0x40] sm:$0xff] %vm2988_vm1, %v2962_v15  ;;  %3105 = vrot.lane.b32.xlu1 %v2962_v15, %s6827_s20  ;;  %v8472_v42 = vrot.slane %v8213_v51, %v12602_v59  ;;  %v8476_v4 = vrot.slane %v8257_v46, %v12602_v59  ;;  %v8480_v25 = vrot.slane %v8264_v37, %v12602_v59  ;;  %6474 = vrcp.f32 %v2868_v39 }
 0x124   : > { %v8484_v53 = vrot.slane %v8140_v27, %v12602_v59  ;;  %v876_v43 = vadd.f32 %v844_v58, %v604_v2  ;;  %v8488_v16 = vrot.slane %v8155_v47, %v12602_v59  ;;  %v8492_v14 = vrot.slane %v8158_v54, %v12602_v59 }
 0x125   : > { %12688 = vst [vmem:[#allocation10_spill] sm:$0xff] %v8472_v42  ;;  %12689 = vst [vmem:[#allocation11_spill] sm:$0xff] %v8476_v4  ;;  %v8496_v6 = vrot.slane %v8170_v63, %v12602_v59  ;;  %v8500_v26 = vrot.slane %v8282_v56, %v12602_v59  ;;  %v956_v39 = vmul.f32 %v12625_v45, %v8472_v42 }
 0x126   : > { %12690 = vst [vmem:[#allocation19_spill] sm:$0xff] %v8480_v25  ;;  %12691 = vst [vmem:[#allocation23_spill] sm:$0xff] %v8484_v53  ;;  %v960_v2 = vmul.f32 %v12625_v45, %v8476_v4  ;;  %v964_v15 = vmul.f32 %v12625_v45, %v8480_v25  ;;  %v968_v30 = vmul.f32 %v12625_v45, %v8484_v53  ;;  %v6473_v31 = vpop.eup %6472 }
 0x127   : > { %12692 = vst [vmem:[#allocation24_spill] sm:$0xff] %v8488_v16  ;;  %12693 = vst [vmem:[#allocation31_spill] sm:$0xff] %v8492_v14  ;;  %v972_v23 = vmul.f32 %v12625_v45, %v8488_v16  ;;  %v976_v5 = vmul.f32 %v12625_v45, %v8492_v14  ;;  %v880_v55 = vadd.f32 %v848_v60, %v608_v19 }
 0x128   : > { %12694 = vst [vmem:[#allocation61_spill] sm:$0xff] %v8496_v6  ;;  %12695 = vst [vmem:[#allocation73_spill] sm:$0xff] %v8500_v26  ;;  %v980_v29 = vmul.f32 %v12625_v45, %v8496_v6  ;;  %v984_v48 = vmul.f32 %v12625_v45, %v8500_v26  ;;  %v988_v58 = vadd.f32 %v956_v39, %v716_v8 }
 0x129   : > { %v2963_v40 = vmul.f32 %v6473_v31, %v8275_v21  ;;  %v992_v25 = vadd.f32 %v960_v2, %v720_v38  ;;  %v996_v4 = vadd.f32 %v964_v15, %v724_v18  ;;  %v1000_v53 = vadd.f32 %v968_v30, %v728_v35 }
 0x12a   : > { %v1004_v42 = vadd.f32 %v972_v23, %v732_v17  ;;  %v1008_v49 = vadd.f32 %v976_v5, %v736_v3  ;;  %v1012_v16 = vadd.f32 %v980_v29, %v740_v24  ;;  %v8521_v14 = vrot.slane %v8213_v51, %v12600_v44 }
 0x12b   : > { %3036 = vst.msk [vmem:[#allocation3 + $0x48] sm:$0xff] %vm2988_vm1, %v2963_v40  ;;  %3107 = vrot.lane.b32.xlu0 %v2963_v40, %s6827_s20  ;;  %v8527_v60 = vrot.slane %v8257_v46, %v12600_v44  ;;  %v8531_v21 = vrot.slane %v8264_v37, %v12600_v44  ;;  %v8535_v17 = vrot.slane %v8140_v27, %v12600_v44 }
 0x12c   : > { %12696 = vst [vmem:[#allocation57_spill] sm:$0xff] %v8521_v14  ;;  %v8539_v35 = vrot.slane %v8155_v47, %v12600_v44  ;;  %v8543_v18 = vrot.slane %v8158_v54, %v12600_v44  ;;  %v8547_v3 = vrot.slane %v8170_v63, %v12600_v44  ;;  %v8551_v8 = vrot.slane %v8282_v56, %v12600_v44 }
 0x12d   : > { %12697 = vst [vmem:[#allocation74_spill] sm:$0xff] %v8527_v60  ;;  %12698 = vst [vmem:[#allocation62_spill] sm:$0xff] %v8531_v21  ;;  %v1092_v19 = vmul.f32 %v12627_v9, %v8521_v14  ;;  %v1096_v38 = vmul.f32 %v12627_v9, %v8527_v60  ;;  %v1100_v40 = vmul.f32 %v12627_v9, %v8531_v21  ;;  %v6475_v5 = vpop.eup %6474 }
 0x12e   : > { %12699 = vst [vmem:[#allocation97_spill] sm:$0xff] %v8535_v17  ;;  %12700 = vst [vmem:[#allocation58_spill] sm:$0xff] %v8539_v35  ;;  %v1104_v24 = vmul.f32 %v12627_v9, %v8535_v17  ;;  %v1108_v39 = vmul.f32 %v12627_v9, %v8539_v35  ;;  %v1016_v2 = vadd.f32 %v984_v48, %v744_v50 }
 0x12f   : > { %12701 = vst [vmem:[#allocation105_spill] sm:$0xff] %v8543_v18  ;;  %12702 = vst [vmem:[#allocation65_spill] sm:$0xff] %v8547_v3  ;;  %v1112_v15 = vmul.f32 %v12627_v9, %v8543_v18  ;;  %v1116_v30 = vmul.f32 %v12627_v9, %v8547_v3  ;;  %v1120_v23 = vmul.f32 %v12627_v9, %v8551_v8 }
 0x130   : > { %12703 = vst [vmem:[#allocation83_spill] sm:$0xff] %v8551_v8  ;;  %v1124_v31 = vadd.f32 %v1092_v19, %v852_v36  ;;  %v1128_v29 = vadd.f32 %v1096_v38, %v856_v41  ;;  %v1132_v26 = vadd.f32 %v1100_v40, %v860_v57  ;;  %v1136_v21 = vadd.f32 %v1104_v24, %v864_v33 }
 0x131   : > { %v2964_v17 = vmul.f32 %v6475_v5, %v8333_v0  ;;  %v1140_v60 = vadd.f32 %v1108_v39, %v868_v12  ;;  %v1144_v14 = vadd.f32 %v1112_v15, %v872_v32  ;;  %v1148_v35 = vadd.f32 %v1116_v30, %v876_v43 }
 0x132   : > { %v1152_v50 = vadd.f32 %v1120_v23, %v880_v55  ;;  %v8572_v48 = vrot.slane %v8213_v51, %v12658_v13  ;;  %v8576_v3 = vrot.slane %v8257_v46, %v12658_v13  ;;  %v8580_v36 = vrot.slane %v8264_v37, %v12658_v13 }
 0x133   : > { %3037 = vst.msk [vmem:[#allocation3 + $0x50] sm:$0xff] %vm2988_vm1, %v2964_v17  ;;  %3109 = vrot.lane.b32.xlu1 %v2964_v17, %s6827_s20  ;;  %v8586_v0 = vrot.slane %v8140_v27, %v12658_v13  ;;  %v8590_v41 = vrot.slane %v8155_v47, %v12658_v13  ;;  %v8594_v57 = vrot.slane %v8158_v54, %v12658_v13 }
 0x134   : > { %12704 = vst [vmem:[#allocation69_spill] sm:$0xff] %v8572_v48  ;;  %12705 = vst [vmem:[#allocation66_spill] sm:$0xff] %v8576_v3  ;;  %v8598_v33 = vrot.slane %v8170_v63, %v12658_v13  ;;  %v8602_v12 = vrot.slane %v8282_v56, %v12658_v13  ;;  %v1228_v32 = vmul.f32 %v7734_v52, %v8572_v48 }
 0x135   : > { %12706 = vst [vmem:[#allocation75_spill] sm:$0xff] %v8580_v36  ;;  %12707 = vst [vmem:[#allocation17_spill] sm:$0xff] %v8586_v0  ;;  %v1232_v43 = vmul.f32 %v7734_v52, %v8576_v3  ;;  %v1236_v55 = vmul.f32 %v7734_v52, %v8580_v36  ;;  %v1240_v17 = vmul.f32 %v7734_v52, %v8586_v0 }
 0x136   : > { %12708 = vst [vmem:[#allocation63_spill] sm:$0xff] %v8590_v41  ;;  %12709 = vst [vmem:[#allocation59_spill] sm:$0xff] %v8594_v57  ;;  %v1244_v19 = vmul.f32 %v7734_v52, %v8590_v41  ;;  %v1248_v38 = vmul.f32 %v7734_v52, %v8594_v57  ;;  %v1252_v40 = vmul.f32 %v7734_v52, %v8598_v33 }
 0x137   : > { %12710 = vst [vmem:[#allocation67_spill] sm:$0xff] %v8598_v33  ;;  %12711 = vst [vmem:[#allocation68_spill] sm:$0xff] %v8602_v12  ;;  %v1256_v24 = vmul.f32 %v7734_v52, %v8602_v12  ;;  %v1260_v39 = vadd.f32 %v1228_v32, %v988_v58  ;;  %v1264_v15 = vadd.f32 %v1232_v43, %v992_v25 }
 0x138   : > { %v1268_v30 = vadd.f32 %v1236_v55, %v996_v4  ;;  %v1272_v23 = vadd.f32 %v1240_v17, %v1000_v53  ;;  %v1276_v5 = vadd.f32 %v1244_v19, %v1004_v42  ;;  %v1280_v8 = vadd.f32 %v1248_v38, %v1008_v49 }
 0x139   : > { %v1284_v36 = vadd.f32 %v1252_v40, %v1012_v16  ;;  %v1288_v0 = vadd.f32 %v1256_v24, %v1016_v2  ;;  %v8622_v41 = vrot.slane %v8213_v51, %v12632_v61  ;;  %v8626_v57 = vrot.slane %v8257_v46, %v12632_v61 }
 0x13a   : > { %v8630_v33 = vrot.slane %v8264_v37, %v12632_v61  ;;  %v8634_v4 = vrot.slane %v8140_v27, %v12632_v61  ;;  %v8638_v49 = vrot.slane %v8155_v47, %v12632_v61  ;;  %v8642_v51 = vrot.slane %v8158_v54, %v12632_v61 }
 0x13b   : > { %12712 = vst [vmem:[#allocation76_spill] sm:$0xff] %v8622_v41  ;;  %12713 = vst [vmem:[#allocation79_spill] sm:$0xff] %v8626_v57  ;;  %v8646_v46 = vrot.slane %v8170_v63, %v12632_v61  ;;  %v8650_v37 = vrot.slane %v8282_v56, %v12632_v61  ;;  %v1364_v27 = vmul.f32 %v7778_v1, %v8622_v41 }
 0x13c   : > { %12714 = vst [vmem:[#allocation70_spill] sm:$0xff] %v8630_v33  ;;  %12715 = vst [vmem:[#allocation64_spill] sm:$0xff] %v8634_v4  ;;  %v1368_v42 = vmul.f32 %v7778_v1, %v8626_v57  ;;  %v1372_v47 = vmul.f32 %v7778_v1, %v8630_v33  ;;  %v1376_v54 = vmul.f32 %v7778_v1, %v8634_v4 }
 0x13d   : > { %12716 = vst [vmem:[#allocation77_spill] sm:$0xff] %v8638_v49  ;;  %12717 = vst [vmem:[#allocation71_spill] sm:$0xff] %v8642_v51  ;;  %v1380_v63 = vmul.f32 %v7778_v1, %v8638_v49  ;;  %v1384_v25 = vmul.f32 %v7778_v1, %v8642_v51  ;;  %v1388_v56 = vmul.f32 %v7778_v1, %v8646_v46 }
 0x13e   : > { %12718 = vst [vmem:[#allocation60_spill] sm:$0xff] %v8646_v46  ;;  %12719 = vst [vmem:[#allocation14_spill] sm:$0xff] %v8650_v37  ;;  %v1392_v53 = vmul.f32 %v7778_v1, %v8650_v37  ;;  %v1396_v16 = vadd.f32 %v1364_v27, %v1124_v31  ;;  %v1400_v58 = vadd.f32 %v1368_v42, %v1128_v29  ;;  %v12725_v42 = vld [vmem:[#allocation91_spill] sm:$0xff]  ;;  %v12738_v37 = vld [vmem:[#allocation100_spill] sm:$0xff] }
 0x13f   : > { %v1404_v2 = vadd.f32 %v1372_v47, %v1132_v26  ;;  %v1408_v32 = vadd.f32 %v1376_v54, %v1136_v21  ;;  %v1412_v43 = vadd.f32 %v1380_v63, %v1140_v60  ;;  %v1416_v55 = vadd.f32 %v1384_v25, %v1144_v14  ;;  %v12726_v47 = vld [vmem:[#allocation47_spill] sm:$0xff]  ;;  %v12727_v63 = vld [vmem:[#allocation21_spill] sm:$0xff]  ;;  %v12728_v25 = vld [vmem:[#allocation20_spill] sm:$0xff] }
 0x140   : > { %v1420_v17 = vadd.f32 %v1388_v56, %v1148_v35  ;;  %v1424_v19 = vadd.f32 %v1392_v53, %v1152_v50  ;;  %v1428_v38 = vadd.f32 %v1396_v16, %v1260_v39  ;;  %v1432_v40 = vadd.f32 %v1400_v58, %v1264_v15  ;;  %v1729_v53 = vld [vmem:[%s6991_s14 + $0x28] sm:$0xff]  ;;  %v12730_v16 = vld [vmem:[#allocation34_spill] sm:$0xff] }
 0x141   : > { %v1436_v24 = vadd.f32 %v1404_v2, %v1268_v30  ;;  %v1440_v12 = vadd.f32 %v1408_v32, %v1272_v23  ;;  %v1444_v49 = vadd.f32 %v1412_v43, %v1276_v5  ;;  %v1448_v51 = vadd.f32 %v1416_v55, %v1280_v8  ;;  %v12721_v23 = vld [vmem:[#allocation89_spill] sm:$0xff]  ;;  %v12722_v5 = vld [vmem:[#allocation72_spill] sm:$0xff]  ;;  %v12731_v2 = vld [vmem:[#allocation94_spill] sm:$0xff] }
 0x142   : > { %v1452_v4 = vadd.f32 %v1420_v17, %v1284_v36  ;;  %v1456_v33 = vadd.f32 %v1424_v19, %v1288_v0  ;;  %v8669_v46 = vadd.f32 %v7660_v10, %v1428_v38  ;;  %v8672_v31 = vadd.f32 %v7660_v10, %v1432_v40  ;;  %v12732_v32 = vld [vmem:[#allocation35_spill] sm:$0xff]  ;;  %v12733_v55 = vld [vmem:[#allocation85_spill] sm:$0xff]  ;;  %v12734_v17 = vld [vmem:[#allocation36_spill] sm:$0xff] }
 0x143   : > { %v8675_v26 = vadd.f32 %v7660_v10, %v1436_v24  ;;  %v8678_v14 = vadd.f32 %v7660_v10, %v1440_v12  ;;  %v8681_v60 = vadd.f32 %v7660_v10, %v1444_v49  ;;  %v8684_v21 = vadd.f32 %v7660_v10, %v1448_v51  ;;  %v12723_v49 = vld [vmem:[#allocation92_spill] sm:$0xff]  ;;  %v12724_v51 = vld [vmem:[#allocation30_spill] sm:$0xff] }
 0x144   : > { %v8687_v35 = vadd.f32 %v7660_v10, %v1452_v4  ;;  %v8690_v8 = vadd.f32 %v7660_v10, %v1456_v33  ;;  %v6180_v29 = vmul.f32 -1.442695, %v8669_v46  ;;  %v6184_v50 = vmul.f32 -1.442695, %v8672_v31  ;;  %v12735_v24 = vld [vmem:[#allocation12_spill] sm:$0xff] }
 0x145   : > { %v6188_v36 = vmul.f32 -1.442695, %v8675_v26  ;;  %v6192_v0 = vmul.f32 -1.442695, %v8678_v14  ;;  %v6196_v12 = vmul.f32 -1.442695, %v8681_v60  ;;  %v1813_v15 = vmul.f32 %v8203_v28, %v12604_v34 }
 0x146   : > { %12720 = vst [vmem:[#allocation106_spill] sm:$0xff] %v8690_v8  ;;  %v6200_v39 = vmul.f32 -1.442695, %v8684_v21  ;;  %6476 = vpow2.f32 %v6180_v29  ;;  %v6204_v33 = vmul.f32 -1.442695, %v8687_v35  ;;  %v1909_v4 = vmul.f32 %v12722_v5, %v12721_v23  ;;  %v12729_v28 = vld [vmem:[#allocation82_spill] sm:$0xff] }
 0x147   : > { %v6208_v30 = vmul.f32 -1.442695, %v8690_v8  ;;  %6478 = vpow2.f32 %v6184_v50  ;;  %v2005_v27 = vmul.f32 %v12724_v51, %v12723_v49  ;;  %v2133_v54 = vmul.f32 %v12726_v47, %v12725_v42  ;;  %v12736_v50 = vld [vmem:[#allocation6_spill] sm:$0xff]  ;;  %v12737_v51 = vld [vmem:[#allocation7_spill] sm:$0xff] }
 0x148   : > { %v2261_v56 = vmul.f32 %v12728_v25, %v12727_v63  ;;  %6480 = vpow2.f32 %v6188_v36  ;;  %v2389_v58 = vmul.f32 %v12730_v16, %v12729_v28  ;;  %v2517_v43 = vmul.f32 %v12732_v32, %v12731_v2 }
 0x149   : > { %v2645_v19 = vmul.f32 %v12734_v17, %v12733_v55  ;;  %6482 = vpow2.f32 %v6192_v0  ;;  %v2037_v38 = vadd.f32 %v2005_v27, %v1813_v15  ;;  %v2165_v40 = vadd.f32 %v2133_v54, %v1909_v4 }
 0x14a   : > { %v1763_v29 = vrot.slane %v1729_v53, %v12735_v24  ;;  %6484 = vpow2.f32 %v6196_v12  ;;  %v1859_v5 = vrot.slane %v1729_v53, %v12736_v50  ;;  %v1955_v47 = vrot.slane %v1729_v53, %v12737_v51 }
 0x14b   : > { %v2083_v36 = vrot.slane %v1729_v53, %v12647_v7  ;;  %6486 = vpow2.f32 %v6200_v39  ;;  %v2293_v25 = vadd.f32 %v2261_v56, %v2037_v38  ;;  %v2421_v16 = vadd.f32 %v2389_v58, %v2165_v40 }
 0x14c   : > { %v1814_v32 = vmul.f32 %v1763_v29, %v12738_v37  ;;  %6488 = vpow2.f32 %v6204_v33  ;;  %v2006_v17 = vmul.f32 %v1955_v47, %v12621_v62  ;;  %v2211_v12 = vrot.slane %v1729_v53, %v12602_v59 }
 0x14d   : > { %v2134_v0 = vmul.f32 %v2083_v36, %v12623_v20  ;;  %6490 = vpow2.f32 %v6208_v30  ;;  %v2549_v15 = vadd.f32 %v2517_v43, %v2293_v25  ;;  %v2677_v4 = vadd.f32 %v2645_v19, %v2421_v16 }
 0x14e   : > { %v1910_v27 = vmul.f32 %v1859_v5, %v12619_v22  ;;  %v2038_v54 = vadd.f32 %v2006_v17, %v1814_v32  ;;  %v2339_v57 = vrot.slane %v1729_v53, %v12600_v44  ;;  %v2467_v39 = vrot.slane %v1729_v53, %v12658_v13  ;;  %v12739_v32 = vld [vmem:[#allocation22_spill] sm:$0xff] }
 0x14f   : > { %v2709_v56 = vadd.f32 %v2677_v4, %v2549_v15  ;;  %v2262_v58 = vmul.f32 %v2211_v12, %v12625_v45  ;;  %v2595_v33 = vrot.slane %v1729_v53, %v12632_v61  ;;  %v1815_v19 = vmul.f32 %v1763_v29, %v12604_v34 }
 0x150   : > { %v6477_v38 = vpop.eup %6476  ;;  %v2166_v40 = vadd.f32 %v2134_v0, %v1910_v27  ;;  %v2390_v30 = vmul.f32 %v2339_v57, %v12627_v9  ;;  %v2518_v43 = vmul.f32 %v2467_v39, %v7734_v52  ;;  %v1911_v53 = vmul.f32 %v1859_v5, %v12721_v23 }
 0x151   : > { %v6479_v25 = vpop.eup %6478  ;;  %v1598_v16 = vadd.f32 1.0, %v6477_v38  ;;  %v8734_v17 = vadd.f32 %v2709_v56, %v12739_v32  ;;  %v2294_v41 = vadd.f32 %v2262_v58, %v2038_v54  ;;  %v2646_v15 = vmul.f32 %v2595_v33, %v7778_v1 }
 0x152   : > { %v6481_v4 = vpop.eup %6480  ;;  %v1602_v3 = vadd.f32 1.0, %v6479_v25  ;;  %v2422_v48 = vadd.f32 %v2390_v30, %v2166_v40  ;;  %v2007_v0 = vmul.f32 %v1955_v47, %v12723_v49  ;;  %v2135_v40 = vmul.f32 %v2083_v36, %v12725_v42 }
 0x153   : > { %v6483_v27 = vpop.eup %6482  ;;  %v1606_v18 = vadd.f32 1.0, %v6481_v4  ;;  %6492 = vrcp.f32 %v1598_v16  ;;  %v6219_v29 = vmul.f32 -1.442695, %v8734_v17  ;;  %v2550_v6 = vadd.f32 %v2518_v43, %v2294_v41 }
 0x154   : > { %v6485_v38 = vpop.eup %6484  ;;  %v1610_v11 = vadd.f32 1.0, %v6483_v27  ;;  %6494 = vrcp.f32 %v1602_v3  ;;  %v2678_v56 = vadd.f32 %v2646_v15, %v2422_v48  ;;  %v2039_v54 = vadd.f32 %v2007_v0, %v1815_v19  ;;  %v1730_v19 = vld [vmem:[%s6991_s14 + $0x30] sm:$0xff] }
 0x155   : > { %v6487_v58 = vpop.eup %6486  ;;  %v1614_v8 = vadd.f32 1.0, %v6485_v38  ;;  %6496 = vrcp.f32 %v1606_v18  ;;  %v2263_v5 = vmul.f32 %v2211_v12, %v12727_v63  ;;  %v2391_v16 = vmul.f32 %v2339_v57, %v12729_v28 }
 0x156   : > { %v6489_v47 = vpop.eup %6488  ;;  %v1618_v30 = vadd.f32 1.0, %v6487_v58  ;;  %6498 = vrcp.f32 %v1610_v11  ;;  %v2710_v25 = vadd.f32 %v2678_v56, %v2550_v6  ;;  %v2167_v3 = vadd.f32 %v2135_v40, %v1911_v53 }
 0x157   : > { %v6491_v41 = vpop.eup %6490  ;;  %v1622_v43 = vadd.f32 1.0, %v6489_v47  ;;  %6500 = vrcp.f32 %v1614_v8  ;;  %v2295_v48 = vadd.f32 %v2263_v5, %v2039_v54  ;;  %v2519_v36 = vmul.f32 %v2467_v39, %v12731_v2 }
 0x158   : > { %v1626_v15 = vadd.f32 1.0, %v6491_v41  ;;  %6502 = vrcp.f32 %v1618_v30  ;;  %v8745_v18 = vadd.f32 %v2710_v25, %v7660_v10  ;;  %v2423_v12 = vadd.f32 %v2391_v16, %v2167_v3 }
 0x159   : > { %6504 = vrcp.f32 %v1622_v43  ;;  %v2647_v11 = vmul.f32 %v2595_v33, %v12733_v55  ;;  %v1767_v6 = vrot.slane %v1730_v19, %v12735_v24  ;;  %v2551_v8 = vadd.f32 %v2519_v36, %v2295_v48 }
 0x15a   : > { %6506 = vrcp.f32 %v1626_v15  ;;  %v6220_v57 = vmul.f32 -1.442695, %v8745_v18  ;;  %v1863_v4 = vrot.slane %v1730_v19, %v12736_v50  ;;  %v1959_v27 = vrot.slane %v1730_v19, %v12737_v51 }
 0x15b   : > { %6508 = vpow2.f32 %v6219_v29  ;;  %v2679_v53 = vadd.f32 %v2647_v11, %v2423_v12  ;;  %v1816_v0 = vmul.f32 %v1767_v6, %v12738_v37  ;;  %v2087_v38 = vrot.slane %v1730_v19, %v12647_v7 }
 0x15c   : > { %6510 = vpow2.f32 %v6220_v57  ;;  %v1912_v39 = vmul.f32 %v1863_v4, %v12619_v22  ;;  %v2215_v33 = vrot.slane %v1730_v19, %v12602_v59  ;;  %v2008_v58 = vmul.f32 %v1959_v27, %v12621_v62 }
 0x15d   : > { %v6493_v56 = vpop.eup %6492  ;;  %v2711_v54 = vadd.f32 %v2679_v53, %v2551_v8  ;;  %v2343_v40 = vrot.slane %v1730_v19, %v12600_v44  ;;  %v2471_v29 = vrot.slane %v1730_v19, %v12658_v13  ;;  %v2136_v30 = vmul.f32 %v2087_v38, %v12623_v20 }
 0x15e   : > { %v6495_v5 = vpop.eup %6494  ;;  %v1694_v47 = vmul.f32 %v6493_v56, %v8669_v46  ;;  %v2264_v25 = vmul.f32 %v2215_v33, %v12625_v45  ;;  %v2599_v16 = vrot.slane %v1730_v19, %v12632_v61  ;;  %v2040_v48 = vadd.f32 %v2008_v58, %v1816_v0 }
 0x15f   : > { %v6497_v41 = vpop.eup %6496  ;;  %v1698_v43 = vmul.f32 %v6495_v5, %v8672_v31  ;;  %v8766_v3 = vadd.f32 %v2711_v54, %v12739_v32  ;;  %v2392_v15 = vmul.f32 %v2343_v40, %v12627_v9  ;;  %v2168_v46 = vadd.f32 %v2136_v30, %v1912_v39 }
 0x160   : > { %v6499_v36 = vpop.eup %6498  ;;  %v1702_v12 = vmul.f32 %v6497_v41, %v8675_v26  ;;  %2998 = vst.msk [vmem:[#allocation2 + $0x20] sm:$0xff] %vm2988_vm1, %v1694_v47  ;;  %v2520_v11 = vmul.f32 %v2471_v29, %v7734_v52  ;;  %v2648_v57 = vmul.f32 %v2599_v16, %v7778_v1  ;;  %v2296_v53 = vadd.f32 %v2264_v25, %v2040_v48 }
 0x161   : > { %v6501_v19 = vpop.eup %6500  ;;  %v1706_v8 = vmul.f32 %v6499_v36, %v8678_v14  ;;  %3002 = vst.msk [vmem:[#allocation2 + $0x40] sm:$0xff] %vm2988_vm1, %v1698_v43  ;;  %v6221_v31 = vmul.f32 -1.442695, %v8766_v3  ;;  %v2424_v26 = vadd.f32 %v2392_v15, %v2168_v46  ;;  %v1817_v39 = vmul.f32 %v1767_v6, %v12604_v34  ;;  %v12740_v43 = vld [vmem:[#allocation106_spill] sm:$0xff] }
 0x162   : > { %v6503_v0 = vpop.eup %6502  ;;  %v1710_v56 = vmul.f32 %v6501_v19, %v8681_v60  ;;  %3006 = vst.msk [vmem:[#allocation2 + $0x60] sm:$0xff] %vm2988_vm1, %v1702_v12  ;;  %v2552_v14 = vadd.f32 %v2520_v11, %v2296_v53  ;;  %v1913_v5 = vmul.f32 %v1863_v4, %v12721_v23  ;;  %v2009_v25 = vmul.f32 %v1959_v27, %v12723_v49  ;;  %v1731_v27 = vld [vmem:[%s6991_s14 + $0x38] sm:$0xff] }
 0x163   : > { %v6505_v54 = vpop.eup %6504  ;;  %v1714_v58 = vmul.f32 %v6503_v0, %v8684_v21  ;;  %3010 = vst.msk [vmem:[#allocation2 + $0x80] sm:$0xff] %vm2988_vm1, %v1706_v8  ;;  %6512 = vpow2.f32 %v6221_v31  ;;  %v2680_v60 = vadd.f32 %v2648_v57, %v2424_v26  ;;  %v2137_v6 = vmul.f32 %v2087_v38, %v12725_v42 }
 0x164   : > { %v6507_v47 = vpop.eup %6506  ;;  %v1718_v30 = vmul.f32 %v6505_v54, %v8687_v35  ;;  %3014 = vst.msk [vmem:[#allocation2 + $0xa0] sm:$0xff] %vm2988_vm1, %v1710_v56  ;;  %v2265_v48 = vmul.f32 %v2215_v33, %v12727_v63  ;;  %v2393_v4 = vmul.f32 %v2343_v40, %v12729_v28  ;;  %v2041_v12 = vadd.f32 %v2009_v25, %v1817_v39 }
 0x165   : > { %v6509_v41 = vpop.eup %6508  ;;  %v1722_v21 = vmul.f32 %v6507_v47, %v12740_v43  ;;  %3018 = vst.msk [vmem:[#allocation2 + $0xc0] sm:$0xff] %vm2988_vm1, %v1714_v58  ;;  %v2712_v36 = vadd.f32 %v2680_v60, %v2552_v14  ;;  %v2521_v46 = vmul.f32 %v2471_v29, %v12731_v2  ;;  %v2169_v11 = vadd.f32 %v2137_v6, %v1913_v5 }
 0x166   : > { %v6511_v15 = vpop.eup %6510  ;;  %3022 = vst.msk [vmem:[#allocation2 + $0xe0] sm:$0xff] %vm2988_vm1, %v1718_v30  ;;  %v2869_v35 = vadd.f32 1.0, %v6509_v41  ;;  %v2649_v57 = vmul.f32 %v2599_v16, %v12733_v55  ;;  %v1771_v19 = vrot.slane %v1731_v27, %v12735_v24  ;;  %v2297_v40 = vadd.f32 %v2265_v48, %v2041_v12 }
 0x167   : > { %3026 = vst.msk [vmem:[#allocation2 + $0x100] sm:$0xff] %vm2988_vm1, %v1722_v21  ;;  %v2870_v38 = vadd.f32 1.0, %v6511_v15  ;;  %v8797_v33 = vadd.f32 %v2712_v36, %v7660_v10  ;;  %v2425_v8 = vadd.f32 %v2393_v4, %v2169_v11  ;;  %v1867_v31 = vrot.slane %v1731_v27, %v12736_v50  ;;  %v8819_v11 = vpop.permute.xlu1 %3277 }
 0x168   : > { %6514 = vrcp.f32 %v2869_v35  ;;  %v1818_v53 = vmul.f32 %v1771_v19, %v12738_v37  ;;  %v2553_v0 = vadd.f32 %v2521_v46, %v2297_v40  ;;  %v1963_v26 = vrot.slane %v1731_v27, %v12737_v51  ;;  %12741 = vst [vmem:[#allocation89_spill] sm:$0xff] %v8819_v11 }
 0x169   : > { %6516 = vrcp.f32 %v2870_v38  ;;  %v6222_v29 = vmul.f32 -1.442695, %v8797_v33  ;;  %v2681_v56 = vadd.f32 %v2649_v57, %v2425_v8  ;;  %v2091_v16 = vrot.slane %v1731_v27, %v12647_v7 }
 0x16a   : > { %v2219_v39 = vrot.slane %v1731_v27, %v12602_v59  ;;  %v2347_v54 = vrot.slane %v1731_v27, %v12600_v44  ;;  %v1914_v5 = vmul.f32 %v1867_v31, %v12619_v22  ;;  %v2010_v47 = vmul.f32 %v1963_v26, %v12621_v62 }
 0x16b   : > { %6518 = vpow2.f32 %v6222_v29  ;;  %v2713_v14 = vadd.f32 %v2681_v56, %v2553_v0  ;;  %v2138_v30 = vmul.f32 %v2091_v16, %v12623_v20  ;;  %v2475_v48 = vrot.slane %v1731_v27, %v12658_v13 }
 0x16c   : > { %v2266_v25 = vmul.f32 %v2219_v39, %v12625_v45  ;;  %v2394_v6 = vmul.f32 %v2347_v54, %v12627_v9  ;;  %v2042_v43 = vadd.f32 %v2010_v47, %v1818_v53  ;;  %v2603_v4 = vrot.slane %v1731_v27, %v12632_v61 }
 0x16d   : > { %v6513_v58 = vpop.eup %6512  ;;  %v8812_v41 = vadd.f32 %v2713_v14, %v12739_v32  ;;  %v2170_v21 = vadd.f32 %v2138_v30, %v1914_v5  ;;  %v1819_v15 = vmul.f32 %v1771_v19, %v12604_v34  ;;  %v1915_v46 = vmul.f32 %v1867_v31, %v12721_v23  ;;  %v1732_v31 = vld [vmem:[%s6991_s14 + $0x40] sm:$0xff]  ;;  %v8835_v30 = vpop.permute.xlu1 %3318 }
 0x16e   : > { %v2871_v60 = vadd.f32 1.0, %v6513_v58  ;;  %v2298_v36 = vadd.f32 %v2266_v25, %v2042_v43  ;;  %v2522_v57 = vmul.f32 %v2475_v48, %v7734_v52  ;;  %v2650_v40 = vmul.f32 %v2603_v4, %v7778_v1  ;;  %12742 = vst [vmem:[#allocation72_spill] sm:$0xff] %v8835_v30 }
 0x16f   : > { %v6223_v35 = vmul.f32 -1.442695, %v8812_v41  ;;  %v2426_v12 = vadd.f32 %v2394_v6, %v2170_v21  ;;  %v2011_v8 = vmul.f32 %v1963_v26, %v12723_v49  ;;  %v2139_v27 = vmul.f32 %v2091_v16, %v12725_v42 }
 0x170   : > { %6520 = vrcp.f32 %v2871_v60  ;;  %v2267_v53 = vmul.f32 %v2219_v39, %v12727_v63  ;;  %v2395_v0 = vmul.f32 %v2347_v54, %v12729_v28  ;;  %v2554_v58 = vadd.f32 %v2522_v57, %v2298_v36 }
 0x171   : > { %6522 = vpow2.f32 %v6223_v35  ;;  %v2682_v14 = vadd.f32 %v2650_v40, %v2426_v12  ;;  %v2043_v5 = vadd.f32 %v2011_v8, %v1819_v15  ;;  %v2171_v26 = vadd.f32 %v2139_v27, %v1915_v46 }
 0x172   : > { %v6515_v38 = vpop.eup %6514  ;;  %v2523_v16 = vmul.f32 %v2475_v48, %v12731_v2  ;;  %v1775_v47 = vrot.slane %v1732_v31, %v12735_v24  ;;  %v1871_v60 = vrot.slane %v1732_v31, %v12736_v50  ;;  %v1967_v25 = vrot.slane %v1732_v31, %v12737_v51 }
 0x173   : > { %v6517_v29 = vpop.eup %6516  ;;  %v2965_v19 = vmul.f32 %v6515_v38, %v8734_v17  ;;  %v2651_v17 = vmul.f32 %v2603_v4, %v12733_v55  ;;  %v2299_v54 = vadd.f32 %v2267_v53, %v2043_v5  ;;  %v2427_v43 = vadd.f32 %v2395_v0, %v2171_v26 }
 0x174   : > { %v2966_v56 = vmul.f32 %v6517_v29, %v8745_v18  ;;  %v2714_v18 = vadd.f32 %v2682_v14, %v2554_v58  ;;  %v1820_v21 = vmul.f32 %v1775_v47, %v12738_v37  ;;  %v2095_v48 = vrot.slane %v1732_v31, %v12647_v7  ;;  %v8855_v58 = vpop.permute.xlu1 %3358 }
 0x175   : > { %3038 = vst.msk [vmem:[#allocation3 + $0x58] sm:$0xff] %vm2988_vm1, %v2965_v19  ;;  %3111 = vrot.lane.b32.xlu0 %v2965_v19, %s6827_s20  ;;  %v6519_v39 = vpop.eup %6518  ;;  %v2555_v15 = vadd.f32 %v2523_v16, %v2299_v54  ;;  %v1916_v35 = vmul.f32 %v1871_v60, %v12619_v22  ;;  %v2012_v36 = vmul.f32 %v1967_v25, %v12621_v62  ;;  %12743 = vst [vmem:[#allocation92_spill] sm:$0xff] %v8855_v58 }
 0x176   : > { %3039 = vst.msk [vmem:[#allocation3 + $0x60] sm:$0xff] %vm2988_vm1, %v2966_v56  ;;  %3113 = vrot.lane.b32.xlu1 %v2966_v56, %s6827_s20  ;;  %v2872_v6 = vadd.f32 1.0, %v6519_v39  ;;  %v8844_v4 = vadd.f32 %v2714_v18, %v7660_v10  ;;  %v2683_v12 = vadd.f32 %v2651_v17, %v2427_v43  ;;  %v2140_v46 = vmul.f32 %v2095_v48, %v12623_v20 }
 0x177   : > { %v2223_v38 = vrot.slane %v1732_v31, %v12602_v59  ;;  %v2044_v8 = vadd.f32 %v2012_v36, %v1820_v21  ;;  %v2351_v27 = vrot.slane %v1732_v31, %v12600_v44  ;;  %v2479_v29 = vrot.slane %v1732_v31, %v12658_v13 }
 0x178   : > { %6524 = vrcp.f32 %v2872_v6  ;;  %v6224_v40 = vmul.f32 -1.442695, %v8844_v4  ;;  %v2715_v53 = vadd.f32 %v2683_v12, %v2555_v15  ;;  %v2172_v0 = vadd.f32 %v2140_v46, %v1916_v35  ;;  %v1733_v46 = vld [vmem:[%s6991_s14 + $0x48] sm:$0xff] }
 0x179   : > { %v2268_v56 = vmul.f32 %v2223_v38, %v12625_v45  ;;  %v2396_v14 = vmul.f32 %v2351_v27, %v12627_v9  ;;  %v2524_v5 = vmul.f32 %v2479_v29, %v7734_v52  ;;  %v2607_v26 = vrot.slane %v1732_v31, %v12632_v61 }
 0x17a   : > { %v6521_v57 = vpop.eup %6520  ;;  %6526 = vpow2.f32 %v6224_v40  ;;  %v1821_v39 = vmul.f32 %v1775_v47, %v12604_v34  ;;  %v1917_v31 = vmul.f32 %v1871_v60, %v12721_v23  ;;  %v2013_v15 = vmul.f32 %v1967_v25, %v12723_v49 }
 0x17b   : > { %v2967_v19 = vmul.f32 %v6521_v57, %v8766_v3  ;;  %v6523_v16 = vpop.eup %6522  ;;  %v8863_v3 = vadd.f32 %v2715_v53, %v12739_v32  ;;  %v2300_v17 = vadd.f32 %v2268_v56, %v2044_v8  ;;  %v2428_v54 = vadd.f32 %v2396_v14, %v2172_v0  ;;  %v8875_v8 = vpop.permute.xlu1 %3362 }
 0x17c   : > { %v2873_v18 = vadd.f32 1.0, %v6523_v16  ;;  %v2652_v6 = vmul.f32 %v2607_v26, %v7778_v1  ;;  %v2141_v36 = vmul.f32 %v2095_v48, %v12725_v42  ;;  %v2269_v12 = vmul.f32 %v2223_v38, %v12727_v63 }
 0x17d   : > { %3040 = vst.msk [vmem:[#allocation3 + $0x68] sm:$0xff] %vm2988_vm1, %v2967_v19  ;;  %3115 = vrot.lane.b32.xlu0 %v2967_v19, %s6827_s20  ;;  %v6225_v43 = vmul.f32 -1.442695, %v8863_v3  ;;  %v2556_v21 = vadd.f32 %v2524_v5, %v2300_v17  ;;  %v2045_v47 = vadd.f32 %v2013_v15, %v1821_v39  ;;  %v2397_v57 = vmul.f32 %v2351_v27, %v12729_v28 }
 0x17e   : > { %6528 = vrcp.f32 %v2873_v18  ;;  %v2684_v35 = vadd.f32 %v2652_v6, %v2428_v54  ;;  %v2525_v40 = vmul.f32 %v2479_v29, %v12731_v2  ;;  %v2173_v53 = vadd.f32 %v2141_v36, %v1917_v31 }
 0x17f   : > { %6530 = vpow2.f32 %v6225_v43  ;;  %v2653_v60 = vmul.f32 %v2607_v26, %v12733_v55  ;;  %v1779_v25 = vrot.slane %v1733_v46, %v12735_v24  ;;  %v2301_v56 = vadd.f32 %v2269_v12, %v2045_v47  ;;  %v8888_v18 = vpop.permute.xlu1 %3418 }
 0x180   : > { %v2716_v19 = vadd.f32 %v2684_v35, %v2556_v21  ;;  %v1875_v48 = vrot.slane %v1733_v46, %v12736_v50  ;;  %v1971_v38 = vrot.slane %v1733_v46, %v12737_v51  ;;  %v2099_v14 = vrot.slane %v1733_v46, %v12647_v7 }
 0x181   : > { %v2429_v5 = vadd.f32 %v2397_v57, %v2173_v53  ;;  %v1822_v16 = vmul.f32 %v1779_v25, %v12738_v37  ;;  %v2557_v17 = vadd.f32 %v2525_v40, %v2301_v56  ;;  %v2227_v31 = vrot.slane %v1733_v46, %v12602_v59 }
 0x182   : > { %v6525_v0 = vpop.eup %6524  ;;  %v8884_v29 = vadd.f32 %v2716_v19, %v7660_v10  ;;  %v1918_v26 = vmul.f32 %v1875_v48, %v12619_v22  ;;  %v2142_v43 = vmul.f32 %v2099_v14, %v12623_v20  ;;  %v2355_v15 = vrot.slane %v1733_v46, %v12600_v44 }
 0x183   : > { %v2968_v27 = vmul.f32 %v6525_v0, %v8797_v33  ;;  %v2685_v6 = vadd.f32 %v2653_v60, %v2429_v5  ;;  %v2014_v33 = vmul.f32 %v1971_v38, %v12621_v62  ;;  %v2483_v35 = vrot.slane %v1733_v46, %v12658_v13 }
 0x184   : > { %v6527_v39 = vpop.eup %6526  ;;  %v6226_v54 = vmul.f32 -1.442695, %v8884_v29  ;;  %v2174_v47 = vadd.f32 %v2142_v43, %v1918_v26  ;;  %v2270_v57 = vmul.f32 %v2227_v31, %v12625_v45  ;;  %v2398_v40 = vmul.f32 %v2355_v15, %v12627_v9  ;;  %v8907_v26 = vpop.permute.xlu1 %3470 }
 0x185   : > { %3041 = vst.msk [vmem:[#allocation3 + $0x70] sm:$0xff] %vm2988_vm1, %v2968_v27  ;;  %3117 = vrot.lane.b32.xlu1 %v2968_v27, %s6827_s20  ;;  %v2874_v21 = vadd.f32 1.0, %v6527_v39  ;;  %v2717_v36 = vadd.f32 %v2685_v6, %v2557_v17  ;;  %v2046_v12 = vadd.f32 %v2014_v33, %v1822_v16  ;;  %v2526_v19 = vmul.f32 %v2483_v35, %v7734_v52 }
 0x186   : > { %6532 = vpow2.f32 %v6226_v54  ;;  %v2611_v0 = vrot.slane %v1733_v46, %v12632_v61  ;;  %v2430_v16 = vadd.f32 %v2398_v40, %v2174_v47  ;;  %v1823_v17 = vmul.f32 %v1779_v25, %v12604_v34  ;;  %12744 = vst [vmem:[#allocation30_spill] sm:$0xff] %v8907_v26  ;;  %v1736_v26 = vld [vmem:[%s6991_s14 + $0x60] sm:$0xff] }
 0x187   : > { %6534 = vrcp.f32 %v2874_v21  ;;  %v8902_v60 = vadd.f32 %v2717_v36, %v12739_v32  ;;  %v2302_v5 = vadd.f32 %v2270_v57, %v2046_v12  ;;  %v1919_v33 = vmul.f32 %v1875_v48, %v12721_v23  ;;  %v1734_v21 = vld [vmem:[%s6991_s14 + $0x50] sm:$0xff] }
 0x188   : > { %v6529_v53 = vpop.eup %6528  ;;  %v2654_v6 = vmul.f32 %v2611_v0, %v7778_v1  ;;  %v2143_v43 = vmul.f32 %v2099_v14, %v12725_v42  ;;  %v2271_v25 = vmul.f32 %v2227_v31, %v12727_v63  ;;  %v2399_v12 = vmul.f32 %v2355_v15, %v12729_v28 }
 0x189   : > { %v6531_v56 = vpop.eup %6530  ;;  %v2969_v27 = vmul.f32 %v6529_v53, %v8812_v41  ;;  %v6227_v54 = vmul.f32 -1.442695, %v8902_v60  ;;  %v2558_v46 = vadd.f32 %v2526_v19, %v2302_v5  ;;  %v2015_v41 = vmul.f32 %v1971_v38, %v12723_v49 }
 0x18a   : > { %v2875_v39 = vadd.f32 1.0, %v6531_v56  ;;  %v2686_v36 = vadd.f32 %v2654_v6, %v2430_v16  ;;  %v2527_v47 = vmul.f32 %v2483_v35, %v12731_v2  ;;  %v2175_v57 = vadd.f32 %v2143_v43, %v1919_v33  ;;  %v8926_v35 = vpop.permute.xlu1 %3526 }
 0x18b   : > { %3042 = vst.msk [vmem:[#allocation3 + $0x78] sm:$0xff] %vm2988_vm1, %v2969_v27  ;;  %3119 = vrot.lane.b32.xlu0 %v2969_v27, %s6827_s20  ;;  %v2047_v48 = vadd.f32 %v2015_v41, %v1823_v17  ;;  %v2655_v40 = vmul.f32 %v2611_v0, %v12733_v55  ;;  %v1783_v19 = vrot.slane %v1734_v21, %v12735_v24  ;;  %12745 = vst [vmem:[#allocation91_spill] sm:$0xff] %v8926_v35  ;;  %v1737_v35 = vld [vmem:[%s6991_s14 + $0x68] sm:$0xff] }
 0x18c   : > { %6536 = vrcp.f32 %v2875_v39  ;;  %v2718_v53 = vadd.f32 %v2686_v36, %v2558_v46  ;;  %v1879_v38 = vrot.slane %v1734_v21, %v12736_v50  ;;  %v1975_v14 = vrot.slane %v1734_v21, %v12737_v51 }
 0x18d   : > { %6538 = vpow2.f32 %v6227_v54  ;;  %v2303_v31 = vadd.f32 %v2271_v25, %v2047_v48  ;;  %v2431_v56 = vadd.f32 %v2399_v12, %v2175_v57  ;;  %v2103_v27 = vrot.slane %v1734_v21, %v12647_v7 }
 0x18e   : > { %v2231_v15 = vrot.slane %v1734_v21, %v12602_v59  ;;  %v8929_v16 = vadd.f32 %v2718_v53, %v7660_v10  ;;  %v1824_v0 = vmul.f32 %v1783_v19, %v12738_v37  ;;  %v1920_v17 = vmul.f32 %v1879_v38, %v12619_v22 }
 0x18f   : > { %v2016_v39 = vmul.f32 %v1975_v14, %v12621_v62  ;;  %v2559_v33 = vadd.f32 %v2527_v47, %v2303_v31  ;;  %v2687_v46 = vadd.f32 %v2655_v40, %v2431_v56  ;;  %v2144_v41 = vmul.f32 %v2103_v27, %v12623_v20 }
 0x190   : > { %v6533_v5 = vpop.eup %6532  ;;  %v6228_v25 = vmul.f32 -1.442695, %v8929_v16  ;;  %v2272_v12 = vmul.f32 %v2231_v15, %v12625_v45  ;;  %v2359_v47 = vrot.slane %v1734_v21, %v12600_v44  ;;  %v2487_v40 = vrot.slane %v1734_v21, %v12658_v13 }
 0x191   : > { %v6535_v54 = vpop.eup %6534  ;;  %v2876_v6 = vadd.f32 1.0, %v6533_v5  ;;  %v2048_v36 = vadd.f32 %v2016_v39, %v1824_v0  ;;  %v2719_v48 = vadd.f32 %v2687_v46, %v2559_v33  ;;  %v2176_v57 = vadd.f32 %v2144_v41, %v1920_v17  ;;  %v8947_v0 = vpop.permute.xlu1 %3530 }
 0x192   : > { %v2970_v43 = vmul.f32 %v6535_v54, %v8844_v4  ;;  %v2615_v31 = vrot.slane %v1734_v21, %v12632_v61  ;;  %v1825_v56 = vmul.f32 %v1783_v19, %v12604_v34  ;;  %v2400_v39 = vmul.f32 %v2359_v47, %v12627_v9 }
 0x193   : > { %6540 = vrcp.f32 %v2876_v6  ;;  %v8943_v53 = vadd.f32 %v2719_v48, %v12739_v32  ;;  %v2304_v4 = vadd.f32 %v2272_v12, %v2048_v36  ;;  %v2528_v17 = vmul.f32 %v2487_v40, %v7734_v52  ;;  %v1735_v48 = vld [vmem:[%s6991_s14 + $0x58] sm:$0xff] }
 0x194   : > { %3043 = vst.msk [vmem:[#allocation3 + $0x80] sm:$0xff] %vm2988_vm1, %v2970_v43  ;;  %3121 = vrot.lane.b32.xlu1 %v2970_v43, %s6827_s20  ;;  %6542 = vpow2.f32 %v6228_v25  ;;  %v1921_v54 = vmul.f32 %v1879_v38, %v12721_v23  ;;  %v2017_v6 = vmul.f32 %v1975_v14, %v12723_v49  ;;  %v2656_v21 = vmul.f32 %v2615_v31, %v7778_v1 }
 0x195   : > { %v6229_v41 = vmul.f32 -1.442695, %v8943_v53  ;;  %v2145_v19 = vmul.f32 %v2103_v27, %v12725_v42  ;;  %v2432_v25 = vadd.f32 %v2400_v39, %v2176_v57  ;;  %v2560_v36 = vadd.f32 %v2528_v17, %v2304_v4  ;;  %v8966_v17 = vpop.permute.xlu1 %3587 }
 0x196   : > { %v6537_v5 = vpop.eup %6536  ;;  %v2049_v12 = vadd.f32 %v2017_v6, %v1825_v56  ;;  %v2273_v14 = vmul.f32 %v2231_v15, %v12727_v63  ;;  %v2529_v30 = vmul.f32 %v2487_v40, %v12731_v2  ;;  %v2657_v27 = vmul.f32 %v2615_v31, %v12733_v55  ;;  %12746 = vst [vmem:[#allocation47_spill] sm:$0xff] %v8966_v17 }
 0x197   : > { %v6539_v33 = vpop.eup %6538  ;;  %v2971_v46 = vmul.f32 %v6537_v5, %v8863_v3  ;;  %6544 = vpow2.f32 %v6229_v41  ;;  %v2177_v38 = vadd.f32 %v2145_v19, %v1921_v54  ;;  %v2401_v3 = vmul.f32 %v2359_v47, %v12729_v28 }
 0x198   : > { %v2877_v43 = vadd.f32 1.0, %v6539_v33  ;;  %v2688_v5 = vadd.f32 %v2656_v21, %v2432_v25  ;;  %v2305_v57 = vadd.f32 %v2273_v14, %v2049_v12  ;;  %v1787_v56 = vrot.slane %v1735_v48, %v12735_v24 }
 0x199   : > { %3044 = vst.msk [vmem:[#allocation3 + $0x88] sm:$0xff] %vm2988_vm1, %v2971_v46  ;;  %3123 = vrot.lane.b32.xlu0 %v2971_v46, %s6827_s20  ;;  %v2433_v4 = vadd.f32 %v2401_v3, %v2177_v38  ;;  %v1883_v39 = vrot.slane %v1735_v48, %v12736_v50  ;;  %v1979_v54 = vrot.slane %v1735_v48, %v12737_v51 }
 0x19a   : > { %6546 = vrcp.f32 %v2877_v43  ;;  %v2720_v6 = vadd.f32 %v2688_v5, %v2560_v36  ;;  %v2107_v15 = vrot.slane %v1735_v48, %v12647_v7  ;;  %v2235_v47 = vrot.slane %v1735_v48, %v12602_v59 }
 0x19b   : > { %v2561_v46 = vadd.f32 %v2529_v30, %v2305_v57  ;;  %v2689_v40 = vadd.f32 %v2657_v27, %v2433_v4  ;;  %v1826_v31 = vmul.f32 %v1787_v56, %v12738_v37  ;;  %v2018_v43 = vmul.f32 %v1979_v54, %v12621_v62  ;;  %v8988_v4 = vpop.permute.xlu1 %3640 }
 0x19c   : > { %v8974_v19 = vadd.f32 %v2720_v6, %v7660_v10  ;;  %v2146_v25 = vmul.f32 %v2107_v15, %v12623_v20  ;;  %v1922_v38 = vmul.f32 %v1883_v39, %v12619_v22  ;;  %v2274_v14 = vmul.f32 %v2235_v47, %v12625_v45  ;;  %12747 = vst [vmem:[#allocation21_spill] sm:$0xff] %v8988_v4 }
 0x19d   : > { %v6541_v33 = vpop.eup %6540  ;;  %v2721_v12 = vadd.f32 %v2689_v40, %v2561_v46  ;;  %v2363_v3 = vrot.slane %v1735_v48, %v12600_v44  ;;  %v2491_v5 = vrot.slane %v1735_v48, %v12658_v13  ;;  %v2147_v4 = vmul.f32 %v2107_v15, %v12725_v42 }
 0x19e   : > { %v6543_v41 = vpop.eup %6542  ;;  %v2972_v21 = vmul.f32 %v6541_v33, %v8884_v29  ;;  %v6230_v30 = vmul.f32 -1.442695, %v8974_v19  ;;  %v2050_v29 = vadd.f32 %v2018_v43, %v1826_v31  ;;  %v2178_v57 = vadd.f32 %v2146_v25, %v1922_v38 }
 0x19f   : > { %v2878_v36 = vadd.f32 1.0, %v6543_v41  ;;  %v8986_v27 = vadd.f32 %v2721_v12, %v12739_v32  ;;  %v2402_v33 = vmul.f32 %v2363_v3, %v12627_v9  ;;  %v2530_v46 = vmul.f32 %v2491_v5, %v7734_v52 }
 0x1a0   : > { %3045 = vst.msk [vmem:[#allocation3 + $0x90] sm:$0xff] %vm2988_vm1, %v2972_v21  ;;  %3125 = vrot.lane.b32.xlu1 %v2972_v21, %s6827_s20  ;;  %v2306_v6 = vadd.f32 %v2274_v14, %v2050_v29  ;;  %v2619_v41 = vrot.slane %v1735_v48, %v12632_v61  ;;  %v1827_v21 = vmul.f32 %v1787_v56, %v12604_v34 }
 0x1a1   : > { %6548 = vrcp.f32 %v2878_v36  ;;  %v6545_v40 = vpop.eup %6544  ;;  %v6231_v31 = vmul.f32 -1.442695, %v8986_v27  ;;  %v1923_v43 = vmul.f32 %v1883_v39, %v12721_v23  ;;  %v2434_v12 = vadd.f32 %v2402_v33, %v2178_v57  ;;  %v9007_v33 = vpop.permute.xlu1 %3697 }
 0x1a2   : > { %6550 = vpow2.f32 %v6230_v30  ;;  %v2879_v25 = vadd.f32 1.0, %v6545_v40  ;;  %v2562_v38 = vadd.f32 %v2530_v46, %v2306_v6  ;;  %v2019_v14 = vmul.f32 %v1979_v54, %v12723_v49  ;;  %12748 = vst [vmem:[#allocation20_spill] sm:$0xff] %v9007_v33 }
 0x1a3   : > { %6552 = vpow2.f32 %v6231_v31  ;;  %v2658_v29 = vmul.f32 %v2619_v41, %v7778_v1  ;;  %v2275_v56 = vmul.f32 %v2235_v47, %v12727_v63  ;;  %v2403_v39 = vmul.f32 %v2363_v3, %v12729_v28 }
 0x1a4   : > { %v6547_v36 = vpop.eup %6546  ;;  %6554 = vrcp.f32 %v2879_v25  ;;  %v2051_v48 = vadd.f32 %v2019_v14, %v1827_v21  ;;  %v2179_v54 = vadd.f32 %v2147_v4, %v1923_v43  ;;  %v2659_v6 = vmul.f32 %v2619_v41, %v12733_v55 }
 0x1a5   : > { %v2973_v30 = vmul.f32 %v6547_v36, %v8902_v60  ;;  %v2690_v57 = vadd.f32 %v2658_v29, %v2434_v12  ;;  %v2531_v60 = vmul.f32 %v2491_v5, %v12731_v2  ;;  %v1791_v46 = vrot.slane %v1736_v26, %v12735_v24 }
 0x1a6   : > { %v2307_v15 = vadd.f32 %v2275_v56, %v2051_v48  ;;  %v1887_v40 = vrot.slane %v1736_v26, %v12736_v50  ;;  %v1983_v47 = vrot.slane %v1736_v26, %v12737_v51  ;;  %v2435_v31 = vadd.f32 %v2403_v39, %v2179_v54 }
 0x1a7   : > { %3046 = vst.msk [vmem:[#allocation3 + $0x98] sm:$0xff] %vm2988_vm1, %v2973_v30  ;;  %3127 = vrot.lane.b32.xlu0 %v2973_v30, %s6827_s20  ;;  %v2722_v3 = vadd.f32 %v2690_v57, %v2562_v38  ;;  %v2111_v21 = vrot.slane %v1736_v26, %v12647_v7  ;;  %v2239_v36 = vrot.slane %v1736_v26, %v12602_v59 }
 0x1a8   : > { %v2563_v4 = vadd.f32 %v2531_v60, %v2307_v15  ;;  %v1828_v5 = vmul.f32 %v1791_v46, %v12738_v37  ;;  %v1924_v41 = vmul.f32 %v1887_v40, %v12619_v22  ;;  %v2020_v43 = vmul.f32 %v1983_v47, %v12621_v62 }
 0x1a9   : > { %v9018_v12 = vadd.f32 %v2722_v3, %v7660_v10  ;;  %v2691_v14 = vadd.f32 %v2659_v6, %v2435_v31  ;;  %v2148_v30 = vmul.f32 %v2111_v21, %v12623_v20  ;;  %v2276_v38 = vmul.f32 %v2239_v36, %v12625_v45  ;;  %v9026_v3 = vpop.permute.xlu1 %3701 }
 0x1aa   : > { %v2052_v56 = vadd.f32 %v2020_v43, %v1828_v5  ;;  %v2367_v39 = vrot.slane %v1736_v26, %v12600_v44  ;;  %v2495_v57 = vrot.slane %v1736_v26, %v12658_v13  ;;  %v2623_v5 = vrot.slane %v1736_v26, %v12632_v61 }
 0x1ab   : > { %v6549_v25 = vpop.eup %6548  ;;  %v6232_v60 = vmul.f32 -1.442695, %v9018_v12  ;;  %v2723_v15 = vadd.f32 %v2691_v14, %v2563_v4  ;;  %v2180_v33 = vadd.f32 %v2148_v30, %v1924_v41  ;;  %v1829_v4 = vmul.f32 %v1791_v46, %v12604_v34 }
 0x1ac   : > { %v6551_v29 = vpop.eup %6550  ;;  %v2974_v48 = vmul.f32 %v6549_v25, %v8929_v16  ;;  %v2308_v6 = vadd.f32 %v2276_v38, %v2052_v56  ;;  %v2404_v31 = vmul.f32 %v2367_v39, %v12627_v9  ;;  %v2532_v16 = vmul.f32 %v2495_v57, %v7734_v52 }
 0x1ad   : > { %v2880_v54 = vadd.f32 1.0, %v6551_v29  ;;  %v6553_v43 = vpop.eup %6552  ;;  %v9034_v25 = vadd.f32 %v2723_v15, %v12739_v32  ;;  %v2660_v56 = vmul.f32 %v2623_v5, %v7778_v1  ;;  %v1925_v26 = vmul.f32 %v1887_v40, %v12721_v23 }
 0x1ae   : > { %3047 = vst.msk [vmem:[#allocation3 + $0xa0] sm:$0xff] %vm2988_vm1, %v2974_v48  ;;  %3129 = vrot.lane.b32.xlu1 %v2974_v48, %s6827_s20  ;;  %v6555_v41 = vpop.eup %6554  ;;  %v2881_v14 = vadd.f32 1.0, %v6553_v43  ;;  %v2436_v30 = vadd.f32 %v2404_v31, %v2180_v33  ;;  %v2564_v29 = vadd.f32 %v2532_v16, %v2308_v6  ;;  %v2149_v15 = vmul.f32 %v2111_v21, %v12725_v42  ;;  %v9045_v43 = vpop.permute.xlu1 %3759 }
 0x1af   : > { %6556 = vrcp.f32 %v2880_v54  ;;  %v2975_v38 = vmul.f32 %v6555_v41, %v8943_v53  ;;  %v6233_v48 = vmul.f32 -1.442695, %v9034_v25  ;;  %v2021_v54 = vmul.f32 %v1983_v47, %v12723_v49  ;;  %12749 = vst [vmem:[#allocation82_spill] sm:$0xff] %v9045_v43 }
 0x1b0   : > { %6558 = vpow2.f32 %v6232_v60  ;;  %v2277_v46 = vmul.f32 %v2239_v36, %v12727_v63  ;;  %v2692_v53 = vadd.f32 %v2660_v56, %v2436_v30  ;;  %v2405_v33 = vmul.f32 %v2367_v39, %v12729_v28 }
 0x1b1   : > { %6560 = vrcp.f32 %v2881_v14  ;;  %3048 = vst.msk [vmem:[#allocation3 + $0xa8] sm:$0xff] %vm2988_vm1, %v2975_v38  ;;  %3131 = vrot.lane.b32.xlu0 %v2975_v38, %s6827_s20  ;;  %v2533_v40 = vmul.f32 %v2495_v57, %v12731_v2  ;;  %v2053_v60 = vadd.f32 %v2021_v54, %v1829_v4  ;;  %v2181_v6 = vadd.f32 %v2149_v15, %v1925_v26 }
 0x1b2   : > { %6562 = vpow2.f32 %v6233_v48  ;;  %v2661_v47 = vmul.f32 %v2623_v5, %v12733_v55  ;;  %v1795_v21 = vrot.slane %v1737_v35, %v12735_v24  ;;  %v2724_v36 = vadd.f32 %v2692_v53, %v2564_v29  ;;  %v9066_v15 = vpop.permute.xlu1 %3819 }
 0x1b3   : > { %v1891_v31 = vrot.slane %v1737_v35, %v12736_v50  ;;  %v1987_v16 = vrot.slane %v1737_v35, %v12737_v51  ;;  %v2115_v41 = vrot.slane %v1737_v35, %v12647_v7  ;;  %v2309_v14 = vadd.f32 %v2277_v46, %v2053_v60  ;;  %12750 = vst [vmem:[#allocation34_spill] sm:$0xff] %v9066_v15 }
 0x1b4   : > { %v2437_v38 = vadd.f32 %v2405_v33, %v2181_v6  ;;  %v1830_v30 = vmul.f32 %v1795_v21, %v12738_v37  ;;  %v2243_v39 = vrot.slane %v1737_v35, %v12602_v59  ;;  %v9059_v57 = vadd.f32 %v2724_v36, %v7660_v10 }
 0x1b5   : > { %v1926_v5 = vmul.f32 %v1891_v31, %v12619_v22  ;;  %v2022_v4 = vmul.f32 %v1987_v16, %v12621_v62  ;;  %v2150_v29 = vmul.f32 %v2115_v41, %v12623_v20  ;;  %v2565_v48 = vadd.f32 %v2533_v40, %v2309_v14 }
 0x1b6   : > { %v2693_v56 = vadd.f32 %v2661_v47, %v2437_v38  ;;  %v2278_v26 = vmul.f32 %v2243_v39, %v12625_v45  ;;  %v2371_v54 = vrot.slane %v1737_v35, %v12600_v44  ;;  %v6234_v53 = vmul.f32 -1.442695, %v9059_v57 }
 0x1b7   : > { %v2054_v33 = vadd.f32 %v2022_v4, %v1830_v30  ;;  %v2182_v60 = vadd.f32 %v2150_v29, %v1926_v5  ;;  %v2499_v6 = vrot.slane %v1737_v35, %v12658_v13  ;;  %v2627_v47 = vrot.slane %v1737_v35, %v12632_v61 }
 0x1b8   : > { %v2725_v11 = vadd.f32 %v2693_v56, %v2565_v48  ;;  %v2406_v40 = vmul.f32 %v2371_v54, %v12627_v9  ;;  %6564 = vpow2.f32 %v6234_v53  ;;  %v9079_v48 = vpop.permute.xlu0 %3821 }
 0x1b9   : > { %v6557_v46 = vpop.eup %6556  ;;  %v2310_v5 = vadd.f32 %v2278_v26, %v2054_v33  ;;  %v2534_v29 = vmul.f32 %v2499_v6, %v7734_v52  ;;  %12751 = vst [vmem:[#allocation94_spill] sm:$0xff] %v9079_v48  ;;  %v2662_v56 = vmul.f32 %v2627_v47, %v7778_v1  ;;  %v1927_v26 = vmul.f32 %v1891_v31, %v12721_v23  ;;  %v9086_v33 = vpop.permute.xlu1 %3839 }
 0x1ba   : > { %v6559_v36 = vpop.eup %6558  ;;  %v2976_v58 = vmul.f32 %v6557_v46, %v8974_v19  ;;  %v9076_v30 = vadd.f32 %v2725_v11, %v12739_v32  ;;  %v2438_v4 = vadd.f32 %v2406_v40, %v2182_v60  ;;  %v1831_v46 = vmul.f32 %v1795_v21, %v12604_v34  ;;  %12752 = vst [vmem:[#allocation35_spill] sm:$0xff] %v9086_v33  ;;  %v1738_v21 = vld [vmem:[%s6991_s14 + $0x70] sm:$0xff] }
 0x1bb   : > { %v2882_v14 = vadd.f32 1.0, %v6559_v36  ;;  %v6561_v38 = vpop.eup %6560  ;;  %v2566_v11 = vadd.f32 %v2534_v29, %v2310_v5  ;;  %v2151_v36 = vmul.f32 %v2115_v41, %v12725_v42  ;;  %v2279_v40 = vmul.f32 %v2243_v39, %v12727_v63 }
 0x1bc   : > { %3049 = vst.msk [vmem:[#allocation3 + $0xb0] sm:$0xff] %vm2988_vm1, %v2976_v58  ;;  %3133 = vrot.lane.b32.xlu1 %v2976_v58, %s6827_s20  ;;  %v6563_v19 = vpop.eup %6562  ;;  %v2977_v35 = vmul.f32 %v6561_v38, %v8986_v27  ;;  %v6235_v58 = vmul.f32 -1.442695, %v9076_v30  ;;  %v2694_v60 = vadd.f32 %v2662_v56, %v2438_v4  ;;  %v2023_v27 = vmul.f32 %v1987_v16, %v12723_v49 }
 0x1bd   : > { %6566 = vrcp.f32 %v2882_v14  ;;  %v2883_v53 = vadd.f32 1.0, %v6563_v19  ;;  %v2407_v14 = vmul.f32 %v2371_v54, %v12729_v28  ;;  %v2535_v38 = vmul.f32 %v2499_v6, %v12731_v2 }
 0x1be   : > { %3050 = vst.msk [vmem:[#allocation3 + $0xb8] sm:$0xff] %vm2988_vm1, %v2977_v35  ;;  %3135 = vrot.lane.b32.xlu0 %v2977_v35, %s6827_s20  ;;  %v2663_v31 = vmul.f32 %v2627_v47, %v12733_v55  ;;  %v2726_v5 = vadd.f32 %v2694_v60, %v2566_v11  ;;  %v2055_v29 = vadd.f32 %v2023_v27, %v1831_v46  ;;  %v9101_v35 = vpop.permute.xlu0 %3841 }
 0x1bf   : > { %6568 = vrcp.f32 %v2883_v53  ;;  %v2183_v19 = vadd.f32 %v2151_v36, %v1927_v26  ;;  %v1799_v4 = vrot.slane %v1738_v21, %v12735_v24  ;;  %v1895_v16 = vrot.slane %v1738_v21, %v12736_v50  ;;  %12753 = vst [vmem:[#allocation85_spill] sm:$0xff] %v9101_v35  ;;  %v9111_v26 = vpop.permute.xlu1 %3870 }
 0x1c0   : > { %6570 = vpow2.f32 %v6235_v58  ;;  %v1991_v41 = vrot.slane %v1738_v21, %v12737_v51  ;;  %v2119_v39 = vrot.slane %v1738_v21, %v12647_v7  ;;  %v9104_v54 = vadd.f32 %v2726_v5, %v7660_v10  ;;  %12754 = vst [vmem:[#allocation36_spill] sm:$0xff] %v9111_v26 }
 0x1c1   : > { %v2311_v6 = vadd.f32 %v2279_v40, %v2055_v29  ;;  %v2439_v56 = vadd.f32 %v2407_v14, %v2183_v19  ;;  %v2247_v47 = vrot.slane %v1738_v21, %v12602_v59  ;;  %v1832_v46 = vmul.f32 %v1799_v4, %v12738_v37 }
 0x1c2   : > { %v1928_v53 = vmul.f32 %v1895_v16, %v12619_v22  ;;  %v2024_v58 = vmul.f32 %v1991_v41, %v12621_v62  ;;  %v2152_v11 = vmul.f32 %v2119_v39, %v12623_v20  ;;  %v6565_v60 = vpop.eup %6564  ;;  %v6236_v27 = vmul.f32 -1.442695, %v9104_v54 }
 0x1c3   : > { %v2567_v36 = vadd.f32 %v2535_v38, %v2311_v6  ;;  %v2695_v5 = vadd.f32 %v2663_v31, %v2439_v56  ;;  %v2280_v40 = vmul.f32 %v2247_v47, %v12625_v45  ;;  %v2884_v14 = vadd.f32 1.0, %v6565_v60  ;;  %v9119_v38 = vpop.permute.xlu1 %3093  ;;  %v9121_v31 = vpop.permute.xlu0 %3882 }
 0x1c4   : > { %v2056_v29 = vadd.f32 %v2024_v58, %v1832_v46  ;;  %v2375_v19 = vrot.slane %v1738_v21, %v12600_v44  ;;  %6572 = vpow2.f32 %v6236_v27  ;;  %v2184_v15 = vadd.f32 %v2152_v11, %v1928_v53  ;;  %12755 = vst [vmem:[#allocation100_spill] sm:$0xff] %v9121_v31 }
 0x1c5   : > { %v2727_v35 = vadd.f32 %v2695_v5, %v2567_v36  ;;  %v2503_v48 = vrot.slane %v1738_v21, %v12658_v13  ;;  %6574 = vrcp.f32 %v2884_v14  ;;  %v2631_v46 = vrot.slane %v1738_v21, %v12632_v61 }
 0x1c6   : > { %v2312_v26 = vadd.f32 %v2280_v40, %v2056_v29  ;;  %v2408_v17 = vmul.f32 %v2375_v19, %v12627_v9  ;;  %v1833_v53 = vmul.f32 %v1799_v4, %v12604_v34  ;;  %v2025_v11 = vmul.f32 %v1991_v41, %v12723_v49 }
 0x1c7   : > { %v6567_v33 = vpop.eup %6566  ;;  %v9124_v6 = vadd.f32 %v2727_v35, %v12739_v32  ;;  %v2536_v56 = vmul.f32 %v2503_v48, %v7734_v52  ;;  %v2153_v35 = vmul.f32 %v2119_v39, %v12725_v42  ;;  %v2664_v4 = vmul.f32 %v2631_v46, %v7778_v1  ;;  %v9143_v41 = vpop.permute.xlu0 %3095 }
 0x1c8   : > { %v2978_v43 = vmul.f32 %v6567_v33, %v9018_v12  ;;  %v2440_v12 = vadd.f32 %v2408_v17, %v2184_v15  ;;  %v1929_v33 = vmul.f32 %v1895_v16, %v12721_v23  ;;  %v2057_v40 = vadd.f32 %v2025_v11, %v1833_v53  ;;  %v1739_v17 = vld [vmem:[%s6991_s14 + $0x78] sm:$0xff] }
 0x1c9   : > { %v6569_v58 = vpop.eup %6568  ;;  %v6237_v21 = vmul.f32 -1.442695, %v9124_v6  ;;  %v2568_v36 = vadd.f32 %v2536_v56, %v2312_v26  ;;  %v2409_v16 = vmul.f32 %v2375_v19, %v12729_v28  ;;  %v2665_v26 = vmul.f32 %v2631_v46, %v12733_v55 }
 0x1ca   : > { %3051 = vst.msk [vmem:[#allocation3 + $0xc0] sm:$0xff] %vm2988_vm1, %v2978_v43  ;;  %3137 = vrot.lane.b32.xlu1 %v2978_v43, %s6827_s20  ;;  %v6571_v60 = vpop.eup %6570  ;;  %v2979_v27 = vmul.f32 %v6569_v58, %v9034_v25  ;;  %v2185_v14 = vadd.f32 %v2153_v35, %v1929_v33  ;;  %v2281_v43 = vmul.f32 %v2247_v47, %v12727_v63  ;;  %v9147_v47 = vpop.permute.xlu1 %3097 }
 0x1cb   : > { %v2885_v5 = vadd.f32 1.0, %v6571_v60  ;;  %6576 = vpow2.f32 %v6237_v21  ;;  %v2696_v15 = vadd.f32 %v2664_v4, %v2440_v12  ;;  %v2537_v25 = vmul.f32 %v2503_v48, %v12731_v2 }
 0x1cc   : > { %3052 = vst.msk [vmem:[#allocation3 + $0xc8] sm:$0xff] %vm2988_vm1, %v2979_v27  ;;  %3139 = vrot.lane.b32.xlu0 %v2979_v27, %s6827_s20  ;;  %v2313_v39 = vadd.f32 %v2281_v43, %v2057_v40  ;;  %v1803_v29 = vrot.slane %v1739_v17, %v12735_v24  ;;  %v2441_v53 = vadd.f32 %v2409_v16, %v2185_v14  ;;  %v3100_v16 = vpop.permute.xlu0 %3099 }
 0x1cd   : > { %6578 = vrcp.f32 %v2885_v5  ;;  %v2728_v56 = vadd.f32 %v2696_v15, %v2568_v36  ;;  %v1899_v58 = vrot.slane %v1739_v17, %v12736_v50  ;;  %v1995_v12 = vrot.slane %v1739_v17, %v12737_v51 }
 0x1ce   : > { %v2569_v33 = vadd.f32 %v2537_v25, %v2313_v39  ;;  %v1834_v19 = vmul.f32 %v1803_v29, %v12738_v37  ;;  %v2123_v48 = vrot.slane %v1739_v17, %v12647_v7  ;;  %v2251_v11 = vrot.slane %v1739_v17, %v12602_v59  ;;  %v6573_v35 = vpop.eup %6572  ;;  %v3102_v39 = vpop.permute.xlu1 %3101 }
 0x1cf   : > { %v9155_v46 = vadd.f32 %v2728_v56, %v7660_v10  ;;  %v2697_v60 = vadd.f32 %v2665_v26, %v2441_v53  ;;  %v1930_v27 = vmul.f32 %v1899_v58, %v12619_v22  ;;  %v2026_v21 = vmul.f32 %v1995_v12, %v12621_v62  ;;  %v6575_v36 = vpop.eup %6574 }
 0x1d0   : > { %v2886_v4 = vadd.f32 1.0, %v6573_v35  ;;  %v2154_v5 = vmul.f32 %v2123_v48, %v12623_v20  ;;  %v2282_v40 = vmul.f32 %v2251_v11, %v12625_v45  ;;  %v2379_v37 = vrot.slane %v1739_v17, %v12600_v44 }
 0x1d1   : > { %v2980_v14 = vmul.f32 %v6575_v36, %v9059_v57  ;;  %v6238_v59 = vmul.f32 -1.442695, %v9155_v46  ;;  %v2729_v43 = vadd.f32 %v2697_v60, %v2569_v33  ;;  %v2058_v15 = vadd.f32 %v2026_v21, %v1834_v19  ;;  %v3104_v21 = vpop.permute.xlu0 %3103 }
 0x1d2   : > { %6580 = vrcp.f32 %v2886_v4  ;;  %v2186_v25 = vadd.f32 %v2154_v5, %v1930_v27  ;;  %v2410_v22 = vmul.f32 %v2379_v37, %v12627_v9  ;;  %v2507_v62 = vrot.slane %v1739_v17, %v12658_v13  ;;  %v3106_v5 = vpop.permute.xlu1 %3105 }
 0x1d3   : > { %3053 = vst.msk [vmem:[#allocation3 + $0xd0] sm:$0xff] %vm2988_vm1, %v2980_v14  ;;  %3141 = vrot.lane.b32.xlu1 %v2980_v14, %s6827_s20  ;;  %6582 = vpow2.f32 %v6238_v59  ;;  %v9169_v44 = vadd.f32 %v2729_v43, %v12739_v32  ;;  %v2314_v20 = vadd.f32 %v2282_v40, %v2058_v15  ;;  %v2635_v26 = vrot.slane %v1739_v17, %v12632_v61 }
 0x1d4   : > { %v2442_v45 = vadd.f32 %v2410_v22, %v2186_v25  ;;  %v2538_v57 = vmul.f32 %v2507_v62, %v7734_v52  ;;  %v12316_v35 = vmov 20   ;;  %v12318_v60 = vmov 10  }
 0x1d5   : > { %v6577_v56 = vpop.eup %6576  ;;  %v6239_v9 = vmul.f32 -1.442695, %v9169_v44  ;;  %v2666_v19 = vmul.f32 %v2635_v26, %v7778_v1  ;;  %6346 = vset.pattern.permute.xlu0 %v12316_v35  ;;  %6344 = vset.pattern.permute.xlu1 %v12318_v60  ;;  %v1835_v27 = vmul.f32 %v1803_v29, %v12604_v34  ;;  %v1931_v61 = vmul.f32 %v1899_v58, %v12721_v23 }
 0x1d6   : > { %v2887_v13 = vadd.f32 1.0, %v6577_v56  ;;  %v2570_v33 = vadd.f32 %v2538_v57, %v2314_v20  ;;  %v2027_v17 = vmul.f32 %v1995_v12, %v12723_v49  ;;  %v2155_v1 = vmul.f32 %v2123_v48, %v12725_v42  ;;  %v3108_v20 = vpop.permute.xlu0 %3107 }
 0x1d7   : > { %v6579_v53 = vpop.eup %6578  ;;  %6584 = vpow2.f32 %v6239_v9  ;;  %v2698_v36 = vadd.f32 %v2666_v19, %v2442_v45  ;;  %v2283_v4 = vmul.f32 %v2251_v11, %v12727_v63  ;;  %v2539_v40 = vmul.f32 %v2507_v62, %v12731_v2 }
 0x1d8   : > { %v2981_v52 = vmul.f32 %v6579_v53, %v9076_v30  ;;  %6586 = vrcp.f32 %v2887_v13  ;;  %v2059_v29 = vadd.f32 %v2027_v17, %v1835_v27  ;;  %v2411_v30 = vmul.f32 %v2379_v37, %v12729_v28 }
 0x1d9   : > { %v2730_v58 = vadd.f32 %v2698_v36, %v2570_v33  ;;  %v2187_v14 = vadd.f32 %v2155_v1, %v1931_v61  ;;  %v2667_v12 = vmul.f32 %v2635_v26, %v12733_v55  ;;  %v3190_v57 = vsel %vm3189_vm2, 0.0, %v9119_v38  ;;  %v3110_v26 = vpop.permute.xlu1 %3109  ;;  %v12756_v1 = vld [vmem:[#allocation93_spill] sm:$0xff] }
 0x1da   : > { %3054 = vst.msk [vmem:[#allocation3 + $0xd8] sm:$0xff] %vm2988_vm1, %v2981_v52  ;;  %3143 = vrot.lane.b32.xlu0 %v2981_v52, %s6827_s20  ;;  %v2315_v59 = vadd.f32 %v2283_v4, %v2059_v29  ;;  %3223 = vst.msk [vmem:[#allocation4 + $0x10] sm:$0xff] %vm2988_vm1, %v3190_v57  ;;  %v3193_v56 = vsel %vm3189_vm2, 0.0, %v3100_v16  ;;  %v3194_v9 = vsel %vm3189_vm2, 0.0, %v3102_v39  ;;  %v3195_v38 = vsel %vm3189_vm2, 0.0, %v3104_v21  ;;  %v12757_v4 = vld [vmem:[#allocation37_spill] sm:$0xff] }
 0x1db   : > { %v9189_v48 = vadd.f32 %v2730_v58, %v7660_v10  ;;  %v2443_v11 = vadd.f32 %v2411_v30, %v2187_v14  ;;  %v3191_v10 = vsel %vm3189_vm2, 0.0, %v9143_v41  ;;  %3226 = vst.msk [vmem:[#allocation4 + $0x28] sm:$0xff] %vm2988_vm1, %v3193_v56  ;;  %3227 = vst.msk [vmem:[#allocation4 + $0x30] sm:$0xff] %vm2988_vm1, %v3194_v9  ;;  %v3196_v41 = vsel %vm3189_vm2, 0.0, %v3106_v5  ;;  %v12758_v29 = vld [vmem:[#allocation39_spill] sm:$0xff]  ;;  %v12760_v14 = vld [vmem:[#allocation41_spill] sm:$0xff] }
 0x1dc   : > { %v6581_v43 = vpop.eup %6580  ;;  %v2571_v22 = vadd.f32 %v2539_v40, %v2315_v59  ;;  %3224 = vst.msk [vmem:[#allocation4 + $0x18] sm:$0xff] %vm2988_vm1, %v3191_v10  ;;  %3228 = vst.msk [vmem:[#allocation4 + $0x38] sm:$0xff] %vm2988_vm1, %v3195_v38  ;;  %v3198_v16 = vsel %vm3189_vm2, 0.0, %v3110_v26  ;;  %v481_v5 = vmul.f32 %v12604_v34, %v12757_v4  ;;  %v485_v30 = vmul.f32 %v12604_v34, %v12758_v29  ;;  %v12759_v40 = vld [vmem:[#allocation40_spill] sm:$0xff]  ;;  %v12761_v59 = vld [vmem:[#allocation98_spill] sm:$0xff] }
 0x1dd   : > { %v6583_v15 = vpop.eup %6582  ;;  %v2982_v25 = vmul.f32 %v6581_v43, %v9104_v54  ;;  %v6240_v37 = vmul.f32 -1.442695, %v9189_v48  ;;  %v2699_v62 = vadd.f32 %v2667_v12, %v2443_v11  ;;  %v3192_v54 = vsel %vm3189_vm2, 0.0, %v9147_v47  ;;  %3229 = vst.msk [vmem:[#allocation4 + $0x40] sm:$0xff] %vm2988_vm1, %v3196_v41  ;;  %3231 = vst.msk [vmem:[#allocation4 + $0x50] sm:$0xff] %vm2988_vm1, %v3198_v16  ;;  %v12762_v11 = vld [vmem:[#allocation99_spill] sm:$0xff] }
 0x1de   : > { %v2888_v45 = vadd.f32 1.0, %v6583_v15  ;;  %3225 = vst.msk [vmem:[#allocation4 + $0x20] sm:$0xff] %vm2988_vm1, %v3192_v54  ;;  %v3197_v47 = vsel %vm3189_vm2, 0.0, %v3108_v20  ;;  %v489_v58 = vmul.f32 %v12604_v34, %v12759_v40  ;;  %v493_v12 = vmul.f32 %v12604_v34, %v12760_v14  ;;  %v12764_v20 = vld [vmem:[#allocation80_spill] sm:$0xff]  ;;  %v12766_v57 = vld [vmem:[#allocation43_spill] sm:$0xff]  ;;  %v12768_v56 = vld [vmem:[#allocation45_spill] sm:$0xff] }
 0x1df   : > { %3055 = vst.msk [vmem:[#allocation3 + $0xe0] sm:$0xff] %vm2988_vm1, %v2982_v25  ;;  %3145 = vrot.lane.b32.xlu1 %v2982_v25, %s6827_s20  ;;  %v2731_v53 = vadd.f32 %v2699_v62, %v2571_v22  ;;  %3230 = vst.msk [vmem:[#allocation4 + $0x48] sm:$0xff] %vm2988_vm1, %v3197_v47  ;;  %v497_v43 = vmul.f32 %v12604_v34, %v12761_v59  ;;  %v501_v15 = vmul.f32 %v12604_v34, %v12762_v11  ;;  %v12763_v25 = vld [vmem:[#allocation78_spill] sm:$0xff]  ;;  %v12767_v10 = vld [vmem:[#allocation44_spill] sm:$0xff] }
 0x1e0   : > { %6588 = vrcp.f32 %v2888_v45  ;;  %v581_v22 = vmul.f32 %v12721_v23, %v12763_v25  ;;  %v585_v45 = vmul.f32 %v12721_v23, %v12764_v20  ;;  %v593_v26 = vmul.f32 %v12721_v23, %v12766_v57  ;;  %v12769_v38 = vld [vmem:[#allocation48_spill] sm:$0xff]  ;;  %v12771_v16 = vld [vmem:[#allocation49_spill] sm:$0xff]  ;;  %v12775_v29 = vld [vmem:[#allocation54_spill] sm:$0xff] }
 0x1e1   : > { %v6585_v13 = vpop.eup %6584  ;;  %6590 = vpow2.f32 %v6240_v37  ;;  %v9215_v19 = vadd.f32 %v2731_v53, %v12739_v32  ;;  %v12765_v37 = vld [vmem:[#allocation81_spill] sm:$0xff]  ;;  %v597_v54 = vmul.f32 %v12721_v23, %v12767_v10  ;;  %v601_v9 = vmul.f32 %v12721_v23, %v12768_v56  ;;  %v12776_v11 = vld [vmem:[#allocation55_spill] sm:$0xff]  ;;  %v12777_v20 = vld [vmem:[#allocation84_spill] sm:$0xff] }
 0x1e2   : > { %v6587_v39 = vpop.eup %6586  ;;  %v2889_v33 = vadd.f32 1.0, %v6585_v13  ;;  %v589_v62 = vmul.f32 %v12721_v23, %v12765_v37  ;;  %v605_v41 = vmul.f32 %v12721_v23, %v12769_v38  ;;  %v12770_v13 = vld [vmem:[#allocation103_spill] sm:$0xff]  ;;  %v705_v40 = vmul.f32 %v12723_v49, %v12775_v29  ;;  %v12783_v29 = vld [vmem:[#allocation16_spill] sm:$0xff] }
 0x1e3   : > { %v2983_v27 = vmul.f32 %v6587_v39, %v9124_v6  ;;  %v6241_v61 = vmul.f32 -1.442695, %v9215_v19  ;;  %v477_v6 = vmul.f32 %v12604_v34, %v12756_v1  ;;  %v685_v47 = vmul.f32 %v12723_v49, %v12770_v13  ;;  %v12774_v1 = vld [vmem:[#allocation53_spill] sm:$0xff]  ;;  %v12778_v56 = vld [vmem:[#allocation15_spill] sm:$0xff]  ;;  %v12779_v13 = vld [vmem:[#allocation46_spill] sm:$0xff] }
 0x1e4   : > { %6592 = vrcp.f32 %v2889_v33  ;;  %v689_v39 = vmul.f32 %v12723_v49, %v12771_v16  ;;  %v12772_v33 = vld [vmem:[#allocation50_spill] sm:$0xff]  ;;  %v701_v4 = vmul.f32 %v12723_v49, %v12774_v1  ;;  %v709_v25 = vmul.f32 %v12723_v49, %v12776_v11 }
 0x1e5   : > { %3056 = vst.msk [vmem:[#allocation3 + $0xe8] sm:$0xff] %vm2988_vm1, %v2983_v27  ;;  %3147 = vrot.lane.b32.xlu0 %v2983_v27, %s6827_s20  ;;  %6594 = vpow2.f32 %v6241_v61  ;;  %v693_v27 = vmul.f32 %v12723_v49, %v12772_v33  ;;  %v821_v37 = vmul.f32 %v12725_v42, %v12777_v20  ;;  %v829_v16 = vmul.f32 %v12725_v42, %v12779_v13  ;;  %v12780_v33 = vld [vmem:[#allocation13_spill] sm:$0xff] }
 0x1e6   : > { %v721_v57 = vadd.f32 %v689_v39, %v481_v5  ;;  %v12782_v5 = vld [vmem:[#allocation104_spill] sm:$0xff]  ;;  %v737_v39 = vadd.f32 %v705_v40, %v497_v43 }
 0x1e7   : > { %v3112_v52 = vpop.permute.xlu0 %3111  ;;  %v725_v10 = vadd.f32 %v693_v27, %v485_v30  ;;  %v841_v30 = vmul.f32 %v12725_v42, %v12782_v5  ;;  %v741_v27 = vadd.f32 %v709_v25, %v501_v15  ;;  %v12786_v15 = vld [vmem:[#allocation19_spill] sm:$0xff]  ;;  %v12792_v5 = vld [vmem:[#allocation74_spill] sm:$0xff] }
 0x1e8   : > { %v3199_v17 = vsel %vm3189_vm2, 0.0, %v3112_v52  ;;  %v3114_v21 = vpop.permute.xlu1 %3113  ;;  %v965_v40 = vmul.f32 %v12727_v63, %v12786_v15  ;;  %v12787_v25 = vld [vmem:[#allocation23_spill] sm:$0xff] }
 0x1e9   : > { %3232 = vst.msk [vmem:[#allocation4 + $0x58] sm:$0xff] %vm2988_vm1, %v3199_v17  ;;  %v3200_v36 = vsel %vm3189_vm2, 0.0, %v3114_v21  ;;  %v12773_v21 = vld [vmem:[#allocation52_spill] sm:$0xff] }
 0x1ea   : > { %3233 = vst.msk [vmem:[#allocation4 + $0x60] sm:$0xff] %vm2988_vm1, %v3200_v36  ;;  %v6589_v53 = vpop.eup %6588  ;;  %v697_v36 = vmul.f32 %v12723_v49, %v12773_v21 }
 0x1eb   : > { %v6591_v52 = vpop.eup %6590  ;;  %v2984_v61 = vmul.f32 %v6589_v53, %v9155_v46  ;;  %v717_v46 = vadd.f32 %v685_v47, %v477_v6  ;;  %v825_v53 = vmul.f32 %v12725_v42, %v12778_v56  ;;  %v733_v6 = vadd.f32 %v701_v4, %v493_v12  ;;  %v12784_v56 = vld [vmem:[#allocation10_spill] sm:$0xff] }
 0x1ec   : > { %v2890_v14 = vadd.f32 1.0, %v6591_v52  ;;  %v833_v52 = vmul.f32 %v12725_v42, %v12780_v33  ;;  %v729_v1 = vadd.f32 %v697_v36, %v489_v58  ;;  %v12785_v58 = vld [vmem:[#allocation11_spill] sm:$0xff]  ;;  %v861_v36 = vadd.f32 %v829_v16, %v589_v62 }
 0x1ed   : > { %3057 = vst.msk [vmem:[#allocation3 + $0xf0] sm:$0xff] %vm2988_vm1, %v2984_v61  ;;  %3149 = vrot.lane.b32.xlu1 %v2984_v61, %s6827_s20  ;;  %v857_v20 = vadd.f32 %v825_v53, %v585_v45  ;;  %v961_v12 = vmul.f32 %v12727_v63, %v12785_v58  ;;  %v12789_v33 = vld [vmem:[#allocation31_spill] sm:$0xff] }
 0x1ee   : > { %v6593_v38 = vpop.eup %6592  ;;  %6596 = vrcp.f32 %v2890_v14  ;;  %v845_v14 = vmul.f32 %v12725_v42, %v12783_v29  ;;  %v865_v4 = vadd.f32 %v833_v52, %v593_v26  ;;  %v997_v52 = vadd.f32 %v965_v40, %v725_v10  ;;  %v12794_v29 = vld [vmem:[#allocation97_spill] sm:$0xff] }
 0x1ef   : > { %v3116_v17 = vpop.permute.xlu0 %3115  ;;  %v2985_v61 = vmul.f32 %v6593_v38, %v9169_v44  ;;  %v6595_v47 = vpop.eup %6594  ;;  %v957_v44 = vmul.f32 %v12727_v63, %v12784_v56  ;;  %v12788_v38 = vld [vmem:[#allocation24_spill] sm:$0xff]  ;;  %v993_v16 = vadd.f32 %v961_v12, %v721_v57  ;;  %v12796_v10 = vld [vmem:[#allocation105_spill] sm:$0xff] }
 0x1f0   : > { %v3201_v59 = vsel %vm3189_vm2, 0.0, %v3116_v17  ;;  %v12781_v17 = vld [vmem:[#allocation51_spill] sm:$0xff]  ;;  %v2891_v11 = vadd.f32 1.0, %v6595_v47  ;;  %v973_v45 = vmul.f32 %v12727_v63, %v12788_v38  ;;  %v877_v13 = vadd.f32 %v845_v14, %v605_v41  ;;  %v12797_v12 = vld [vmem:[#allocation65_spill] sm:$0xff] }
 0x1f1   : > { %3234 = vst.msk [vmem:[#allocation4 + $0x68] sm:$0xff] %vm2988_vm1, %v3201_v59  ;;  %v837_v21 = vmul.f32 %v12725_v42, %v12781_v17  ;;  %v853_v59 = vadd.f32 %v821_v37, %v581_v22  ;;  %3058 = vst.msk [vmem:[#allocation3 + $0xf8] sm:$0xff] %vm2988_vm1, %v2985_v61  ;;  %3151 = vrot.lane.b32.xlu0 %v2985_v61, %s6827_s20  ;;  %v873_v22 = vadd.f32 %v841_v30, %v601_v9  ;;  %v12790_v61 = vld [vmem:[#allocation61_spill] sm:$0xff] }
 0x1f2   : > { %6598 = vrcp.f32 %v2891_v11  ;;  %v969_v37 = vmul.f32 %v12727_v63, %v12787_v25  ;;  %v977_v17 = vmul.f32 %v12727_v63, %v12789_v33  ;;  %v981_v62 = vmul.f32 %v12727_v63, %v12790_v61  ;;  %v12795_v11 = vld [vmem:[#allocation58_spill] sm:$0xff]  ;;  %v12798_v33 = vld [vmem:[#allocation69_spill] sm:$0xff] }
 0x1f3   : > { %v869_v43 = vadd.f32 %v837_v21, %v597_v54  ;;  %v989_v26 = vadd.f32 %v957_v44, %v717_v46  ;;  %v9308_v54 = vld [vmem:[%s12079_s6] sm:$0xf]  ;;  %v12791_v21 = vld [vmem:[#allocation57_spill] sm:$0xff]  ;;  %v1097_v30 = vmul.f32 %v12729_v28, %v12792_v5  ;;  %v1105_v14 = vmul.f32 %v12729_v28, %v12794_v29  ;;  %v12805_v29 = vld [vmem:[#allocation67_spill] sm:$0xff] }
 0x1f4   : > { %v1093_v41 = vmul.f32 %v12729_v28, %v12791_v21  ;;  %v12793_v46 = vld [vmem:[#allocation62_spill] sm:$0xff]  ;;  %v1109_v56 = vmul.f32 %v12729_v28, %v12795_v11  ;;  %v1001_v44 = vadd.f32 %v969_v37, %v729_v1  ;;  %v1005_v57 = vadd.f32 %v973_v45, %v733_v6  ;;  %v9334_v37 = vld [vmem:[%s12077_s4 + $0x8] sm:$0xff] }
 0x1f5   : > { %3934 = vperm.xlu0 %6346, %v9308_v54   ;;  %v1101_v47 = vmul.f32 %v12729_v28, %v12793_v46  ;;  %v1113_v58 = vmul.f32 %v12729_v28, %v12796_v10  ;;  %v1117_v15 = vmul.f32 %v12729_v28, %v12797_v12  ;;  %v1009_v25 = vadd.f32 %v977_v17, %v737_v39  ;;  %v12801_v45 = vld [vmem:[#allocation75_spill] sm:$0xff] }
 0x1f6   : > { %v1013_v38 = vadd.f32 %v981_v62, %v741_v27  ;;  %v1229_v61 = vmul.f32 %v12731_v2, %v12798_v33  ;;  %v12799_v21 = vmov 1   ;;  %v1129_v5 = vadd.f32 %v1097_v30, %v857_v20  ;;  %v12800_v27 = vld [vmem:[#allocation66_spill] sm:$0xff]  ;;  %v9357_v33 = vld [vmem:[#allocation5 + $0x28] sm:$0xf] }
 0x1f7   : > { %v3118_v53 = vpop.permute.xlu1 %3117  ;;  %v1133_v1 = vadd.f32 %v1101_v47, %v861_v36  ;;  %v1137_v6 = vadd.f32 %v1105_v14, %v865_v4  ;;  %v1141_v39 = vadd.f32 %v1109_v56, %v869_v43  ;;  %v1237_v17 = vmul.f32 %v12731_v2, %v12801_v45  ;;  %v12804_v43 = vld [vmem:[#allocation59_spill] sm:$0xff]  ;;  %v12806_v56 = vld [vmem:[#allocation76_spill] sm:$0xff] }
 0x1f8   : > { %v3202_v9 = vsel %vm3189_vm2, 0.0, %v3118_v53  ;;  %v6597_v40 = vpop.eup %6596  ;;  %v1125_v53 = vadd.f32 %v1093_v41, %v853_v59  ;;  %v1233_v59 = vmul.f32 %v12731_v2, %v12800_v27  ;;  %v1145_v36 = vadd.f32 %v1113_v58, %v873_v22  ;;  %v12803_v41 = vld [vmem:[#allocation63_spill] sm:$0xff]  ;;  %v12809_v27 = vld [vmem:[#allocation64_spill] sm:$0xff] }
 0x1f9   : > { %3235 = vst.msk [vmem:[#allocation4 + $0x70] sm:$0xff] %vm2988_vm1, %v3202_v9  ;;  %v2986_v9 = vmul.f32 %v6597_v40, %v9189_v48  ;;  %6347 = vset.pattern.permute.xlu0 %v12799_v21  ;;  %v12802_v48 = vld [vmem:[#allocation17_spill] sm:$0xff]  ;;  %v1149_v4 = vadd.f32 %v1117_v15, %v877_v13  ;;  %v1245_v30 = vmul.f32 %v12731_v2, %v12803_v41  ;;  %v12807_v15 = vld [vmem:[#allocation79_spill] sm:$0xff] }
 0x1fa   : > { %3322 = vperm.xlu0 %6347, %v9334_v37   ;;  %v1241_v62 = vmul.f32 %v12731_v2, %v12802_v48  ;;  %v1249_v46 = vmul.f32 %v12731_v2, %v12804_v43  ;;  %v1253_v14 = vmul.f32 %v12731_v2, %v12805_v29  ;;  %v1261_v11 = vadd.f32 %v1229_v61, %v989_v26  ;;  %v12808_v26 = vld [vmem:[#allocation70_spill] sm:$0xff]  ;;  %v12810_v48 = vld [vmem:[#allocation77_spill] sm:$0xff] }
 0x1fb   : > { %3059 = vst.msk [vmem:[#allocation3 + $0x100] sm:$0xff] %vm2988_vm1, %v2986_v9  ;;  %3153 = vrot.lane.b32.xlu1 %v2986_v9, %s6827_s20  ;;  %v1365_v10 = vmul.f32 %v12733_v55, %v12806_v56  ;;  %v1265_v22 = vadd.f32 %v1233_v59, %v993_v16  ;;  %v1269_v13 = vadd.f32 %v1237_v17, %v997_v52  ;;  %v12811_v59 = vld [vmem:[#allocation71_spill] sm:$0xff] }
 0x1fc   : > { %v6599_v12 = vpop.eup %6598  ;;  %v1273_v58 = vadd.f32 %v1241_v62, %v1001_v44  ;;  %v1369_v40 = vmul.f32 %v12733_v55, %v12807_v15  ;;  %v1373_v61 = vmul.f32 %v12733_v55, %v12808_v26  ;;  %v1377_v45 = vmul.f32 %v12733_v55, %v12809_v27  ;;  %v12812_v62 = vld [vmem:[#allocation60_spill] sm:$0xff] }
 0x1fd   : > { %v3120_v20 = vpop.permute.xlu0 %3119  ;;  %v2987_v9 = vmul.f32 %v6599_v12, %v9215_v19  ;;  %v1381_v16 = vmul.f32 %v12733_v55, %v12810_v48  ;;  %v1277_v52 = vadd.f32 %v1245_v30, %v1005_v57  ;;  %v1281_v44 = vadd.f32 %v1249_v46, %v1009_v25 }
 0x1fe   : > { %v3203_v47 = vsel %vm3189_vm2, 0.0, %v3120_v20  ;;  %3973 = vrot.lane.b32.xlu0 %v9357_v33, %s6827_s20  ;;  %v1385_v17 = vmul.f32 %v12733_v55, %v12811_v59  ;;  %v1389_v20 = vmul.f32 %v12733_v55, %v12812_v62  ;;  %v1285_v19 = vadd.f32 %v1253_v14, %v1013_v38 }
 0x1ff   : > { %3236 = vst.msk [vmem:[#allocation4 + $0x78] sm:$0xff] %vm2988_vm1, %v3203_v47  ;;  %3894 = vperm.xlu1 %6344, %v9308_v54   ;;  %3060 = vst.msk [vmem:[#allocation3 + $0x108] sm:$0xff] %vm2988_vm1, %v2987_v9  ;;  %v1397_v41 = vadd.f32 %v1365_v10, %v1125_v53  ;;  %v1401_v43 = vadd.f32 %v1369_v40, %v1129_v5  ;;  %v1405_v47 = vadd.f32 %v1373_v61, %v1133_v1  ;;  %v12319_v46 = vmov 15   ;;  %v9406_v40 = vld [vmem:[#allocation5] sm:$0xf] }
 0x200   : > { %v1409_v29 = vadd.f32 %v1377_v45, %v1137_v6  ;;  %v1413_v56 = vadd.f32 %v1381_v16, %v1141_v39  ;;  %v1417_v12 = vadd.f32 %v1385_v17, %v1145_v36  ;;  %v1421_v15 = vadd.f32 %v1389_v20, %v1149_v4  ;;  %v12815_v17 = vld [vmem:[#allocation102_spill] sm:$0xff] }
 0x201   : > { %v1429_v57 = vadd.f32 %v1397_v41, %v1261_v11  ;;  %v1433_v25 = vadd.f32 %v1401_v43, %v1265_v22  ;;  %v1437_v30 = vadd.f32 %v1405_v47, %v1269_v13  ;;  %v12312_v22 = vmov 16   ;;  %v12816_v41 = vld [vmem:[#allocation9_spill] sm:$0xff]  ;;  %v12817_v47 = vld [vmem:[#allocation56_spill] sm:$0xff] }
 0x202   : > { %4002 = vperm.xlu0 %6347, %v9308_v54   ;;  %v1441_v26 = vadd.f32 %v1409_v29, %v1273_v58  ;;  %v1445_v27 = vadd.f32 %v1413_v56, %v1277_v52  ;;  %v1449_v48 = vadd.f32 %v1417_v12, %v1281_v44  ;;  %v1453_v59 = vadd.f32 %v1421_v15, %v1285_v19  ;;  %v12814_v52 = vld [vmem:[#allocation101_spill] sm:$0xff]  ;;  %v12819_v12 = vld [vmem:[#allocation83_spill] sm:$0xff] }
 0x203   : > { %6345 = vset.pattern.permute.xlu1 %v12319_v46  ;;  %v9378_v53 = vadd.f32 %v12739_v32, %v1429_v57  ;;  %v9381_v5 = vadd.f32 %v12739_v32, %v1433_v25  ;;  %v9384_v1 = vadd.f32 %v12739_v32, %v1437_v30  ;;  %v12813_v61 = vmov 6   ;;  %v12820_v57 = vld [vmem:[#allocation86_spill] sm:$0xff]  ;;  %v12821_v25 = vld [vmem:[#allocation27_spill] sm:$0xff] }
 0x204   : > { %3914 = vperm.xlu1 %6345, %v9308_v54   ;;  %v9388_v39 = vadd.f32 %v12739_v32, %v1441_v26  ;;  %v9391_v36 = vadd.f32 %v12739_v32, %v1445_v27  ;;  %v9396_v4 = vadd.f32 %v12739_v32, %v1449_v48  ;;  %v9399_v14 = vadd.f32 %v12739_v32, %v1453_v59  ;;  %v12822_v26 = vld [vmem:[#allocation87_spill] sm:$0xff]  ;;  %v12823_v27 = vld [vmem:[#allocation28_spill] sm:$0xff] }
 0x205   : > { %v6181_v11 = vmul.f32 -1.442695, %v9378_v53  ;;  %v6185_v10 = vmul.f32 -1.442695, %v9381_v5  ;;  %v6189_v13 = vmul.f32 -1.442695, %v9384_v1  ;;  %v505_v44 = vmul.f32 %v12604_v34, %v12814_v52 }
 0x206   : > { %v3122_v38 = vpop.permute.xlu1 %3121  ;;  %3155 = vrot.lane.b32.xlu0 %v2987_v9, %s6827_s20  ;;  %v6193_v58 = vmul.f32 -1.442695, %v9388_v39  ;;  %v6197_v9 = vmul.f32 -1.442695, %v9391_v36  ;;  %v6201_v16 = vmul.f32 -1.442695, %v9396_v4  ;;  %v609_v62 = vmul.f32 %v12721_v23, %v12815_v17 }
 0x207   : > { %v3204_v6 = vsel %vm3189_vm2, 0.0, %v3122_v38  ;;  %6350 = vset.pattern.permute.xlu0 %v12312_v22  ;;  %6600 = vpow2.f32 %v6181_v11  ;;  %v6205_v19 = vmul.f32 -1.442695, %v9399_v14  ;;  %v849_v43 = vmul.f32 %v12725_v42, %v12816_v41  ;;  %v9425_v34 = vld [vmem:[#allocation5 + $0x4] sm:$0xf]  ;;  %v12818_v23 = vld [vmem:[#allocation73_spill] sm:$0xff] }
 0x208   : > { %3237 = vst.msk [vmem:[#allocation4 + $0x80] sm:$0xff] %vm2988_vm1, %v3204_v6  ;;  %3953 = vrot.lane.b32.xlu1 %v9406_v40, %s6827_s20  ;;  %6602 = vpow2.f32 %v6185_v10  ;;  %v713_v29 = vmul.f32 %v12723_v49, %v12817_v47  ;;  %v985_v56 = vmul.f32 %v12727_v63, %v12818_v23  ;;  %v1121_v15 = vmul.f32 %v12729_v28, %v12819_v12  ;;  %v12825_v38 = vld [vmem:[#allocation14_spill] sm:$0xff]  ;;  %v12826_v11 = vld [vmem:[#allocation88_spill] sm:$0xff]  ;;  %v12827_v63 = vld [vmem:[#allocation29_spill] sm:$0xff] }
 0x209   : > { %6348 = vset.pattern.permute.xlu1 %v12813_v61  ;;  %6604 = vpow2.f32 %v6189_v13  ;;  %v1431_v30 = vadd.f32 %v12821_v25, %v12820_v57  ;;  %v1435_v49 = vadd.f32 %v12823_v27, %v12822_v26  ;;  %v12824_v48 = vmov 7   ;;  %v12828_v28 = vld [vmem:[#allocation90_spill] sm:$0xff]  ;;  %v12829_v13 = vld [vmem:[#allocation32_spill] sm:$0xff]  ;;  %v12832_v52 = vld [vmem:[#allocation95_spill] sm:$0xff] }
 0x20a   : > { %4062 = vperm.xlu0 %6350, %v9308_v54   ;;  %6606 = vpow2.f32 %v6193_v58  ;;  %v745_v42 = vadd.f32 %v713_v29, %v505_v44  ;;  %v881_v59 = vadd.f32 %v849_v43, %v609_v62  ;;  %v1393_v6 = vmul.f32 %v12733_v55, %v12825_v38  ;;  %v12833_v44 = vld [vmem:[#allocation38_spill] sm:$0xff]  ;;  %v9451_v41 = vld [vmem:[#allocation5 + $0x2c] sm:$0xf]  ;;  %v12837_v29 = vld [vmem:[#allocation68_spill] sm:$0xff] }
 0x20b   : > { %v3124_v45 = vpop.permute.xlu0 %3123  ;;  %6608 = vpow2.f32 %v6197_v9  ;;  %v1439_v10 = vadd.f32 %v12827_v63, %v12826_v11  ;;  %v1443_v58 = vadd.f32 %v12829_v13, %v12828_v28  ;;  %v12830_v9 = vld [vmem:[#allocation25_spill] sm:$0xff]  ;;  %v1451_v17 = vadd.f32 %v12833_v44, %v12832_v52  ;;  %12836 = vst [vmem:[#allocation22_spill] sm:$0xff] %v9451_v41  ;;  %v12847_v46 = vld [vmem:[#allocation47_spill] sm:$0xff] }
 0x20c   : > { %v3205_v20 = vsel %vm3189_vm2, 0.0, %v3124_v45  ;;  %3955 = vrot.lane.b32.xlu1 %v9425_v34, %s6827_s20  ;;  %6610 = vpow2.f32 %v6201_v16  ;;  %v12831_v45 = vld [vmem:[#allocation33_spill] sm:$0xff]  ;;  %v1017_v43 = vadd.f32 %v985_v56, %v745_v42  ;;  %v1153_v47 = vadd.f32 %v1121_v15, %v881_v59 }
 0x20d   : > { %3238 = vst.msk [vmem:[#allocation4 + $0x88] sm:$0xff] %vm2988_vm1, %v3205_v20  ;;  %6612 = vpow2.f32 %v6205_v19  ;;  %v1447_v16 = vadd.f32 %v12831_v45, %v12830_v9  ;;  %v12834_v20 = vld [vmem:[#allocation26_spill] sm:$0xff]  ;;  %v1257_v23 = vmul.f32 %v12731_v2, %v12837_v29  ;;  %v9462_v11 = vadd.f32 %v12739_v32, %v1431_v30  ;;  %v3402_v22 = vld [vmem:[#allocation4 + $0x58] sm:$0xff] }
 0x20e   : > { %6351 = vset.pattern.permute.xlu0 %v12824_v48  ;;  %v12835_v19 = vld [vmem:[#allocation42_spill] sm:$0xff]  ;;  %v1425_v26 = vadd.f32 %v1393_v6, %v1153_v47  ;;  %v9465_v2 = vadd.f32 %v12739_v32, %v1435_v49  ;;  %v9468_v28 = vadd.f32 %v12739_v32, %v1439_v10  ;;  %v9471_v6 = vadd.f32 %v12739_v32, %v1443_v58  ;;  %v3695_v7 = vld [vmem:[#allocation3 + $0x108] sm:$0xff] }
 0x20f   : > { %3644 = vperm.xlu0 %6351, %v9334_v37   ;;  %v1455_v62 = vadd.f32 %v12835_v19, %v12834_v20  ;;  %v1289_v42 = vadd.f32 %v1257_v23, %v1017_v43  ;;  %v12314_v9 = vmov 22   ;;  %v9475_v49 = vadd.f32 %v12739_v32, %v1447_v16 }
 0x210   : > { %3975 = vrot.lane.b32.xlu1 %v9451_v41, %s6827_s20  ;;  %v12313_v20 = vmov 11   ;;  %v6183_v19 = vmul.f32 -1.442695, %v9462_v11  ;;  %v9484_v16 = vadd.f32 %v12739_v32, %v1451_v17  ;;  %v6191_v47 = vmul.f32 -1.442695, %v9468_v28 }
 0x211   : > { %v6601_v12 = vpop.eup %6600  ;;  %v1457_v52 = vadd.f32 %v1425_v26, %v1289_v42  ;;  %v9488_v43 = vadd.f32 %v12739_v32, %v1455_v62  ;;  %v6195_v23 = vmul.f32 -1.442695, %v9471_v6  ;;  %v6199_v17 = vmul.f32 -1.442695, %v9475_v49 }
 0x212   : > { %v3126_v55 = vpop.permute.xlu1 %3125  ;;  %v6603_v57 = vpop.eup %6602  ;;  %v1599_v25 = vadd.f32 1.0, %v6601_v12  ;;  %v12838_v12 = vmov 8   ;;  %v6203_v62 = vmul.f32 -1.442695, %v9484_v16  ;;  %v9677_v51 = vmul.f32 %v8888_v18, %v3402_v22 }
 0x213   : > { %v3206_v37 = vsel %vm3189_vm2, 0.0, %v3126_v55  ;;  %4122 = vperm.xlu0 %6351, %v9308_v54   ;;  %v6605_v27 = vpop.eup %6604  ;;  %v1603_v38 = vadd.f32 1.0, %v6603_v57  ;;  %v9492_v29 = vadd.f32 %v12739_v32, %v1457_v52  ;;  %v12317_v57 = vmov 21  }
 0x214   : > { %3239 = vst.msk [vmem:[#allocation4 + $0x90] sm:$0xff] %vm2988_vm1, %v3206_v37  ;;  %4022 = vperm.xlu1 %6348, %v9308_v54   ;;  %v6607_v56 = vpop.eup %6606  ;;  %v1607_v15 = vadd.f32 1.0, %v6605_v27  ;;  %6614 = vrcp.f32 %v1599_v25  ;;  %v6187_v37 = vmul.f32 -1.442695, %v9465_v2  ;;  %v6207_v32 = vmul.f32 -1.442695, %v9488_v43 }
 0x215   : > { %v6609_v59 = vpop.eup %6608  ;;  %v1611_v63 = vadd.f32 1.0, %v6607_v56  ;;  %6616 = vrcp.f32 %v1603_v38  ;;  %v6209_v38 = vmul.f32 -1.442695, %v9492_v29 }
 0x216   : > { %v6611_v13 = vpop.eup %6610  ;;  %v1615_v45 = vadd.f32 1.0, %v6609_v59  ;;  %6618 = vrcp.f32 %v1607_v15 }
 0x217   : > { %6356 = vset.pattern.permute.xlu0 %v12314_v9  ;;  %v6613_v44 = vpop.eup %6612  ;;  %v1619_v58 = vadd.f32 1.0, %v6611_v13  ;;  %6620 = vrcp.f32 %v1611_v63  ;;  %v12311_v63 = vmov 23  }
 0x218   : > { %6349 = vset.pattern.permute.xlu1 %v12313_v20  ;;  %4182 = vperm.xlu0 %6356, %v9308_v54   ;;  %v1623_v55 = vadd.f32 1.0, %v6613_v44  ;;  %6622 = vrcp.f32 %v1615_v45 }
 0x219   : > { %v3128_v30 = vpop.permute.xlu0 %3127  ;;  %4042 = vperm.xlu1 %6349, %v9308_v54   ;;  %6624 = vrcp.f32 %v1619_v58 }
 0x21a   : > { %v3207_v10 = vsel %vm3189_vm2, 0.0, %v3128_v30  ;;  %6626 = vrcp.f32 %v1623_v55  ;;  %v12839_v30 = vmov 2  }
 0x21b   : > { %3240 = vst.msk [vmem:[#allocation4 + $0x98] sm:$0xff] %vm2988_vm1, %v3207_v10  ;;  %6628 = vpow2.f32 %v6183_v19 }
 0x21c   : > { %6358 = vset.pattern.permute.xlu0 %v12838_v12  ;;  %6630 = vpow2.f32 %v6187_v37  ;;  %v12305_v37 = vmov 14  }
 0x21d   : > { %6352 = vset.pattern.permute.xlu1 %v12317_v57  ;;  %4271 = vperm.xlu0 %6358, %v9308_v54   ;;  %6632 = vpow2.f32 %v6191_v47 }
 0x21e   : > { %4082 = vperm.xlu1 %6352, %v9308_v54   ;;  %v6615_v26 = vpop.eup %6614  ;;  %6634 = vpow2.f32 %v6195_v23  ;;  %v12315_v23 = vmov 12  }
 0x21f   : > { %v6617_v56 = vpop.eup %6616  ;;  %v1695_v15 = vmul.f32 %v6615_v26, %v9378_v53  ;;  %6636 = vpow2.f32 %v6199_v17 }
 0x220   : > { %v3130_v25 = vpop.permute.xlu1 %3129  ;;  %v6619_v42 = vpop.eup %6618  ;;  %v1699_v59 = vmul.f32 %v6617_v56, %v9381_v5  ;;  %6638 = vpow2.f32 %v6203_v62 }
 0x221   : > { %v3208_v27 = vsel %vm3189_vm2, 0.0, %v3130_v25  ;;  %6361 = vset.pattern.permute.xlu0 %v12311_v63  ;;  %v6621_v13 = vpop.eup %6620  ;;  %v1703_v45 = vmul.f32 %v6619_v42, %v9384_v1  ;;  %2999 = vst.msk [vmem:[#allocation2 + $0x28] sm:$0xff] %vm2988_vm1, %v1695_v15  ;;  %6640 = vpow2.f32 %v6207_v32  ;;  %v12308_v15 = vmov 17  }
 0x222   : > { %3241 = vst.msk [vmem:[#allocation4 + $0xa0] sm:$0xff] %vm2988_vm1, %v3208_v27  ;;  %6353 = vset.pattern.permute.xlu1 %v12839_v30  ;;  %4331 = vperm.xlu0 %6361, %v9308_v54   ;;  %v6623_v52 = vpop.eup %6622  ;;  %v1707_v5 = vmul.f32 %v6621_v13, %v9388_v39  ;;  %3003 = vst.msk [vmem:[#allocation2 + $0x48] sm:$0xff] %vm2988_vm1, %v1699_v59  ;;  %6642 = vpow2.f32 %v6209_v38  ;;  %v12304_v27 = vmov 19  }
 0x223   : > { %4102 = vperm.xlu1 %6353, %v9308_v54   ;;  %v3132_v53 = vpop.permute.xlu0 %3131  ;;  %v6625_v44 = vpop.eup %6624  ;;  %v1711_v58 = vmul.f32 %v6623_v52, %v9391_v36  ;;  %3007 = vst.msk [vmem:[#allocation2 + $0x68] sm:$0xff] %vm2988_vm1, %v1703_v45 }
 0x224   : > { %v3209_v10 = vsel %vm3189_vm2, 0.0, %v3132_v53  ;;  %v6627_v1 = vpop.eup %6626  ;;  %v1715_v19 = vmul.f32 %v6625_v44, %v9396_v4  ;;  %3011 = vst.msk [vmem:[#allocation2 + $0x88] sm:$0xff] %vm2988_vm1, %v1707_v5  ;;  %v3257_v53 = vld [vmem:[%s12078_s5] sm:$0xff] }
 0x225   : > { %3242 = vst.msk [vmem:[#allocation4 + $0xa8] sm:$0xff] %vm2988_vm1, %v3209_v10  ;;  %v6629_v55 = vpop.eup %6628  ;;  %v1719_v39 = vmul.f32 %v6627_v1, %v9399_v14  ;;  %3015 = vst.msk [vmem:[#allocation2 + $0xa8] sm:$0xff] %vm2988_vm1, %v1711_v58  ;;  %v12840_v58 = vmov 0   ;;  %v12841_v1 = vmov 3  }
 0x226   : > { %6364 = vset.pattern.permute.xlu0 %v12305_v37  ;;  %v6631_v47 = vpop.eup %6630  ;;  %3019 = vst.msk [vmem:[#allocation2 + $0xc8] sm:$0xff] %vm2988_vm1, %v1715_v19  ;;  %v1601_v36 = vadd.f32 1.0, %v6629_v55 }
 0x227   : > { %6354 = vset.pattern.permute.xlu1 %v12315_v23  ;;  %4440 = vperm.xlu0 %6364, %v9308_v54   ;;  %v6633_v4 = vpop.eup %6632  ;;  %3023 = vst.msk [vmem:[#allocation2 + $0xe8] sm:$0xff] %vm2988_vm1, %v1719_v39  ;;  %v1605_v14 = vadd.f32 1.0, %v6631_v47  ;;  %v3404_v23 = vld [vmem:[#allocation4 + $0x78] sm:$0xff] }
 0x228   : > { %4142 = vperm.xlu1 %6354, %v9308_v54   ;;  %v6635_v17 = vpop.eup %6634  ;;  %v1609_v62 = vadd.f32 1.0, %v6633_v4  ;;  %6644 = vrcp.f32 %v1601_v36 }
 0x229   : > { %v6637_v25 = vpop.eup %6636  ;;  %v1613_v32 = vadd.f32 1.0, %v6635_v17  ;;  %6646 = vrcp.f32 %v1605_v14 }
 0x22a   : > { %v6639_v26 = vpop.eup %6638  ;;  %v1617_v38 = vadd.f32 1.0, %v6637_v25  ;;  %6648 = vrcp.f32 %v1609_v62 }
 0x22b   : > { %6365 = vset.pattern.permute.xlu0 %v12304_v27  ;;  %v6641_v56 = vpop.eup %6640  ;;  %v1621_v59 = vadd.f32 1.0, %v6639_v26  ;;  %6650 = vrcp.f32 %v1613_v32 }
 0x22c   : > { %6355 = vset.pattern.permute.xlu1 %v12308_v15  ;;  %4460 = vperm.xlu0 %6365, %v9308_v54   ;;  %v6643_v13 = vpop.eup %6642  ;;  %v1625_v52 = vadd.f32 1.0, %v6641_v56  ;;  %6652 = vrcp.f32 %v1617_v38  ;;  %v12307_v56 = vmov 13  }
 0x22d   : > { %4162 = vperm.xlu1 %6355, %v9308_v54   ;;  %v1627_v5 = vadd.f32 1.0, %v6643_v13  ;;  %6654 = vrcp.f32 %v1621_v59  ;;  %v12842_v59 = vmov 4  }
 0x22e   : > { %v3134_v42 = vpop.permute.xlu1 %3133  ;;  %6656 = vrcp.f32 %v1625_v52  ;;  %v12310_v52 = vmov 9  }
 0x22f   : > { %v3210_v45 = vsel %vm3189_vm2, 0.0, %v3134_v42  ;;  %6658 = vrcp.f32 %v1627_v5 }
 0x230   : > { %3243 = vst.msk [vmem:[#allocation4 + $0xb0] sm:$0xff] %vm2988_vm1, %v3210_v45  ;;  %v3136_v44 = vpop.permute.xlu0 %3135  ;;  %6366 = vset.pattern.permute.xlu0 %v12840_v58 }
 0x231   : > { %v3211_v10 = vsel %vm3189_vm2, 0.0, %v3136_v44  ;;  %4201 = vrot.lane.b32.xlu1 %v9406_v40, %s6840_s28  ;;  %3754 = vperm.xlu0 %6366, %v3257_v53   ;;  %v12309_v44 = vmov 24  }
 0x232   : > { %3244 = vst.msk [vmem:[#allocation4 + $0xb8] sm:$0xff] %vm2988_vm1, %v3211_v10  ;;  %6357 = vset.pattern.permute.xlu1 %v12841_v1  ;;  %v6645_v19 = vpop.eup %6644 }
 0x233   : > { %v6647_v55 = vpop.eup %6646  ;;  %v1697_v39 = vmul.f32 %v6645_v19, %v9462_v11 }
 0x234   : > { %v6649_v47 = vpop.eup %6648  ;;  %v1701_v36 = vmul.f32 %v6647_v55, %v9465_v2 }
 0x235   : > { %4203 = vrot.lane.b32.xlu1 %v9425_v34, %s6840_s28  ;;  %4350 = vrot.lane.b32.xlu0 %v9406_v40, %s6841_s29  ;;  %v6651_v4 = vpop.eup %6650  ;;  %v1705_v14 = vmul.f32 %v6649_v47, %v9468_v28  ;;  %3001 = vst.msk [vmem:[#allocation2 + $0x38] sm:$0xff] %vm2988_vm1, %v1697_v39  ;;  %v3342_v47 = vld [vmem:[#allocation3 + $0x8] sm:$0xff] }
 0x236   : > { %v1709_v17 = vmul.f32 %v6651_v4, %v9471_v6  ;;  %3005 = vst.msk [vmem:[#allocation2 + $0x58] sm:$0xff] %vm2988_vm1, %v1701_v36  ;;  %v6653_v11 = vpop.eup %6652  ;;  %v3260_v36 = vld [vmem:[#allocation4 + $0x8] sm:$0xff]  ;;  %v3454_v4 = vld [vmem:[#allocation2 + $0x18] sm:$0xff] }
 0x237   : > { %3009 = vst.msk [vmem:[#allocation2 + $0x78] sm:$0xff] %vm2988_vm1, %v1705_v14  ;;  %v6655_v62 = vpop.eup %6654  ;;  %v1713_v2 = vmul.f32 %v6653_v11, %v9475_v49 }
 0x238   : > { %3013 = vst.msk [vmem:[#allocation2 + $0x98] sm:$0xff] %vm2988_vm1, %v1709_v17  ;;  %v6657_v40 = vpop.eup %6656  ;;  %v1717_v28 = vmul.f32 %v6655_v62, %v9484_v16  ;;  %v3366_v17 = vmul.f32 %v8875_v8, %v3342_v47 }
 0x239   : > { %4251 = vperm.xlu1 %6357, %v9308_v54   ;;  %v6659_v32 = vpop.eup %6658  ;;  %v1721_v6 = vmul.f32 %v6657_v40, %v9488_v43  ;;  %3017 = vst.msk [vmem:[#allocation2 + $0xb8] sm:$0xff] %vm2988_vm1, %v1713_v2  ;;  %v12306_v43 = vmov 18   ;;  %v12844_v2 = vld [vmem:[#allocation96_spill] sm:$0xff]  ;;  %v3408_v1 = vld [vmem:[#allocation4 + $0xb8] sm:$0xff] }
 0x23a   : > { %v1723_v38 = vmul.f32 %v6659_v32, %v9492_v29  ;;  %3021 = vst.msk [vmem:[#allocation2 + $0xd8] sm:$0xff] %vm2988_vm1, %v1717_v28  ;;  %v3478_v40 = vmul.f32 %v12844_v2, %v3454_v4  ;;  %v3344_v32 = vld [vmem:[#allocation3 + $0x28] sm:$0xff] }
 0x23b   : > { %3025 = vst.msk [vmem:[#allocation2 + $0xf8] sm:$0xff] %vm2988_vm1, %v1721_v6  ;;  %v3346_v6 = vld [vmem:[#allocation3 + $0x48] sm:$0xff] }
 0x23c   : > { %v3138_v25 = vpop.permute.xlu1 %3137  ;;  %3027 = vst.msk [vmem:[#allocation2 + $0x108] sm:$0xff] %vm2988_vm1, %v1723_v38  ;;  %v3514_v38 = vld [vmem:[#allocation3 + $0x58] sm:$0xff] }
 0x23d   : > { %v3212_v26 = vsel %vm3189_vm2, 0.0, %v3138_v25  ;;  %6359 = vset.pattern.permute.xlu1 %v12307_v56  ;;  %v3510_v25 = vld [vmem:[#allocation3 + $0x18] sm:$0xff]  ;;  %v9616_v47 = vmul.f32 %v8947_v0, %v3514_v38  ;;  %v3400_v56 = vld [vmem:[#allocation4 + $0x38] sm:$0xff] }
 0x23e   : > { %3245 = vst.msk [vmem:[#allocation4 + $0xc0] sm:$0xff] %vm2988_vm1, %v3212_v26  ;;  %v3140_v49 = vpop.permute.xlu0 %3139  ;;  %4291 = vperm.xlu1 %6359, %v9308_v54   ;;  %v3512_v26 = vld [vmem:[#allocation3 + $0x38] sm:$0xff]  ;;  %v9674_v24 = vmul.f32 %v8888_v18, %v3400_v56 }
 0x23f   : > { %v3213_v16 = vsel %vm3189_vm2, 0.0, %v3140_v49  ;;  %v3348_v49 = vld [vmem:[#allocation3 + $0x68] sm:$0xff]  ;;  %v3266_v38 = vld [vmem:[#allocation4 + $0x68] sm:$0xff] }
 0x240   : > { %3246 = vst.msk [vmem:[#allocation4 + $0xc8] sm:$0xff] %vm2988_vm1, %v3213_v16  ;;  %v3681_v16 = vld [vmem:[#allocation3 + $0x28] sm:$0xff]  ;;  %v3595_v22 = vmul.f32 %v12847_v46, %v3266_v38 }
 0x241   : > { %v9620_v4 = vmul.f32 %v9026_v3, %v3681_v16  ;;  %v3268_v16 = vld [vmem:[#allocation4 + $0x88] sm:$0xff]  ;;  %v3466_v21 = vld [vmem:[#allocation2 + $0xd8] sm:$0xff] }
 0x242   : > { %6360 = vset.pattern.permute.xlu1 %v12306_v43  ;;  %v3398_v43 = vld [vmem:[#allocation4 + $0x18] sm:$0xff] }
 0x243   : > { %4311 = vperm.xlu1 %6360, %v9308_v54   ;;  %v9668_v60 = vmul.f32 %v8888_v18, %v3398_v43  ;;  %v3406_v43 = vld [vmem:[#allocation4 + $0x98] sm:$0xff] }
 0x245   : > { %v3142_v29 = vpop.permute.xlu1 %3141 }
 0x246   : > { %v3214_v42 = vsel %vm3189_vm2, 0.0, %v3142_v29 }
 0x247   : > { %3247 = vst.msk [vmem:[#allocation4 + $0xd0] sm:$0xff] %vm2988_vm1, %v3214_v42  ;;  %6362 = vset.pattern.permute.xlu1 %v12842_v59  ;;  %v3516_v42 = vld [vmem:[#allocation3 + $0x78] sm:$0xff]  ;;  %v3458_v59 = vld [vmem:[#allocation2 + $0x58] sm:$0xff] }
 0x248   : > { %4400 = vperm.xlu1 %6362, %v9308_v54   ;;  %v3272_v63 = vld [vmem:[#allocation4 + $0xc8] sm:$0xff]  ;;  %v3482_v30 = vmul.f32 %v12844_v2, %v3458_v59  ;;  %v3432_v59 = vmul.f32 %v8888_v18, %v3408_v1  ;;  %v3468_v1 = vld [vmem:[#allocation2 + $0xf8] sm:$0xff] }
 0x24c   : > { %v3144_v13 = vpop.permute.xlu0 %3143  ;;  %6363 = vset.pattern.permute.xlu1 %v12310_v52  ;;  %v3270_v52 = vld [vmem:[#allocation4 + $0xa8] sm:$0xff] }
 0x24d   : > { %v3215_v45 = vsel %vm3189_vm2, 0.0, %v3144_v13  ;;  %4420 = vperm.xlu1 %6363, %v9308_v54   ;;  %v3350_v13 = vld [vmem:[#allocation3 + $0x88] sm:$0xff] }
 0x24e   : > { %3248 = vst.msk [vmem:[#allocation4 + $0xd8] sm:$0xff] %vm2988_vm1, %v3215_v45  ;;  %v3518_v45 = vld [vmem:[#allocation3 + $0x98] sm:$0xff] }
 0x251   : > { %v3146_v53 = vpop.permute.xlu1 %3145  ;;  %4221 = vrot.lane.b32.xlu1 %v9357_v33, %s6840_s28 }
 0x252   : > { %v3216_v5 = vsel %vm3189_vm2, 0.0, %v3146_v53  ;;  %6367 = vset.pattern.permute.xlu1 %v12309_v44 }
 0x253   : > { %3249 = vst.msk [vmem:[#allocation4 + $0xe0] sm:$0xff] %vm2988_vm1, %v3216_v5  ;;  %v3368_v5 = vmul.f32 %v8875_v8, %v3344_v32  ;;  %v9633_v32 = vmul.f32 %v9026_v3, %v3350_v13 }
 0x255   : > { %4480 = vperm.xlu1 %6367, %v9308_v54  }
 0x257   : > { %v3148_v10 = vpop.permute.xlu0 %3147 }
 0x258   : > { %v3217_v19 = vsel %vm3189_vm2, 0.0, %v3148_v10  ;;  %v9609_v10 = vmul.f32 %v8947_v0, %v3510_v25  ;;  %v9629_v25 = vmul.f32 %v8947_v0, %v3516_v42  ;;  %v3524_v42 = vld [vmem:[#allocation3 + $0xf8] sm:$0xff] }
 0x259   : > { %3250 = vst.msk [vmem:[#allocation4 + $0xe8] sm:$0xff] %vm2988_vm1, %v3217_v19  ;;  %4223 = vrot.lane.b32.xlu1 %v9451_v41, %s6840_s28  ;;  %v9612_v19 = vmul.f32 %v8947_v0, %v3512_v26  ;;  %v3356_v26 = vld [vmem:[#allocation3 + $0xe8] sm:$0xff]  ;;  %v9665_v57 = vmul.f32 %v8947_v0, %v3524_v42  ;;  %v9683_v42 = vmul.f32 %v8888_v18, %v3404_v23 }
 0x25a   : > { %6368 = vset.pattern.permute.xlu1 %v12840_v58  ;;  %v9657_v20 = vmul.f32 %v8875_v8, %v3356_v26  ;;  %v9662_v35 = vmul.f32 %v9026_v3, %v3356_v26  ;;  %v3456_v26 = vld [vmem:[#allocation2 + $0x38] sm:$0xff] }
 0x25b   : > { %12846 = vst [vmem:[#allocation93_spill] sm:$0xff] %v9665_v57  ;;  %v3462_v58 = vld [vmem:[#allocation2 + $0x98] sm:$0xff]  ;;  %v3480_v23 = vmul.f32 %v12844_v2, %v3456_v26  ;;  %v3302_v26 = vld [vmem:[#allocation2 + $0x8] sm:$0xff] }
 0x25d   : > { %4352 = vrot.lane.b32.xlu1 %v9425_v34, %s6841_s29  ;;  %v12843_v34 = vld [vmem:[#allocation18_spill] sm:$0xff] }
 0x25e   : > { %v3286_v62 = vmul.f32 %v12843_v34, %v3260_v36  ;;  %v3372_v36 = vmul.f32 %v8875_v8, %v3348_v49  ;;  %v3292_v9 = vmul.f32 %v12843_v34, %v3266_v38  ;;  %v3298_v50 = vmul.f32 %v12843_v34, %v3272_v63 }
 0x25f   : > { %v3150_v33 = vpop.permute.xlu1 %3149  ;;  %v3599_v38 = vmul.f32 %v12847_v46, %v3270_v52 }
 0x260   : > { %v3218_v55 = vsel %vm3189_vm2, 0.0, %v3150_v33  ;;  %v3382_v28 = vadd.f32 %v3366_v17, %v3286_v62  ;;  %v3370_v33 = vmul.f32 %v8875_v8, %v3346_v6  ;;  %v3522_v17 = vld [vmem:[#allocation3 + $0xd8] sm:$0xff]  ;;  %v3388_v31 = vadd.f32 %v3372_v36, %v3292_v9 }
 0x261   : > { %3251 = vst.msk [vmem:[#allocation4 + $0xf0] sm:$0xff] %vm2988_vm1, %v3218_v55  ;;  %v3352_v55 = vld [vmem:[#allocation3 + $0xa8] sm:$0xff]  ;;  %v3264_v62 = vld [vmem:[#allocation4 + $0x48] sm:$0xff] }
 0x262   : > { %v9603_v29 = vadd.f32 %v3478_v40, %v3382_v28  ;;  %v9626_v40 = vmul.f32 %v9026_v3, %v3348_v49  ;;  %v3374_v28 = vmul.f32 %v8875_v8, %v3350_v13  ;;  %v3376_v27 = vmul.f32 %v8875_v8, %v3352_v55 }
 0x263   : > { %v3152_v39 = vpop.permute.xlu0 %3151  ;;  %v9640_v37 = vmul.f32 %v9026_v3, %v3352_v55  ;;  %v3593_v61 = vmul.f32 %v12847_v46, %v3264_v62 }
 0x264   : > { %v3219_v54 = vsel %vm3189_vm2, 0.0, %v3152_v39  ;;  %v3520_v39 = vld [vmem:[#allocation3 + $0xb8] sm:$0xff] }
 0x265   : > { %3252 = vst.msk [vmem:[#allocation4 + $0xf8] sm:$0xff] %vm2988_vm1, %v3219_v54  ;;  %v3354_v54 = vld [vmem:[#allocation3 + $0xc8] sm:$0xff]  ;;  %v9643_v49 = vmul.f32 %v8947_v0, %v3520_v39  ;;  %v9654_v39 = vmul.f32 %v8947_v0, %v3522_v17 }
 0x266   : > { %v3378_v13 = vmul.f32 %v8875_v8, %v3354_v54  ;;  %v9647_v15 = vmul.f32 %v9026_v3, %v3354_v54  ;;  %v3294_v54 = vmul.f32 %v12843_v34, %v3268_v16  ;;  %v3296_v8 = vmul.f32 %v12843_v34, %v3270_v52 }
 0x268   : > { %v3390_v56 = vadd.f32 %v3374_v28, %v3294_v54  ;;  %v3392_v9 = vadd.f32 %v3376_v27, %v3296_v8 }
 0x26d   : > { %v3154_v14 = vpop.permute.xlu1 %3153 }
 0x26e   : > { %v3220_v11 = vsel %vm3189_vm2, 0.0, %v3154_v14  ;;  %v9623_v14 = vmul.f32 %v9026_v3, %v3346_v6  ;;  %v9636_v6 = vmul.f32 %v8947_v0, %v3518_v45  ;;  %v3290_v45 = vmul.f32 %v12843_v34, %v3264_v62  ;;  %v3274_v62 = vld [vmem:[#allocation4 + $0xe8] sm:$0xff] }
 0x26f   : > { %3253 = vst.msk [vmem:[#allocation4 + $0x100] sm:$0xff] %vm2988_vm1, %v3220_v11  ;;  %v3262_v11 = vld [vmem:[#allocation4 + $0x28] sm:$0xff]  ;;  %v9680_v0 = vmul.f32 %v9026_v3, %v3695_v7  ;;  %v3597_v7 = vmul.f32 %v12847_v46, %v3268_v16  ;;  %v3464_v3 = vld [vmem:[#allocation2 + $0xb8] sm:$0xff]  ;;  %v3486_v16 = vmul.f32 %v12844_v2, %v3462_v58  ;;  %v3603_v58 = vmul.f32 %v12847_v46, %v3274_v62 }
 0x270   : > { %v3288_v44 = vmul.f32 %v12843_v34, %v3262_v11  ;;  %v3591_v17 = vmul.f32 %v12847_v46, %v3262_v11  ;;  %v3386_v12 = vadd.f32 %v3370_v33, %v3290_v45  ;;  %v3394_v33 = vadd.f32 %v3378_v13, %v3298_v50  ;;  %v9702_v50 = vld [vmem:[#allocation2 + $0x28] sm:$0xff] }
 0x271   : > { %12848 = vst [vmem:[#allocation37_spill] sm:$0xff] %v9680_v0  ;;  %12851 = vst [vmem:[#allocation41_spill] sm:$0xff] %v9702_v50  ;;  %v3601_v13 = vmul.f32 %v12847_v46, %v3272_v63  ;;  %v3502_v8 = vadd.f32 %v3486_v16, %v3390_v56 }
 0x272   : > { %v3384_v48 = vadd.f32 %v3368_v5, %v3288_v44  ;;  %v3607_v44 = vadd.f32 %v3591_v17, %v9603_v29  ;;  %v3430_v5 = vmul.f32 %v8888_v18, %v3406_v43  ;;  %v3498_v54 = vadd.f32 %v3482_v30, %v3386_v12  ;;  %v3308_v12 = vld [vmem:[#allocation2 + $0x68] sm:$0xff] }
 0x273   : > { %v3488_v29 = vmul.f32 %v12844_v2, %v3464_v3  ;;  %v3490_v17 = vmul.f32 %v12844_v2, %v3466_v21  ;;  %v3310_v30 = vld [vmem:[#allocation2 + $0x88] sm:$0xff]  ;;  %v3410_v21 = vld [vmem:[#allocation4 + $0xd8] sm:$0xff] }
 0x274   : > { %v9605_v53 = vpop.permute.xlu0 %3934  ;;  %v3496_v45 = vadd.f32 %v3480_v23, %v3384_v48  ;;  %v3611_v43 = vadd.f32 %v3595_v22, %v3498_v54  ;;  %v3300_v48 = vmul.f32 %v12843_v34, %v3274_v62  ;;  %v3412_v22 = vld [vmem:[#allocation4 + $0xf8] sm:$0xff]  ;;  %v3492_v54 = vmul.f32 %v12844_v2, %v3468_v1 }
 0x275   : > { %12845 = vst [vmem:[#allocation106_spill] sm:$0xff] %v9605_v53  ;;  %v3460_v53 = vld [vmem:[#allocation2 + $0x78] sm:$0xff]  ;;  %v3504_v3 = vadd.f32 %v3488_v29, %v3392_v9  ;;  %v3506_v23 = vadd.f32 %v3490_v17, %v3394_v33  ;;  %v3615_v29 = vadd.f32 %v3599_v38, %v3502_v8 }
 0x276   : > { %v3484_v36 = vmul.f32 %v12844_v2, %v3460_v53  ;;  %v9704_v53 = vld [vmem:[#allocation2 + $0x48] sm:$0xff]  ;;  %v3609_v52 = vadd.f32 %v3593_v61, %v3496_v45  ;;  %v3396_v0 = vadd.f32 %v9657_v20, %v3300_v48 }
 0x277   : > { %12852 = vst [vmem:[#allocation98_spill] sm:$0xff] %v9704_v53  ;;  %v3316_v45 = vld [vmem:[#allocation2 + $0xe8] sm:$0xff]  ;;  %v3617_v17 = vadd.f32 %v3601_v13, %v3504_v3  ;;  %v3619_v57 = vadd.f32 %v3603_v58, %v3506_v23  ;;  %v3725_v13 = vadd.f32 %v9626_v40, %v3611_v43 }
 0x278   : > { %v3500_v27 = vadd.f32 %v3484_v36, %v3388_v31  ;;  %v3312_v31 = vld [vmem:[#allocation2 + $0xa8] sm:$0xff]  ;;  %v3723_v20 = vadd.f32 %v9623_v14, %v3609_v52 }
 0x279   : > { %v9651_v55 = vpop.permute.xlu0 %3322  ;;  %v3314_v36 = vld [vmem:[#allocation2 + $0xc8] sm:$0xff] }
 0x27a   : > { %v3328_v63 = vmul.f32 %v9651_v55, %v9702_v50  ;;  %v3330_v61 = vmul.f32 %v9651_v55, %v9704_v53  ;;  %v3332_v34 = vmul.f32 %v9651_v55, %v3308_v12  ;;  %v3334_v62 = vmul.f32 %v9651_v55, %v3310_v30 }
 0x27b   : > { %v3336_v9 = vmul.f32 %v9651_v55, %v3312_v31  ;;  %v3338_v33 = vmul.f32 %v9651_v55, %v3314_v36  ;;  %v3340_v41 = vmul.f32 %v9651_v55, %v3316_v45  ;;  %v3436_v53 = vmul.f32 %v8888_v18, %v3412_v22 }
 0x27c   : > { %v3444_v2 = vadd.f32 %v9683_v42, %v3332_v34 }
 0x27d   : > { %v9685_v11 = vpop.permute.xlu0 %3973  ;;  %v3448_v38 = vadd.f32 %v3432_v59, %v3336_v9  ;;  %v12854_v59 = vld [vmem:[#allocation41_spill] sm:$0xff] }
 0x27e   : > { %12849 = vst [vmem:[#allocation39_spill] sm:$0xff] %v9685_v11  ;;  %v3434_v11 = vmul.f32 %v8888_v18, %v3410_v21  ;;  %v3556_v40 = vadd.f32 %v9629_v25, %v3444_v2 }
 0x281   : > { %v9695_v28 = vpop.permute.xlu0 %4002 }
 0x282   : > { %12850 = vst [vmem:[#allocation40_spill] sm:$0xff] %v9695_v28  ;;  %v3326_v28 = vmul.f32 %v9651_v55, %v3302_v26  ;;  %v3613_v26 = vadd.f32 %v3597_v7, %v3500_v27  ;;  %v3446_v7 = vadd.f32 %v3430_v5, %v3334_v62  ;;  %v3450_v27 = vadd.f32 %v3434_v11, %v3338_v33 }
 0x283   : > { %v3721_v55 = vadd.f32 %v9620_v4, %v3607_v44  ;;  %v3733_v4 = vadd.f32 %v9662_v35, %v3619_v57  ;;  %v3638_v35 = vld [vmem:[#allocation2 + $0x108] sm:$0xff] }
 0x284   : > { %v3438_v50 = vadd.f32 %v9668_v60, %v3326_v28  ;;  %v3727_v18 = vadd.f32 %v9633_v32, %v3613_v26  ;;  %v3452_v60 = vadd.f32 %v3436_v53, %v3340_v41  ;;  %v3508_v28 = vadd.f32 %v3492_v54, %v3396_v0  ;;  %v12858_v54 = vld [vmem:[#allocation82_spill] sm:$0xff] }
 0x285   : > { %v3156_v56 = vpop.permute.xlu0 %3155  ;;  %v3558_v41 = vadd.f32 %v9636_v6, %v3446_v7  ;;  %v3560_v32 = vadd.f32 %v9643_v49, %v3448_v38 }
 0x286   : > { %v3221_v16 = vsel %vm3189_vm2, 0.0, %v3156_v56  ;;  %v3440_v56 = vadd.f32 %v9674_v24, %v3328_v63  ;;  %v3729_v24 = vadd.f32 %v9640_v37, %v3615_v29  ;;  %v3550_v42 = vadd.f32 %v9609_v10, %v3438_v50  ;;  %v12855_v50 = vld [vmem:[#allocation98_spill] sm:$0xff] }
 0x287   : > { %3254 = vst.msk [vmem:[#allocation4 + $0x108] sm:$0xff] %vm2988_vm1, %v3221_v16  ;;  %v3442_v16 = vadd.f32 %v9677_v51, %v3330_v61  ;;  %v3731_v51 = vadd.f32 %v9647_v15, %v3617_v17  ;;  %v3562_v37 = vadd.f32 %v9654_v39, %v3450_v27  ;;  %v12853_v15 = vld [vmem:[#allocation47_spill] sm:$0xff]  ;;  %v12857_v61 = vld [vmem:[#allocation37_spill] sm:$0xff] }
 0x288   : > { %v3552_v5 = vadd.f32 %v9612_v19, %v3440_v56 }
 0x289   : > { %v9728_v46 = vpop.permute.xlu0 %4062  ;;  %v3554_v11 = vadd.f32 %v9616_v47, %v3442_v16  ;;  %v12856_v47 = vld [vmem:[#allocation93_spill] sm:$0xff] }
 0x28a   : > { %v3564_v8 = vadd.f32 %v12856_v47, %v3452_v60 }
 0x28e   : > { %v3581_v14 = vld [vmem:[#allocation4 + $0x108] sm:$0xff]  ;;  %v3645_v44 = vpop.permute.xlu0 %3644 }
 0x28f   : > { %v3605_v0 = vmul.f32 %v12853_v15, %v3581_v14  ;;  %v3648_v10 = vmul.f32 %v3645_v44, %v12854_v59  ;;  %v3650_v19 = vmul.f32 %v3645_v44, %v12855_v50  ;;  %v3652_v53 = vmul.f32 %v3645_v44, %v3308_v12  ;;  %v9898_v59 = vld [vmem:[#allocation5 + $0x28] sm:$0xf]  ;;  %v4507_v50 = vld [vmem:[%s12080_s7] sm:$0xf] }
 0x290   : > { %v3654_v57 = vmul.f32 %v3645_v44, %v3310_v30  ;;  %v3656_v52 = vmul.f32 %v3645_v44, %v3312_v31  ;;  %v3658_v43 = vmul.f32 %v3645_v44, %v3314_v36  ;;  %v3660_v48 = vmul.f32 %v3645_v44, %v3316_v45  ;;  %v9750_v45 = vpop.permute.xlu1 %3894 }
 0x291   : > { %v3621_v25 = vadd.f32 %v3605_v0, %v3508_v28  ;;  %v3662_v6 = vmul.f32 %v3645_v44, %v3638_v35  ;;  %v3664_v58 = vadd.f32 %v3648_v10, %v3550_v42  ;;  %v3666_v49 = vadd.f32 %v3650_v19, %v3552_v5  ;;  %v12867_v10 = vld [vmem:[#allocation22_spill] sm:$0xff] }
 0x292   : > { %v3668_v1 = vadd.f32 %v3652_v53, %v3554_v11  ;;  %v3670_v39 = vadd.f32 %v3654_v57, %v3556_v40  ;;  %v3672_v3 = vadd.f32 %v3656_v52, %v3558_v41  ;;  %v3674_v23 = vadd.f32 %v3658_v43, %v3560_v32  ;;  %v4577_v19 = vld [vmem:[%s12081_s8] sm:$0xf]  ;;  %v9912_v47 = vpop.permute.xlu0 %4122  ;;  %v9916_v57 = vld [vmem:[#allocation5] sm:$0xf] }
 0x293   : > { %v3676_v21 = vadd.f32 %v3660_v48, %v3562_v37  ;;  %v3678_v63 = vadd.f32 %v3662_v6, %v3564_v8  ;;  %v3735_v34 = vadd.f32 %v12857_v61, %v3621_v25  ;;  %v3737_v12 = vadd.f32 %v3721_v55, %v3664_v58  ;;  %12871 = vst [vmem:[#allocation49_spill] sm:$0xff] %v9916_v57  ;;  %v9925_v48 = vld [vmem:[#allocation5 + $0x28] sm:$0xf]  ;;  %v9952_v61 = vld [vmem:[#allocation5 + $0x2c] sm:$0xf] }
 0x294   : > { %v3739_v22 = vadd.f32 %v3723_v20, %v3666_v49  ;;  %v3741_v62 = vadd.f32 %v3725_v13, %v3668_v1  ;;  %v3743_v9 = vadd.f32 %v3727_v18, %v3670_v39  ;;  %v3745_v30 = vadd.f32 %v3729_v24, %v3672_v3  ;;  %v9792_v27 = vpop.permute.xlu1 %3914  ;;  %v4578_v1 = vld [vmem:[%s12082_s9] sm:$0xf]  ;;  %v9940_v39 = vld [vmem:[%s12079_s6 + $0x4] sm:$0xf]  ;;  %12880 = vst [vmem:[#allocation84_spill] sm:$0xff] %v9952_v61 }
 0x295   : > { %v3747_v31 = vadd.f32 %v3731_v51, %v3674_v23  ;;  %v3749_v36 = vadd.f32 %v3733_v4, %v3676_v21  ;;  %v3751_v33 = vadd.f32 %v3735_v34, %v3678_v63  ;;  %v9753_v26 = vadd.f32 %v12858_v54, %v3737_v12  ;;  %v9945_v21 = vld [vmem:[#allocation5 + $0x4] sm:$0xf] }
 0x296   : > { %v9756_v29 = vadd.f32 %v12858_v54, %v3739_v22  ;;  %v9759_v17 = vadd.f32 %v12858_v54, %v3741_v62  ;;  %v9762_v56 = vadd.f32 %v12858_v54, %v3743_v9  ;;  %v9765_v16 = vadd.f32 %v12858_v54, %v3745_v30  ;;  %v6799_v22 = vld [vmem:[%s12077_s4] sm:$0xff] }
 0x297   : > { %12859 = vst [vmem:[#allocation99_spill] sm:$0xff] %v9753_v26  ;;  %v9768_v2 = vadd.f32 %v12858_v54, %v3747_v31  ;;  %v9771_v7 = vadd.f32 %v12858_v54, %v3749_v36  ;;  %v9774_v38 = vadd.f32 %v12858_v54, %v3751_v33  ;;  %3787 = vst.msk [vmem:[#allocation5 + $0x4] sm:$0xf0] %vm3786_vm3, %v9753_v26  ;;  %v12869_v8 = vmov 2   ;;  %v9920_v43 = vpop.permute.xlu0 %4182  ;;  %v12885_v31 = vld [vmem:[#allocation94_spill] sm:$0xff] }
 0x298   : > { %12860 = vst [vmem:[#allocation78_spill] sm:$0xff] %v9756_v29  ;;  %12861 = vst [vmem:[#allocation80_spill] sm:$0xff] %v9759_v17  ;;  %v9800_v20 = vpop.permute.xlu1 %3953  ;;  %v12870_v35 = vmov 1   ;;  %v12873_v25 = vmov 3   ;;  %v12874_v6 = vmov 15   ;;  %v12877_v3 = vmov 0  }
 0x299   : > { %12862 = vst [vmem:[#allocation81_spill] sm:$0xff] %v9762_v56  ;;  %12863 = vst [vmem:[#allocation43_spill] sm:$0xff] %v9765_v16  ;;  %v12881_v34 = vmov 5   ;;  %v12882_v12 = vmov 6   ;;  %v3857_v36 = vsel %vm3855_vm4, 0.0, %v12885_v31  ;;  %v12887_v54 = vld [vmem:[#allocation34_spill] sm:$0xff] }
 0x29a   : > { %12864 = vst [vmem:[#allocation44_spill] sm:$0xff] %v9768_v2  ;;  %12865 = vst [vmem:[#allocation45_spill] sm:$0xff] %v9771_v7  ;;  %v12891_v31 = vld [vmem:[#allocation39_spill] sm:$0xff] }
 0x29b   : > { %12866 = vst [vmem:[#allocation48_spill] sm:$0xff] %v9774_v38  ;;  %3788 = vst.msk [vmem:[#allocation5 + $0x8] sm:$0xf0] %vm3786_vm3, %v9756_v29 }
 0x29c   : > { %3789 = vst.msk [vmem:[#allocation5 + $0xc] sm:$0xf0] %vm3786_vm3, %v9759_v17  ;;  %3790 = vst.msk [vmem:[#allocation5 + $0x10] sm:$0xf0] %vm3786_vm3, %v9762_v56  ;;  %v9810_v60 = vpop.permute.xlu1 %3955  ;;  %v9928_v58 = vpop.permute.xlu0 %4271  ;;  %v12897_v17 = vld [vmem:[#allocation106_spill] sm:$0xff] }
 0x29d   : > { %3791 = vst.msk [vmem:[#allocation5 + $0x14] sm:$0xf0] %vm3786_vm3, %v9765_v16  ;;  %3792 = vst.msk [vmem:[#allocation5 + $0x18] sm:$0xf0] %vm3786_vm3, %v9768_v2  ;;  %v12894_v2 = vld [vmem:[#allocation40_spill] sm:$0xff] }
 0x29e   : > { %3793 = vst.msk [vmem:[#allocation5 + $0x1c] sm:$0xf0] %vm3786_vm3, %v9771_v7  ;;  %3794 = vst.msk [vmem:[#allocation5 + $0x20] sm:$0xf0] %vm3786_vm3, %v9774_v38  ;;  %v9794_v55 = vld [vmem:[#allocation5 + $0x8] sm:$0xf] }
 0x29f   : > { %3957 = vrot.lane.b32.xlu0 %v9794_v55, %s6827_s20  ;;  %3823 = vrot.lane.b32.xlu1 %v9794_v55, %s6825_s23  ;;  %12875 = vst [vmem:[#allocation52_spill] sm:$0xff] %v9928_v58  ;;  %v3999_v38 = vsel %vm3189_vm2, 0.0, %v12891_v31 }
 0x2a0   : > { %v9820_v51 = vpop.permute.xlu1 %3975 }
 0x2a1   : > { %v9943_v23 = vpop.permute.xlu0 %4331 }
 0x2a2   : > { %v9816_v28 = vld [vmem:[#allocation5 + $0xc] sm:$0xf]  ;;  %12878 = vst [vmem:[#allocation54_spill] sm:$0xff] %v9943_v23 }
 0x2a3   : > { %v9802_v13 = vld [vmem:[#allocation5 + $0x10] sm:$0xf]  ;;  %4205 = vrot.lane.b32.xlu0 %v9794_v55, %s6840_s28  ;;  %v9826_v42 = vld [vmem:[#allocation5 + $0x14] sm:$0xf] }
 0x2a4   : > { %3827 = vrot.lane.b32.xlu1 %v9802_v13, %s6825_s23  ;;  %v9808_v18 = vld [vmem:[#allocation5 + $0x18] sm:$0xf]  ;;  %v9832_v5 = vpop.permute.xlu1 %4022  ;;  %v9834_v11 = vld [vmem:[#allocation5 + $0x1c] sm:$0xf] }
 0x2a5   : > { %v9818_v24 = vld [vmem:[#allocation5 + $0x20] sm:$0xf]  ;;  %v9840_v4 = vld [vmem:[#allocation5 + $0x24] sm:$0xf] }
 0x2a6   : > { %v9959_v62 = vpop.permute.xlu0 %4440 }
 0x2a7   : > { %4354 = vrot.lane.b32.xlu0 %v9794_v55, %s6841_s29  ;;  %12883 = vst [vmem:[#allocation15_spill] sm:$0xff] %v9959_v62 }
 0x2a8   : > { %3831 = vrot.lane.b32.xlu1 %v9808_v18, %s6825_s23  ;;  %v9842_v14 = vpop.permute.xlu1 %4042 }
 0x2ab   : > { %3825 = vrot.lane.b32.xlu0 %v9816_v28, %s6825_s23  ;;  %v9968_v30 = vpop.permute.xlu0 %4460 }
 0x2ac   : > { %3835 = vrot.lane.b32.xlu1 %v9818_v24, %s6825_s23  ;;  %v9852_v44 = vpop.permute.xlu1 %4082  ;;  %12884 = vst [vmem:[#allocation46_spill] sm:$0xff] %v9968_v30 }
 0x2af   : > { %3829 = vrot.lane.b32.xlu0 %v9826_v42, %s6825_s23 }
 0x2b0   : > { %3959 = vrot.lane.b32.xlu1 %v9816_v28, %s6827_s20  ;;  %v9858_v40 = vpop.permute.xlu1 %4102  ;;  %v10000_v16 = vpop.permute.xlu0 %3754 }
 0x2b1   : > { %12895 = vst [vmem:[#allocation51_spill] sm:$0xff] %v10000_v16  ;;  %v10020_v16 = vmul.f32 %v9728_v46, %v3999_v38 }
 0x2b3   : > { %3833 = vrot.lane.b32.xlu0 %v9834_v11, %s6825_s23  ;;  %12899 = vst [vmem:[#allocation16_spill] sm:$0xff] %v10020_v16 }
 0x2b4   : > { %3963 = vrot.lane.b32.xlu1 %v9826_v42, %s6827_s20  ;;  %v9864_v41 = vpop.permute.xlu1 %4142 }
 0x2b7   : > { %3837 = vrot.lane.b32.xlu0 %v9840_v4, %s6825_s23 }
 0x2b8   : > { %3967 = vrot.lane.b32.xlu1 %v9834_v11, %s6827_s20  ;;  %v9874_v32 = vpop.permute.xlu1 %4162 }
 0x2bb   : > { %3961 = vrot.lane.b32.xlu0 %v9802_v13, %s6827_s20 }
 0x2bc   : > { %3971 = vrot.lane.b32.xlu1 %v9840_v4, %s6827_s20  ;;  %v9880_v37 = vpop.permute.xlu1 %4201 }
 0x2bd   : > { %v4238_v16 = vsel %vm4237_vm5, %v9880_v37, 0.0 }
 0x2bf   : > { %3965 = vrot.lane.b32.xlu0 %v9808_v18, %s6827_s20 }
 0x2c0   : > { %4207 = vrot.lane.b32.xlu1 %v9816_v28, %s6840_s28  ;;  %v9890_v15 = vpop.permute.xlu1 %4203 }
 0x2c3   : > { %3969 = vrot.lane.b32.xlu0 %v9818_v24, %s6827_s20 }
 0x2c4   : > { %4211 = vrot.lane.b32.xlu1 %v9826_v42, %s6840_s28  ;;  %v9896_v0 = vpop.permute.xlu1 %4251 }
 0x2c7   : > { %4209 = vrot.lane.b32.xlu0 %v9802_v13, %s6840_s28 }
 0x2c8   : > { %4215 = vrot.lane.b32.xlu1 %v9834_v11, %s6840_s28  ;;  %v9910_v53 = vpop.permute.xlu1 %4291 }
 0x2c9   : > { %12868 = vst [vmem:[#allocation103_spill] sm:$0xff] %v9910_v53 }
 0x2cb   : > { %4213 = vrot.lane.b32.xlu0 %v9808_v18, %s6840_s28 }
 0x2cc   : > { %4219 = vrot.lane.b32.xlu1 %v9840_v4, %s6840_s28  ;;  %v9918_v52 = vpop.permute.xlu1 %4311 }
 0x2cd   : > { %12872 = vst [vmem:[#allocation50_spill] sm:$0xff] %v9918_v52 }
 0x2cf   : > { %4217 = vrot.lane.b32.xlu0 %v9818_v24, %s6840_s28 }
 0x2d0   : > { %4356 = vrot.lane.b32.xlu1 %v9816_v28, %s6841_s29  ;;  %v9930_v49 = vpop.permute.xlu1 %4400 }
 0x2d1   : > { %12876 = vst [vmem:[#allocation53_spill] sm:$0xff] %v9930_v49 }
 0x2d3   : > { %4358 = vrot.lane.b32.xlu0 %v9802_v13, %s6841_s29 }
 0x2d4   : > { %4360 = vrot.lane.b32.xlu1 %v9826_v42, %s6841_s29  ;;  %v9948_v63 = vpop.permute.xlu1 %4420 }
 0x2d5   : > { %12879 = vst [vmem:[#allocation55_spill] sm:$0xff] %v9948_v63 }
 0x2d7   : > { %4362 = vrot.lane.b32.xlu0 %v9808_v18, %s6841_s29 }
 0x2d8   : > { %4364 = vrot.lane.b32.xlu1 %v9834_v11, %s6841_s29  ;;  %v9963_v9 = vpop.permute.xlu1 %4221 }
 0x2db   : > { %4366 = vrot.lane.b32.xlu0 %v9818_v24, %s6841_s29 }
 0x2dc   : > { %4368 = vrot.lane.b32.xlu1 %v9840_v4, %s6841_s29  ;;  %v9972_v33 = vpop.permute.xlu1 %4480 }
 0x2dd   : > { %12886 = vst [vmem:[#allocation13_spill] sm:$0xff] %v9972_v33  ;;  %v6800_v33 = vld [vmem:[#allocation5] sm:$0xf] }
 0x2de   : > { %v10027_v30 = vmul.f32 %v6800_v33, %v9858_v40  ;;  %v10045_v33 = vmul.f32 %v9912_v47, %v9794_v55 }
 0x2df   : > { %4370 = vrot.lane.b32.xlu0 %v9898_v59, %s6841_s29 }
 0x2e0   : > { %4372 = vrot.lane.b32.xlu1 %v12867_v10, %s6841_s29  ;;  %v3856_v10 = vsel %vm3855_vm4, 0.0, %v12887_v54  ;;  %v12892_v54 = vld [vmem:[#allocation36_spill] sm:$0xff] }
 0x2e1   : > { %v9990_v7 = vmul.f32 %v12892_v54, %v3857_v36  ;;  %v10004_v31 = vmul.f32 %v12892_v54, %v3856_v10  ;;  %v12900_v10 = vmov 20  }
 0x2e3   : > { %4510 = vperm.xlu0 %6366, %v4507_v50   ;;  %v3990_v50 = vsel %vm3189_vm2, 0.0, %v9810_v60  ;;  %v12893_v60 = vld [vmem:[#allocation100_spill] sm:$0xff] }
 0x2e4   : > { %4613 = vperm.xlu1 %6368, %v4577_v19   ;;  %v10024_v26 = vmul.f32 %v9832_v5, %v3990_v50 }
 0x2e7   : > { %6370 = vset.pattern.permute.xlu0 %v12869_v8 }
 0x2e8   : > { %6369 = vset.pattern.permute.xlu1 %v12870_v35  ;;  %4701 = vperm.xlu0 %6370, %v4577_v19  }
 0x2e9   : > { %4657 = vperm.xlu1 %6369, %v4577_v19  }
 0x2ec   : > { %5046 = vrot.lane.b32.xlu0 %v9916_v57, %s6825_s23 }
 0x2ed   : > { %6371 = vset.pattern.permute.xlu1 %v12873_v25  ;;  %6375 = vset.pattern.permute.xlu0 %v12874_v6  ;;  %v12889_v6 = vld [vmem:[#allocation85_spill] sm:$0xff]  ;;  %v4239_v25 = vsel %vm4237_vm5, %v9890_v15, 0.0  ;;  %v10074_v15 = vmul.f32 %v9912_v47, %v9808_v18 }
 0x2ee   : > { %4753 = vperm.xlu1 %6371, %v4577_v19   ;;  %v12888_v19 = vmov 10  }
 0x2ef   : > { %12907 = vst [vmem:[#allocation31_spill] sm:$0xff] %v10074_v15  ;;  %v10095_v15 = vmul.f32 %v9912_v47, %v9802_v13 }
 0x2f0   : > { %5066 = vrot.lane.b32.xlu0 %v9925_v48, %s6825_s23 }
 0x2f2   : > { %6372 = vset.pattern.permute.xlu1 %v12877_v3 }
 0x2f3   : > { %4782 = vperm.xlu1 %6372, %v4578_v1   ;;  %v3867_v1 = vsel %vm3855_vm4, 0.0, %v12889_v6  ;;  %v9996_v6 = vmul.f32 %v12894_v2, %v3990_v50  ;;  %v10041_v50 = vmul.f32 %v9858_v40, %v9794_v55 }
 0x2f4   : > { %5140 = vperm.xlu0 %6375, %v9940_v39  }
 0x2f7   : > { %5048 = vrot.lane.b32.xlu1 %v9945_v21, %s6825_s23 }
 0x2f8   : > { %6373 = vset.pattern.permute.xlu1 %v12881_v34  ;;  %6376 = vset.pattern.permute.xlu0 %v12882_v12  ;;  %v12890_v34 = vld [vmem:[#allocation35_spill] sm:$0xff] }
 0x2f9   : > { %3583 = vperm.xlu0 %6376, %v6799_v22   ;;  %v3866_v12 = vsel %vm3855_vm4, 0.0, %v12890_v34  ;;  %v3989_v22 = vsel %vm3189_vm2, 0.0, %v9800_v20  ;;  %v4000_v34 = vsel %vm3189_vm2, 0.0, %v9820_v51  ;;  %v12896_v20 = vmov 21  }
 0x2fa   : > { %v10007_v56 = vmul.f32 %v9792_v27, %v3866_v12  ;;  %v10014_v29 = vmul.f32 %v12897_v17, %v3866_v12  ;;  %v10017_v51 = vmul.f32 %v12897_v17, %v3867_v1  ;;  %v10031_v12 = vmul.f32 %v9864_v41, %v9794_v55 }
 0x2fb   : > { %5068 = vrot.lane.b32.xlu1 %v9952_v61, %s6825_s23  ;;  %v12904_v61 = vmov 12   ;;  %v10070_v55 = vmul.f32 %v9858_v40, %v9808_v18 }
 0x2fc   : > { %12898 = vst [vmem:[#allocation104_spill] sm:$0xff] %v10017_v51  ;;  %v10061_v51 = vmul.f32 %v9864_v41, %v9816_v28 }
 0x2fd   : > { %5181 = vrot.lane.b32.xlu0 %v9945_v21, %s6827_s20  ;;  %12906 = vst [vmem:[#allocation24_spill] sm:$0xff] %v10070_v55  ;;  %v10091_v55 = vmul.f32 %v9912_v47, %v9816_v28 }
 0x2fe   : > { %12903 = vst [vmem:[#allocation19_spill] sm:$0xff] %v10061_v51 }
 0x2ff   : > { %5108 = vperm.xlu1 %6373, %v9940_v39   ;;  %12911 = vst [vmem:[#allocation62_spill] sm:$0xff] %v10091_v55  ;;  %v10125_v55 = vmul.f32 %v9858_v40, %v9834_v11 }
 0x301   : > { %5248 = vperm.xlu0 %6376, %v9940_v39   ;;  %12916 = vst [vmem:[#allocation69_spill] sm:$0xff] %v10125_v55  ;;  %v12922_v55 = vmov 22  }
 0x303   : > { %6374 = vset.pattern.permute.xlu1 %v12888_v19  ;;  %v9993_v19 = vmul.f32 %v12893_v60, %v3857_v36  ;;  %v10011_v36 = vmul.f32 %v12894_v2, %v3989_v22  ;;  %v6801_v22 = vld [vmem:[#allocation5 + $0x4] sm:$0xf] }
 0x304   : > { %5120 = vperm.xlu1 %6374, %v9940_v39   ;;  %v10034_v1 = vmul.f32 %v6801_v22, %v9912_v47  ;;  %v10057_v37 = vmul.f32 %v6801_v22, %v9858_v40  ;;  %v10078_v22 = vmul.f32 %v9912_v47, %v9818_v24 }
 0x305   : > { %6381 = vset.pattern.permute.xlu0 %v12896_v20  ;;  %v4224_v20 = vpop.permute.xlu1 %4223 }
 0x306   : > { %5308 = vperm.xlu0 %6381, %v9940_v39   ;;  %12901 = vst [vmem:[#allocation10_spill] sm:$0xff] %v10034_v1  ;;  %v10054_v1 = vmul.f32 %v9858_v40, %v9802_v13  ;;  %12908 = vst [vmem:[#allocation61_spill] sm:$0xff] %v10078_v22  ;;  %v10100_v22 = vmul.f32 %v9852_v44, %v4000_v34  ;;  %v10121_v34 = vmul.f32 %v9858_v40, %v9826_v42 }
 0x308   : > { %6377 = vset.pattern.permute.xlu1 %v12900_v10  ;;  %v10048_v10 = vmul.f32 %v9852_v44, %v3999_v38  ;;  %v10066_v38 = vmul.f32 %v9874_v32, %v9816_v28  ;;  %12915 = vst [vmem:[#allocation65_spill] sm:$0xff] %v10121_v34 }
 0x309   : > { %5160 = vperm.xlu1 %6377, %v9940_v39   ;;  %v4353_v51 = vpop.permute.xlu1 %4352 }
 0x30a   : > { %12902 = vst [vmem:[#allocation11_spill] sm:$0xff] %v10048_v10  ;;  %6384 = vset.pattern.permute.xlu0 %v12904_v61  ;;  %12905 = vst [vmem:[#allocation23_spill] sm:$0xff] %v10066_v38  ;;  %v4351_v10 = vpop.permute.xlu0 %4350  ;;  %v10083_v61 = vmul.f32 %v9864_v41, %v9818_v24  ;;  %v10087_v38 = vmul.f32 %v9858_v40, %v9816_v28  ;;  %v10112_v28 = vmul.f32 %v9920_v43, %v9802_v13 }
 0x30b   : > { %5368 = vperm.xlu0 %6384, %v9940_v39   ;;  %v10145_v40 = vmul.f32 %v9920_v43, %v9818_v24 }
 0x30c   : > { %12909 = vst [vmem:[#allocation57_spill] sm:$0xff] %v10083_v61  ;;  %12910 = vst [vmem:[#allocation74_spill] sm:$0xff] %v10087_v38  ;;  %v10104_v61 = vmul.f32 %v9874_v32, %v9818_v24  ;;  %v10108_v38 = vmul.f32 %v9864_v41, %v9802_v13  ;;  %v4387_v24 = vsel %vm4386_vm6, %v4351_v10, 0.0  ;;  %v10181_v10 = vmul.f32 %v9920_v43, %v9826_v42 }
 0x30d   : > { %5179 = vrot.lane.b32.xlu1 %v9916_v57, %s6827_s20  ;;  %12913 = vst [vmem:[#allocation58_spill] sm:$0xff] %v10112_v28  ;;  %v10117_v57 = vmul.f32 %v9920_v43, %v9808_v18  ;;  %v10133_v28 = vmul.f32 %v9912_v47, %v9834_v11  ;;  %12921 = vst [vmem:[#allocation59_spill] sm:$0xff] %v10145_v40  ;;  %v10185_v40 = vmul.f32 %v9920_v43, %v9834_v11 }
 0x30e   : > { %12912 = vst [vmem:[#allocation97_spill] sm:$0xff] %v10104_v61  ;;  %6378 = vset.pattern.permute.xlu1 %v12870_v35  ;;  %v10129_v61 = vmul.f32 %v9912_v47, %v9826_v42  ;;  %v10137_v35 = vmul.f32 %v9864_v41, %v9834_v11  ;;  %v10154_v47 = vmul.f32 %v9874_v32, %v9808_v18  ;;  %12927 = vst [vmem:[#allocation64_spill] sm:$0xff] %v10181_v10 }
 0x30f   : > { %12914 = vst [vmem:[#allocation105_spill] sm:$0xff] %v10117_v57  ;;  %12918 = vst [vmem:[#allocation75_spill] sm:$0xff] %v10133_v28  ;;  %v10141_v57 = vmul.f32 %v9864_v41, %v9808_v18  ;;  %6386 = vset.pattern.permute.xlu0 %v12922_v55  ;;  %v10162_v28 = vmul.f32 %v9864_v41, %v9826_v42  ;;  %v10171_v18 = vmul.f32 %v9928_v58, %v4239_v25 }
 0x310   : > { %12917 = vst [vmem:[#allocation66_spill] sm:$0xff] %v10129_v61  ;;  %12919 = vst [vmem:[#allocation17_spill] sm:$0xff] %v10137_v35  ;;  %v10150_v61 = vmul.f32 %v9874_v32, %v9802_v13  ;;  %v10158_v35 = vmul.f32 %v9874_v32, %v9834_v11  ;;  %5408 = vperm.xlu0 %6386, %v9940_v39   ;;  %v10168_v13 = vmul.f32 %v9896_v0, %v4239_v25 }
 0x311   : > { %12920 = vst [vmem:[#allocation63_spill] sm:$0xff] %v10141_v57  ;;  %12924 = vst [vmem:[#allocation76_spill] sm:$0xff] %v10162_v28  ;;  %5228 = vperm.xlu1 %6378, %v9940_v39   ;;  %v10175_v55 = vmul.f32 %v9874_v32, %v9826_v42  ;;  %v3958_v34 = vpop.permute.xlu0 %3957  ;;  %v3824_v28 = vpop.permute.xlu1 %3823  ;;  %v10189_v25 = vmul.f32 %v9864_v41, %v9840_v4  ;;  %v4249_v57 = vsel %vm4237_vm5, %v4224_v20, 0.0  ;;  %v4388_v41 = vsel %vm4386_vm6, %v4353_v51, 0.0 }
 0x312   : > { %12923 = vst [vmem:[#allocation67_spill] sm:$0xff] %v10158_v35  ;;  %12925 = vst [vmem:[#allocation79_spill] sm:$0xff] %v10171_v18  ;;  %v4248_v35 = vsel %vm4237_vm5, %v9963_v9, 0.0  ;;  %v10195_v9 = vmul.f32 %v9874_v32, %v9840_v4  ;;  %v10199_v42 = vmul.f32 %v9920_v43, %v9840_v4  ;;  %v10205_v11 = vmul.f32 %v9930_v49, %v4387_v24 }
 0x313   : > { %12926 = vst [vmem:[#allocation70_spill] sm:$0xff] %v10175_v55  ;;  %12928 = vst [vmem:[#allocation77_spill] sm:$0xff] %v10185_v40  ;;  %v3858_v55 = vsel %vm3855_vm4, 0.0, %v3824_v28  ;;  %v10202_v10 = vmul.f32 %v9918_v52, %v4248_v35  ;;  %v10209_v20 = vmul.f32 %v9896_v0, %v4238_v16  ;;  %v10212_v28 = vmul.f32 %v9943_v23, %v4248_v35 }
 0x314   : > { %12929 = vst [vmem:[#allocation71_spill] sm:$0xff] %v10189_v25  ;;  %12930 = vst [vmem:[#allocation60_spill] sm:$0xff] %v10195_v9  ;;  %v3991_v9 = vsel %vm3189_vm2, 0.0, %v3958_v34  ;;  %v3897_v25 = vmul.f32 %v9750_v45, %v3858_v55  ;;  %v12936_v4 = vmov 11   ;;  %v10220_v24 = vmul.f32 %v9898_v59, %v9874_v32  ;;  %v6802_v34 = vld [vmem:[#allocation5 + $0x2c] sm:$0xf] }
 0x315   : > { %12931 = vst [vmem:[#allocation101_spill] sm:$0xff] %v10199_v42  ;;  %12932 = vst [vmem:[#allocation102_spill] sm:$0xff] %v10202_v10  ;;  %6379 = vset.pattern.permute.xlu1 %v12936_v4  ;;  %v12937_v42 = vmov 8   ;;  %v10223_v51 = vmul.f32 %v9943_v23, %v4249_v57  ;;  %v4206_v16 = vpop.permute.xlu0 %4205  ;;  %v10229_v35 = vmul.f32 %v9898_v59, %v9920_v43  ;;  %v10235_v32 = vmul.f32 %v9930_v49, %v4388_v41 }
 0x316   : > { %12933 = vst [vmem:[#allocation9_spill] sm:$0xff] %v10205_v11  ;;  %12934 = vst [vmem:[#allocation56_spill] sm:$0xff] %v10209_v20  ;;  %6388 = vset.pattern.permute.xlu0 %v12937_v42  ;;  %v3828_v10 = vpop.permute.xlu1 %3827  ;;  %5268 = vperm.xlu1 %6379, %v9940_v39   ;;  %v10232_v42 = vmul.f32 %v6802_v34, %v9920_v43  ;;  %v10238_v57 = vmul.f32 %v9948_v63, %v4388_v41  ;;  %v4240_v4 = vsel %vm4237_vm5, %v4206_v16, 0.0  ;;  %v12946_v20 = vmov 16  }
 0x317   : > { %12935 = vst [vmem:[#allocation73_spill] sm:$0xff] %v10212_v28  ;;  %12938 = vst [vmem:[#allocation83_spill] sm:$0xff] %v10220_v24  ;;  %5496 = vperm.xlu0 %6388, %v9940_v39   ;;  %v10243_v28 = vmul.f32 %v12894_v2, %v3991_v9  ;;  %v10246_v59 = vmul.f32 %v9832_v5, %v3991_v9  ;;  %v3886_v43 = vmul.f32 %v12893_v60, %v3858_v55  ;;  %v12947_v40 = vmov 23  }
 0x318   : > { %12939 = vst [vmem:[#allocation86_spill] sm:$0xff] %v10223_v51  ;;  %12940 = vst [vmem:[#allocation27_spill] sm:$0xff] %v10229_v35  ;;  %v3860_v51 = vsel %vm3855_vm4, 0.0, %v3828_v10  ;;  %v10249_v35 = vmul.f32 %v9842_v14, %v3991_v9  ;;  %v3905_v34 = vadd.f32 %v3897_v25, %v10004_v31  ;;  %v3875_v10 = vmul.f32 %v12892_v54, %v3858_v55 }
 0x319   : > { %12941 = vst [vmem:[#allocation87_spill] sm:$0xff] %v10232_v42  ;;  %12942 = vst [vmem:[#allocation28_spill] sm:$0xff] %v10235_v32  ;;  %v3899_v41 = vmul.f32 %v9750_v45, %v3860_v51  ;;  %v3937_v16 = vmul.f32 %v12897_v17, %v3860_v51  ;;  %v10258_v32 = vmul.f32 %v9896_v0, %v4240_v4  ;;  %v4355_v9 = vpop.permute.xlu0 %4354 }
 0x31a   : > { %12943 = vst [vmem:[#allocation14_spill] sm:$0xff] %v10238_v57  ;;  %v3918_v57 = vmul.f32 %v9792_v27, %v3860_v51  ;;  %v10261_v42 = vmul.f32 %v9928_v58, %v4240_v4  ;;  %v3832_v24 = vpop.permute.xlu1 %3831  ;;  %6380 = vset.pattern.permute.xlu1 %v12946_v20  ;;  %v10266_v31 = vmul.f32 %v9910_v53, %v4240_v4  ;;  %v4389_v11 = vsel %vm4386_vm6, %v4355_v9, 0.0 }
 0x31b   : > { %12944 = vst [vmem:[#allocation88_spill] sm:$0xff] %v10258_v32  ;;  %6391 = vset.pattern.permute.xlu0 %v12947_v40  ;;  %v3945_v23 = vadd.f32 %v3937_v16, %v3905_v34  ;;  %5288 = vperm.xlu1 %6380, %v9940_v39   ;;  %v3877_v55 = vmul.f32 %v12892_v54, %v3860_v51  ;;  %v3862_v20 = vsel %vm3855_vm4, 0.0, %v3832_v24 }
 0x31c   : > { %12945 = vst [vmem:[#allocation29_spill] sm:$0xff] %v10261_v42  ;;  %12948 = vst [vmem:[#allocation90_spill] sm:$0xff] %v10266_v31  ;;  %v3926_v25 = vadd.f32 %v3918_v57, %v3886_v43  ;;  %5556 = vperm.xlu0 %6391, %v9940_v39   ;;  %v3888_v42 = vmul.f32 %v12893_v60, %v3860_v51  ;;  %v3907_v32 = vadd.f32 %v3899_v41, %v3875_v10 }
 0x31d   : > { %v10275_v40 = vmul.f32 %v9930_v49, %v4389_v11  ;;  %v10278_v4 = vmul.f32 %v9948_v63, %v4389_v11  ;;  %v3901_v57 = vmul.f32 %v9750_v45, %v3862_v20  ;;  %v3920_v43 = vmul.f32 %v9792_v27, %v3862_v20  ;;  %v3826_v24 = vpop.permute.xlu0 %3825 }
 0x31e   : > { %v10283_v34 = vmul.f32 %v9959_v62, %v4389_v11  ;;  %v3879_v16 = vmul.f32 %v12892_v54, %v3862_v20  ;;  %v3890_v51 = vmul.f32 %v12893_v60, %v3862_v20  ;;  %v3939_v41 = vmul.f32 %v12897_v17, %v3862_v20  ;;  %v3836_v10 = vpop.permute.xlu1 %3835 }
 0x31f   : > { %12949 = vst [vmem:[#allocation32_spill] sm:$0xff] %v10275_v40  ;;  %12950 = vst [vmem:[#allocation25_spill] sm:$0xff] %v10278_v4  ;;  %v3859_v9 = vsel %vm3855_vm4, 0.0, %v3826_v24  ;;  %v3864_v40 = vsel %vm3855_vm4, 0.0, %v3836_v10  ;;  %v4014_v4 = vadd.f32 %v9996_v6, %v3926_v25  ;;  %v4033_v63 = vadd.f32 %v10024_v26, %v3945_v23  ;;  %6382 = vset.pattern.permute.xlu1 %v12869_v8 }
 0x320   : > { %12951 = vst [vmem:[#allocation33_spill] sm:$0xff] %v10283_v34  ;;  %5429 = vrot.lane.b32.xlu0 %v9945_v21, %s6840_s28  ;;  %v3898_v11 = vmul.f32 %v9750_v45, %v3859_v9  ;;  %v3917_v34 = vmul.f32 %v9792_v27, %v3859_v9  ;;  %v3909_v20 = vadd.f32 %v3901_v57, %v3877_v55  ;;  %v12952_v23 = vmov 9  }
 0x321   : > { %v3928_v62 = vadd.f32 %v3920_v43, %v3888_v42  ;;  %5328 = vperm.xlu1 %6382, %v9940_v39   ;;  %v3892_v24 = vmul.f32 %v12893_v60, %v3864_v40  ;;  %v3903_v10 = vmul.f32 %v9750_v45, %v3864_v40  ;;  %v3922_v6 = vmul.f32 %v9792_v27, %v3864_v40  ;;  %v3830_v55 = vpop.permute.xlu0 %3829 }
 0x322   : > { %v3941_v26 = vmul.f32 %v12897_v17, %v3864_v40  ;;  %6393 = vset.pattern.permute.xlu0 %v12952_v23  ;;  %v3876_v25 = vmul.f32 %v12892_v54, %v3859_v9  ;;  %v3887_v8 = vmul.f32 %v12893_v60, %v3859_v9  ;;  %v3906_v49 = vadd.f32 %v3898_v11, %v9990_v7  ;;  %v3960_v57 = vpop.permute.xlu1 %3959 }
 0x323   : > { %v3925_v42 = vadd.f32 %v3917_v34, %v9993_v19  ;;  %v3911_v43 = vadd.f32 %v3903_v10, %v3879_v16  ;;  %v10307_v31 = vadd.f32 %v3922_v6, %v3890_v51  ;;  %v10310_v52 = vadd.f32 %v10007_v56, %v3892_v24 }
 0x324   : > { %v3947_v53 = vadd.f32 %v3939_v41, %v3907_v32  ;;  %5644 = vperm.xlu0 %6393, %v9940_v39   ;;  %v3949_v23 = vadd.f32 %v3941_v26, %v3909_v20  ;;  %v3861_v9 = vsel %vm3855_vm4, 0.0, %v3830_v55  ;;  %v3992_v7 = vsel %vm3189_vm2, 0.0, %v3960_v57 }
 0x325   : > { %v10314_v40 = vadd.f32 %v10011_v36, %v3925_v42  ;;  %v12953_v19 = vmov 7   ;;  %v10320_v34 = vadd.f32 %v10014_v29, %v3911_v43  ;;  %v3878_v16 = vmul.f32 %v12892_v54, %v3861_v9  ;;  %v3834_v20 = vpop.permute.xlu0 %3833 }
 0x326   : > { %6383 = vset.pattern.permute.xlu1 %v12953_v19  ;;  %v3889_v56 = vmul.f32 %v12893_v60, %v3861_v9  ;;  %v3900_v32 = vmul.f32 %v9750_v45, %v3861_v9  ;;  %v3919_v36 = vmul.f32 %v9792_v27, %v3861_v9  ;;  %v3938_v51 = vmul.f32 %v12897_v17, %v3861_v9  ;;  %v3964_v24 = vpop.permute.xlu1 %3963 }
 0x327   : > { %5348 = vperm.xlu1 %6383, %v9940_v39   ;;  %v4008_v41 = vmul.f32 %v12894_v2, %v3992_v7  ;;  %v4027_v11 = vmul.f32 %v9832_v5, %v3992_v7  ;;  %v4046_v10 = vmul.f32 %v9842_v14, %v3992_v7  ;;  %v4065_v6 = vmul.f32 %v9728_v46, %v3992_v7 }
 0x328   : > { %v3908_v29 = vadd.f32 %v3900_v32, %v3876_v25  ;;  %v3863_v26 = vsel %vm3855_vm4, 0.0, %v3834_v20  ;;  %5447 = vrot.lane.b32.xlu0 %v9925_v48, %s6840_s28  ;;  %v3927_v42 = vadd.f32 %v3919_v36, %v3887_v8  ;;  %v3946_v55 = vadd.f32 %v3938_v51, %v3906_v49 }
 0x329   : > { %v4016_v57 = vadd.f32 %v4008_v41, %v3928_v62  ;;  %v4035_v43 = vadd.f32 %v4027_v11, %v3947_v53  ;;  %v12954_v9 = vmov 24   ;;  %v4054_v19 = vadd.f32 %v4046_v10, %v4014_v4  ;;  %v3838_v53 = vpop.permute.xlu0 %3837 }
 0x32a   : > { %6396 = vset.pattern.permute.xlu0 %v12954_v9  ;;  %v4073_v18 = vadd.f32 %v4065_v6, %v4033_v63  ;;  %v3902_v58 = vmul.f32 %v9750_v45, %v3863_v26  ;;  %v3921_v25 = vmul.f32 %v9792_v27, %v3863_v26  ;;  %v3940_v7 = vmul.f32 %v12897_v17, %v3863_v26 }
 0x32b   : > { %5199 = vrot.lane.b32.xlu1 %v9925_v48, %s6827_s20  ;;  %v3994_v32 = vsel %vm3189_vm2, 0.0, %v3964_v24  ;;  %v3880_v8 = vmul.f32 %v12892_v54, %v3863_v26  ;;  %v3891_v49 = vmul.f32 %v12893_v60, %v3863_v26  ;;  %v12955_v62 = vmov 17   ;;  %v3968_v60 = vpop.permute.xlu1 %3967 }
 0x32c   : > { %6385 = vset.pattern.permute.xlu1 %v12955_v62  ;;  %v4113_v63 = vadd.f32 %v10027_v30, %v4073_v18  ;;  %v3929_v4 = vadd.f32 %v3921_v25, %v3889_v56  ;;  %v4010_v36 = vmul.f32 %v12894_v2, %v3994_v32  ;;  %v4029_v51 = vmul.f32 %v9832_v5, %v3994_v32 }
 0x32d   : > { %5704 = vperm.xlu0 %6396, %v9940_v39   ;;  %v3948_v41 = vadd.f32 %v3940_v7, %v3908_v29  ;;  %v4048_v11 = vmul.f32 %v9842_v14, %v3994_v32  ;;  %v4067_v20 = vmul.f32 %v9728_v46, %v3994_v32  ;;  %v4086_v54 = vmul.f32 %v9852_v44, %v3994_v32  ;;  %v3962_v32 = vpop.permute.xlu0 %3961 }
 0x32e   : > { %v10353_v24 = vadd.f32 %v10031_v12, %v4113_v63  ;;  %v4037_v10 = vadd.f32 %v4029_v51, %v3949_v23  ;;  %v3910_v30 = vadd.f32 %v3902_v58, %v3878_v16  ;;  %v3865_v18 = vsel %vm3855_vm4, 0.0, %v3838_v53 }
 0x32f   : > { %5388 = vperm.xlu1 %6385, %v9940_v39   ;;  %v4056_v56 = vadd.f32 %v4048_v11, %v4016_v57  ;;  %v4075_v6 = vadd.f32 %v4067_v20, %v4035_v43  ;;  %v4094_v26 = vadd.f32 %v4086_v54, %v4054_v19  ;;  %v3904_v29 = vmul.f32 %v9750_v45, %v3865_v18  ;;  %v12956_v57 = vld [vmem:[#allocation84_spill] sm:$0xff] }
 0x330   : > { %v3923_v9 = vmul.f32 %v9792_v27, %v3865_v18  ;;  %v3942_v25 = vmul.f32 %v12897_v17, %v3865_v18  ;;  %v3996_v7 = vsel %vm3189_vm2, 0.0, %v3968_v60  ;;  %v4015_v12 = vadd.f32 %v10243_v28, %v3927_v42 }
 0x331   : > { %6397 = vset.pattern.permute.xlu0 %v12877_v3  ;;  %v10364_v58 = vadd.f32 %v10041_v50, %v4075_v6  ;;  %v10367_v23 = vadd.f32 %v10045_v33, %v4094_v26  ;;  %v3912_v16 = vadd.f32 %v3904_v29, %v3880_v8  ;;  %v4012_v45 = vmul.f32 %v12894_v2, %v3996_v7  ;;  %v12957_v50 = vld [vmem:[#allocation104_spill] sm:$0xff] }
 0x332   : > { %5096 = vperm.xlu0 %6397, %v9940_v39   ;;  %v10371_v27 = vadd.f32 %v3923_v9, %v3891_v49  ;;  %v10373_v17 = vadd.f32 %v3942_v25, %v3910_v30  ;;  %v4031_v28 = vmul.f32 %v9832_v5, %v3996_v7  ;;  %v4050_v42 = vmul.f32 %v9842_v14, %v3996_v7  ;;  %v3972_v30 = vpop.permute.xlu1 %3971 }
 0x333   : > { %5201 = vrot.lane.b32.xlu1 %v12956_v57, %s6827_s20  ;;  %v10380_v43 = vadd.f32 %v12957_v50, %v3912_v16  ;;  %v4069_v33 = vmul.f32 %v9728_v46, %v3996_v7  ;;  %v4088_v19 = vmul.f32 %v9852_v44, %v3996_v7  ;;  %v4034_v8 = vadd.f32 %v10246_v59, %v3946_v55  ;;  %v3966_v55 = vpop.permute.xlu0 %3965  ;;  %v12961_v50 = vld [vmem:[#allocation19_spill] sm:$0xff] }
 0x334   : > { %v12958_v49 = vmov 3   ;;  %v4053_v53 = vadd.f32 %v10249_v35, %v10314_v40  ;;  %v3993_v62 = vsel %vm3189_vm2, 0.0, %v3962_v32  ;;  %v4018_v63 = vadd.f32 %v4010_v36, %v10307_v31  ;;  %v12959_v32 = vld [vmem:[#allocation10_spill] sm:$0xff] }
 0x335   : > { %6387 = vset.pattern.permute.xlu1 %v12958_v49  ;;  %v4020_v51 = vadd.f32 %v4012_v45, %v10310_v52  ;;  %v4077_v11 = vadd.f32 %v4069_v33, %v4037_v10  ;;  %v4096_v20 = vadd.f32 %v4088_v19, %v4056_v56  ;;  %v4009_v54 = vmul.f32 %v12894_v2, %v3993_v62  ;;  %v12962_v19 = vld [vmem:[#allocation23_spill] sm:$0xff] }
 0x336   : > { %v4028_v60 = vmul.f32 %v9832_v5, %v3993_v62  ;;  %5577 = vrot.lane.b32.xlu0 %v9945_v21, %s6841_s29  ;;  %v4047_v59 = vmul.f32 %v9842_v14, %v3993_v62  ;;  %v4066_v35 = vmul.f32 %v9728_v46, %v3993_v62  ;;  %v4085_v40 = vmul.f32 %v9852_v44, %v3993_v62  ;;  %v12963_v62 = vld [vmem:[#allocation24_spill] sm:$0xff] }
 0x337   : > { %v4039_v31 = vadd.f32 %v4031_v28, %v10320_v34  ;;  %5476 = vperm.xlu1 %6387, %v9940_v39   ;;  %v4117_v52 = vadd.f32 %v10054_v1, %v4077_v11  ;;  %v4017_v36 = vadd.f32 %v4009_v54, %v3929_v4  ;;  %v4058_v18 = vadd.f32 %v4050_v42, %v4018_v63 }
 0x338   : > { %v4036_v10 = vadd.f32 %v4028_v60, %v3948_v41  ;;  %v4055_v56 = vadd.f32 %v4047_v59, %v4015_v12  ;;  %v4074_v6 = vadd.f32 %v4066_v35, %v4034_v8  ;;  %v4093_v26 = vadd.f32 %v4085_v40, %v4053_v53  ;;  %v4208_v60 = vpop.permute.xlu1 %4207 }
 0x339   : > { %v3998_v21 = vsel %vm3189_vm2, 0.0, %v3972_v30  ;;  %v3995_v34 = vsel %vm3189_vm2, 0.0, %v3966_v55  ;;  %v12960_v12 = vmov 13   ;;  %v4136_v54 = vadd.f32 %v10095_v15, %v4096_v20  ;;  %v12965_v55 = vld [vmem:[#allocation61_spill] sm:$0xff] }
 0x33a   : > { %v4052_v29 = vmul.f32 %v9842_v14, %v3998_v21  ;;  %v4071_v9 = vmul.f32 %v9728_v46, %v3998_v21  ;;  %v4090_v25 = vmul.f32 %v9852_v44, %v3998_v21  ;;  %v4114_v7 = vadd.f32 %v10057_v37, %v4074_v6 }
 0x33b   : > { %v4133_v1 = vadd.f32 %v12959_v32, %v4093_v26  ;;  %v4011_v4 = vmul.f32 %v12894_v2, %v3995_v34  ;;  %v4030_v41 = vmul.f32 %v9832_v5, %v3995_v34  ;;  %6389 = vset.pattern.permute.xlu1 %v12960_v12  ;;  %v4049_v42 = vmul.f32 %v9842_v14, %v3995_v34  ;;  %v12967_v26 = vld [vmem:[#allocation97_spill] sm:$0xff] }
 0x33c   : > { %v4060_v16 = vadd.f32 %v4052_v29, %v4020_v51  ;;  %v4079_v45 = vadd.f32 %v4071_v9, %v4039_v31  ;;  %v4098_v28 = vadd.f32 %v4090_v25, %v4058_v18  ;;  %5516 = vperm.xlu1 %6389, %v9940_v39   ;;  %v10414_v33 = vadd.f32 %v12961_v50, %v4114_v7  ;;  %v12964_v51 = vld [vmem:[#allocation31_spill] sm:$0xff]  ;;  %v3970_v31 = vpop.permute.xlu0 %3969  ;;  %v12972_v29 = vld [vmem:[#allocation105_spill] sm:$0xff]  ;;  %v12976_v50 = vld [vmem:[#allocation50_spill] sm:$0xff] }
 0x33d   : > { %v10417_v37 = vadd.f32 %v12962_v19, %v4133_v1  ;;  %v4068_v8 = vmul.f32 %v9728_v46, %v3995_v34  ;;  %v4087_v2 = vmul.f32 %v9852_v44, %v3995_v34  ;;  %v4155_v35 = vadd.f32 %v10108_v38, %v10364_v58  ;;  %v12970_v38 = vld [vmem:[#allocation62_spill] sm:$0xff]  ;;  %v12973_v1 = vld [vmem:[#allocation52_spill] sm:$0xff] }
 0x33e   : > { %v4100_v53 = vadd.f32 %v10100_v22, %v4060_v16  ;;  %v4119_v63 = vadd.f32 %v12963_v62, %v4079_v45  ;;  %v4138_v11 = vadd.f32 %v12964_v51, %v4098_v28  ;;  %v4174_v40 = vadd.f32 %v10150_v61, %v10367_v23  ;;  %v12966_v22 = vld [vmem:[#allocation57_spill] sm:$0xff]  ;;  %v12971_v61 = vld [vmem:[#allocation58_spill] sm:$0xff]  ;;  %v12974_v16 = vld [vmem:[#allocation79_spill] sm:$0xff] }
 0x33f   : > { %v4076_v30 = vadd.f32 %v4068_v8, %v4036_v10  ;;  %v4095_v59 = vadd.f32 %v4087_v2, %v4055_v56  ;;  %v4176_v15 = vadd.f32 %v10154_v47, %v4136_v54  ;;  %v12968_v20 = vmov 18   ;;  %v12969_v10 = vld [vmem:[#allocation74_spill] sm:$0xff]  ;;  %v12975_v28 = vld [vmem:[#allocation103_spill] sm:$0xff] }
 0x340   : > { %v10430_v18 = vadd.f32 %v12965_v55, %v4100_v53  ;;  %v10433_v6 = vadd.f32 %v12966_v22, %v4119_v63  ;;  %v10436_v21 = vadd.f32 %v12967_v26, %v4138_v11  ;;  %6390 = vset.pattern.permute.xlu1 %v12968_v20  ;;  %v4193_v23 = vadd.f32 %v12971_v61, %v10353_v24  ;;  %v12977_v53 = vld [vmem:[#allocation63_spill] sm:$0xff]  ;;  %v12982_v26 = vld [vmem:[#allocation16_spill] sm:$0xff] }
 0x341   : > { %v4116_v56 = vadd.f32 %v12969_v10, %v4076_v30  ;;  %v4135_v58 = vadd.f32 %v12970_v38, %v4095_v59  ;;  %v4195_v9 = vadd.f32 %v12972_v29, %v4155_v35  ;;  %5536 = vperm.xlu1 %6390, %v9940_v39   ;;  %v4241_v25 = vsel %vm4237_vm5, %v4208_v60, 0.0  ;;  %v12980_v35 = vld [vmem:[#allocation76_spill] sm:$0xff]  ;;  %v12983_v20 = vld [vmem:[#allocation11_spill] sm:$0xff]  ;;  %v12984_v38 = vld [vmem:[#allocation65_spill] sm:$0xff] }
 0x342   : > { %v4263_v34 = vadd.f32 %v10168_v13, %v4174_v40  ;;  %v4019_v7 = vadd.f32 %v4011_v4, %v10371_v27  ;;  %v4038_v47 = vadd.f32 %v4030_v41, %v10373_v17  ;;  %v4257_v32 = vmul.f32 %v9896_v0, %v4241_v25  ;;  %v4212_v13 = vpop.permute.xlu1 %4211  ;;  %v4210_v41 = vpop.permute.xlu0 %4209  ;;  %v12981_v40 = vld [vmem:[#allocation9_spill] sm:$0xff] }
 0x343   : > { %v4276_v12 = vmul.f32 %v12973_v1, %v4241_v25  ;;  %v4282_v45 = vadd.f32 %v12974_v16, %v4193_v23  ;;  %v4295_v24 = vmul.f32 %v12975_v28, %v4241_v25  ;;  %v4314_v19 = vmul.f32 %v12976_v50, %v4241_v25  ;;  %v12985_v23 = vld [vmem:[#allocation66_spill] sm:$0xff]  ;;  %v12986_v25 = vld [vmem:[#allocation49_spill] sm:$0xff] }
 0x344   : > { %v4057_v8 = vadd.f32 %v4049_v42, %v4017_v36  ;;  %v3997_v2 = vsel %vm3189_vm2, 0.0, %v3970_v31  ;;  %v4157_v62 = vadd.f32 %v12977_v53, %v4117_v52  ;;  %v4265_v63 = vadd.f32 %v4257_v32, %v4176_v15  ;;  %v12979_v42 = vld [vmem:[#allocation59_spill] sm:$0xff] }
 0x345   : > { %v4284_v27 = vadd.f32 %v4276_v12, %v4195_v9  ;;  %v4303_v4 = vadd.f32 %v4295_v24, %v4263_v34  ;;  %v4032_v17 = vmul.f32 %v9832_v5, %v3997_v2  ;;  %v12978_v51 = vmov 4   ;;  %v12987_v34 = vld [vmem:[#allocation69_spill] sm:$0xff]  ;;  %v12988_v12 = vld [vmem:[#allocation54_spill] sm:$0xff] }
 0x346   : > { %6392 = vset.pattern.permute.xlu1 %v12978_v51  ;;  %v4322_v11 = vadd.f32 %v4314_v19, %v4282_v45  ;;  %v4051_v54 = vmul.f32 %v9842_v14, %v3997_v2  ;;  %v4070_v60 = vmul.f32 %v9728_v46, %v3997_v2  ;;  %v4089_v36 = vmul.f32 %v9852_v44, %v3997_v2  ;;  %v4216_v9 = vpop.permute.xlu1 %4215  ;;  %v4214_v45 = vpop.permute.xlu0 %4213  ;;  %v12990_v19 = vld [vmem:[#allocation75_spill] sm:$0xff]  ;;  %v12991_v2 = vld [vmem:[#allocation17_spill] sm:$0xff] }
 0x347   : > { %5624 = vperm.xlu1 %6392, %v9940_v39   ;;  %v4040_v52 = vadd.f32 %v4032_v17, %v10380_v43  ;;  %v4197_v30 = vadd.f32 %v12979_v42, %v4157_v62  ;;  %v4243_v59 = vsel %vm4237_vm5, %v4212_v13, 0.0  ;;  %v4156_v5 = vadd.f32 %v12980_v35, %v4116_v56  ;;  %v12992_v62 = vld [vmem:[#allocation67_spill] sm:$0xff]  ;;  %v12996_v42 = vld [vmem:[#allocation56_spill] sm:$0xff] }
 0x348   : > { %v10468_v31 = vadd.f32 %v12981_v40, %v4322_v11  ;;  %v4059_v55 = vadd.f32 %v4051_v54, %v4019_v7  ;;  %v4078_v22 = vadd.f32 %v4070_v60, %v4038_v47  ;;  %v4097_v14 = vadd.f32 %v4089_v36, %v4057_v8  ;;  %v12993_v11 = vld [vmem:[#allocation70_spill] sm:$0xff]  ;;  %v12994_v60 = vld [vmem:[#allocation64_spill] sm:$0xff]  ;;  %v12995_v36 = vld [vmem:[#allocation77_spill] sm:$0xff] }
 0x349   : > { %v4080_v46 = vadd.f32 %v12982_v26, %v4040_v52  ;;  %v4259_v44 = vmul.f32 %v9896_v0, %v4243_v59  ;;  %v4278_v15 = vmul.f32 %v12973_v1, %v4243_v59  ;;  %v4297_v43 = vmul.f32 %v12975_v28, %v4243_v59 }
 0x34a   : > { %v4099_v10 = vadd.f32 %v12983_v20, %v4059_v55  ;;  %v4118_v61 = vadd.f32 %v12984_v38, %v4078_v22  ;;  %v4137_v56 = vadd.f32 %v12985_v23, %v4097_v14  ;;  %v4316_v29 = vmul.f32 %v12976_v50, %v4243_v59  ;;  %v12998_v55 = vld [vmem:[#allocation29_spill] sm:$0xff] }
 0x34b   : > { %5427 = vrot.lane.b32.xlu1 %v12986_v25, %s6840_s28  ;;  %v4120_v7 = vadd.f32 %v12987_v34, %v4080_v46  ;;  %v4286_v47 = vadd.f32 %v4278_v15, %v4197_v30  ;;  %v4305_v32 = vadd.f32 %v4297_v43, %v4265_v63  ;;  %v4335_v16 = vmul.f32 %v12988_v12, %v4243_v59  ;;  %v4220_v46 = vpop.permute.xlu1 %4219 }
 0x34c   : > { %v12989_v24 = vmov 14   ;;  %v4139_v8 = vadd.f32 %v12990_v19, %v4099_v10  ;;  %v4158_v53 = vadd.f32 %v12991_v2, %v4118_v61  ;;  %v4177_v13 = vadd.f32 %v12992_v62, %v4137_v56 }
 0x34d   : > { %6394 = vset.pattern.permute.xlu1 %v12989_v24  ;;  %v10486_v17 = vadd.f32 %v4316_v29, %v4284_v27  ;;  %v10488_v51 = vadd.f32 %v4335_v16, %v4303_v4  ;;  %v4175_v54 = vadd.f32 %v12993_v11, %v4135_v58  ;;  %v4194_v63 = vadd.f32 %v12994_v60, %v10414_v33  ;;  %v12997_v27 = vld [vmem:[#allocation88_spill] sm:$0xff]  ;;  %v4218_v24 = vpop.permute.xlu0 %4217 }
 0x34e   : > { %v4196_v52 = vadd.f32 %v12995_v36, %v4156_v5  ;;  %v4262_v30 = vadd.f32 %v12996_v42, %v10417_v37  ;;  %v4242_v59 = vsel %vm4237_vm5, %v4210_v41, 0.0  ;;  %v4245_v35 = vsel %vm4237_vm5, %v4216_v9, 0.0  ;;  %v12999_v5 = vld [vmem:[#allocation90_spill] sm:$0xff] }
 0x34f   : > { %v4244_v40 = vsel %vm4237_vm5, %v4214_v45, 0.0  ;;  %5664 = vperm.xlu1 %6394, %v9940_v39   ;;  %v4264_v4 = vadd.f32 %v12997_v27, %v4175_v54  ;;  %v4283_v58 = vadd.f32 %v12998_v55, %v4194_v63  ;;  %v4258_v22 = vmul.f32 %v9896_v0, %v4242_v59  ;;  %v13002_v63 = vld [vmem:[#allocation27_spill] sm:$0xff] }
 0x350   : > { %v4277_v33 = vmul.f32 %v12973_v1, %v4242_v59  ;;  %v4302_v14 = vadd.f32 %v12999_v5, %v4262_v30  ;;  %v4296_v37 = vmul.f32 %v12975_v28, %v4242_v59  ;;  %v4315_v41 = vmul.f32 %v12976_v50, %v4242_v59 }
 0x351   : > { %v4334_v26 = vmul.f32 %v12988_v12, %v4242_v59  ;;  %v4266_v15 = vadd.f32 %v4258_v22, %v4177_v13  ;;  %v4261_v20 = vmul.f32 %v9896_v0, %v4245_v35  ;;  %v4280_v10 = vmul.f32 %v12973_v1, %v4245_v35  ;;  %v13001_v13 = vld [vmem:[#allocation83_spill] sm:$0xff]  ;;  %v4357_v59 = vpop.permute.xlu1 %4356 }
 0x352   : > { %v4285_v43 = vadd.f32 %v4277_v33, %v4196_v52  ;;  %v4304_v38 = vadd.f32 %v4296_v37, %v4264_v4  ;;  %v4323_v61 = vadd.f32 %v4315_v41, %v4283_v58  ;;  %v4299_v56 = vmul.f32 %v12975_v28, %v4245_v35  ;;  %v13005_v4 = vld [vmem:[#allocation101_spill] sm:$0xff] }
 0x353   : > { %v4342_v23 = vadd.f32 %v4334_v26, %v4302_v14  ;;  %v13000_v29 = vmov 19   ;;  %v4318_v9 = vmul.f32 %v12976_v50, %v4245_v35  ;;  %v4337_v34 = vmul.f32 %v12988_v12, %v4245_v35  ;;  %v4359_v14 = vpop.permute.xlu0 %4358 }
 0x354   : > { %6395 = vset.pattern.permute.xlu1 %v13000_v29  ;;  %v4260_v16 = vmul.f32 %v9896_v0, %v4244_v40  ;;  %v4279_v45 = vmul.f32 %v12973_v1, %v4244_v40  ;;  %v4298_v19 = vmul.f32 %v12975_v28, %v4244_v40  ;;  %v4317_v2 = vmul.f32 %v12976_v50, %v4244_v40 }
 0x355   : > { %5684 = vperm.xlu1 %6395, %v9940_v39   ;;  %v4336_v62 = vmul.f32 %v12988_v12, %v4244_v40  ;;  %v4180_v11 = vadd.f32 %v13001_v13, %v10430_v18  ;;  %v4326_v54 = vadd.f32 %v4318_v9, %v4286_v47  ;;  %v10522_v60 = vadd.f32 %v4337_v34, %v4305_v32  ;;  %v4361_v9 = vpop.permute.xlu1 %4360  ;;  %v13014_v13 = vld [vmem:[#allocation73_spill] sm:$0xff] }
 0x356   : > { %v4199_v0 = vadd.f32 %v13002_v63, %v10433_v6  ;;  %v4267_v36 = vadd.f32 %v4259_v44, %v10436_v21  ;;  %v4325_v52 = vadd.f32 %v4317_v2, %v4285_v43  ;;  %v4247_v30 = vsel %vm4237_vm5, %v4220_v46, 0.0  ;;  %v13003_v6 = vld [vmem:[#allocation71_spill] sm:$0xff]  ;;  %v13004_v21 = vld [vmem:[#allocation60_spill] sm:$0xff]  ;;  %v13012_v2 = vld [vmem:[#allocation46_spill] sm:$0xff] }
 0x357   : > { %v4344_v42 = vadd.f32 %v4336_v62, %v4304_v38  ;;  %v4269_v39 = vadd.f32 %v4261_v20, %v4180_v11  ;;  %v4301_v40 = vmul.f32 %v12975_v28, %v4247_v30  ;;  %v4320_v18 = vmul.f32 %v12976_v50, %v4247_v30  ;;  %v13013_v62 = vld [vmem:[#allocation102_spill] sm:$0xff] }
 0x358   : > { %v4288_v35 = vadd.f32 %v4280_v10, %v4199_v0  ;;  %v4307_v27 = vadd.f32 %v4299_v56, %v4267_v36  ;;  %v4339_v47 = vmul.f32 %v12988_v12, %v4247_v30  ;;  %v4160_v32 = vadd.f32 %v13003_v6, %v4120_v7  ;;  %v13008_v10 = vld [vmem:[#allocation14_spill] sm:$0xff]  ;;  %v13015_v0 = vld [vmem:[#allocation32_spill] sm:$0xff] }
 0x359   : > { %5449 = vrot.lane.b32.xlu1 %v12956_v57, %s6840_s28  ;;  %v4179_v44 = vadd.f32 %v13004_v21, %v4139_v8  ;;  %v4198_v55 = vadd.f32 %v13005_v4, %v4158_v53  ;;  %v10537_v58 = vadd.f32 %v4301_v40, %v4269_v39  ;;  %v4306_v33 = vadd.f32 %v4298_v19, %v4266_v15  ;;  %v13006_v57 = vld [vmem:[#allocation87_spill] sm:$0xff]  ;;  %v13007_v15 = vld [vmem:[#allocation28_spill] sm:$0xff]  ;;  %v4363_v39 = vpop.permute.xlu0 %4362  ;;  %v13017_v21 = vld [vmem:[#allocation33_spill] sm:$0xff] }
 0x35a   : > { %6398 = vset.pattern.permute.xlu1 %v12877_v3  ;;  %v10539_v22 = vadd.f32 %v4320_v18, %v4288_v35  ;;  %v4246_v5 = vsel %vm4237_vm5, %v4218_v24, 0.0  ;;  %v10542_v37 = vadd.f32 %v4339_v47, %v4307_v27  ;;  %v4200_v41 = vadd.f32 %v13006_v57, %v4160_v32  ;;  %v13011_v19 = vld [vmem:[#allocation15_spill] sm:$0xff]  ;;  %v13016_v47 = vld [vmem:[#allocation25_spill] sm:$0xff] }
 0x35b   : > { %v4268_v26 = vadd.f32 %v4260_v16, %v4179_v44  ;;  %v4287_v7 = vadd.f32 %v4279_v45, %v4198_v55  ;;  %v4281_v8 = vmul.f32 %v12973_v1, %v4246_v5  ;;  %v4300_v53 = vmul.f32 %v12975_v28, %v4246_v5  ;;  %v13018_v4 = vld [vmem:[#allocation13_spill] sm:$0xff] }
 0x35c   : > { %v4319_v46 = vmul.f32 %v12976_v50, %v4246_v5  ;;  %v4338_v43 = vmul.f32 %v12988_v12, %v4246_v5  ;;  %v4412_v20 = vadd.f32 %v13007_v15, %v4323_v61  ;;  %v4431_v38 = vadd.f32 %v13008_v10, %v4342_v23  ;;  %v13009_v50 = vld [vmem:[#allocation53_spill] sm:$0xff]  ;;  %v13010_v12 = vld [vmem:[#allocation55_spill] sm:$0xff] }
 0x35d   : > { %5575 = vrot.lane.b32.xlu1 %v12986_v25, %s6841_s29  ;;  %v4390_v56 = vsel %vm4386_vm6, %v4357_v59, 0.0  ;;  %v4391_v29 = vsel %vm4386_vm6, %v4359_v14, 0.0  ;;  %v4289_v34 = vadd.f32 %v4281_v8, %v4200_v41  ;;  %v4308_v1 = vadd.f32 %v4300_v53, %v4268_v26  ;;  %v4367_v53 = vpop.permute.xlu0 %4366 }
 0x35e   : > { %v10555_v16 = vadd.f32 %v4319_v46, %v4287_v7  ;;  %v4346_v28 = vadd.f32 %v4338_v43, %v4306_v33  ;;  %v4406_v45 = vmul.f32 %v13009_v50, %v4390_v56  ;;  %v4425_v24 = vmul.f32 %v13010_v12, %v4390_v56 }
 0x35f   : > { %v4444_v25 = vmul.f32 %v13011_v19, %v4390_v56  ;;  %v4463_v61 = vmul.f32 %v13012_v2, %v4390_v56  ;;  %v10562_v23 = vadd.f32 %v13013_v62, %v4289_v34  ;;  %v10565_v11 = vadd.f32 %v13014_v13, %v4308_v1 }
 0x360   : > { %v4407_v63 = vmul.f32 %v13009_v50, %v4391_v29  ;;  %v4413_v36 = vadd.f32 %v13015_v0, %v10486_v17  ;;  %v4414_v30 = vadd.f32 %v4406_v45, %v4325_v52  ;;  %v4433_v59 = vadd.f32 %v4425_v24, %v4344_v42  ;;  %v4365_v52 = vpop.permute.xlu1 %4364 }
 0x361   : > { %5595 = vrot.lane.b32.xlu1 %v9925_v48, %s6841_s29  ;;  %v4452_v35 = vadd.f32 %v4444_v25, %v4412_v20  ;;  %v4471_v27 = vadd.f32 %v4463_v61, %v4431_v38  ;;  %v4426_v18 = vmul.f32 %v13010_v12, %v4391_v29  ;;  %v4432_v6 = vadd.f32 %v13016_v47, %v10488_v51 }
 0x362   : > { %v4415_v40 = vadd.f32 %v4407_v63, %v4326_v54  ;;  %v4445_v32 = vmul.f32 %v13011_v19, %v4391_v29  ;;  %v4451_v44 = vadd.f32 %v13017_v21, %v10468_v31  ;;  %v4464_v17 = vmul.f32 %v13012_v2, %v4391_v29 }
 0x363   : > { %v4483_v55 = vmul.f32 %v13018_v4, %v4391_v29  ;;  %v4392_v48 = vsel %vm4386_vm6, %v4361_v9, 0.0  ;;  %v4434_v42 = vadd.f32 %v4426_v18, %v10522_v60  ;;  %v4393_v7 = vsel %vm4386_vm6, %v4363_v39, 0.0 }
 0x364   : > { %v4453_v54 = vadd.f32 %v4445_v32, %v4413_v36  ;;  %v4408_v33 = vmul.f32 %v13009_v50, %v4392_v48  ;;  %v4427_v5 = vmul.f32 %v13010_v12, %v4392_v48  ;;  %v4472_v51 = vadd.f32 %v4464_v17, %v4432_v6  ;;  %v4369_v61 = vpop.permute.xlu1 %4368 }
 0x365   : > { %v4491_v14 = vadd.f32 %v4483_v55, %v4451_v44  ;;  %v4446_v57 = vmul.f32 %v13011_v19, %v4392_v48  ;;  %v4465_v31 = vmul.f32 %v13012_v2, %v4392_v48  ;;  %v4484_v26 = vmul.f32 %v13018_v4, %v4392_v48 }
 0x366   : > { %v4435_v41 = vadd.f32 %v4427_v5, %v4346_v28  ;;  %v4394_v8 = vsel %vm4386_vm6, %v4365_v52, 0.0  ;;  %v4409_v15 = vmul.f32 %v13009_v50, %v4393_v7  ;;  %v4428_v10 = vmul.f32 %v13010_v12, %v4393_v7  ;;  %v13019_v52 = vld [vmem:[#allocation86_spill] sm:$0xff] }
 0x367   : > { %v4499_v60 = vadd.f32 %v4491_v14, %v4471_v27  ;;  %v4454_v46 = vadd.f32 %v4446_v57, %v4414_v30  ;;  %v4473_v43 = vadd.f32 %v4465_v31, %v4433_v59  ;;  %v4492_v20 = vadd.f32 %v4484_v26, %v4452_v35  ;;  %v4371_v59 = vpop.permute.xlu0 %4370 }
 0x368   : > { %v4447_v38 = vmul.f32 %v13011_v19, %v4393_v7  ;;  %v4466_v56 = vmul.f32 %v13012_v2, %v4393_v7  ;;  %v4485_v29 = vmul.f32 %v13018_v4, %v4393_v7  ;;  %v4410_v9 = vmul.f32 %v13009_v50, %v4394_v8 }
 0x369   : > { %v4429_v34 = vmul.f32 %v13010_v12, %v4394_v8  ;;  %v4448_v1 = vmul.f32 %v13011_v19, %v4394_v8  ;;  %v4500_v28 = vadd.f32 %v4492_v20, %v4472_v51  ;;  %v4467_v24 = vmul.f32 %v13012_v2, %v4394_v8 }
 0x36a   : > { %v4474_v45 = vadd.f32 %v4466_v56, %v4434_v42  ;;  %v4486_v25 = vmul.f32 %v13018_v4, %v4394_v8  ;;  %v4493_v62 = vadd.f32 %v4485_v29, %v4453_v54  ;;  %v4395_v13 = vsel %vm4386_vm6, %v4367_v53, 0.0  ;;  %v4373_v54 = vpop.permute.xlu1 %4372 }
 0x36b   : > { %v4436_v63 = vadd.f32 %v4428_v10, %v10542_v37  ;;  %v4455_v0 = vadd.f32 %v4447_v38, %v4415_v40  ;;  %v4475_v36 = vadd.f32 %v4467_v24, %v4435_v41  ;;  %v4430_v50 = vmul.f32 %v13010_v12, %v4395_v13 }
 0x36c   : > { %v4494_v39 = vadd.f32 %v4486_v25, %v4454_v46  ;;  %v4449_v30 = vmul.f32 %v13011_v19, %v4395_v13  ;;  %v4501_v35 = vadd.f32 %v4493_v62, %v4473_v43  ;;  %v4468_v27 = vmul.f32 %v13012_v2, %v4395_v13 }
 0x36d   : > { %v4487_v18 = vmul.f32 %v13018_v4, %v4395_v13  ;;  %v4416_v47 = vadd.f32 %v4408_v33, %v10555_v16  ;;  %v4418_v32 = vadd.f32 %v4410_v9, %v10562_v23  ;;  %v4437_v37 = vadd.f32 %v4429_v34, %v10565_v11  ;;  %v4511_v23 = vpop.permute.xlu0 %4510 }
 0x36e   : > { %v4502_v6 = vadd.f32 %v4494_v39, %v4474_v45  ;;  %v4396_v40 = vsel %vm4386_vm6, %v4369_v61, 0.0  ;;  %v4476_v21 = vadd.f32 %v4468_v27, %v4436_v63  ;;  %v4349_v42 = vadd.f32 %v13019_v52, %v10537_v58 }
 0x36f   : > { %v4495_v44 = vadd.f32 %v4487_v18, %v4455_v0  ;;  %v4456_v12 = vadd.f32 %v4448_v1, %v4416_v47  ;;  %v4450_v17 = vmul.f32 %v13011_v19, %v4396_v40  ;;  %v4469_v55 = vmul.f32 %v13012_v2, %v4396_v40 }
 0x370   : > { %v4488_v48 = vmul.f32 %v13018_v4, %v4396_v40  ;;  %v4397_v16 = vsel %vm4386_vm6, %v4371_v59, 0.0  ;;  %v4417_v5 = vadd.f32 %v4409_v15, %v10539_v22  ;;  %v4438_v19 = vadd.f32 %v4430_v50, %v4349_v42  ;;  %v13021_v42 = vld [vmem:[#allocation12_spill] sm:$0xff] }
 0x371   : > { %v4503_v33 = vadd.f32 %v4495_v44, %v4475_v36  ;;  %v4458_v11 = vadd.f32 %v4450_v17, %v4418_v32  ;;  %v4470_v51 = vmul.f32 %v13012_v2, %v4397_v16  ;;  %v4477_v14 = vadd.f32 %v4469_v55, %v4437_v37 }
 0x372   : > { %v4496_v57 = vadd.f32 %v4488_v48, %v4456_v12  ;;  %v4489_v31 = vmul.f32 %v13018_v4, %v4397_v16  ;;  %v4457_v41 = vadd.f32 %v4449_v30, %v4417_v5  ;;  %v4398_v26 = vsel %vm4386_vm6, %v4373_v54, 0.0  ;;  %v13020_v48 = vld [vmem:[#allocation7_spill] sm:$0xff]  ;;  %v13022_v54 = vld [vmem:[#allocation6_spill] sm:$0xff]  ;;  %v4702_v5 = vpop.permute.xlu0 %4701 }
 0x373   : > { %v4513_v7 = vadd.f32 %v4511_v23, %v4499_v60  ;;  %v4514_v58 = vadd.f32 %v4511_v23, %v4500_v28  ;;  %v4478_v53 = vadd.f32 %v4470_v51, %v4438_v19  ;;  %v4490_v46 = vmul.f32 %v13018_v4, %v4398_v26 }
 0x374   : > { %v4504_v8 = vadd.f32 %v4496_v57, %v4476_v21  ;;  %v4515_v43 = vadd.f32 %v4511_v23, %v4501_v35  ;;  %v4497_v20 = vadd.f32 %v4489_v31, %v4457_v41  ;;  %v4516_v10 = vadd.f32 %v4511_v23, %v4502_v6 }
 0x375   : > { %v10620_v22 = vadd.f32 %v4511_v23, %v4503_v33  ;;  %v6242_v2 = vmul.f32 -1.442695, %v4513_v7  ;;  %v4498_v15 = vadd.f32 %v4490_v46, %v4458_v11  ;;  %v6243_v56 = vmul.f32 -1.442695, %v4514_v58 }
 0x376   : > { %v10622_v38 = vadd.f32 %v4511_v23, %v4504_v8  ;;  %v6244_v29 = vmul.f32 -1.442695, %v4515_v43  ;;  %v4505_v9 = vadd.f32 %v4497_v20, %v4477_v14  ;;  %v6245_v34 = vmul.f32 -1.442695, %v4516_v10 }
 0x377   : > { %6660 = vpow2.f32 %v6242_v2  ;;  %v6246_v60 = vmul.f32 -1.442695, %v10620_v22  ;;  %v4506_v1 = vadd.f32 %v4498_v15, %v4478_v53 }
 0x378   : > { %6662 = vpow2.f32 %v6243_v56  ;;  %v6247_v4 = vmul.f32 -1.442695, %v10622_v38  ;;  %v4519_v28 = vadd.f32 %v4511_v23, %v4505_v9  ;;  %v4614_v56 = vpop.permute.xlu1 %4613 }
 0x379   : > { %6664 = vpow2.f32 %v6244_v29  ;;  %v10626_v45 = vadd.f32 %v4511_v23, %v4506_v1 }
 0x37a   : > { %6666 = vpow2.f32 %v6245_v34  ;;  %v6248_v24 = vmul.f32 -1.442695, %v4519_v28 }
 0x37b   : > { %6668 = vpow2.f32 %v6246_v60  ;;  %v6249_v25 = vmul.f32 -1.442695, %v10626_v45 }
 0x37c   : > { %6670 = vpow2.f32 %v6247_v4 }
 0x37d   : > { %6672 = vpow2.f32 %v6248_v24 }
 0x37e   : > { %6674 = vpow2.f32 %v6249_v25 }
 0x381   : > { %v6661_v61 = vpop.eup %6660 }
 0x382   : > { %v6663_v62 = vpop.eup %6662  ;;  %v4545_v13 = vadd.f32 1.0, %v6661_v61 }
 0x383   : > { %v6665_v63 = vpop.eup %6664  ;;  %v4546_v0 = vadd.f32 1.0, %v6663_v62 }
 0x384   : > { %v6667_v36 = vpop.eup %6666  ;;  %v4547_v39 = vadd.f32 1.0, %v6665_v63  ;;  %6676 = vrcp.f32 %v4545_v13 }
 0x385   : > { %v6669_v50 = vpop.eup %6668  ;;  %v4548_v30 = vadd.f32 1.0, %v6667_v36  ;;  %6678 = vrcp.f32 %v4546_v0 }
 0x386   : > { %v6671_v59 = vpop.eup %6670  ;;  %v4549_v35 = vadd.f32 1.0, %v6669_v50  ;;  %6680 = vrcp.f32 %v4547_v39 }
 0x387   : > { %v6673_v27 = vpop.eup %6672  ;;  %v4550_v18 = vadd.f32 1.0, %v6671_v59  ;;  %6682 = vrcp.f32 %v4548_v30 }
 0x388   : > { %v6675_v47 = vpop.eup %6674  ;;  %v4551_v6 = vadd.f32 1.0, %v6673_v27  ;;  %6684 = vrcp.f32 %v4549_v35 }
 0x389   : > { %v4552_v32 = vadd.f32 1.0, %v6675_v47  ;;  %6686 = vrcp.f32 %v4550_v18  ;;  %v4658_v47 = vpop.permute.xlu1 %4657 }
 0x38a   : > { %6688 = vrcp.f32 %v4551_v6 }
 0x38b   : > { %6690 = vrcp.f32 %v4552_v32 }
 0x38e   : > { %v6677_v37 = vpop.eup %6676 }
 0x38f   : > { %v6679_v40 = vpop.eup %6678  ;;  %v10629_v21 = vmul.f32 %v6677_v37, %v4513_v7 }
 0x390   : > { %v6681_v44 = vpop.eup %6680  ;;  %v10631_v12 = vmul.f32 %v6679_v40, %v4514_v58 }
 0x391   : > { %v6683_v17 = vpop.eup %6682  ;;  %v10633_v55 = vmul.f32 %v6681_v44, %v4515_v43  ;;  %v4671_v52 = vrot.slane %v10629_v21, %v13020_v48  ;;  %v4582_v16 = vrot.slane %v10629_v21, %v13021_v42  ;;  %v4627_v23 = vrot.slane %v10629_v21, %v13022_v54 }
 0x392   : > { %v6685_v33 = vpop.eup %6684  ;;  %v10641_v11 = vmul.f32 %v6683_v17, %v4516_v10  ;;  %v4675_v51 = vrot.slane %v10631_v12, %v13020_v48  ;;  %v4586_v14 = vrot.slane %v10631_v12, %v13021_v42  ;;  %v4631_v57 = vrot.slane %v10631_v12, %v13022_v54 }
 0x393   : > { %v6687_v19 = vpop.eup %6686  ;;  %v10650_v31 = vmul.f32 %v6685_v33, %v10620_v22  ;;  %v4679_v41 = vrot.slane %v10633_v55, %v13020_v48  ;;  %v4704_v26 = vmul.f32 %v4702_v5, %v4671_v52  ;;  %v4590_v7 = vrot.slane %v10633_v55, %v13021_v42 }
 0x394   : > { %v6689_v58 = vpop.eup %6688  ;;  %v10657_v8 = vmul.f32 %v6687_v19, %v10622_v38  ;;  %v4683_v53 = vrot.slane %v10641_v11, %v13020_v48  ;;  %v4705_v46 = vmul.f32 %v4702_v5, %v4675_v51  ;;  %v4594_v43 = vrot.slane %v10641_v11, %v13021_v42 }
 0x395   : > { %v6691_v20 = vpop.eup %6690  ;;  %v4575_v10 = vmul.f32 %v6689_v58, %v4519_v28  ;;  %v4687_v22 = vrot.slane %v10650_v31, %v13020_v48  ;;  %v4706_v2 = vmul.f32 %v4702_v5, %v4679_v41  ;;  %v4598_v15 = vrot.slane %v10650_v31, %v13021_v42 }
 0x396   : > { %v4576_v38 = vmul.f32 %v6691_v20, %v10626_v45  ;;  %v4691_v29 = vrot.slane %v10657_v8, %v13020_v48  ;;  %v4707_v9 = vmul.f32 %v4702_v5, %v4683_v53  ;;  %v4602_v34 = vrot.slane %v10657_v8, %v13021_v42 }
 0x397   : > { %v4695_v60 = vrot.slane %v4575_v10, %v13020_v48  ;;  %v4708_v1 = vmul.f32 %v4702_v5, %v4687_v22  ;;  %v4606_v4 = vrot.slane %v4575_v10, %v13021_v42  ;;  %v4616_v28 = vmul.f32 %v4614_v56, %v4582_v16 }
 0x398   : > { %v4699_v24 = vrot.slane %v4576_v38, %v13020_v48  ;;  %v4709_v25 = vmul.f32 %v4702_v5, %v4691_v29  ;;  %v4610_v61 = vrot.slane %v4576_v38, %v13021_v42  ;;  %v4617_v62 = vmul.f32 %v4614_v56, %v4586_v14  ;;  %v3680_v42 = vld [vmem:[#allocation3 + $0x20] sm:$0xff] }
 0x399   : > { %v4710_v45 = vmul.f32 %v4702_v5, %v4695_v60  ;;  %v4618_v13 = vmul.f32 %v4614_v56, %v4590_v7  ;;  %v4619_v63 = vmul.f32 %v4614_v56, %v4594_v43  ;;  %v4620_v0 = vmul.f32 %v4614_v56, %v4598_v15  ;;  %v3682_v48 = vld [vmem:[#allocation3 + $0x40] sm:$0xff] }
 0x39a   : > { %v4711_v36 = vmul.f32 %v4702_v5, %v4699_v24  ;;  %v4621_v39 = vmul.f32 %v4614_v56, %v4602_v34  ;;  %v4622_v50 = vmul.f32 %v4614_v56, %v4606_v4  ;;  %v4623_v30 = vmul.f32 %v4614_v56, %v4610_v61 }
 0x39b   : > { %v4712_v59 = vadd.f32 %v4704_v26, %v4616_v28  ;;  %v4713_v35 = vadd.f32 %v4705_v46, %v4617_v62  ;;  %v4714_v27 = vadd.f32 %v4706_v2, %v4618_v13  ;;  %v4715_v18 = vadd.f32 %v4707_v9, %v4619_v63  ;;  %v13023_v46 = vld [vmem:[#allocation8_spill] sm:$0xff] }
 0x39c   : > { %v4716_v6 = vadd.f32 %v4708_v1, %v4620_v0  ;;  %v4717_v32 = vadd.f32 %v4709_v25, %v4621_v39  ;;  %v4718_v37 = vadd.f32 %v4710_v45, %v4622_v50  ;;  %v4719_v40 = vadd.f32 %v4711_v36, %v4623_v30 }
 0x39d   : > { %v4639_v44 = vrot.slane %v10641_v11, %v13022_v54  ;;  %v4643_v17 = vrot.slane %v10650_v31, %v13022_v54  ;;  %v4647_v52 = vrot.slane %v10657_v8, %v13022_v54  ;;  %v4651_v16 = vrot.slane %v4575_v10, %v13022_v54 }
 0x39e   : > { %v4655_v33 = vrot.slane %v4576_v38, %v13022_v54  ;;  %v4635_v5 = vrot.slane %v10633_v55, %v13022_v54  ;;  %v4660_v51 = vmul.f32 %v4658_v47, %v4627_v23  ;;  %v4661_v14 = vmul.f32 %v4658_v47, %v4631_v57  ;;  %v4754_v57 = vpop.permute.xlu1 %4753 }
 0x39f   : > { %v4663_v19 = vmul.f32 %v4658_v47, %v4639_v44  ;;  %v4664_v41 = vmul.f32 %v4658_v47, %v4643_v17  ;;  %v4665_v26 = vmul.f32 %v4658_v47, %v4647_v52  ;;  %v4666_v7 = vmul.f32 %v4658_v47, %v4651_v16 }
 0x3a0   : > { %v4662_v58 = vmul.f32 %v4658_v47, %v4635_v5  ;;  %v4667_v53 = vmul.f32 %v4658_v47, %v4655_v33  ;;  %v4735_v43 = vrot.slane %v10641_v11, %v13023_v46  ;;  %v4739_v20 = vrot.slane %v10650_v31, %v13023_v46 }
 0x3a1   : > { %v4743_v22 = vrot.slane %v10657_v8, %v13023_v46  ;;  %v4747_v2 = vrot.slane %v4575_v10, %v13023_v46  ;;  %v4751_v23 = vrot.slane %v4576_v38, %v13023_v46  ;;  %v4723_v15 = vrot.slane %v10629_v21, %v13023_v46 }
 0x3a2   : > { %v4727_v56 = vrot.slane %v10631_v12, %v13023_v46  ;;  %v4731_v11 = vrot.slane %v10633_v55, %v13023_v46  ;;  %v4759_v29 = vmul.f32 %v4754_v57, %v4735_v43  ;;  %v4760_v9 = vmul.f32 %v4754_v57, %v4739_v20  ;;  %v4783_v0 = vpop.permute.xlu1 %4782  ;;  %v13076_v46 = vld [vmem:[#allocation30_spill] sm:$0xff] }
 0x3a3   : > { %v4756_v31 = vmul.f32 %v4754_v57, %v4723_v15  ;;  %v4761_v34 = vmul.f32 %v4754_v57, %v4743_v22  ;;  %v4762_v60 = vmul.f32 %v4754_v57, %v4747_v2  ;;  %v4763_v8 = vmul.f32 %v4754_v57, %v4751_v23  ;;  %v13024_v15 = vld [vmem:[#allocation99_spill] sm:$0xff] }
 0x3a4   : > { %v4757_v1 = vmul.f32 %v4754_v57, %v4727_v56  ;;  %v4758_v10 = vmul.f32 %v4754_v57, %v4731_v11  ;;  %v4767_v4 = vadd.f32 %v4759_v29, %v4663_v19  ;;  %v4768_v38 = vadd.f32 %v4760_v9, %v4664_v41  ;;  %v13025_v29 = vld [vmem:[#allocation78_spill] sm:$0xff] }
 0x3a5   : > { %v4764_v28 = vadd.f32 %v4756_v31, %v4660_v51  ;;  %v4769_v24 = vadd.f32 %v4761_v34, %v4665_v26  ;;  %v4770_v25 = vadd.f32 %v4762_v60, %v4666_v7  ;;  %v4771_v21 = vadd.f32 %v4763_v8, %v4667_v53  ;;  %v13026_v31 = vld [vmem:[#allocation80_spill] sm:$0xff]  ;;  %v13027_v8 = vld [vmem:[#allocation81_spill] sm:$0xff] }
 0x3a6   : > { %v4765_v61 = vadd.f32 %v4757_v1, %v4661_v14  ;;  %v4766_v62 = vadd.f32 %v4758_v10, %v4662_v58  ;;  %v4775_v12 = vadd.f32 %v4767_v4, %v4715_v18  ;;  %v4776_v45 = vadd.f32 %v4768_v38, %v4716_v6  ;;  %v13028_v10 = vld [vmem:[#allocation43_spill] sm:$0xff]  ;;  %v13029_v38 = vld [vmem:[#allocation44_spill] sm:$0xff] }
 0x3a7   : > { %v4777_v13 = vadd.f32 %v4769_v24, %v4717_v32  ;;  %v4778_v55 = vadd.f32 %v4770_v25, %v4718_v37  ;;  %v4779_v63 = vadd.f32 %v4771_v21, %v4719_v40  ;;  %v4772_v36 = vadd.f32 %v4764_v28, %v4712_v59  ;;  %v13030_v24 = vld [vmem:[#allocation45_spill] sm:$0xff]  ;;  %v13031_v21 = vld [vmem:[#allocation48_spill] sm:$0xff] }
 0x3a8   : > { %v4773_v39 = vadd.f32 %v4765_v61, %v4713_v35  ;;  %v4774_v50 = vadd.f32 %v4766_v62, %v4714_v27  ;;  %v10700_v30 = vadd.f32 %v4783_v0, %v4775_v12  ;;  %v10702_v47 = vadd.f32 %v4783_v0, %v4776_v45 }
 0x3a9   : > { %v10704_v44 = vadd.f32 %v4783_v0, %v4772_v36  ;;  %v10706_v17 = vadd.f32 %v4783_v0, %v4777_v13  ;;  %v10712_v18 = vadd.f32 %v4783_v0, %v4778_v55  ;;  %v10715_v32 = vadd.f32 %v4783_v0, %v4779_v63  ;;  %v10737_v63 = vpop.permute.xlu1 %5048 }
 0x3aa   : > { %v10708_v52 = vadd.f32 %v4783_v0, %v4773_v39  ;;  %v10710_v16 = vadd.f32 %v4783_v0, %v4774_v50  ;;  %v6253_v6 = vmul.f32 -1.442695, %v10700_v30  ;;  %v6254_v37 = vmul.f32 -1.442695, %v10702_v47 }
 0x3ab   : > { %v6250_v59 = vmul.f32 -1.442695, %v10704_v44  ;;  %v6255_v40 = vmul.f32 -1.442695, %v10706_v17  ;;  %v6256_v33 = vmul.f32 -1.442695, %v10712_v18 }
 0x3ac   : > { %v6251_v35 = vmul.f32 -1.442695, %v10708_v52  ;;  %v6252_v27 = vmul.f32 -1.442695, %v10710_v16  ;;  %6692 = vpow2.f32 %v6253_v6  ;;  %v6257_v5 = vmul.f32 -1.442695, %v10715_v32 }
 0x3ad   : > { %6694 = vpow2.f32 %v6250_v59  ;;  %v4881_v56 = vrot.slane %v13024_v15, 7  ;;  %v4882_v9 = vrot.slane %v13025_v29, 7  ;;  %v4883_v34 = vrot.slane %v13026_v31, 7 }
 0x3ae   : > { %6696 = vpow2.f32 %v6251_v35  ;;  %v4884_v1 = vrot.slane %v13027_v8, 7  ;;  %v4885_v4 = vrot.slane %v13028_v10, 7  ;;  %v4886_v28 = vrot.slane %v13029_v38, 7 }
 0x3af   : > { %6698 = vpow2.f32 %v6252_v27  ;;  %v4887_v25 = vrot.slane %v13030_v24, 7  ;;  %v4888_v61 = vrot.slane %v13031_v21, 7  ;;  %v4940_v62 = vrot.slane %v13024_v15, 2 }
 0x3b0   : > { %6700 = vpow2.f32 %v6254_v37  ;;  %v4941_v12 = vrot.slane %v13025_v29, 2  ;;  %v4942_v45 = vrot.slane %v13026_v31, 2  ;;  %v4943_v13 = vrot.slane %v13027_v8, 2 }
 0x3b1   : > { %6702 = vpow2.f32 %v6255_v40  ;;  %v4944_v55 = vrot.slane %v13028_v10, 2  ;;  %v4945_v0 = vrot.slane %v13029_v38, 2  ;;  %v4946_v36 = vrot.slane %v13030_v24, 2 }
 0x3b2   : > { %6704 = vpow2.f32 %v6256_v33  ;;  %v4947_v39 = vrot.slane %v13031_v21, 2  ;;  %v4972_v50 = vrot.slane %v13024_v15, 1 }
 0x3b3   : > { %6706 = vpow2.f32 %v6257_v5 }
 0x3b6   : > { %v6693_v51 = vpop.eup %6692 }
 0x3b7   : > { %v6695_v14 = vpop.eup %6694  ;;  %v4820_v19 = vadd.f32 1.0, %v6693_v51 }
 0x3b8   : > { %v6697_v41 = vpop.eup %6696  ;;  %v4817_v26 = vadd.f32 1.0, %v6695_v14 }
 0x3b9   : > { %v6699_v7 = vpop.eup %6698  ;;  %v4818_v58 = vadd.f32 1.0, %v6697_v41  ;;  %6708 = vrcp.f32 %v4820_v19 }
 0x3ba   : > { %v6701_v53 = vpop.eup %6700  ;;  %v4819_v43 = vadd.f32 1.0, %v6699_v7  ;;  %6710 = vrcp.f32 %v4817_v26 }
 0x3bb   : > { %v6703_v20 = vpop.eup %6702  ;;  %v4821_v22 = vadd.f32 1.0, %v6701_v53  ;;  %6712 = vrcp.f32 %v4818_v58 }
 0x3bc   : > { %v6705_v2 = vpop.eup %6704  ;;  %v4822_v23 = vadd.f32 1.0, %v6703_v20  ;;  %6714 = vrcp.f32 %v4819_v43 }
 0x3bd   : > { %v6707_v57 = vpop.eup %6706  ;;  %v4823_v11 = vadd.f32 1.0, %v6705_v2  ;;  %6716 = vrcp.f32 %v4821_v22 }
 0x3be   : > { %v4824_v60 = vadd.f32 1.0, %v6707_v57  ;;  %6718 = vrcp.f32 %v4822_v23  ;;  %v10768_v23 = vpop.permute.xlu1 %5068 }
 0x3bf   : > { %6720 = vrcp.f32 %v4823_v11 }
 0x3c0   : > { %6722 = vrcp.f32 %v4824_v60 }
 0x3c2   : > { %v10818_v35 = vpop.permute.xlu1 %5108 }
 0x3c3   : > { %v6709_v6 = vpop.eup %6708  ;;  %13032 = vst [vmem:[#allocation95_spill] sm:$0xff] %v10818_v35 }
 0x3c4   : > { %v6711_v40 = vpop.eup %6710  ;;  %v10751_v14 = vmul.f32 %v6709_v6, %v10700_v30 }
 0x3c5   : > { %v6713_v19 = vpop.eup %6712  ;;  %v10754_v41 = vmul.f32 %v6711_v40, %v10704_v44 }
 0x3c6   : > { %v6715_v26 = vpop.eup %6714  ;;  %v10757_v7 = vmul.f32 %v6713_v19, %v10708_v52  ;;  %v4860_v58 = vrot.slane %v10751_v14, 7  ;;  %v4900_v53 = vrot.slane %v10751_v14, 6  ;;  %v4959_v43 = vrot.slane %v10751_v14, 1 }
 0x3c7   : > { %v6717_v20 = vpop.eup %6716  ;;  %v10763_v30 = vmul.f32 %v6715_v26, %v10710_v16  ;;  %v4857_v22 = vrot.slane %v10754_v41, 7  ;;  %v4897_v2 = vrot.slane %v10754_v41, 6  ;;  %v4956_v44 = vrot.slane %v10754_v41, 1 }
 0x3c8   : > { %v6719_v52 = vpop.eup %6718  ;;  %v10771_v57 = vmul.f32 %v6717_v20, %v10702_v47  ;;  %v4858_v11 = vrot.slane %v10757_v7, 7  ;;  %v4898_v60 = vrot.slane %v10757_v7, 6  ;;  %v4917_v16 = vsel %vm4913_vm7, %v13027_v8, %v4860_v58 }
 0x3c9   : > { %v6721_v6 = vpop.eup %6720  ;;  %v10778_v40 = vmul.f32 %v6719_v52, %v10706_v17  ;;  %v4859_v19 = vrot.slane %v10763_v30, 7  ;;  %v4899_v26 = vrot.slane %v10763_v30, 6  ;;  %v4914_v47 = vsel %vm4913_vm7, %v13024_v15, %v4857_v22 }
 0x3ca   : > { %v6723_v20 = vpop.eup %6722  ;;  %v10785_v51 = vmul.f32 %v6721_v6, %v10712_v18  ;;  %v4861_v5 = vrot.slane %v10771_v57, 7  ;;  %v4901_v58 = vrot.slane %v10771_v57, 6  ;;  %v4915_v17 = vsel %vm4913_vm7, %v13025_v29, %v4858_v11 }
 0x3cb   : > { %v10792_v52 = vmul.f32 %v6723_v20, %v10715_v32  ;;  %v4862_v33 = vrot.slane %v10778_v40, 7  ;;  %v4902_v37 = vrot.slane %v10778_v40, 6  ;;  %v4916_v22 = vsel %vm4913_vm7, %v13026_v31, %v4859_v19 }
 0x3cc   : > { %v4863_v18 = vrot.slane %v10785_v51, 7  ;;  %v4903_v6 = vrot.slane %v10785_v51, 6  ;;  %v4918_v27 = vsel %vm4913_vm7, %v13028_v10, %v4861_v5  ;;  %v4923_v11 = vsel %vm4922_vm8, %v4914_v47, %v4881_v56 }
 0x3cd   : > { %v4864_v32 = vrot.slane %v10792_v52, 7  ;;  %v4904_v19 = vrot.slane %v10792_v52, 6  ;;  %v4919_v20 = vsel %vm4913_vm7, %v13029_v38, %v4862_v33  ;;  %v4924_v5 = vsel %vm4922_vm8, %v4915_v17, %v4882_v9 }
 0x3ce   : > { %v4920_v56 = vsel %vm4913_vm7, %v13030_v24, %v4863_v18  ;;  %v4925_v47 = vsel %vm4922_vm8, %v4916_v22, %v4883_v34  ;;  %v4926_v59 = vsel %vm4922_vm8, %v4917_v16, %v4884_v1  ;;  %v4927_v33 = vsel %vm4922_vm8, %v4918_v27, %v4885_v4 }
 0x3cf   : > { %v4921_v9 = vsel %vm4913_vm7, %v13031_v21, %v4864_v32  ;;  %v4928_v17 = vsel %vm4922_vm8, %v4919_v20, %v4886_v28  ;;  %v4929_v34 = vsel %vm4922_vm8, %v4920_v56, %v4887_v25  ;;  %v4932_v22 = vsel %vm4931_vm9, %v4923_v11, %v4897_v2  ;;  %v10880_v11 = vpop.permute.xlu1 %5120 }
 0x3d0   : > { %v4930_v1 = vsel %vm4922_vm8, %v4921_v9, %v4888_v61  ;;  %v4933_v4 = vsel %vm4931_vm9, %v4924_v5, %v4898_v60  ;;  %v4934_v27 = vsel %vm4931_vm9, %v4925_v47, %v4899_v26  ;;  %v4935_v16 = vsel %vm4931_vm9, %v4926_v59, %v4900_v53  ;;  %6084 = vst.msk [vmem:[%s10809_s26 + $0x8] sm:$0xf] %vm3778_vm0, %v4932_v22 }
 0x3d1   : > { %v4936_v28 = vsel %vm4931_vm9, %v4927_v33, %v4901_v58  ;;  %v4937_v25 = vsel %vm4931_vm9, %v4928_v17, %v4902_v37  ;;  %v4938_v2 = vsel %vm4931_vm9, %v4929_v34, %v4903_v6  ;;  %v4939_v61 = vsel %vm4931_vm9, %v4930_v1, %v4904_v19  ;;  %6085 = vst.msk [vmem:[%s10809_s26 + $0x18] sm:$0xf] %vm3778_vm0, %v4933_v4 }
 0x3d2   : > { %6086 = vst.msk [vmem:[%s10809_s26 + $0x28] sm:$0xf] %vm3778_vm0, %v4934_v27  ;;  %6087 = vst.msk [vmem:[%s10809_s26 + $0x38] sm:$0xf] %vm3778_vm0, %v4935_v16  ;;  %v4957_v60 = vrot.slane %v10757_v7, 1  ;;  %v4958_v59 = vrot.slane %v10763_v30, 1  ;;  %v4988_v18 = vsel %vm4913_vm7, %v4940_v62, %v4956_v44  ;;  %v4991_v6 = vsel %vm4913_vm7, %v4943_v13, %v4959_v43 }
 0x3d3   : > { %v4960_v53 = vrot.slane %v10771_v57, 1  ;;  %v4961_v26 = vrot.slane %v10778_v40, 1  ;;  %6088 = vst.msk [vmem:[%s10809_s26 + $0x48] sm:$0xf] %vm3778_vm0, %v4936_v28  ;;  %6089 = vst.msk [vmem:[%s10809_s26 + $0x58] sm:$0xf] %vm3778_vm0, %v4937_v25 }
 0x3d4   : > { %6090 = vst.msk [vmem:[%s10809_s26 + $0x68] sm:$0xf] %vm3778_vm0, %v4938_v2  ;;  %6091 = vst.msk [vmem:[%s10809_s26 + $0x78] sm:$0xf] %vm3778_vm0, %v4939_v61  ;;  %v4962_v37 = vrot.slane %v10785_v51, 1  ;;  %v4963_v58 = vrot.slane %v10792_v52, 1  ;;  %v4989_v32 = vsel %vm4913_vm7, %v4941_v12, %v4957_v60  ;;  %v4990_v19 = vsel %vm4913_vm7, %v4942_v45, %v4958_v59 }
 0x3d5   : > { %13033 = vst [vmem:[#allocation38_spill] sm:$0xff] %v10880_v11  ;;  %v4992_v62 = vsel %vm4913_vm7, %v4944_v55, %v4960_v53  ;;  %v4993_v44 = vsel %vm4913_vm7, %v4945_v0, %v4961_v26  ;;  %v4996_v45 = vsel %vm4922_vm8, %v4988_v18, %v4972_v50  ;;  %v13034_v43 = vrot.slane %v13025_v29, 1 }
 0x3d6   : > { %v4994_v13 = vsel %vm4913_vm7, %v4946_v36, %v4962_v37  ;;  %v4995_v12 = vsel %vm4913_vm7, %v4947_v39, %v4963_v58  ;;  %v13035_v20 = vrot.slane %v13026_v31, 1  ;;  %v13036_v5 = vrot.slane %v13027_v8, 1 }
 0x3d7   : > { %v4997_v55 = vsel %vm4922_vm8, %v4989_v32, %v13034_v43  ;;  %v13037_v56 = vrot.slane %v13028_v10, 1  ;;  %v13038_v15 = vrot.slane %v13029_v38, 1  ;;  %v13039_v29 = vrot.slane %v13030_v24, 1 }
 0x3d8   : > { %v4998_v0 = vsel %vm4922_vm8, %v4990_v19, %v13035_v20  ;;  %v4999_v36 = vsel %vm4922_vm8, %v4991_v6, %v13036_v5  ;;  %v13040_v31 = vrot.slane %v13031_v21, 1  ;;  %v5004_v8 = vsel %vm4931_vm9, %v4996_v45, %v10754_v41  ;;  %v6268_v45 = vld [vmem:[%s12081_s8 + $0x4] sm:$0xf] }
 0x3d9   : > { %v5000_v39 = vsel %vm4922_vm8, %v4992_v62, %v13037_v56  ;;  %v5001_v50 = vsel %vm4922_vm8, %v4993_v44, %v13038_v15  ;;  %v5002_v47 = vsel %vm4922_vm8, %v4994_v13, %v13039_v29  ;;  %v5005_v10 = vsel %vm4931_vm9, %v4997_v55, %v10757_v7  ;;  %5014 = vst.msk [vmem:[#allocation5 + $0x8] sm:$0xf] %vm3778_vm0, %v5004_v8  ;;  %v6259_v20 = vld [vmem:[%s12080_s7 + $0x4] sm:$0xf]  ;;  %v3341_v56 = vld [vmem:[#allocation3] sm:$0xff] }
 0x3da   : > { %v5003_v33 = vsel %vm4922_vm8, %v4995_v12, %v13040_v31  ;;  %v5006_v9 = vsel %vm4931_vm9, %v4998_v0, %v10763_v30  ;;  %v5007_v38 = vsel %vm4931_vm9, %v4999_v36, %v10751_v14  ;;  %v5008_v24 = vsel %vm4931_vm9, %v5000_v39, %v10771_v57  ;;  %5015 = vst.msk [vmem:[#allocation5 + $0xc] sm:$0xf] %vm3778_vm0, %v5005_v10  ;;  %v10946_v14 = vpop.permute.xlu1 %5160  ;;  %v11070_v12 = vld [vmem:[#allocation5 + $0x2c] sm:$0xf]  ;;  %v6804_v0 = vld [vmem:[%s12077_s4] sm:$0xff]  ;;  %v3453_v15 = vld [vmem:[#allocation2 + $0x10] sm:$0xff] }
 0x3db   : > { %v5009_v21 = vsel %vm4931_vm9, %v5001_v50, %v10778_v40  ;;  %v5010_v41 = vsel %vm4931_vm9, %v5002_v47, %v10785_v51  ;;  %v5011_v7 = vsel %vm4931_vm9, %v5003_v33, %v10792_v52  ;;  %5016 = vst.msk [vmem:[#allocation5 + $0x10] sm:$0xf] %vm3778_vm0, %v5006_v9  ;;  %5017 = vst.msk [vmem:[#allocation5 + $0x14] sm:$0xf] %vm3778_vm0, %v5007_v38  ;;  %v10966_v52 = vpop.permute.xlu0 %5046  ;;  %v3259_v36 = vld [vmem:[#allocation4] sm:$0xff]  ;;  %v3455_v50 = vld [vmem:[#allocation2 + $0x30] sm:$0xff] }
 0x3dc   : > { %5018 = vst.msk [vmem:[#allocation5 + $0x18] sm:$0xf] %vm3778_vm0, %v5008_v24  ;;  %5019 = vst.msk [vmem:[#allocation5 + $0x1c] sm:$0xf] %vm3778_vm0, %v5009_v21  ;;  %v3509_v29 = vld [vmem:[#allocation3 + $0x10] sm:$0xff]  ;;  %v13070_v47 = vmov 1   ;;  %v11105_v54 = vmul.f32 %v13076_v46, %v3453_v15 }
 0x3dd   : > { %13041 = vst [vmem:[#allocation26_spill] sm:$0xff] %v10946_v14  ;;  %5020 = vst.msk [vmem:[#allocation5 + $0x20] sm:$0xf] %vm3778_vm0, %v5010_v41  ;;  %v3457_v31 = vld [vmem:[#allocation2 + $0x50] sm:$0xff]  ;;  %v13071_v38 = vld [vmem:[#allocation89_spill] sm:$0xff] }
 0x3de   : > { %5021 = vst.msk [vmem:[#allocation5 + $0x24] sm:$0xf] %vm3778_vm0, %v5011_v7  ;;  %v10950_v30 = vpop.permute.xlu1 %5179  ;;  %13066 = vst [vmem:[#allocation23_spill] sm:$0xff] %v11070_v12  ;;  %v3459_v33 = vld [vmem:[#allocation2 + $0x70] sm:$0xff]  ;;  %v11096_v24 = vmul.f32 %v13071_v38, %v3259_v36  ;;  %v13073_v7 = vld [vmem:[#allocation91_spill] sm:$0xff] }
 0x3df   : > { %13042 = vst [vmem:[#allocation42_spill] sm:$0xff] %v10950_v30  ;;  %v10984_v4 = vpop.permute.xlu0 %5066  ;;  %v3461_v8 = vld [vmem:[#allocation2 + $0x90] sm:$0xff]  ;;  %v11114_v36 = vmul.f32 %v13076_v46, %v3459_v33 }
 0x3e0   : > { %v10952_v51 = vld [vmem:[#allocation5 + $0x8] sm:$0xf]  ;;  %v3465_v10 = vld [vmem:[#allocation2 + $0xd0] sm:$0xff] }
 0x3e1   : > { %13043 = vst [vmem:[#allocation68_spill] sm:$0xff] %v10952_v51  ;;  %5183 = vrot.lane.b32.xlu1 %v10952_v51, %s6827_s20  ;;  %5050 = vrot.lane.b32.xlu0 %v10952_v51, %s6825_s23  ;;  %v10976_v22 = vld [vmem:[#allocation5 + $0xc] sm:$0xf]  ;;  %v3467_v9 = vld [vmem:[#allocation2 + $0xf0] sm:$0xff]  ;;  %v11123_v15 = vmul.f32 %v13076_v46, %v3465_v10 }
 0x3e2   : > { %v10958_v57 = vld [vmem:[#allocation5 + $0x10] sm:$0xf]  ;;  %v10964_v40 = vpop.permute.xlu1 %5228  ;;  %13048 = vst [vmem:[#allocation98_spill] sm:$0xff] %v10976_v22  ;;  %v10986_v27 = vld [vmem:[#allocation5 + $0x14] sm:$0xf]  ;;  %v13072_v21 = vld [vmem:[#allocation92_spill] sm:$0xff] }
 0x3e3   : > { %13044 = vst [vmem:[#allocation18_spill] sm:$0xff] %v10958_v57  ;;  %13045 = vst [vmem:[#allocation96_spill] sm:$0xff] %v10964_v40  ;;  %v10968_v17 = vld [vmem:[#allocation5 + $0x18] sm:$0xf]  ;;  %v10994_v28 = vpop.permute.xlu0 %5140  ;;  %v10996_v25 = vld [vmem:[#allocation5 + $0x1c] sm:$0xf]  ;;  %v3365_v41 = vmul.f32 %v13072_v21, %v3341_v56 }
 0x3e4   : > { %13046 = vst [vmem:[#allocation47_spill] sm:$0xff] %v10968_v17  ;;  %v10978_v1 = vld [vmem:[#allocation5 + $0x20] sm:$0xf]  ;;  %13050 = vst [vmem:[#allocation37_spill] sm:$0xff] %v10986_v27  ;;  %v3625_v56 = vld [vmem:[#allocation2 + $0x40] sm:$0xff] }
 0x3e5   : > { %5431 = vrot.lane.b32.xlu1 %v10952_v51, %s6840_s28  ;;  %5054 = vrot.lane.b32.xlu0 %v10958_v57, %s6825_s23  ;;  %13049 = vst [vmem:[#allocation93_spill] sm:$0xff] %v10978_v1  ;;  %13052 = vst [vmem:[#allocation22_spill] sm:$0xff] %v10994_v28  ;;  %v11004_v61 = vld [vmem:[#allocation5 + $0x24] sm:$0xf]  ;;  %v13079_v28 = vld [vmem:[#allocation21_spill] sm:$0xff] }
 0x3e6   : > { %v10974_v34 = vpop.permute.xlu1 %5268  ;;  %13053 = vst [vmem:[#allocation94_spill] sm:$0xff] %v10996_v25  ;;  %13055 = vst [vmem:[#allocation85_spill] sm:$0xff] %v11004_v61 }
 0x3e7   : > { %13047 = vst [vmem:[#allocation41_spill] sm:$0xff] %v10974_v34  ;;  %v11010_v60 = vpop.permute.xlu0 %3583  ;;  %v11111_v34 = vmul.f32 %v13076_v46, %v3457_v31  ;;  %v3637_v31 = vld [vmem:[#allocation2 + $0x100] sm:$0xff] }
 0x3e9   : > { %5579 = vrot.lane.b32.xlu1 %v10952_v51, %s6841_s29  ;;  %5058 = vrot.lane.b32.xlu0 %v10968_v17, %s6825_s23  ;;  %v3694_v51 = vld [vmem:[#allocation3 + $0x100] sm:$0xff] }
 0x3ea   : > { %v10992_v16 = vpop.permute.xlu1 %5288 }
 0x3eb   : > { %13051 = vst [vmem:[#allocation82_spill] sm:$0xff] %v10992_v16  ;;  %v11016_v59 = vpop.permute.xlu0 %5181  ;;  %v3513_v16 = vld [vmem:[#allocation3 + $0x50] sm:$0xff] }
 0x3ed   : > { %5052 = vrot.lane.b32.xlu1 %v10976_v22, %s6825_s23  ;;  %5062 = vrot.lane.b32.xlu0 %v10978_v1, %s6825_s23 }
 0x3ee   : > { %v11002_v2 = vpop.permute.xlu1 %5328 }
 0x3ef   : > { %13054 = vst [vmem:[#allocation34_spill] sm:$0xff] %v11002_v2  ;;  %v11024_v26 = vpop.permute.xlu0 %5248 }
 0x3f0   : > { %13057 = vst [vmem:[#allocation39_spill] sm:$0xff] %v11024_v26  ;;  %v3684_v26 = vld [vmem:[#allocation3 + $0x60] sm:$0xff] }
 0x3f1   : > { %5056 = vrot.lane.b32.xlu1 %v10986_v27, %s6825_s23  ;;  %5185 = vrot.lane.b32.xlu0 %v10976_v22, %s6827_s20 }
 0x3f2   : > { %v11018_v53 = vpop.permute.xlu1 %5348 }
 0x3f3   : > { %13056 = vst [vmem:[#allocation35_spill] sm:$0xff] %v11018_v53  ;;  %v11036_v58 = vpop.permute.xlu0 %5308  ;;  %v3271_v53 = vld [vmem:[#allocation4 + $0xc0] sm:$0xff] }
 0x3f4   : > { %13058 = vst [vmem:[#allocation36_spill] sm:$0xff] %v11036_v58  ;;  %v3511_v58 = vld [vmem:[#allocation3 + $0x30] sm:$0xff] }
 0x3f5   : > { %5060 = vrot.lane.b32.xlu1 %v10996_v25, %s6825_s23  ;;  %5189 = vrot.lane.b32.xlu0 %v10986_v27, %s6827_s20 }
 0x3f6   : > { %v11026_v37 = vpop.permute.xlu1 %5199 }
 0x3f7   : > { %v11046_v32 = vpop.permute.xlu0 %5368 }
 0x3f8   : > { %13061 = vst [vmem:[#allocation106_spill] sm:$0xff] %v11046_v32 }
 0x3f9   : > { %5064 = vrot.lane.b32.xlu1 %v11004_v61, %s6825_s23  ;;  %5193 = vrot.lane.b32.xlu0 %v10996_v25, %s6827_s20 }
 0x3fa   : > { %v11038_v18 = vpop.permute.xlu1 %5388 }
 0x3fb   : > { %13059 = vst [vmem:[#allocation100_spill] sm:$0xff] %v11038_v18  ;;  %v11058_v62 = vpop.permute.xlu0 %5408  ;;  %v3347_v18 = vld [vmem:[#allocation3 + $0x60] sm:$0xff] }
 0x3fc   : > { %13063 = vst [vmem:[#allocation104_spill] sm:$0xff] %v11058_v62  ;;  %v13081_v62 = vld [vmem:[#allocation20_spill] sm:$0xff] }
 0x3fd   : > { %5187 = vrot.lane.b32.xlu1 %v10958_v57, %s6827_s20  ;;  %5197 = vrot.lane.b32.xlu0 %v11004_v61, %s6827_s20  ;;  %v11136_v10 = vmul.f32 %v13081_v62, %v3680_v42  ;;  %v3351_v42 = vld [vmem:[#allocation3 + $0xa0] sm:$0xff] }
 0x3fe   : > { %v11044_v6 = vpop.permute.xlu1 %5201  ;;  %v3375_v2 = vmul.f32 %v13072_v21, %v3351_v42  ;;  %v11183_v14 = vmul.f32 %v13081_v62, %v3351_v42  ;;  %v3311_v42 = vld [vmem:[#allocation2 + $0xa0] sm:$0xff] }
 0x3ff   : > { %13060 = vst [vmem:[#allocation40_spill] sm:$0xff] %v11044_v6  ;;  %v11066_v13 = vpop.permute.xlu0 %5496 }
 0x400   : > { %13065 = vst [vmem:[#allocation19_spill] sm:$0xff] %v11066_v13  ;;  %v13091_v13 = vld [vmem:[#allocation72_spill] sm:$0xff] }
 0x401   : > { %5191 = vrot.lane.b32.xlu1 %v10968_v17, %s6827_s20  ;;  %5433 = vrot.lane.b32.xlu0 %v10976_v22, %s6840_s28 }
 0x402   : > { %v11052_v19 = vpop.permute.xlu1 %5476 }
 0x403   : > { %13062 = vst [vmem:[#allocation84_spill] sm:$0xff] %v11052_v19  ;;  %v11081_v55 = vpop.permute.xlu0 %5556 }
 0x404   : > { %13068 = vst [vmem:[#allocation31_spill] sm:$0xff] %v11081_v55 }
 0x405   : > { %5195 = vrot.lane.b32.xlu1 %v10978_v1, %s6827_s20  ;;  %5437 = vrot.lane.b32.xlu0 %v10986_v27, %s6840_s28 }
 0x406   : > { %v11064_v44 = vpop.permute.xlu1 %5516 }
 0x407   : > { %13064 = vst [vmem:[#allocation10_spill] sm:$0xff] %v11064_v44  ;;  %v11092_v39 = vpop.permute.xlu0 %5429  ;;  %v11108_v44 = vmul.f32 %v13076_v46, %v3455_v50  ;;  %v3633_v50 = vld [vmem:[#allocation2 + $0xc0] sm:$0xff] }
 0x409   : > { %5435 = vrot.lane.b32.xlu1 %v10958_v57, %s6840_s28  ;;  %5441 = vrot.lane.b32.xlu0 %v10996_v25, %s6840_s28 }
 0x40a   : > { %v11077_v43 = vpop.permute.xlu1 %5536 }
 0x40b   : > { %13067 = vst [vmem:[#allocation24_spill] sm:$0xff] %v11077_v43  ;;  %v3631_v43 = vld [vmem:[#allocation2 + $0xa0] sm:$0xff]  ;;  %v11125_v33 = vpop.permute.xlu0 %5644 }
 0x40c   : > { %13077 = vst [vmem:[#allocation74_spill] sm:$0xff] %v11125_v33  ;;  %v3313_v33 = vld [vmem:[#allocation2 + $0xc0] sm:$0xff] }
 0x40d   : > { %5439 = vrot.lane.b32.xlu1 %v10968_v17, %s6840_s28  ;;  %5581 = vrot.lane.b32.xlu0 %v10976_v22, %s6841_s29  ;;  %v3349_v22 = vld [vmem:[#allocation3 + $0x80] sm:$0xff]  ;;  %v11222_v6 = vmul.f32 %v13091_v13, %v3313_v33 }
 0x40e   : > { %v11090_v5 = vpop.permute.xlu1 %5624 }
 0x40f   : > { %13069 = vst [vmem:[#allocation61_spill] sm:$0xff] %v11090_v5  ;;  %v11191_v5 = vpop.permute.xlu0 %5447  ;;  %13098 = vst [vmem:[#allocation69_spill] sm:$0xff] %v11222_v6 }
 0x410   : > { %13090 = vst [vmem:[#allocation76_spill] sm:$0xff] %v11191_v5 }
 0x411   : > { %5443 = vrot.lane.b32.xlu1 %v10978_v1, %s6840_s28  ;;  %5585 = vrot.lane.b32.xlu0 %v10986_v27, %s6841_s29  ;;  %v13078_v27 = vmov 2  }
 0x415   : > { %5445 = vrot.lane.b32.xlu1 %v11004_v61, %s6840_s28  ;;  %5589 = vrot.lane.b32.xlu0 %v10996_v25, %s6841_s29  ;;  %v3343_v25 = vld [vmem:[#allocation3 + $0x20] sm:$0xff] }
 0x419   : > { %5583 = vrot.lane.b32.xlu1 %v10958_v57, %s6841_s29  ;;  %5593 = vrot.lane.b32.xlu0 %v11004_v61, %s6841_s29  ;;  %v3635_v61 = vld [vmem:[#allocation2 + $0xe0] sm:$0xff] }
 0x41d   : > { %5587 = vrot.lane.b32.xlu1 %v10968_v17, %s6841_s29  ;;  %5597 = vrot.lane.b32.xlu0 %v11070_v12, %s6841_s29  ;;  %v11117_v12 = vmul.f32 %v13076_v46, %v3461_v8  ;;  %v11130_v8 = vmul.f32 %v13076_v46, %v3467_v9  ;;  %v3345_v17 = vld [vmem:[#allocation3 + $0x40] sm:$0xff]  ;;  %v11151_v9 = vmul.f32 %v13079_v28, %v3631_v43  ;;  %v6269_v43 = vld [vmem:[%s12082_s9 + $0x4] sm:$0xf] }
 0x41f   : > { %13085 = vst [vmem:[#allocation79_spill] sm:$0xff] %v11151_v9  ;;  %v3263_v9 = vld [vmem:[#allocation4 + $0x40] sm:$0xff] }
 0x421   : > { %5591 = vrot.lane.b32.xlu1 %v10978_v1, %s6841_s29  ;;  %5840 = vperm.xlu0 %6397, %v6268_v45   ;;  %v11139_v1 = vmul.f32 %v13081_v62, %v3682_v48  ;;  %v3355_v48 = vld [vmem:[#allocation3 + $0xe0] sm:$0xff] }
 0x422   : > { %v11189_v35 = vmul.f32 %v13081_v62, %v3355_v48 }
 0x425   : > { %5735 = vperm.xlu1 %6398, %v6259_v20   ;;  %6399 = vset.pattern.permute.xlu0 %v12958_v49  ;;  %v3463_v49 = vld [vmem:[#allocation2 + $0xb0] sm:$0xff]  ;;  %v11100_v20 = vmul.f32 %v13073_v7, %v3509_v29  ;;  %v3627_v29 = vld [vmem:[#allocation2 + $0x60] sm:$0xff] }
 0x426   : > { %3414 = vperm.xlu0 %6399, %v6804_v0   ;;  %v3623_v0 = vld [vmem:[#allocation2 + $0x20] sm:$0xff]  ;;  %v11120_v11 = vmul.f32 %v13076_v46, %v3463_v49  ;;  %v11145_v57 = vmul.f32 %v13079_v28, %v3627_v29  ;;  %v11163_v29 = vmul.f32 %v13081_v62, %v3684_v26 }
 0x427   : > { %13074 = vst [vmem:[#allocation57_spill] sm:$0xff] %v11100_v20  ;;  %v3629_v20 = vld [vmem:[#allocation2 + $0x80] sm:$0xff]  ;;  %v11133_v49 = vmul.f32 %v13079_v28, %v3623_v0  ;;  %v3353_v0 = vld [vmem:[#allocation3 + $0xc0] sm:$0xff] }
 0x428   : > { %13083 = vst [vmem:[#allocation105_spill] sm:$0xff] %v11145_v57  ;;  %v11148_v46 = vmul.f32 %v13079_v28, %v3629_v20  ;;  %v3261_v20 = vld [vmem:[#allocation4 + $0x20] sm:$0xff]  ;;  %v3367_v57 = vmul.f32 %v13072_v21, %v3343_v25  ;;  %v3377_v32 = vmul.f32 %v13072_v21, %v3353_v0  ;;  %v3379_v25 = vmul.f32 %v13072_v21, %v3355_v48 }
 0x429   : > { %6400 = vset.pattern.permute.xlu1 %v13070_v47  ;;  %v11102_v47 = vpop.permute.xlu1 %5427  ;;  %13080 = vst [vmem:[#allocation62_spill] sm:$0xff] %v11133_v49  ;;  %v11154_v49 = vmul.f32 %v13079_v28, %v3633_v50  ;;  %v3369_v50 = vmul.f32 %v13072_v21, %v3345_v17  ;;  %v3305_v26 = vld [vmem:[#allocation2 + $0x40] sm:$0xff]  ;;  %v3381_v17 = vadd.f32 %v3365_v41, %v11096_v24 }
 0x42a   : > { %5884 = vperm.xlu1 %6400, %v6268_v45   ;;  %5980 = vperm.xlu0 %6399, %v6268_v45   ;;  %13075 = vst [vmem:[#allocation97_spill] sm:$0xff] %v11102_v47  ;;  %13084 = vst [vmem:[#allocation52_spill] sm:$0xff] %v11148_v46  ;;  %v3265_v46 = vld [vmem:[#allocation4 + $0x60] sm:$0xff]  ;;  %v11186_v40 = vmul.f32 %v13081_v62, %v3353_v0  ;;  %v11219_v47 = vmul.f32 %v13091_v13, %v3311_v42  ;;  %v11233_v42 = vpop.permute.xlu0 %5704 }
 0x42b   : > { %13086 = vst [vmem:[#allocation103_spill] sm:$0xff] %v11154_v49  ;;  %v3267_v49 = vld [vmem:[#allocation4 + $0x80] sm:$0xff]  ;;  %v3493_v41 = vadd.f32 %v11105_v54, %v3381_v17  ;;  %v3291_v19 = vmul.f32 %v13071_v38, %v3265_v46  ;;  %v11208_v54 = vmul.f32 %v13091_v13, %v3305_v26  ;;  %13102 = vst [vmem:[#allocation67_spill] sm:$0xff] %v11233_v42 }
 0x42c   : > { %v3309_v24 = vld [vmem:[#allocation2 + $0x80] sm:$0xff]  ;;  %v3293_v48 = vmul.f32 %v13071_v38, %v3267_v49  ;;  %13097 = vst [vmem:[#allocation49_spill] sm:$0xff] %v11219_v47  ;;  %v3590_v6 = vmul.f32 %v11010_v60, %v3261_v20 }
 0x42d   : > { %v3315_v0 = vld [vmem:[#allocation2 + $0xe0] sm:$0xff]  ;;  %13093 = vst [vmem:[#allocation16_spill] sm:$0xff] %v11208_v54  ;;  %v11216_v30 = vmul.f32 %v13091_v13, %v3309_v24  ;;  %v11228_v54 = vmul.f32 %v13073_v7, %v3511_v58  ;;  %v3596_v58 = vmul.f32 %v11010_v60, %v3267_v49 }
 0x42e   : > { %6401 = vset.pattern.permute.xlu1 %v13078_v27  ;;  %6403 = vset.pattern.permute.xlu0 %v12877_v3  ;;  %v11142_v27 = vmul.f32 %v13079_v28, %v3625_v56  ;;  %v11160_v56 = vmul.f32 %v13079_v28, %v3637_v31  ;;  %v3303_v31 = vld [vmem:[#allocation2 + $0x20] sm:$0xff] }
 0x42f   : > { %5928 = vperm.xlu1 %6401, %v6268_v45   ;;  %v11157_v45 = vmul.f32 %v13079_v28, %v3635_v61  ;;  %v3371_v61 = vmul.f32 %v13072_v21, %v3347_v18  ;;  %v11172_v28 = vpop.permute.xlu1 %5664  ;;  %v3273_v18 = vld [vmem:[#allocation4 + $0xe0] sm:$0xff]  ;;  %13096 = vst [vmem:[#allocation66_spill] sm:$0xff] %v11216_v30  ;;  %13100 = vst [vmem:[#allocation75_spill] sm:$0xff] %v11228_v54 }
 0x430   : > { %13082 = vst [vmem:[#allocation58_spill] sm:$0xff] %v11142_v27  ;;  %13088 = vst [vmem:[#allocation63_spill] sm:$0xff] %v11160_v56  ;;  %v3307_v56 = vld [vmem:[#allocation2 + $0x60] sm:$0xff]  ;;  %v3299_v5 = vmul.f32 %v13071_v38, %v3273_v18 }
 0x431   : > { %13087 = vst [vmem:[#allocation50_spill] sm:$0xff] %v11157_v45  ;;  %v3373_v45 = vmul.f32 %v13072_v21, %v3349_v22  ;;  %13089 = vst [vmem:[#allocation59_spill] sm:$0xff] %v11172_v28  ;;  %v3269_v27 = vld [vmem:[#allocation4 + $0xa0] sm:$0xff]  ;;  %v11180_v28 = vmul.f32 %v13081_v62, %v3349_v22  ;;  %v3289_v21 = vmul.f32 %v13071_v38, %v3263_v9 }
 0x432   : > { %v11196_v22 = vmul.f32 %v13081_v62, %v3694_v51  ;;  %v3295_v55 = vmul.f32 %v13071_v38, %v3269_v27  ;;  %v11205_v51 = vmul.f32 %v13091_v13, %v3303_v31  ;;  %v11211_v62 = vmul.f32 %v13091_v13, %v3307_v56  ;;  %v3515_v47 = vld [vmem:[#allocation3 + $0x70] sm:$0xff] }
 0x433   : > { %6402 = vset.pattern.permute.xlu1 %v12877_v3  ;;  %v3287_v3 = vmul.f32 %v13071_v38, %v3261_v20  ;;  %v11213_v17 = vpop.permute.xlu1 %5684  ;;  %v3385_v26 = vadd.f32 %v3369_v50, %v3289_v21  ;;  %v11231_v56 = vmul.f32 %v13073_v7, %v3513_v16  ;;  %v3389_v24 = vadd.f32 %v3373_v45, %v3293_v48  ;;  %v3580_v50 = vld [vmem:[#allocation4 + $0x100] sm:$0xff] }
 0x434   : > { %6009 = vperm.xlu1 %6402, %v6269_v43   ;;  %v3297_v43 = vmul.f32 %v13071_v38, %v3271_v53  ;;  %13092 = vst [vmem:[#allocation9_spill] sm:$0xff] %v11205_v51  ;;  %13094 = vst [vmem:[#allocation11_spill] sm:$0xff] %v11211_v62  ;;  %v11225_v38 = vmul.f32 %v13091_v13, %v3315_v0  ;;  %v3387_v62 = vadd.f32 %v3371_v61, %v3291_v19  ;;  %v3517_v20 = vld [vmem:[#allocation3 + $0x90] sm:$0xff] }
 0x435   : > { %13095 = vst [vmem:[#allocation65_spill] sm:$0xff] %v11213_v17  ;;  %v3383_v31 = vadd.f32 %v3367_v57, %v3287_v3  ;;  %13101 = vst [vmem:[#allocation17_spill] sm:$0xff] %v11231_v56  ;;  %v3391_v30 = vadd.f32 %v3375_v2, %v3295_v55  ;;  %v3395_v33 = vadd.f32 %v3379_v25, %v3299_v5  ;;  %v3519_v61 = vld [vmem:[#allocation3 + $0xb0] sm:$0xff] }
 0x436   : > { %13099 = vst [vmem:[#allocation54_spill] sm:$0xff] %v11225_v38  ;;  %v3393_v51 = vadd.f32 %v3377_v32, %v3297_v43  ;;  %v3592_v0 = vmul.f32 %v11010_v60, %v3263_v9  ;;  %v3594_v57 = vmul.f32 %v11010_v60, %v3265_v46  ;;  %v3598_v16 = vmul.f32 %v11010_v60, %v3269_v27  ;;  %v3521_v25 = vld [vmem:[#allocation3 + $0xd0] sm:$0xff] }
 0x437   : > { %v3600_v19 = vmul.f32 %v11010_v60, %v3271_v53  ;;  %v3602_v2 = vmul.f32 %v11010_v60, %v3273_v18  ;;  %v3495_v32 = vadd.f32 %v11108_v44, %v3383_v31  ;;  %v3497_v55 = vadd.f32 %v11111_v34, %v3385_v26  ;;  %v5450_v53 = vpop.permute.xlu1 %5449  ;;  %v3301_v3 = vld [vmem:[#allocation2] sm:$0xff] }
 0x438   : > { %v3604_v5 = vmul.f32 %v11010_v60, %v3580_v50  ;;  %v11246_v45 = vmul.f32 %v13073_v7, %v3515_v47  ;;  %v3499_v46 = vadd.f32 %v11114_v36, %v3387_v62  ;;  %v3501_v9 = vadd.f32 %v11117_v12, %v3389_v24  ;;  %v3523_v47 = vld [vmem:[#allocation3 + $0xf0] sm:$0xff]  ;;  %v11253_v12 = vpop.permute.xlu0 %5096 }
 0x439   : > { %v3503_v49 = vadd.f32 %v11120_v11, %v3391_v30  ;;  %v3505_v27 = vadd.f32 %v11123_v15, %v3393_v51  ;;  %v3507_v44 = vadd.f32 %v11130_v8, %v3395_v33  ;;  %v3606_v34 = vadd.f32 %v3590_v6, %v3493_v41  ;;  %v13159_v56 = vld [vmem:[#allocation22_spill] sm:$0xff] }
 0x43a   : > { %13103 = vst [vmem:[#allocation70_spill] sm:$0xff] %v11246_v45  ;;  %v3608_v18 = vadd.f32 %v3592_v0, %v3495_v32  ;;  %v3610_v60 = vadd.f32 %v3594_v57, %v3497_v55  ;;  %v3612_v21 = vadd.f32 %v3596_v58, %v3499_v46  ;;  %v3614_v48 = vadd.f32 %v3598_v16, %v3501_v9  ;;  %v13118_v57 = vld [vmem:[#allocation97_spill] sm:$0xff]  ;;  %v13119_v58 = vld [vmem:[#allocation42_spill] sm:$0xff]  ;;  %v13125_v55 = vld [vmem:[#allocation36_spill] sm:$0xff] }
 0x43b   : > { %v3616_v36 = vadd.f32 %v3600_v19, %v3503_v49  ;;  %v3618_v43 = vadd.f32 %v3602_v2, %v3505_v27  ;;  %v3620_v11 = vadd.f32 %v3604_v5, %v3507_v44  ;;  %v11256_v30 = vmul.f32 %v13073_v7, %v3517_v20  ;;  %v5576_v33 = vpop.permute.xlu1 %5575  ;;  %v13123_v2 = vld [vmem:[#allocation82_spill] sm:$0xff]  ;;  %v13127_v46 = vld [vmem:[#allocation31_spill] sm:$0xff]  ;;  %v13129_v20 = vld [vmem:[#allocation84_spill] sm:$0xff] }
 0x43c   : > { %v11259_v15 = vmul.f32 %v13073_v7, %v3519_v61  ;;  %v11262_v8 = vmul.f32 %v13073_v7, %v3521_v25  ;;  %v5082_v6 = vsel %vm3855_vm4, 0.0, %v10966_v52  ;;  %v11268_v41 = vsel %vm3855_vm4, 0.0, %v10984_v4  ;;  %v13132_v44 = vld [vmem:[#allocation74_spill] sm:$0xff] }
 0x43d   : > { %13104 = vst [vmem:[#allocation64_spill] sm:$0xff] %v11256_v30  ;;  %v11271_v51 = vmul.f32 %v13091_v13, %v3301_v3  ;;  %v11274_v62 = vmul.f32 %v13073_v7, %v3523_v47  ;;  %v11277_v31 = vadd.f32 %v11136_v10, %v3606_v34  ;;  %v11280_v26 = vadd.f32 %v11139_v1, %v3608_v18  ;;  %v5578_v1 = vpop.permute.xlu0 %5577  ;;  %v13134_v18 = vld [vmem:[#allocation61_spill] sm:$0xff] }
 0x43e   : > { %13105 = vst [vmem:[#allocation77_spill] sm:$0xff] %v11259_v15  ;;  %13106 = vst [vmem:[#allocation56_spill] sm:$0xff] %v11262_v8  ;;  %v11283_v24 = vadd.f32 %v11163_v29, %v3610_v60  ;;  %v5083_v52 = vsel %vm3855_vm4, 0.0, %v10737_v63  ;;  %v11288_v4 = vadd.f32 %v11180_v28, %v3612_v21  ;;  %v11291_v13 = vadd.f32 %v11183_v14, %v3614_v48  ;;  %v13136_v21 = vld [vmem:[#allocation95_spill] sm:$0xff]  ;;  %v13157_v8 = vld [vmem:[#allocation104_spill] sm:$0xff] }
 0x43f   : > { %13107 = vst [vmem:[#allocation88_spill] sm:$0xff] %v11271_v51  ;;  %13108 = vst [vmem:[#allocation29_spill] sm:$0xff] %v11274_v62  ;;  %v11294_v7 = vadd.f32 %v11186_v40, %v3616_v36  ;;  %v11297_v10 = vadd.f32 %v11189_v35, %v3618_v43  ;;  %v11300_v29 = vadd.f32 %v11196_v22, %v3620_v11  ;;  %v5093_v63 = vsel %vm3855_vm4, 0.0, %v10768_v23  ;;  %v13117_v35 = vld [vmem:[#allocation40_spill] sm:$0xff]  ;;  %v5596_v27 = vpop.permute.xlu1 %5595 }
 0x440   : > { %13109 = vst [vmem:[#allocation90_spill] sm:$0xff] %v11277_v31  ;;  %13110 = vst [vmem:[#allocation83_spill] sm:$0xff] %v11280_v26  ;;  %v5216_v28 = vsel %vm3189_vm2, 0.0, %v11016_v59  ;;  %v5225_v14 = vsel %vm3189_vm2, 0.0, %v11026_v37  ;;  %v11310_v40 = vsel %vm4237_vm5, %v11092_v39, 0.0  ;;  %v5226_v0 = vsel %vm3189_vm2, 0.0, %v13117_v35 }
 0x441   : > { %13111 = vst [vmem:[#allocation27_spill] sm:$0xff] %v11283_v24  ;;  %13112 = vst [vmem:[#allocation71_spill] sm:$0xff] %v11288_v4  ;;  %v5463_v22 = vsel %vm4237_vm5, %v13118_v57, 0.0  ;;  %v5474_v50 = vsel %vm4237_vm5, %v5450_v53, 0.0  ;;  %v5215_v23 = vsel %vm3189_vm2, 0.0, %v13119_v58  ;;  %v13120_v59 = vld [vmem:[#allocation19_spill] sm:$0xff]  ;;  %v11329_v32 = vmul.f32 %v13123_v2, %v5225_v14 }
 0x442   : > { %13113 = vst [vmem:[#allocation60_spill] sm:$0xff] %v11291_v13  ;;  %13114 = vst [vmem:[#allocation101_spill] sm:$0xff] %v11294_v7  ;;  %v11321_v16 = vmul.f32 %v13120_v59, %v11310_v40  ;;  %v13122_v37 = vld [vmem:[#allocation76_spill] sm:$0xff]  ;;  %v5612_v39 = vsel %vm4386_vm6, %v5578_v1, 0.0  ;;  %v11332_v5 = vmul.f32 %v13125_v55, %v5225_v14  ;;  %v5611_v49 = vsel %vm4386_vm6, %v5576_v33, 0.0  ;;  %v13139_v33 = vld [vmem:[#allocation26_spill] sm:$0xff] }
 0x443   : > { %13115 = vst [vmem:[#allocation87_spill] sm:$0xff] %v11297_v10  ;;  %13116 = vst [vmem:[#allocation28_spill] sm:$0xff] %v11300_v29  ;;  %v11325_v19 = vsel %vm4237_vm5, %v13122_v37, 0.0  ;;  %v11340_v53 = vmul.f32 %v13125_v55, %v5226_v0  ;;  %v11343_v61 = vmul.f32 %v13129_v20, %v5463_v22  ;;  %v11346_v25 = vmul.f32 %v13127_v46, %v5474_v50  ;;  %v13138_v11 = vld [vmem:[#allocation96_spill] sm:$0xff]  ;;  %v13142_v57 = vld [vmem:[#allocation34_spill] sm:$0xff] }
 0x444   : > { %13121 = vst [vmem:[#allocation14_spill] sm:$0xff] %v11321_v16  ;;  %13124 = vst [vmem:[#allocation53_spill] sm:$0xff] %v11329_v32  ;;  %v11336_v9 = vmul.f32 %v13127_v46, %v11325_v19  ;;  %v11349_v34 = vmul.f32 %v13132_v44, %v5612_v39  ;;  %v11352_v60 = vmul.f32 %v13134_v18, %v5612_v39  ;;  %v5621_v43 = vsel %vm4386_vm6, %v5596_v27, 0.0  ;;  %v13140_v35 = vld [vmem:[#allocation68_spill] sm:$0xff]  ;;  %v13144_v58 = vld [vmem:[#allocation18_spill] sm:$0xff] }
 0x445   : > { %13126 = vst [vmem:[#allocation55_spill] sm:$0xff] %v11332_v5  ;;  %13130 = vst [vmem:[#allocation46_spill] sm:$0xff] %v11343_v61  ;;  %v11355_v3 = vmul.f32 %v11253_v12, %v5082_v6  ;;  %v11358_v47 = vmul.f32 %v11253_v12, %v5083_v52  ;;  %v11361_v48 = vmul.f32 %v13136_v21, %v5083_v52  ;;  %v13141_v6 = vld [vmem:[#allocation106_spill] sm:$0xff]  ;;  %v13143_v52 = vld [vmem:[#allocation35_spill] sm:$0xff] }
 0x446   : > { %13128 = vst [vmem:[#allocation15_spill] sm:$0xff] %v11336_v9  ;;  %13131 = vst [vmem:[#allocation102_spill] sm:$0xff] %v11346_v25  ;;  %v11364_v36 = vmul.f32 %v13134_v18, %v5611_v49  ;;  %v11368_v1 = vmul.f32 %v13138_v11, %v5215_v23  ;;  %v11371_v14 = vmul.f32 %v13139_v33, %v5093_v63  ;;  %v13145_v23 = vld [vmem:[#allocation98_spill] sm:$0xff]  ;;  %v13146_v39 = vld [vmem:[#allocation100_spill] sm:$0xff] }
 0x447   : > { %13133 = vst [vmem:[#allocation73_spill] sm:$0xff] %v11349_v34  ;;  %13135 = vst [vmem:[#allocation32_spill] sm:$0xff] %v11352_v60  ;;  %v11375_v0 = vmul.f32 %v13141_v6, %v13140_v35  ;;  %v11379_v22 = vmul.f32 %v13142_v57, %v13140_v35  ;;  %v11383_v50 = vmul.f32 %v13143_v52, %v13140_v35  ;;  %v13147_v27 = vld [vmem:[#allocation47_spill] sm:$0xff]  ;;  %v13150_v13 = vld [vmem:[#allocation93_spill] sm:$0xff] }
 0x448   : > { %13137 = vst [vmem:[#allocation25_spill] sm:$0xff] %v11364_v36  ;;  %v11387_v37 = vmul.f32 %v13142_v57, %v13144_v58  ;;  %v11391_v63 = vmul.f32 %v13141_v6, %v13145_v23  ;;  %v11395_v49 = vmul.f32 %v13146_v39, %v13145_v23  ;;  %v11399_v29 = vmul.f32 %v13142_v57, %v13147_v27  ;;  %v13163_v25 = vld [vmem:[#allocation94_spill] sm:$0xff]  ;;  %v13168_v61 = vld [vmem:[#allocation39_spill] sm:$0xff] }
 0x449   : > { %v11403_v35 = vmul.f32 %v13143_v52, %v13147_v27  ;;  %v11406_v10 = vmul.f32 %v11213_v17, %v5621_v43  ;;  %v11409_v7 = vmul.f32 %v11233_v42, %v5621_v43  ;;  %v11413_v4 = vmul.f32 %v13143_v52, %v13150_v13  ;;  %v13178_v36 = vld [vmem:[#allocation38_spill] sm:$0xff] }
 0x44a   : > { %v11417_v24 = vmul.f32 %v13141_v6, %v13150_v13  ;;  %v11421_v26 = vmul.f32 %v13146_v39, %v13150_v13  ;;  %v11425_v31 = vmul.f32 %v13142_v57, %v13145_v23  ;;  %v11429_v43 = vmul.f32 %v13143_v52, %v13145_v23 }
 0x44b   : > { %13148 = vst [vmem:[#allocation33_spill] sm:$0xff] %v11406_v10  ;;  %13149 = vst [vmem:[#allocation13_spill] sm:$0xff] %v11409_v7  ;;  %v11433_v62 = vmul.f32 %v13146_v39, %v13147_v27  ;;  %v11437_v15 = vmul.f32 %v13157_v8, %v13147_v27  ;;  %v11441_v30 = vmul.f32 %v13143_v52, %v13144_v58  ;;  %v13161_v7 = vld [vmem:[#allocation37_spill] sm:$0xff] }
 0x44c   : > { %13151 = vst [vmem:[#allocation86_spill] sm:$0xff] %v11413_v4  ;;  %13152 = vst [vmem:[#allocation99_spill] sm:$0xff] %v11417_v24  ;;  %v11445_v45 = vmul.f32 %v13141_v6, %v13144_v58  ;;  %v11449_v23 = vmul.f32 %v13146_v39, %v13144_v58  ;;  %v11453_v54 = vmul.f32 %v13159_v56, %v11268_v41 }
 0x44d   : > { %13153 = vst [vmem:[#allocation78_spill] sm:$0xff] %v11421_v26  ;;  %13154 = vst [vmem:[#allocation80_spill] sm:$0xff] %v11425_v31  ;;  %v11457_v38 = vmul.f32 %v13139_v33, %v11268_v41  ;;  %v11461_v51 = vmul.f32 %v13157_v8, %v13144_v58  ;;  %v11465_v10 = vmul.f32 %v13142_v57, %v13161_v7 }
 0x44e   : > { %13155 = vst [vmem:[#allocation81_spill] sm:$0xff] %v11429_v43  ;;  %13156 = vst [vmem:[#allocation43_spill] sm:$0xff] %v11433_v62  ;;  %v11469_v9 = vmul.f32 %v13142_v57, %v13163_v25  ;;  %v11473_v42 = vmul.f32 %v13143_v52, %v13161_v7  ;;  %v11477_v41 = vmul.f32 %v13143_v52, %v13163_v25 }
 0x44f   : > { %13158 = vst [vmem:[#allocation44_spill] sm:$0xff] %v11437_v15  ;;  %13160 = vst [vmem:[#allocation45_spill] sm:$0xff] %v11461_v51  ;;  %v11481_v58 = vmul.f32 %v13141_v6, %v13163_v25  ;;  %v11484_v60 = vmul.f32 %v13138_v11, %v5216_v28  ;;  %v5251_v46 = vmul.f32 %v13168_v61, %v5216_v28 }
 0x450   : > { %13162 = vst [vmem:[#allocation48_spill] sm:$0xff] %v11465_v10  ;;  %13164 = vst [vmem:[#allocation89_spill] sm:$0xff] %v11469_v9  ;;  %v6805_v9 = vld [vmem:[#allocation5] sm:$0xf]  ;;  %v11501_v5 = vmul.f32 %v13157_v8, %v13150_v13  ;;  %v11505_v28 = vmul.f32 %v13141_v6, %v13161_v7 }
 0x451   : > { %13165 = vst [vmem:[#allocation92_spill] sm:$0xff] %v11473_v42  ;;  %13166 = vst [vmem:[#allocation91_spill] sm:$0xff] %v11477_v41  ;;  %v11488_v10 = vmul.f32 %v6805_v9, %v13142_v57  ;;  %v11492_v42 = vmul.f32 %v13146_v39, %v13163_v25  ;;  %v11509_v9 = vmul.f32 %v13146_v39, %v13161_v7 }
 0x452   : > { %13167 = vst [vmem:[#allocation30_spill] sm:$0xff] %v11481_v58  ;;  %v11497_v58 = vmul.f32 %v13141_v6, %v13147_v27  ;;  %13171 = vst [vmem:[#allocation72_spill] sm:$0xff] %v11501_v5  ;;  %v13176_v27 = vld [vmem:[#allocation85_spill] sm:$0xff] }
 0x453   : > { %v5184_v17 = vpop.permute.xlu1 %5183  ;;  %v5051_v34 = vpop.permute.xlu0 %5050  ;;  %13169 = vst [vmem:[#allocation21_spill] sm:$0xff] %v11492_v42  ;;  %13172 = vst [vmem:[#allocation40_spill] sm:$0xff] %v11505_v28  ;;  %v11513_v42 = vmul.f32 %v13157_v8, %v13161_v7  ;;  %v11521_v13 = vmul.f32 %v13141_v6, %v13176_v27  ;;  %v11527_v5 = vmul.f32 %v13146_v39, %v13176_v27 }
 0x454   : > { %v5084_v41 = vsel %vm3855_vm4, 0.0, %v5051_v34  ;;  %13170 = vst [vmem:[#allocation20_spill] sm:$0xff] %v11497_v58  ;;  %13173 = vst [vmem:[#allocation97_spill] sm:$0xff] %v11509_v9  ;;  %v11517_v34 = vmul.f32 %v13157_v8, %v13163_v25  ;;  %v5217_v32 = vsel %vm3189_vm2, 0.0, %v5184_v17  ;;  %v11531_v7 = vmul.f32 %v13157_v8, %v13176_v27  ;;  %v6806_v25 = vld [vmem:[#allocation5 + $0x4] sm:$0xf] }
 0x455   : > { %13174 = vst [vmem:[#allocation42_spill] sm:$0xff] %v11513_v42  ;;  %13177 = vst [vmem:[#allocation82_spill] sm:$0xff] %v11521_v13  ;;  %v5123_v28 = vmul.f32 %v13178_v36, %v5084_v41  ;;  %v11537_v6 = vmul.f32 %v6806_v25, %v13143_v52  ;;  %v11541_v17 = vmul.f32 %v13129_v20, %v11310_v40  ;;  %v13182_v13 = vld [vmem:[#allocation23_spill] sm:$0xff]  ;;  %v13184_v58 = vld [vmem:[#allocation24_spill] sm:$0xff] }
 0x456   : > { %13175 = vst [vmem:[#allocation76_spill] sm:$0xff] %v11517_v34  ;;  %13179 = vst [vmem:[#allocation36_spill] sm:$0xff] %v11527_v5  ;;  %v11534_v34 = vmul.f32 %v6806_v25, %v13142_v57  ;;  %v11545_v5 = vmul.f32 %v13182_v13, %v13157_v8  ;;  %v11551_v16 = vmul.f32 %v13184_v58, %v11325_v19  ;;  %v6807_v57 = vld [vmem:[#allocation5 + $0x28] sm:$0xf] }
 0x457   : > { %13180 = vst [vmem:[#allocation95_spill] sm:$0xff] %v11531_v7  ;;  %v5432_v42 = vpop.permute.xlu1 %5431  ;;  %v5055_v9 = vpop.permute.xlu0 %5054  ;;  %13181 = vst [vmem:[#allocation96_spill] sm:$0xff] %v11541_v17  ;;  %v11554_v52 = vmul.f32 %v6807_v57, %v13146_v39  ;;  %v11557_v25 = vmul.f32 %v13138_v11, %v5217_v32  ;;  %v11560_v40 = vmul.f32 %v13168_v61, %v5217_v32 }
 0x458   : > { %13183 = vst [vmem:[#allocation26_spill] sm:$0xff] %v11545_v5  ;;  %v5465_v27 = vsel %vm4237_vm5, %v5432_v42, 0.0  ;;  %v5086_v7 = vsel %vm3855_vm4, 0.0, %v5055_v9  ;;  %13185 = vst [vmem:[#allocation68_spill] sm:$0xff] %v11551_v16  ;;  %v5112_v13 = vmul.f32 %v13136_v21, %v5084_v41  ;;  %v11564_v42 = vmul.f32 %v6807_v57, %v13157_v8 }
 0x459   : > { %13186 = vst [vmem:[#allocation106_spill] sm:$0xff] %v11554_v52  ;;  %v5131_v9 = vadd.f32 %v5123_v28, %v11355_v3  ;;  %v5125_v19 = vmul.f32 %v13178_v36, %v5086_v7  ;;  %v5144_v16 = vmul.f32 %v13159_v56, %v5086_v7  ;;  %v5163_v39 = vmul.f32 %v13139_v33, %v5086_v7  ;;  %v13188_v52 = vld [vmem:[#allocation41_spill] sm:$0xff] }
 0x45a   : > { %13187 = vst [vmem:[#allocation34_spill] sm:$0xff] %v11564_v42  ;;  %v5271_v5 = vmul.f32 %v13188_v52, %v5217_v32  ;;  %v5101_v58 = vmul.f32 %v11253_v12, %v5084_v41  ;;  %v11573_v17 = vmul.f32 %v13129_v20, %v5465_v27  ;;  %v11576_v15 = vmul.f32 %v13120_v59, %v5465_v27  ;;  %v13191_v42 = vld [vmem:[#allocation10_spill] sm:$0xff] }
 0x45b   : > { %v5580_v8 = vpop.permute.xlu1 %5579  ;;  %v5059_v57 = vpop.permute.xlu0 %5058  ;;  %v11579_v3 = vmul.f32 %v13191_v42, %v5465_v27  ;;  %v5152_v28 = vadd.f32 %v5144_v16, %v5112_v13  ;;  %v5171_v51 = vadd.f32 %v5163_v39, %v5131_v9  ;;  %v5103_v31 = vmul.f32 %v11253_v12, %v5086_v7  ;;  %v13195_v13 = vld [vmem:[#allocation59_spill] sm:$0xff] }
 0x45c   : > { %13189 = vst [vmem:[#allocation35_spill] sm:$0xff] %v11573_v17  ;;  %13190 = vst [vmem:[#allocation18_spill] sm:$0xff] %v11576_v15  ;;  %v5613_v43 = vsel %vm4386_vm6, %v5580_v8, 0.0  ;;  %v5114_v32 = vmul.f32 %v13136_v21, %v5086_v7  ;;  %v5133_v41 = vadd.f32 %v5125_v19, %v5101_v58  ;;  %v5088_v20 = vsel %vm3855_vm4, 0.0, %v5059_v57 }
 0x45d   : > { %13192 = vst [vmem:[#allocation98_spill] sm:$0xff] %v11579_v3  ;;  %v11586_v17 = vmul.f32 %v13134_v18, %v5613_v43  ;;  %v11589_v15 = vmul.f32 %v13132_v44, %v5613_v43  ;;  %v5127_v27 = vmul.f32 %v13178_v36, %v5088_v20  ;;  %v5146_v16 = vmul.f32 %v13159_v56, %v5088_v20 }
 0x45e   : > { %v11594_v9 = vmul.f32 %v13195_v13, %v5613_v43  ;;  %v5105_v39 = vmul.f32 %v11253_v12, %v5088_v20  ;;  %v5116_v7 = vmul.f32 %v13136_v21, %v5088_v20  ;;  %v5259_v8 = vadd.f32 %v5251_v46, %v5171_v51 }
 0x45f   : > { %13193 = vst [vmem:[#allocation100_spill] sm:$0xff] %v11586_v17  ;;  %13194 = vst [vmem:[#allocation47_spill] sm:$0xff] %v11589_v15  ;;  %v5053_v58 = vpop.permute.xlu1 %5052  ;;  %v5063_v19 = vpop.permute.xlu0 %5062  ;;  %v5165_v57 = vmul.f32 %v13139_v33, %v5088_v20  ;;  %v5240_v44 = vadd.f32 %v11484_v60, %v5152_v28  ;;  %v5135_v13 = vadd.f32 %v5127_v27, %v5103_v31 }
 0x460   : > { %13196 = vst [vmem:[#allocation93_spill] sm:$0xff] %v11594_v9  ;;  %v5085_v17 = vsel %vm3855_vm4, 0.0, %v5053_v58  ;;  %v5090_v15 = vsel %vm3855_vm4, 0.0, %v5063_v19  ;;  %v5154_v3 = vadd.f32 %v5146_v16, %v5114_v32 }
 0x461   : > { %v5124_v18 = vmul.f32 %v13178_v36, %v5085_v17  ;;  %v5143_v43 = vmul.f32 %v13159_v56, %v5085_v17  ;;  %v5118_v9 = vmul.f32 %v13136_v21, %v5090_v15  ;;  %v5129_v42 = vmul.f32 %v13178_v36, %v5090_v15 }
 0x462   : > { %v5148_v51 = vmul.f32 %v13159_v56, %v5090_v15  ;;  %v5167_v46 = vmul.f32 %v13139_v33, %v5090_v15  ;;  %v5102_v20 = vmul.f32 %v11253_v12, %v5085_v17  ;;  %v5113_v58 = vmul.f32 %v13136_v21, %v5085_v17 }
 0x463   : > { %v5132_v60 = vadd.f32 %v5124_v18, %v11358_v47  ;;  %v5151_v28 = vadd.f32 %v5143_v43, %v11361_v48  ;;  %v5057_v19 = vpop.permute.xlu1 %5056  ;;  %v5186_v59 = vpop.permute.xlu0 %5185  ;;  %v5137_v31 = vadd.f32 %v5129_v42, %v5105_v39  ;;  %v11615_v27 = vadd.f32 %v11453_v54, %v5118_v9 }
 0x464   : > { %v11612_v32 = vadd.f32 %v5148_v51, %v5116_v7  ;;  %v5173_v16 = vadd.f32 %v5165_v57, %v5133_v41  ;;  %v5175_v15 = vadd.f32 %v5167_v46, %v5135_v13  ;;  %v5087_v26 = vsel %vm3855_vm4, 0.0, %v5057_v19 }
 0x465   : > { %v5239_v62 = vadd.f32 %v11368_v1, %v5151_v28  ;;  %v5218_v17 = vsel %vm3189_vm2, 0.0, %v5186_v59  ;;  %v11621_v18 = vadd.f32 %v11457_v38, %v5137_v31  ;;  %v5104_v47 = vmul.f32 %v11253_v12, %v5087_v26 }
 0x466   : > { %v5115_v48 = vmul.f32 %v13136_v21, %v5087_v26  ;;  %v5126_v42 = vmul.f32 %v13178_v36, %v5087_v26  ;;  %v5145_v54 = vmul.f32 %v13159_v56, %v5087_v26  ;;  %v5164_v1 = vmul.f32 %v13139_v33, %v5087_v26 }
 0x467   : > { %v11626_v39 = vadd.f32 %v5271_v5, %v5239_v62  ;;  %v5234_v41 = vmul.f32 %v13138_v11, %v5218_v17  ;;  %v5061_v13 = vpop.permute.xlu1 %5060  ;;  %v5190_v9 = vpop.permute.xlu0 %5189  ;;  %v5253_v38 = vmul.f32 %v13168_v61, %v5218_v17  ;;  %v5272_v7 = vmul.f32 %v13188_v52, %v5218_v17 }
 0x468   : > { %v5134_v59 = vadd.f32 %v5126_v42, %v5102_v20  ;;  %v5291_v57 = vmul.f32 %v13123_v2, %v5218_v17  ;;  %v5153_v43 = vadd.f32 %v5145_v54, %v5113_v58  ;;  %v5172_v51 = vadd.f32 %v5164_v1, %v5132_v60 }
 0x469   : > { %v5242_v46 = vadd.f32 %v5234_v41, %v5154_v3  ;;  %v5089_v62 = vsel %vm3855_vm4, 0.0, %v5061_v13  ;;  %v5261_v5 = vadd.f32 %v5253_v38, %v5173_v16  ;;  %v5280_v28 = vadd.f32 %v5272_v7, %v5240_v44 }
 0x46a   : > { %v5299_v19 = vadd.f32 %v5291_v57, %v5259_v8  ;;  %v5128_v26 = vmul.f32 %v13178_v36, %v5089_v62  ;;  %v5147_v31 = vmul.f32 %v13159_v56, %v5089_v62  ;;  %v5166_v20 = vmul.f32 %v13139_v33, %v5089_v62 }
 0x46b   : > { %v5220_v42 = vsel %vm3189_vm2, 0.0, %v5190_v9  ;;  %v5106_v24 = vmul.f32 %v11253_v12, %v5089_v62  ;;  %v5065_v4 = vpop.permute.xlu1 %5064  ;;  %v5194_v1 = vpop.permute.xlu0 %5193 }
 0x46c   : > { %v5339_v58 = vadd.f32 %v11488_v10, %v5299_v19  ;;  %v5236_v3 = vmul.f32 %v13138_v11, %v5220_v42  ;;  %v5255_v60 = vmul.f32 %v13168_v61, %v5220_v42  ;;  %v5274_v44 = vmul.f32 %v13188_v52, %v5220_v42 }
 0x46d   : > { %v5155_v8 = vadd.f32 %v5147_v31, %v5115_v48  ;;  %v5174_v16 = vadd.f32 %v5166_v20, %v5134_v59  ;;  %v5293_v17 = vmul.f32 %v13123_v2, %v5220_v42  ;;  %v5312_v54 = vmul.f32 %v13125_v55, %v5220_v42 }
 0x46e   : > { %v11647_v41 = vadd.f32 %v11375_v0, %v5339_v58  ;;  %v5263_v12 = vadd.f32 %v5255_v60, %v5175_v15  ;;  %v5282_v13 = vadd.f32 %v5274_v44, %v5242_v46  ;;  %v5117_v10 = vmul.f32 %v13136_v21, %v5089_v62 }
 0x46f   : > { %v5301_v9 = vadd.f32 %v5293_v17, %v5261_v5  ;;  %v5320_v38 = vadd.f32 %v5312_v54, %v5280_v28  ;;  %v5136_v7 = vadd.f32 %v5128_v26, %v5104_v47  ;;  %v5091_v57 = vsel %vm3855_vm4, 0.0, %v5065_v4  ;;  %v5188_v20 = vpop.permute.xlu1 %5187  ;;  %v5198_v17 = vpop.permute.xlu0 %5197 }
 0x470   : > { %v5130_v48 = vmul.f32 %v13178_v36, %v5091_v57  ;;  %v5149_v59 = vmul.f32 %v13159_v56, %v5091_v57  ;;  %v5168_v19 = vmul.f32 %v13139_v33, %v5091_v57  ;;  %v5222_v31 = vsel %vm3189_vm2, 0.0, %v5194_v1 }
 0x471   : > { %v5341_v0 = vadd.f32 %v11379_v22, %v5301_v9  ;;  %v5360_v15 = vadd.f32 %v11383_v50, %v5320_v38  ;;  %v5238_v21 = vmul.f32 %v13138_v11, %v5222_v31  ;;  %v5257_v46 = vmul.f32 %v13168_v61, %v5222_v31 }
 0x472   : > { %v5138_v47 = vadd.f32 %v5130_v48, %v5106_v24  ;;  %v11659_v62 = vadd.f32 %v5149_v59, %v5117_v10  ;;  %v11661_v4 = vadd.f32 %v5168_v19, %v5136_v7  ;;  %v5276_v56 = vmul.f32 %v13188_v52, %v5222_v31 }
 0x473   : > { %v5295_v36 = vmul.f32 %v13123_v2, %v5222_v31  ;;  %v5314_v33 = vmul.f32 %v13125_v55, %v5222_v31  ;;  %v5241_v5 = vadd.f32 %v11557_v25, %v5153_v43  ;;  %v5260_v22 = vadd.f32 %v11560_v40, %v5172_v51  ;;  %v5192_v51 = vpop.permute.xlu1 %5191 }
 0x474   : > { %v11669_v50 = vadd.f32 %v11371_v14, %v5138_v47  ;;  %v5219_v28 = vsel %vm3189_vm2, 0.0, %v5188_v20  ;;  %v5244_v24 = vadd.f32 %v5236_v3, %v11612_v32  ;;  %v5246_v26 = vadd.f32 %v5238_v21, %v11615_v27  ;;  %v5434_v47 = vpop.permute.xlu0 %5433 }
 0x475   : > { %v5303_v42 = vadd.f32 %v5295_v36, %v5263_v12  ;;  %v5322_v58 = vadd.f32 %v5314_v33, %v5282_v13  ;;  %v5235_v60 = vmul.f32 %v13138_v11, %v5219_v28  ;;  %v5254_v44 = vmul.f32 %v13168_v61, %v5219_v28 }
 0x476   : > { %v5273_v25 = vmul.f32 %v13188_v52, %v5219_v28  ;;  %v5292_v40 = vmul.f32 %v13123_v2, %v5219_v28  ;;  %v5311_v14 = vmul.f32 %v13125_v55, %v5219_v28  ;;  %v5265_v43 = vadd.f32 %v5257_v46, %v11621_v18  ;;  %v13198_v28 = vld [vmem:[#allocation99_spill] sm:$0xff] }
 0x477   : > { %v5343_v32 = vadd.f32 %v11387_v37, %v5303_v42  ;;  %v5243_v3 = vadd.f32 %v5235_v60, %v5155_v8  ;;  %v5262_v27 = vadd.f32 %v5254_v44, %v5174_v16  ;;  %v5284_v54 = vadd.f32 %v5276_v56, %v5244_v24  ;;  %v5196_v42 = vpop.permute.xlu1 %5195  ;;  %v13201_v60 = vld [vmem:[#allocation80_spill] sm:$0xff] }
 0x478   : > { %v5281_v1 = vadd.f32 %v5273_v25, %v5241_v5  ;;  %v5300_v12 = vadd.f32 %v5292_v40, %v5260_v22  ;;  %v5319_v13 = vadd.f32 %v5311_v14, %v11626_v39  ;;  %v5224_v10 = vsel %vm3189_vm2, 0.0, %v5198_v17  ;;  %v13197_v5 = vld [vmem:[#allocation86_spill] sm:$0xff]  ;;  %v13205_v25 = vld [vmem:[#allocation96_spill] sm:$0xff] }
 0x479   : > { %v5278_v9 = vmul.f32 %v13188_v52, %v5224_v10  ;;  %v5297_v38 = vmul.f32 %v13123_v2, %v5224_v10  ;;  %v5316_v7 = vmul.f32 %v13125_v55, %v5224_v10  ;;  %v5221_v18 = vsel %vm3189_vm2, 0.0, %v5192_v51  ;;  %v13206_v51 = vld [vmem:[#allocation84_spill] sm:$0xff]  ;;  %v13209_v10 = vld [vmem:[#allocation10_spill] sm:$0xff] }
 0x47a   : > { %v5340_v57 = vadd.f32 %v11534_v34, %v5300_v12  ;;  %v5359_v37 = vadd.f32 %v11537_v6, %v5319_v13  ;;  %v5237_v8 = vmul.f32 %v13138_v11, %v5221_v18  ;;  %v5256_v16 = vmul.f32 %v13168_v61, %v5221_v18  ;;  %v13208_v12 = vld [vmem:[#allocation14_spill] sm:$0xff] }
 0x47b   : > { %v5286_v48 = vadd.f32 %v5278_v9, %v5246_v26  ;;  %v5305_v39 = vadd.f32 %v5297_v38, %v5265_v43  ;;  %v5324_v59 = vadd.f32 %v5316_v7, %v5284_v54  ;;  %v5275_v19 = vmul.f32 %v13188_v52, %v5221_v18  ;;  %v13207_v54 = vld [vmem:[#allocation19_spill] sm:$0xff]  ;;  %v13210_v38 = vld [vmem:[#allocation24_spill] sm:$0xff] }
 0x47c   : > { %v11693_v31 = vadd.f32 %v11391_v63, %v5340_v57  ;;  %v11696_v20 = vadd.f32 %v11395_v49, %v5359_v37  ;;  %v5294_v21 = vmul.f32 %v13123_v2, %v5221_v18  ;;  %v5313_v34 = vmul.f32 %v13125_v55, %v5221_v18  ;;  %v5438_v57 = vpop.permute.xlu0 %5437  ;;  %v13211_v37 = vld [vmem:[#allocation20_spill] sm:$0xff] }
 0x47d   : > { %v5326_v6 = vadd.f32 %v11340_v53, %v5286_v48  ;;  %v5345_v11 = vadd.f32 %v11399_v29, %v5305_v39  ;;  %v5364_v46 = vadd.f32 %v11403_v35, %v5324_v59  ;;  %v5362_v56 = vadd.f32 %v11441_v30, %v5322_v58  ;;  %v13199_v53 = vld [vmem:[#allocation78_spill] sm:$0xff]  ;;  %v13200_v29 = vld [vmem:[#allocation43_spill] sm:$0xff]  ;;  %v13202_v58 = vld [vmem:[#allocation81_spill] sm:$0xff] }
 0x47e   : > { %v5302_v36 = vadd.f32 %v5294_v21, %v5262_v27  ;;  %v5321_v33 = vadd.f32 %v5313_v34, %v5281_v1  ;;  %v5381_v63 = vadd.f32 %v11445_v45, %v5341_v0  ;;  %v5400_v49 = vadd.f32 %v11449_v23, %v5360_v15  ;;  %v13203_v45 = vld [vmem:[#allocation45_spill] sm:$0xff]  ;;  %v13204_v23 = vld [vmem:[#allocation44_spill] sm:$0xff] }
 0x47f   : > { %v11707_v22 = vadd.f32 %v13197_v5, %v5326_v6  ;;  %v11710_v24 = vadd.f32 %v13198_v28, %v5345_v11  ;;  %v11713_v26 = vadd.f32 %v13199_v53, %v5364_v46  ;;  %v5402_v35 = vadd.f32 %v13200_v29, %v5362_v56  ;;  %v5436_v6 = vpop.permute.xlu1 %5435  ;;  %v13214_v56 = vld [vmem:[#allocation25_spill] sm:$0xff]  ;;  %v13217_v53 = vld [vmem:[#allocation55_spill] sm:$0xff] }
 0x480   : > { %v5342_v30 = vadd.f32 %v13201_v60, %v5302_v36  ;;  %v5361_v44 = vadd.f32 %v13202_v58, %v5321_v33  ;;  %v5419_v0 = vadd.f32 %v13203_v45, %v11647_v41  ;;  %v5421_v15 = vadd.f32 %v13204_v23, %v5381_v63  ;;  %v13216_v5 = vld [vmem:[#allocation93_spill] sm:$0xff]  ;;  %v13219_v60 = vld [vmem:[#allocation92_spill] sm:$0xff]  ;;  %v5442_v58 = vpop.permute.xlu0 %5441 }
 0x481   : > { %v5466_v17 = vsel %vm4237_vm5, %v5434_v47, 0.0  ;;  %v5488_v40 = vadd.f32 %v13205_v25, %v5400_v49  ;;  %v5245_v14 = vadd.f32 %v5237_v8, %v11659_v62  ;;  %v5264_v43 = vadd.f32 %v5256_v16, %v11661_v4  ;;  %v13215_v49 = vld [vmem:[#allocation53_spill] sm:$0xff]  ;;  %v13221_v25 = vld [vmem:[#allocation91_spill] sm:$0xff] }
 0x482   : > { %v5482_v27 = vmul.f32 %v13206_v51, %v5466_v17  ;;  %v5501_v1 = vmul.f32 %v13207_v54, %v5466_v17  ;;  %v5507_v13 = vadd.f32 %v13208_v12, %v5419_v0  ;;  %v5520_v9 = vmul.f32 %v13209_v10, %v5466_v17  ;;  %v13220_v45 = vld [vmem:[#allocation89_spill] sm:$0xff]  ;;  %v13224_v12 = vld [vmem:[#allocation31_spill] sm:$0xff] }
 0x483   : > { %v5539_v41 = vmul.f32 %v13210_v38, %v5466_v17  ;;  %v5283_v7 = vadd.f32 %v5275_v19, %v5243_v3  ;;  %v5223_v18 = vsel %vm3189_vm2, 0.0, %v5196_v42  ;;  %v5383_v48 = vadd.f32 %v13211_v37, %v5343_v32  ;;  %v13212_v19 = vld [vmem:[#allocation72_spill] sm:$0xff] }
 0x484   : > { %v5490_v39 = vadd.f32 %v5482_v27, %v5402_v35  ;;  %v5509_v62 = vadd.f32 %v5501_v1, %v5421_v15  ;;  %v5528_v8 = vadd.f32 %v5520_v9, %v5488_v40  ;;  %v5258_v4 = vmul.f32 %v13168_v61, %v5223_v18  ;;  %v13213_v32 = vld [vmem:[#allocation40_spill] sm:$0xff]  ;;  %v13223_v27 = vld [vmem:[#allocation21_spill] sm:$0xff]  ;;  %v5440_v9 = vpop.permute.xlu1 %5439 }
 0x485   : > { %v5547_v16 = vadd.f32 %v5539_v41, %v5507_v13  ;;  %v5277_v59 = vmul.f32 %v13188_v52, %v5223_v18  ;;  %v5296_v21 = vmul.f32 %v13123_v2, %v5223_v18  ;;  %v5315_v34 = vmul.f32 %v13125_v55, %v5223_v18  ;;  %v13218_v35 = vld [vmem:[#allocation48_spill] sm:$0xff] }
 0x486   : > { %v5266_v3 = vadd.f32 %v5258_v4, %v11669_v50  ;;  %v5423_v11 = vadd.f32 %v13212_v19, %v5383_v48  ;;  %v5468_v46 = vsel %vm4237_vm5, %v5438_v57, 0.0  ;;  %v5382_v47 = vadd.f32 %v13213_v32, %v5342_v30  ;;  %v13226_v57 = vld [vmem:[#allocation42_spill] sm:$0xff]  ;;  %v13227_v48 = vld [vmem:[#allocation76_spill] sm:$0xff] }
 0x487   : > { %v5635_v36 = vadd.f32 %v13214_v56, %v5547_v16  ;;  %v5285_v33 = vadd.f32 %v5277_v59, %v5245_v14  ;;  %v5304_v61 = vadd.f32 %v5296_v21, %v5264_v43  ;;  %v5323_v63 = vadd.f32 %v5315_v34, %v5283_v7  ;;  %v13222_v14 = vld [vmem:[#allocation30_spill] sm:$0xff]  ;;  %v13225_v7 = vld [vmem:[#allocation97_spill] sm:$0xff]  ;;  %v5582_v56 = vpop.permute.xlu0 %5581 }
 0x488   : > { %v5306_v52 = vadd.f32 %v13215_v49, %v5266_v3  ;;  %v11743_v2 = vmul.f32 %v13206_v51, %v5468_v46  ;;  %v5503_v55 = vmul.f32 %v13207_v54, %v5468_v46  ;;  %v5522_v50 = vmul.f32 %v13209_v10, %v5468_v46  ;;  %v13228_v16 = vld [vmem:[#allocation46_spill] sm:$0xff]  ;;  %v13229_v3 = vld [vmem:[#allocation35_spill] sm:$0xff] }
 0x489   : > { %v11748_v28 = vadd.f32 %v13216_v5, %v5635_v36  ;;  %v5325_v29 = vadd.f32 %v13217_v53, %v5285_v33  ;;  %v5344_v42 = vadd.f32 %v13218_v35, %v5304_v61  ;;  %v5363_v30 = vadd.f32 %v13219_v60, %v5323_v63 }
 0x48a   : > { %v5346_v0 = vadd.f32 %v13220_v45, %v5306_v52  ;;  %v5511_v23 = vadd.f32 %v5503_v55, %v5423_v11  ;;  %v5530_v15 = vadd.f32 %v5522_v50, %v5490_v39  ;;  %v5541_v17 = vmul.f32 %v13210_v38, %v5468_v46  ;;  %v5444_v50 = vpop.permute.xlu1 %5443 }
 0x48b   : > { %v5365_v40 = vadd.f32 %v13221_v25, %v5325_v29  ;;  %v5384_v43 = vadd.f32 %v13222_v14, %v5344_v42  ;;  %v5403_v1 = vadd.f32 %v13223_v27, %v5363_v30  ;;  %v5560_v13 = vmul.f32 %v13224_v12, %v5468_v46  ;;  %v13232_v14 = vld [vmem:[#allocation32_spill] sm:$0xff] }
 0x48c   : > { %v11759_v41 = vadd.f32 %v5541_v17, %v5509_v62  ;;  %v5401_v18 = vadd.f32 %v13225_v7, %v5361_v44  ;;  %v5420_v37 = vadd.f32 %v13226_v57, %v11693_v31  ;;  %v5422_v39 = vadd.f32 %v13227_v48, %v5382_v47  ;;  %v13230_v62 = vld [vmem:[#allocation18_spill] sm:$0xff]  ;;  %v13234_v7 = vld [vmem:[#allocation61_spill] sm:$0xff]  ;;  %v13236_v48 = vld [vmem:[#allocation59_spill] sm:$0xff] }
 0x48d   : > { %v11765_v4 = vadd.f32 %v5560_v13, %v5528_v8  ;;  %v5487_v59 = vadd.f32 %v13228_v16, %v11696_v20  ;;  %v5467_v21 = vsel %vm4237_vm5, %v5436_v6, 0.0  ;;  %v5470_v34 = vsel %vm4237_vm5, %v5442_v58, 0.0  ;;  %v13231_v31 = vld [vmem:[#allocation98_spill] sm:$0xff]  ;;  %v13233_v13 = vld [vmem:[#allocation73_spill] sm:$0xff] }
 0x48e   : > { %v5489_v19 = vadd.f32 %v13229_v3, %v5401_v18  ;;  %v5508_v11 = vadd.f32 %v13230_v62, %v5420_v37  ;;  %v5483_v44 = vmul.f32 %v13206_v51, %v5467_v21  ;;  %v5502_v46 = vmul.f32 %v13207_v54, %v5467_v21  ;;  %v13237_v16 = vld [vmem:[#allocation65_spill] sm:$0xff]  ;;  %v13239_v3 = vld [vmem:[#allocation36_spill] sm:$0xff]  ;;  %v13240_v62 = vld [vmem:[#allocation95_spill] sm:$0xff] }
 0x48f   : > { %v5527_v32 = vadd.f32 %v13231_v31, %v5487_v59  ;;  %v5521_v8 = vmul.f32 %v13209_v10, %v5467_v21  ;;  %v5540_v47 = vmul.f32 %v13210_v38, %v5467_v21  ;;  %v5559_v20 = vmul.f32 %v13224_v12, %v5467_v21 }
 0x490   : > { %v5491_v6 = vadd.f32 %v5483_v44, %v5403_v1  ;;  %v5510_v36 = vadd.f32 %v5502_v46, %v5422_v39  ;;  %v11780_v33 = vmul.f32 %v13206_v51, %v5470_v34  ;;  %v11783_v61 = vmul.f32 %v13207_v54, %v5470_v34  ;;  %v5446_v46 = vpop.permute.xlu1 %5445 }
 0x491   : > { %v5529_v63 = vadd.f32 %v5521_v8, %v5489_v19  ;;  %v5548_v49 = vadd.f32 %v5540_v47, %v5508_v11  ;;  %v5567_v52 = vadd.f32 %v5559_v20, %v5527_v32  ;;  %v11786_v55 = vmul.f32 %v13209_v10, %v5470_v34  ;;  %v13241_v47 = vld [vmem:[#allocation26_spill] sm:$0xff] }
 0x492   : > { %v5543_v5 = vmul.f32 %v13210_v38, %v5470_v34  ;;  %v5562_v53 = vmul.f32 %v13224_v12, %v5470_v34  ;;  %v5469_v29 = vsel %vm4237_vm5, %v5440_v9, 0.0  ;;  %v5614_v35 = vsel %vm4386_vm6, %v5582_v56, 0.0 }
 0x493   : > { %v5485_v42 = vmul.f32 %v13206_v51, %v5469_v29  ;;  %v5504_v60 = vmul.f32 %v13207_v54, %v5469_v29  ;;  %v5523_v30 = vmul.f32 %v13209_v10, %v5469_v29  ;;  %v5542_v58 = vmul.f32 %v13210_v38, %v5469_v29  ;;  %v13235_v51 = vld [vmem:[#allocation74_spill] sm:$0xff] }
 0x494   : > { %v11796_v45 = vadd.f32 %v5543_v5, %v5511_v23  ;;  %v11798_v17 = vadd.f32 %v5562_v53, %v5530_v15  ;;  %v5561_v25 = vmul.f32 %v13224_v12, %v5469_v29  ;;  %v5636_v27 = vadd.f32 %v13232_v14, %v5548_v49  ;;  %v13238_v23 = vld [vmem:[#allocation82_spill] sm:$0xff]  ;;  %v5586_v15 = vpop.permute.xlu0 %5585 }
 0x495   : > { %v5550_v1 = vadd.f32 %v5542_v58, %v5510_v36  ;;  %v5655_v9 = vadd.f32 %v13233_v13, %v5567_v52  ;;  %v5630_v18 = vmul.f32 %v13234_v7, %v5614_v35  ;;  %v5649_v57 = vmul.f32 %v13235_v51, %v5614_v35  ;;  %v5584_v13 = vpop.permute.xlu1 %5583 }
 0x496   : > { %v5569_v37 = vadd.f32 %v5561_v25, %v5529_v63  ;;  %v5668_v39 = vmul.f32 %v13236_v48, %v5614_v35  ;;  %v5687_v59 = vmul.f32 %v13237_v16, %v5614_v35  ;;  %v5386_v21 = vadd.f32 %v13238_v23, %v5346_v0  ;;  %v13242_v25 = vld [vmem:[#allocation67_spill] sm:$0xff] }
 0x497   : > { %v5638_v34 = vadd.f32 %v5630_v18, %v5550_v1  ;;  %v5405_v19 = vadd.f32 %v13239_v3, %v5365_v40  ;;  %v5424_v11 = vadd.f32 %v13240_v62, %v5384_v43  ;;  %v5531_v44 = vadd.f32 %v5523_v30, %v5491_v6 }
 0x498   : > { %v5657_v31 = vadd.f32 %v5649_v57, %v5569_v37  ;;  %v5676_v32 = vadd.f32 %v5668_v39, %v5636_v27  ;;  %v11810_v8 = vadd.f32 %v5687_v59, %v5655_v9  ;;  %v5426_v20 = vadd.f32 %v13241_v47, %v5386_v21  ;;  %v5590_v30 = vpop.permute.xlu0 %5589  ;;  %v13243_v27 = vld [vmem:[#allocation106_spill] sm:$0xff]  ;;  %v13244_v9 = vld [vmem:[#allocation68_spill] sm:$0xff]  ;;  %v13245_v57 = vld [vmem:[#allocation15_spill] sm:$0xff] }
 0x499   : > { %v5493_v56 = vadd.f32 %v5485_v42, %v5405_v19  ;;  %v5512_v36 = vadd.f32 %v5504_v60, %v5424_v11  ;;  %v5471_v63 = vsel %vm4237_vm5, %v5444_v50, 0.0  ;;  %v5616_v0 = vsel %vm4386_vm6, %v5586_v15, 0.0  ;;  %v13246_v59 = vld [vmem:[#allocation34_spill] sm:$0xff] }
 0x49a   : > { %v5506_v49 = vmul.f32 %v13207_v54, %v5471_v63  ;;  %v5525_v40 = vmul.f32 %v13209_v10, %v5471_v63  ;;  %v5544_v43 = vmul.f32 %v13210_v38, %v5471_v63  ;;  %v5563_v6 = vmul.f32 %v13224_v12, %v5471_v63 }
 0x49b   : > { %v5632_v52 = vmul.f32 %v13234_v7, %v5616_v0  ;;  %v5651_v5 = vmul.f32 %v13235_v51, %v5616_v0  ;;  %v5670_v53 = vmul.f32 %v13236_v48, %v5616_v0  ;;  %v5689_v29 = vmul.f32 %v13237_v16, %v5616_v0 }
 0x49c   : > { %v5514_v35 = vadd.f32 %v5506_v49, %v5426_v20  ;;  %v5533_v50 = vadd.f32 %v5525_v40, %v5493_v56  ;;  %v5552_v42 = vadd.f32 %v5544_v43, %v5512_v36  ;;  %v5571_v60 = vadd.f32 %v5563_v6, %v5531_v44  ;;  %v5588_v20 = vpop.permute.xlu1 %5587  ;;  %v13248_v56 = vld [vmem:[#allocation102_spill] sm:$0xff] }
 0x49d   : > { %v5678_v54 = vadd.f32 %v5670_v53, %v5638_v34  ;;  %v11823_v58 = vadd.f32 %v5689_v29, %v5657_v31  ;;  %v5708_v14 = vmul.f32 %v13242_v25, %v5616_v0  ;;  %v5406_v1 = vadd.f32 %v13243_v27, %v11707_v22  ;;  %v13249_v0 = vld [vmem:[#allocation47_spill] sm:$0xff] }
 0x49e   : > { %v5554_v18 = vadd.f32 %v13244_v9, %v5514_v35  ;;  %v5573_v37 = vadd.f32 %v13245_v57, %v5533_v50  ;;  %v5659_v39 = vadd.f32 %v5651_v5, %v5571_v60  ;;  %v5425_v23 = vadd.f32 %v13246_v59, %v11710_v24 }
 0x49f   : > { %v5716_v21 = vadd.f32 %v5708_v14, %v5676_v32  ;;  %v5472_v15 = vsel %vm4237_vm5, %v5446_v46, 0.0  ;;  %v5492_v34 = vadd.f32 %v11743_v2, %v11713_v26  ;;  %v5494_v3 = vadd.f32 %v11780_v33, %v5406_v1  ;;  %v13247_v46 = vld [vmem:[#allocation100_spill] sm:$0xff] }
 0x4a0   : > { %v5513_v19 = vadd.f32 %v11783_v61, %v5425_v23  ;;  %v5526_v22 = vmul.f32 %v13209_v10, %v5472_v15  ;;  %v5545_v62 = vmul.f32 %v13210_v38, %v5472_v15  ;;  %v5564_v11 = vmul.f32 %v13224_v12, %v5472_v15  ;;  %v5594_v10 = vpop.permute.xlu0 %5593 }
 0x4a1   : > { %v5532_v44 = vadd.f32 %v11786_v55, %v5492_v34  ;;  %v5618_v24 = vsel %vm4386_vm6, %v5590_v30, 0.0  ;;  %v5615_v31 = vsel %vm4386_vm6, %v5584_v13, 0.0  ;;  %v5637_v32 = vadd.f32 %v13247_v46, %v11759_v41 }
 0x4a2   : > { %v5534_v26 = vadd.f32 %v5526_v22, %v5494_v3  ;;  %v5553_v2 = vadd.f32 %v5545_v62, %v5513_v19  ;;  %v5634_v33 = vmul.f32 %v13234_v7, %v5618_v24  ;;  %v5653_v61 = vmul.f32 %v13235_v51, %v5618_v24 }
 0x4a3   : > { %v5572_v47 = vadd.f32 %v5564_v11, %v5532_v44  ;;  %v5672_v38 = vmul.f32 %v13236_v48, %v5618_v24  ;;  %v5691_v12 = vmul.f32 %v13237_v16, %v5618_v24  ;;  %v5710_v55 = vmul.f32 %v13242_v25, %v5618_v24 }
 0x4a4   : > { %v5574_v36 = vadd.f32 %v13248_v56, %v5534_v26  ;;  %v5631_v63 = vmul.f32 %v13234_v7, %v5615_v31  ;;  %v5650_v41 = vmul.f32 %v13235_v51, %v5615_v31  ;;  %v5656_v49 = vadd.f32 %v13249_v0, %v11765_v4  ;;  %v5598_v9 = vpop.permute.xlu0 %5597 }
 0x4a5   : > { %v5699_v40 = vadd.f32 %v5691_v12, %v5659_v39  ;;  %v5718_v43 = vadd.f32 %v5710_v55, %v5678_v54  ;;  %v5669_v6 = vmul.f32 %v13236_v48, %v5615_v31  ;;  %v5688_v5 = vmul.f32 %v13237_v16, %v5615_v31 }
 0x4a6   : > { %v5639_v53 = vadd.f32 %v5631_v63, %v11796_v45  ;;  %v5658_v29 = vadd.f32 %v5650_v41, %v11798_v17  ;;  %v5707_v35 = vmul.f32 %v13242_v25, %v5615_v31  ;;  %v5640_v50 = vadd.f32 %v5632_v52, %v5552_v42  ;;  %v5592_v52 = vpop.permute.xlu1 %5591  ;;  %v13251_v41 = vld [vmem:[#allocation13_spill] sm:$0xff] }
 0x4a7   : > { %v5677_v60 = vadd.f32 %v5669_v6, %v5637_v32  ;;  %v5696_v30 = vadd.f32 %v5688_v5, %v5656_v49  ;;  %v5642_v14 = vadd.f32 %v5634_v33, %v5554_v18  ;;  %v5661_v27 = vadd.f32 %v5653_v61, %v5573_v37 }
 0x4a8   : > { %v5715_v1 = vadd.f32 %v5707_v35, %v11748_v28  ;;  %v5680_v4 = vadd.f32 %v5672_v38, %v5640_v50  ;;  %v5620_v54 = vsel %vm4386_vm6, %v5594_v10, 0.0  ;;  %v5617_v13 = vsel %vm4386_vm6, %v5588_v20, 0.0  ;;  %v11874_v62 = vpop.permute.xlu0 %5840  ;;  %v3397_v50 = vld [vmem:[#allocation4 + $0x10] sm:$0xff] }
 0x4a9   : > { %v5724_v57 = vadd.f32 %v5716_v21, %v5696_v30  ;;  %v5674_v45 = vmul.f32 %v13236_v48, %v5620_v54  ;;  %v5693_v17 = vmul.f32 %v13237_v16, %v5620_v54  ;;  %v5712_v39 = vmul.f32 %v13242_v25, %v5620_v54 }
 0x4aa   : > { %v5723_v42 = vadd.f32 %v5715_v1, %v11810_v8  ;;  %v5633_v18 = vmul.f32 %v13234_v7, %v5617_v13  ;;  %v5652_v28 = vmul.f32 %v13235_v51, %v5617_v13  ;;  %v5671_v37 = vmul.f32 %v13236_v48, %v5617_v13  ;;  %v5736_v24 = vpop.permute.xlu1 %5735 }
 0x4ab   : > { %v5682_v59 = vadd.f32 %v5674_v45, %v5642_v14  ;;  %v5701_v23 = vadd.f32 %v5693_v17, %v5661_v27  ;;  %v5720_v15 = vadd.f32 %v5712_v39, %v5680_v4  ;;  %v5690_v21 = vmul.f32 %v13237_v16, %v5617_v13  ;;  %v3399_v14 = vld [vmem:[#allocation4 + $0x30] sm:$0xff] }
 0x4ac   : > { %v5709_v34 = vmul.f32 %v13242_v25, %v5617_v13  ;;  %v5622_v3 = vsel %vm4386_vm6, %v5598_v9, 0.0  ;;  %v5619_v19 = vsel %vm4386_vm6, %v5592_v52, 0.0  ;;  %v5641_v22 = vadd.f32 %v5633_v18, %v5553_v2  ;;  %v3401_v4 = vld [vmem:[#allocation4 + $0x50] sm:$0xff] }
 0x4ad   : > { %v5698_v8 = vadd.f32 %v5690_v21, %v5658_v29  ;;  %v5714_v7 = vmul.f32 %v13242_v25, %v5622_v3  ;;  %v5654_v11 = vmul.f32 %v13235_v51, %v5619_v19  ;;  %v5660_v44 = vadd.f32 %v5652_v28, %v5572_v47  ;;  %v13250_v51 = vld [vmem:[#allocation33_spill] sm:$0xff]  ;;  %v3405_v45 = vld [vmem:[#allocation4 + $0x90] sm:$0xff] }
 0x4ae   : > { %v5717_v31 = vadd.f32 %v5709_v34, %v5677_v60  ;;  %v5673_v46 = vmul.f32 %v13236_v48, %v5619_v19  ;;  %v5679_v32 = vadd.f32 %v5671_v37, %v5639_v53  ;;  %v5692_v26 = vmul.f32 %v13237_v16, %v5619_v19  ;;  %v3407_v52 = vld [vmem:[#allocation4 + $0xb0] sm:$0xff]  ;;  %v13253_v3 = vld [vmem:[#allocation9_spill] sm:$0xff] }
 0x4af   : > { %v5726_v33 = vadd.f32 %v5718_v43, %v5698_v8  ;;  %v5722_v61 = vadd.f32 %v5714_v7, %v5682_v59  ;;  %v5662_v10 = vadd.f32 %v5654_v11, %v5574_v36  ;;  %v5711_v2 = vmul.f32 %v13242_v25, %v5619_v19  ;;  %v3415_v36 = vpop.permute.xlu0 %3414  ;;  %v3411_v18 = vld [vmem:[#allocation4 + $0xf0] sm:$0xff]  ;;  %v13255_v7 = vld [vmem:[#allocation11_spill] sm:$0xff] }
 0x4b0   : > { %v5725_v38 = vadd.f32 %v5717_v31, %v11823_v58  ;;  %v5681_v12 = vadd.f32 %v5673_v46, %v5641_v22  ;;  %v5700_v55 = vadd.f32 %v5692_v26, %v5660_v44  ;;  %v11882_v20 = vadd.f32 %v5736_v24, %v5723_v42  ;;  %v3409_v42 = vld [vmem:[#allocation4 + $0xd0] sm:$0xff]  ;;  %v13256_v44 = vld [vmem:[#allocation66_spill] sm:$0xff]  ;;  %v13257_v31 = vld [vmem:[#allocation49_spill] sm:$0xff] }
 0x4b1   : > { %v5702_v47 = vadd.f32 %v13250_v51, %v5662_v10  ;;  %v5719_v56 = vadd.f32 %v5711_v2, %v5679_v32  ;;  %v11885_v63 = vadd.f32 %v5736_v24, %v5724_v57  ;;  %v11887_v48 = vadd.f32 %v5736_v24, %v5726_v33  ;;  %v3403_v57 = vld [vmem:[#allocation4 + $0x70] sm:$0xff]  ;;  %v13258_v32 = vld [vmem:[#allocation69_spill] sm:$0xff]  ;;  %v13259_v33 = vld [vmem:[#allocation54_spill] sm:$0xff] }
 0x4b2   : > { %v5721_v16 = vadd.f32 %v13251_v41, %v5681_v12  ;;  %v5728_v0 = vadd.f32 %v5720_v15, %v5700_v55  ;;  %v11890_v49 = vadd.f32 %v5736_v24, %v5725_v38  ;;  %v6260_v25 = vmul.f32 -1.442695, %v11882_v20  ;;  %v13252_v21 = vld [vmem:[#allocation88_spill] sm:$0xff]  ;;  %v13260_v10 = vld [vmem:[#allocation57_spill] sm:$0xff]  ;;  %v13261_v38 = vld [vmem:[#allocation75_spill] sm:$0xff] }
 0x4b3   : > { %v5727_v58 = vadd.f32 %v5719_v56, %v5699_v40  ;;  %v5730_v43 = vadd.f32 %v5722_v61, %v5702_v47  ;;  %v6261_v6 = vmul.f32 -1.442695, %v11885_v63  ;;  %v6263_v5 = vmul.f32 -1.442695, %v11887_v48  ;;  %v13254_v22 = vld [vmem:[#allocation16_spill] sm:$0xff]  ;;  %v13262_v55 = vld [vmem:[#allocation17_spill] sm:$0xff] }
 0x4b4   : > { %v5729_v53 = vadd.f32 %v5721_v16, %v5701_v23  ;;  %v11895_v29 = vadd.f32 %v5736_v24, %v5728_v0  ;;  %6724 = vpow2.f32 %v6260_v25  ;;  %v6262_v35 = vmul.f32 -1.442695, %v11890_v49  ;;  %v13263_v47 = vld [vmem:[#allocation70_spill] sm:$0xff]  ;;  %v13264_v41 = vld [vmem:[#allocation64_spill] sm:$0xff]  ;;  %v13265_v0 = vld [vmem:[#allocation77_spill] sm:$0xff] }
 0x4b5   : > { %v11898_v60 = vadd.f32 %v5736_v24, %v5727_v58  ;;  %v11900_v30 = vadd.f32 %v5736_v24, %v5730_v43  ;;  %6726 = vpow2.f32 %v6261_v6  ;;  %v3421_v27 = vmul.f32 %v3415_v36, %v3397_v50  ;;  %v13266_v58 = vld [vmem:[#allocation56_spill] sm:$0xff]  ;;  %v13267_v6 = vld [vmem:[#allocation29_spill] sm:$0xff]  ;;  %v13269_v50 = vld [vmem:[#allocation58_spill] sm:$0xff] }
 0x4b6   : > { %v11902_v40 = vadd.f32 %v5736_v24, %v5729_v53  ;;  %6728 = vpow2.f32 %v6262_v35  ;;  %v6265_v1 = vmul.f32 -1.442695, %v11895_v29  ;;  %v3423_v54 = vmul.f32 %v3415_v36, %v3399_v14  ;;  %v13268_v53 = vld [vmem:[#allocation62_spill] sm:$0xff] }
 0x4b7   : > { %6730 = vpow2.f32 %v6263_v5  ;;  %v6264_v13 = vmul.f32 -1.442695, %v11898_v60  ;;  %v6267_v9 = vmul.f32 -1.442695, %v11900_v30  ;;  %v3425_v17 = vmul.f32 %v3415_v36, %v3401_v4  ;;  %v13270_v4 = vld [vmem:[#allocation105_spill] sm:$0xff] }
 0x4b8   : > { %6732 = vpow2.f32 %v6265_v1  ;;  %v6266_v39 = vmul.f32 -1.442695, %v11902_v40  ;;  %v3427_v28 = vmul.f32 %v3415_v36, %v3403_v57  ;;  %v3429_v37 = vmul.f32 %v3415_v36, %v3405_v45  ;;  %v13272_v57 = vld [vmem:[#allocation79_spill] sm:$0xff] }
 0x4b9   : > { %6734 = vpow2.f32 %v6264_v13  ;;  %v3431_v59 = vmul.f32 %v3415_v36, %v3407_v52  ;;  %v3433_v23 = vmul.f32 %v3415_v36, %v3409_v42  ;;  %v3435_v15 = vmul.f32 %v3415_v36, %v3411_v18  ;;  %v13271_v13 = vld [vmem:[#allocation52_spill] sm:$0xff]  ;;  %v13273_v52 = vld [vmem:[#allocation103_spill] sm:$0xff]  ;;  %v13274_v18 = vld [vmem:[#allocation50_spill] sm:$0xff] }
 0x4ba   : > { %6736 = vpow2.f32 %v6266_v39  ;;  %v3437_v34 = vadd.f32 %v3421_v27, %v13252_v21  ;;  %v3439_v19 = vadd.f32 %v3423_v54, %v13253_v3  ;;  %v3441_v8 = vadd.f32 %v3425_v17, %v13254_v22  ;;  %v13276_v21 = vld [vmem:[#allocation90_spill] sm:$0xff]  ;;  %v13277_v3 = vld [vmem:[#allocation83_spill] sm:$0xff] }
 0x4bb   : > { %6738 = vpow2.f32 %v6267_v9  ;;  %v3443_v11 = vadd.f32 %v3427_v28, %v13255_v7  ;;  %v3445_v24 = vadd.f32 %v3429_v37, %v13256_v44  ;;  %v3447_v46 = vadd.f32 %v3431_v59, %v13257_v31  ;;  %v13275_v37 = vld [vmem:[#allocation63_spill] sm:$0xff] }
 0x4bc   : > { %v3449_v26 = vadd.f32 %v3433_v23, %v13258_v32  ;;  %v3451_v61 = vadd.f32 %v3435_v15, %v13259_v33  ;;  %v3549_v2 = vadd.f32 %v13260_v10, %v3437_v34  ;;  %v3551_v12 = vadd.f32 %v13261_v38, %v3439_v19  ;;  %v13278_v7 = vld [vmem:[#allocation27_spill] sm:$0xff]  ;;  %v13280_v32 = vld [vmem:[#allocation60_spill] sm:$0xff]  ;;  %v13281_v33 = vld [vmem:[#allocation101_spill] sm:$0xff] }
 0x4bd   : > { %v3553_v51 = vadd.f32 %v13262_v55, %v3441_v8  ;;  %v3555_v56 = vadd.f32 %v13263_v47, %v3443_v11  ;;  %v3557_v16 = vadd.f32 %v13264_v41, %v3445_v24  ;;  %v3559_v25 = vadd.f32 %v13265_v0, %v3447_v46  ;;  %v13279_v44 = vld [vmem:[#allocation71_spill] sm:$0xff]  ;;  %v13283_v55 = vld [vmem:[#allocation28_spill] sm:$0xff] }
 0x4be   : > { %v6725_v36 = vpop.eup %6724  ;;  %v3561_v43 = vadd.f32 %v13266_v58, %v3449_v26  ;;  %v3563_v5 = vadd.f32 %v13267_v6, %v3451_v61  ;;  %v3663_v35 = vadd.f32 %v13268_v53, %v3549_v2  ;;  %v3665_v14 = vadd.f32 %v13269_v50, %v3551_v12  ;;  %v13282_v38 = vld [vmem:[#allocation87_spill] sm:$0xff] }
 0x4bf   : > { %v6727_v27 = vpop.eup %6726  ;;  %v5770_v1 = vadd.f32 1.0, %v6725_v36  ;;  %v3667_v54 = vadd.f32 %v13270_v4, %v3553_v51  ;;  %v3669_v9 = vadd.f32 %v13271_v13, %v3555_v56  ;;  %v3671_v45 = vadd.f32 %v13272_v57, %v3557_v16  ;;  %v13284_v41 = vld [vmem:[#allocation51_spill] sm:$0xff]  ;;  %v13285_v13 = vld [vmem:[#allocation6_spill] sm:$0xff]  ;;  %v13286_v57 = vld [vmem:[#allocation8_spill] sm:$0xff] }
 0x4c0   : > { %v6729_v17 = vpop.eup %6728  ;;  %v5771_v39 = vadd.f32 1.0, %v6727_v27  ;;  %v3673_v42 = vadd.f32 %v13273_v52, %v3559_v25  ;;  %v3675_v28 = vadd.f32 %v13274_v18, %v3561_v43  ;;  %v3677_v59 = vadd.f32 %v13275_v37, %v3563_v5 }
 0x4c1   : > { %v6731_v23 = vpop.eup %6730  ;;  %v5772_v15 = vadd.f32 1.0, %v6729_v17  ;;  %6740 = vrcp.f32 %v5770_v1  ;;  %v3736_v34 = vadd.f32 %v13276_v21, %v3663_v35  ;;  %v3738_v19 = vadd.f32 %v13277_v3, %v3665_v14  ;;  %v13287_v17 = vld [vmem:[#allocation7_spill] sm:$0xff] }
 0x4c2   : > { %v6733_v22 = vpop.eup %6732  ;;  %v5773_v8 = vadd.f32 1.0, %v6731_v23  ;;  %6742 = vrcp.f32 %v5771_v39  ;;  %v3740_v11 = vadd.f32 %v13278_v7, %v3667_v54  ;;  %v3742_v24 = vadd.f32 %v13279_v44, %v3669_v9  ;;  %v5981_v44 = vpop.permute.xlu0 %5980 }
 0x4c3   : > { %v6735_v31 = vpop.eup %6734  ;;  %v5775_v46 = vadd.f32 1.0, %v6733_v22  ;;  %6744 = vrcp.f32 %v5772_v15  ;;  %v3744_v26 = vadd.f32 %v13280_v32, %v3671_v45  ;;  %v3746_v61 = vadd.f32 %v13281_v33, %v3673_v42  ;;  %v5885_v42 = vpop.permute.xlu1 %5884 }
 0x4c4   : > { %v6737_v10 = vpop.eup %6736  ;;  %v5774_v2 = vadd.f32 1.0, %v6735_v31  ;;  %6746 = vrcp.f32 %v5773_v8  ;;  %v3748_v12 = vadd.f32 %v13282_v38, %v3675_v28  ;;  %v3750_v51 = vadd.f32 %v13283_v55, %v3677_v59 }
 0x4c5   : > { %v6739_v47 = vpop.eup %6738  ;;  %v5776_v56 = vadd.f32 1.0, %v6737_v10  ;;  %6748 = vrcp.f32 %v5775_v46  ;;  %v3762_v16 = vadd.f32 %v13284_v41, %v3736_v34  ;;  %v3764_v0 = vadd.f32 %v13284_v41, %v3738_v19 }
 0x4c6   : > { %v5777_v25 = vadd.f32 1.0, %v6739_v47  ;;  %6750 = vrcp.f32 %v5774_v2  ;;  %v3766_v36 = vadd.f32 %v13284_v41, %v3740_v11  ;;  %v3768_v58 = vadd.f32 %v13284_v41, %v3742_v24 }
 0x4c7   : > { %6752 = vrcp.f32 %v5776_v56  ;;  %v3770_v43 = vadd.f32 %v13284_v41, %v3744_v26  ;;  %v3772_v6 = vadd.f32 %v13284_v41, %v3746_v61  ;;  %v3774_v5 = vadd.f32 %v13284_v41, %v3748_v12  ;;  %6076 = vst.msk [vmem:[%s10809_s26] sm:$0xff] %vm2988_vm1, %v3762_v16  ;;  %6077 = vst.msk [vmem:[%s10809_s26 + $0x10] sm:$0xff] %vm2988_vm1, %v3764_v0 }
 0x4c8   : > { %6754 = vrcp.f32 %v5777_v25  ;;  %v3776_v53 = vadd.f32 %v13284_v41, %v3750_v51  ;;  %6078 = vst.msk [vmem:[%s10809_s26 + $0x20] sm:$0xff] %vm2988_vm1, %v3766_v36  ;;  %6079 = vst.msk [vmem:[%s10809_s26 + $0x30] sm:$0xff] %vm2988_vm1, %v3768_v58 }
 0x4c9   : > { %6080 = vst.msk [vmem:[%s10809_s26 + $0x40] sm:$0xff] %vm2988_vm1, %v3770_v43  ;;  %6081 = vst.msk [vmem:[%s10809_s26 + $0x50] sm:$0xff] %vm2988_vm1, %v3772_v6  ;;  %v5929_v43 = vpop.permute.xlu1 %5928 }
 0x4ca   : > { %6082 = vst.msk [vmem:[%s10809_s26 + $0x60] sm:$0xff] %vm2988_vm1, %v3774_v5  ;;  %6083 = vst.msk [vmem:[%s10809_s26 + $0x70] sm:$0xff] %vm2988_vm1, %v3776_v53 }
 0x4cb   : > { %v6741_v35 = vpop.eup %6740 }
 0x4cc   : > { %v6743_v50 = vpop.eup %6742  ;;  %v11965_v14 = vmul.f32 %v6741_v35, %v11882_v20 }
 0x4cd   : > { %v6745_v27 = vpop.eup %6744  ;;  %v11968_v1 = vmul.f32 %v6743_v50, %v11885_v63 }
 0x4ce   : > { %v6747_v4 = vpop.eup %6746  ;;  %v11971_v54 = vmul.f32 %v6745_v27, %v11890_v49  ;;  %v5854_v9 = vrot.slane %v11965_v14, %v13285_v13  ;;  %v5950_v45 = vrot.slane %v11965_v14, %v13286_v57  ;;  %v5898_v39 = vrot.slane %v11965_v14, %v13287_v17 }
 0x4cf   : > { %v6749_v52 = vpop.eup %6748  ;;  %v11980_v20 = vmul.f32 %v6747_v4, %v11887_v48  ;;  %v5858_v63 = vrot.slane %v11968_v1, %v13285_v13  ;;  %v5954_v49 = vrot.slane %v11968_v1, %v13286_v57  ;;  %v5902_v18 = vrot.slane %v11968_v1, %v13287_v17 }
 0x4d0   : > { %v6751_v28 = vpop.eup %6750  ;;  %v11989_v37 = vmul.f32 %v6749_v52, %v11895_v29  ;;  %v5862_v59 = vrot.slane %v11971_v54, %v13285_v13  ;;  %v5887_v23 = vmul.f32 %v5885_v42, %v5854_v9  ;;  %v5958_v48 = vrot.slane %v11971_v54, %v13286_v57 }
 0x4d1   : > { %v6753_v15 = vpop.eup %6752  ;;  %v11996_v21 = vmul.f32 %v6751_v28, %v11898_v60  ;;  %v5866_v34 = vrot.slane %v11980_v20, %v13285_v13  ;;  %v5888_v3 = vmul.f32 %v5885_v42, %v5858_v63  ;;  %v5962_v19 = vrot.slane %v11980_v20, %v13286_v57 }
 0x4d2   : > { %v6755_v29 = vpop.eup %6754  ;;  %v12003_v22 = vmul.f32 %v6753_v15, %v11902_v40  ;;  %v5874_v8 = vrot.slane %v11989_v37, %v13285_v13  ;;  %v5970_v7 = vrot.slane %v11989_v37, %v13286_v57  ;;  %v5889_v11 = vmul.f32 %v5885_v42, %v5862_v59 }
 0x4d3   : > { %v5801_v60 = vmul.f32 %v6755_v29, %v11900_v30  ;;  %v5870_v24 = vrot.slane %v11996_v21, %v13285_v13  ;;  %v5890_v31 = vmul.f32 %v5885_v42, %v5866_v34  ;;  %v5966_v46 = vrot.slane %v11996_v21, %v13286_v57 }
 0x4d4   : > { %v5878_v40 = vrot.slane %v12003_v22, %v13285_v13  ;;  %v5892_v32 = vmul.f32 %v5885_v42, %v5874_v8  ;;  %v5974_v26 = vrot.slane %v12003_v22, %v13286_v57  ;;  %v5983_v33 = vmul.f32 %v5981_v44, %v5950_v45 }
 0x4d5   : > { %v5882_v61 = vrot.slane %v5801_v60, %v13285_v13  ;;  %v5978_v30 = vrot.slane %v5801_v60, %v13286_v57  ;;  %v5891_v10 = vmul.f32 %v5885_v42, %v5870_v24  ;;  %v5984_v2 = vmul.f32 %v5981_v44, %v5954_v49 }
 0x4d6   : > { %v5893_v38 = vmul.f32 %v5885_v42, %v5878_v40  ;;  %v5985_v12 = vmul.f32 %v5981_v44, %v5958_v48  ;;  %v5986_v55 = vmul.f32 %v5981_v44, %v5962_v19  ;;  %v5987_v51 = vmul.f32 %v5981_v44, %v5966_v46  ;;  %v13288_v48 = vld [vmem:[#allocation12_spill] sm:$0xff] }
 0x4d7   : > { %v5894_v47 = vmul.f32 %v5885_v42, %v5882_v61  ;;  %v5988_v56 = vmul.f32 %v5981_v44, %v5970_v7  ;;  %v5989_v41 = vmul.f32 %v5981_v44, %v5974_v26  ;;  %v5990_v16 = vmul.f32 %v5981_v44, %v5978_v30  ;;  %v6010_v44 = vpop.permute.xlu1 %6009 }
 0x4d8   : > { %v5991_v0 = vadd.f32 %v5983_v33, %v5887_v23  ;;  %v5992_v25 = vadd.f32 %v5984_v2, %v5888_v3  ;;  %v5993_v36 = vadd.f32 %v5985_v12, %v5889_v11  ;;  %v5994_v58 = vadd.f32 %v5986_v55, %v5890_v31 }
 0x4d9   : > { %v5995_v6 = vadd.f32 %v5987_v51, %v5891_v10  ;;  %v5996_v5 = vadd.f32 %v5988_v56, %v5892_v32  ;;  %v5997_v53 = vadd.f32 %v5989_v41, %v5893_v38  ;;  %v5998_v35 = vadd.f32 %v5990_v16, %v5894_v47 }
 0x4da   : > { %v5906_v50 = vrot.slane %v11971_v54, %v13287_v17  ;;  %v5910_v27 = vrot.slane %v11980_v20, %v13287_v17  ;;  %v5914_v4 = vrot.slane %v11996_v21, %v13287_v17  ;;  %v5918_v13 = vrot.slane %v11989_v37, %v13287_v17 }
 0x4db   : > { %v5922_v9 = vrot.slane %v12003_v22, %v13287_v17  ;;  %v5926_v57 = vrot.slane %v5801_v60, %v13287_v17  ;;  %v5931_v45 = vmul.f32 %v5929_v43, %v5898_v39  ;;  %v5932_v52 = vmul.f32 %v5929_v43, %v5902_v18 }
 0x4dc   : > { %v5933_v42 = vmul.f32 %v5929_v43, %v5906_v50  ;;  %v5934_v63 = vmul.f32 %v5929_v43, %v5910_v27  ;;  %v5935_v49 = vmul.f32 %v5929_v43, %v5914_v4  ;;  %v5936_v28 = vmul.f32 %v5929_v43, %v5918_v13 }
 0x4dd   : > { %v5937_v59 = vmul.f32 %v5929_v43, %v5922_v9  ;;  %v5938_v23 = vmul.f32 %v5929_v43, %v5926_v57  ;;  %v5809_v15 = vrot.slane %v11965_v14, %v13288_v48  ;;  %v5813_v34 = vrot.slane %v11968_v1, %v13288_v48 }
 0x4de   : > { %v5817_v3 = vrot.slane %v11971_v54, %v13288_v48  ;;  %v5821_v17 = vrot.slane %v11980_v20, %v13288_v48  ;;  %v5825_v39 = vrot.slane %v11996_v21, %v13288_v48  ;;  %v5829_v18 = vrot.slane %v11989_v37, %v13288_v48 }
 0x4df   : > { %v5833_v19 = vrot.slane %v12003_v22, %v13288_v48  ;;  %v5837_v14 = vrot.slane %v5801_v60, %v13288_v48  ;;  %v5843_v29 = vmul.f32 %v11874_v62, %v5809_v15  ;;  %v5844_v1 = vmul.f32 %v11874_v62, %v5813_v34 }
 0x4e0   : > { %v5845_v54 = vmul.f32 %v11874_v62, %v5817_v3  ;;  %v5846_v8 = vmul.f32 %v11874_v62, %v5821_v17  ;;  %v5847_v20 = vmul.f32 %v11874_v62, %v5825_v39  ;;  %v5848_v21 = vmul.f32 %v11874_v62, %v5829_v18 }
 0x4e1   : > { %v5849_v7 = vmul.f32 %v11874_v62, %v5833_v19  ;;  %v5850_v37 = vmul.f32 %v11874_v62, %v5837_v14  ;;  %v5939_v11 = vadd.f32 %v5931_v45, %v5843_v29  ;;  %v5940_v22 = vadd.f32 %v5932_v52, %v5844_v1 }
 0x4e2   : > { %v5941_v60 = vadd.f32 %v5933_v42, %v5845_v54  ;;  %v5942_v24 = vadd.f32 %v5934_v63, %v5846_v8  ;;  %v5943_v31 = vadd.f32 %v5935_v49, %v5847_v20  ;;  %v5944_v46 = vadd.f32 %v5936_v28, %v5848_v21 }
 0x4e3   : > { %v5945_v40 = vadd.f32 %v5937_v59, %v5849_v7  ;;  %v5946_v32 = vadd.f32 %v5938_v23, %v5850_v37  ;;  %v5999_v26 = vadd.f32 %v5991_v0, %v5939_v11  ;;  %v6000_v33 = vadd.f32 %v5992_v25, %v5940_v22 }
 0x4e4   : > { %v6001_v61 = vadd.f32 %v5993_v36, %v5941_v60  ;;  %v6002_v30 = vadd.f32 %v5994_v58, %v5942_v24  ;;  %v6003_v10 = vadd.f32 %v5995_v6, %v5943_v31  ;;  %v6004_v2 = vadd.f32 %v5996_v5, %v5944_v46 }
 0x4e5   : > { %v6005_v38 = vadd.f32 %v5997_v53, %v5945_v40  ;;  %v6006_v12 = vadd.f32 %v5998_v35, %v5946_v32  ;;  %v6012_v55 = vadd.f32 %v6010_v44, %v5999_v26  ;;  %v6013_v51 = vadd.f32 %v6010_v44, %v6000_v33 }
 0x4e6   : > { %v6014_v62 = vadd.f32 %v6010_v44, %v6001_v61  ;;  %v6015_v47 = vadd.f32 %v6010_v44, %v6002_v30  ;;  %v6016_v56 = vadd.f32 %v6010_v44, %v6003_v10  ;;  %v6017_v41 = vadd.f32 %v6010_v44, %v6004_v2 }
 0x4e7   : > { %v6018_v16 = vadd.f32 %v6010_v44, %v6005_v38  ;;  %v6270_v43 = vmul.f32 -1.442695, %v6012_v55  ;;  %v6271_v50 = vmul.f32 -1.442695, %v6013_v51  ;;  %v6019_v27 = vadd.f32 %v6010_v44, %v6006_v12 }
 0x4e8   : > { %v6272_v4 = vmul.f32 -1.442695, %v6014_v62  ;;  %v6273_v13 = vmul.f32 -1.442695, %v6015_v47  ;;  %v6274_v0 = vmul.f32 -1.442695, %v6016_v56 }
 0x4e9   : > { %6756 = vpow2.f32 %v6270_v43  ;;  %v6275_v25 = vmul.f32 -1.442695, %v6017_v41  ;;  %v6276_v36 = vmul.f32 -1.442695, %v6018_v16  ;;  %v6277_v58 = vmul.f32 -1.442695, %v6019_v27 }
 0x4ea   : > { %6758 = vpow2.f32 %v6271_v50 }
 0x4eb   : > { %6760 = vpow2.f32 %v6272_v4 }
 0x4ec   : > { %6762 = vpow2.f32 %v6273_v13 }
 0x4ed   : > { %6764 = vpow2.f32 %v6274_v0 }
 0x4ee   : > { %6766 = vpow2.f32 %v6275_v25 }
 0x4ef   : > { %6768 = vpow2.f32 %v6276_v36 }
 0x4f0   : > { %6770 = vpow2.f32 %v6277_v58 }
 0x4f3   : > { %v6757_v6 = vpop.eup %6756 }
 0x4f4   : > { %v6759_v5 = vpop.eup %6758  ;;  %v6044_v53 = vadd.f32 1.0, %v6757_v6 }
 0x4f5   : > { %v6761_v35 = vpop.eup %6760  ;;  %v6045_v9 = vadd.f32 1.0, %v6759_v5 }
 0x4f6   : > { %v6763_v57 = vpop.eup %6762  ;;  %v6046_v45 = vadd.f32 1.0, %v6761_v35  ;;  %6772 = vrcp.f32 %v6044_v53 }
 0x4f7   : > { %v6765_v52 = vpop.eup %6764  ;;  %v6047_v42 = vadd.f32 1.0, %v6763_v57  ;;  %6774 = vrcp.f32 %v6045_v9 }
 0x4f8   : > { %v6767_v63 = vpop.eup %6766  ;;  %v6048_v49 = vadd.f32 1.0, %v6765_v52  ;;  %6776 = vrcp.f32 %v6046_v45 }
 0x4f9   : > { %v6769_v28 = vpop.eup %6768  ;;  %v6049_v59 = vadd.f32 1.0, %v6767_v63  ;;  %6778 = vrcp.f32 %v6047_v42 }
 0x4fa   : > { %v6771_v23 = vpop.eup %6770  ;;  %v6050_v48 = vadd.f32 1.0, %v6769_v28  ;;  %6780 = vrcp.f32 %v6048_v49 }
 0x4fb   : > { %v6051_v15 = vadd.f32 1.0, %v6771_v23  ;;  %6782 = vrcp.f32 %v6049_v59 }
 0x4fc   : > { %6784 = vrcp.f32 %v6050_v48 }
 0x4fd   : > { %6786 = vrcp.f32 %v6051_v15 }
 0x500   : > { %v6773_v34 = vpop.eup %6772 }
 0x501   : > { %v6775_v3 = vpop.eup %6774  ;;  %v6068_v17 = vmul.f32 %v6773_v34, %v6012_v55 }
 0x502   : > { %v6777_v39 = vpop.eup %6776  ;;  %v6069_v18 = vmul.f32 %v6775_v3, %v6013_v51 }
 0x503   : > { %v6779_v19 = vpop.eup %6778  ;;  %v6070_v14 = vmul.f32 %v6777_v39, %v6014_v62  ;;  %6092 = vst.msk [vmem:[%s10809_s26 + $0xc] sm:$0xf] %vm3778_vm0, %v6068_v17 }
 0x504   : > { %v6781_v29 = vpop.eup %6780  ;;  %v6071_v1 = vmul.f32 %v6779_v19, %v6015_v47  ;;  %6093 = vst.msk [vmem:[%s10809_s26 + $0x1c] sm:$0xf] %vm3778_vm0, %v6069_v18 }
 0x505   : > { %v6783_v54 = vpop.eup %6782  ;;  %v6072_v8 = vmul.f32 %v6781_v29, %v6016_v56  ;;  %6094 = vst.msk [vmem:[%s10809_s26 + $0x2c] sm:$0xf] %vm3778_vm0, %v6070_v14 }
 0x506   : > { %v6785_v20 = vpop.eup %6784  ;;  %v6073_v21 = vmul.f32 %v6783_v54, %v6017_v41  ;;  %6095 = vst.msk [vmem:[%s10809_s26 + $0x3c] sm:$0xf] %vm3778_vm0, %v6071_v1 }
 0x507   : > { %v6787_v7 = vpop.eup %6786  ;;  %v6074_v37 = vmul.f32 %v6785_v20, %v6018_v16  ;;  %6096 = vst.msk [vmem:[%s10809_s26 + $0x4c] sm:$0xf] %vm3778_vm0, %v6072_v8 }
 0x508   : > { %v6075_v11 = vmul.f32 %v6787_v7, %v6019_v27  ;;  %6097 = vst.msk [vmem:[%s10809_s26 + $0x5c] sm:$0xf] %vm3778_vm0, %v6073_v21 }
 0x509   : > { %6098 = vst.msk [vmem:[%s10809_s26 + $0x6c] sm:$0xf] %vm3778_vm0, %v6074_v37 }
 0x50a   : > { %6099 = vst.msk [vmem:[%s10809_s26 + $0x7c] sm:$0xf] %vm3778_vm0, %v6075_v11 }
 0x50b PF: > { %s20_s13 = sadd.s32 1, %s6814_s13  }
 0x50c   : > { %p17_p4 = scmp.ge.s32.totalorder %s20_s13, 4  }
 0x50e   :  { %19 = sbr.rel (!%p17_p4) target bundleno = 1 (0x1), region = 105 }

</bundles_post_ra>
